<compile_context>
chip_gen: v6e
topology: v6e:2x2x1
jax: 0.10.0
libtpu: 0.0.40
codegen_flags: <defaults>
</compile_context>

<pallas_src>
import functools

import jax
import jax.numpy as jnp
from jax.experimental import pallas as pl
from jax.experimental.pallas import tpu as pltpu


def _round_up(x, m):
    return (x + m - 1) // m * m


def _vmem_capacity_bytes():
    try:
        return int(pltpu.get_tpu_info().vmem_capacity_bytes)
    except Exception:
        return 64 << 20            # conservative fallback: v7x per-TensorCore VMEM


def _padded_bytes(shape, dtype):
    """VMEM footprint estimate with (8,128) tile padding on the last two dims."""
    itemsize = jnp.dtype(dtype).itemsize
    if len(shape) >= 2:
        lead = 1
        for d in shape[:-2]:
            lead *= int(d)
        return lead * _round_up(int(shape[-2]), 8) * _round_up(int(shape[-1]), 128) * itemsize
    n = 1
    for d in shape:
        n *= int(d)
    return _round_up(max(n, 1) * itemsize, 512)


def _vmem_limit_bytes(entries):
    """entries: iterable of (shape, dtype, n_buffers).  Clamped to device VMEM."""
    need = sum(_padded_bytes(s, d) * nb for (s, d, nb) in entries) + (4 << 20)
    hi = int(_vmem_capacity_bytes() * 0.9)
    lo = min(32 << 20, hi)
    return int(min(max(need, lo), hi))


# ----------------------------------------------------------------------------
# Prenet: torchaudio Spectrogram (center=False, normalized='window', complex).
# Frames are assembled inside the kernel from r = n_fft/hop shifted chunk
# windows; the windowed DFT basis has interleaved (real, imag) columns so the
# output reshapes straight into NHWC with channel = (real, imag).
# ----------------------------------------------------------------------------
def make_stft_basis(n_fft):
    n_freq = n_fft // 2 + 1
    hop = n_fft // 4
    n = jnp.arange(n_fft, dtype=jnp.float32)
    window = 0.5 * (1.0 - jnp.cos(2.0 * jnp.pi * n / n_fft))      # periodic Hann
    norm = jnp.sqrt(jnp.sum(window ** 2))                          # 'window' norm
    k = jnp.arange(n_freq, dtype=jnp.float32)
    theta = 2.0 * jnp.pi * n[:, None] * k[None, :] / n_fft
    wr = (window[:, None] * jnp.cos(theta)) / norm                 # [n_fft, n_freq]
    wi = (-window[:, None] * jnp.sin(theta)) / norm
    basis = jnp.stack([wr, wi], axis=-1).reshape(n_fft, 2 * n_freq)
    # per-chunk split: basis3[j] multiplies the j-th hop-chunk of each frame.
    return basis.reshape(n_fft // hop, hop, 2 * n_freq).astype(jnp.float32)


def _stft_kernel(chunks_ref, basis_ref, o_ref, *, n_frames, r):
    # chunks_ref: (1, n_chunks, hop) f32   basis_ref: (r, hop, 2*n_freq) f32 (resident)
    nf2 = basis_ref.shape[-1]
    acc = jnp.zeros((n_frames, nf2), jnp.float32)
    for j in range(r):                                    # static unroll (r = 4)
        a = chunks_ref[0, pl.ds(j, n_frames), :]          # overlapped framing, in VMEM
        acc = acc + jnp.dot(a, basis_ref[j], preferred_element_type=jnp.float32)
    o_ref[0] = acc.astype(o_ref.dtype)


def stft_features_nhwc(audios, basis3):
    """audios:[B,T] f32 -> [B, n_frames, n_freq, 2] bf16 (NHWC, C = (real, imag))."""
    r, hop, nf2 = basis3.shape
    n_fft = r * hop
    B, T = audios.shape
    n_frames = 1 + (T - n_fft) // hop
    n_chunks = n_frames + r - 1
    chunks = audios[:, :n_chunks * hop].reshape(B, n_chunks, hop)   # free reshape
    vmem = _vmem_limit_bytes([
        ((n_chunks, hop), jnp.float32, 2),
        ((n_frames, nf2), jnp.bfloat16, 2),
        (tuple(basis3.shape), jnp.float32, 1),
    ])
    spec = pl.pallas_call(
        functools.partial(_stft_kernel, n_frames=n_frames, r=r),
        out_shape=jax.ShapeDtypeStruct((B, n_frames, nf2), jnp.bfloat16),
        grid_spec=pltpu.PrefetchScalarGridSpec(
            num_scalar_prefetch=0,
            grid=(B,),
            in_specs=[
                pl.BlockSpec((1, n_chunks, hop), lambda b: (b, 0, 0)),
                # DFT basis: one resident VMEM copy for all grid steps.
                pl.BlockSpec(memory_space=pltpu.MemorySpace.VMEM),
            ],
            out_specs=pl.BlockSpec((1, n_frames, nf2), lambda b: (b, 0, 0)),
        ),
        compiler_params=pltpu.CompilerParams(
            dimension_semantics=("parallel",),
            vmem_limit_bytes=vmem),
        cost_estimate=pl.CostEstimate(
            flops=int(2 * B * n_frames * n_fft * nf2), transcendentals=0,
            bytes_accessed=int(B * n_chunks * hop * 4 + basis3.size * 4
                               + B * n_frames * nf2 * 2)),
    )(chunks, basis3)
    return spec.reshape(B, n_frames, nf2 // 2, 2)


# ----------------------------------------------------------------------------
# Conv2d block (weight-normed Conv2d + LeakyReLU), NHWC, strided.
# The padded activation is stored once in a phase-split layout
#   [B, sh, sw, (Hq+1)*Wq, C]
# so that every (kh, kw) tap is a CONTIGUOUS 2-D window [M, C] with
# M = Ho*Wq rows (Wq - Wo junk phase columns per row group are computed and
# sliced off afterwards; at realistic widths that overhead is ~1-3%).
# ----------------------------------------------------------------------------
def _conv_taps_kernel(x_ref, w_ref, b_ref, o_ref, *, KH, KW, sh, sw, Wq, M, neg_slope):
    # x_ref: (1, sh, sw, L, C) bf16   w_ref: (KH*KW, C, N) bf16 (resident)
    # b_ref: (1, N) f32 (resident)    o_ref: (1, M, N)
    N = w_ref.shape[-1]
    acc = jnp.zeros((M, N), jnp.float32)
    for kh in range(KH):                                  # static unroll over taps
        qh, rh = divmod(kh, sh)
        for kw in range(KW):
            qw, rw = divmod(kw, sw)
            a = x_ref[0, rh, rw, pl.ds(qh * Wq + qw, M), :].astype(jnp.bfloat16)
            acc = acc + jnp.dot(a, w_ref[kh * KW + kw],
                                preferred_element_type=jnp.float32)
    acc = acc + b_ref[...]                                # bias (1, N) broadcasts, f32
    if neg_slope is not None:                             # static (trace-time) branch
        acc = jnp.where(acc > 0, acc, acc * neg_slope)
    o_ref[0] = acc.astype(o_ref.dtype)


def conv2d_nhwc(x, w_taps, bias_row, *, KH, KW, sh, sw, ph, pw, neg_slope,
                out_dtype=jnp.bfloat16):
    """x:[B,H,W,C] bf16, w_taps:[KH*KW,C,N] bf16, bias_row:[1,N] f32 -> [B,Ho,Wo,N]."""
    B, H, W, C = x.shape
    N = w_taps.shape[-1]
    Hp, Wp = H + 2 * ph, W + 2 * pw
    Ho = (Hp - KH) // sh + 1
    Wo = (Wp - KW) // sw + 1
    Hq = -(-Hp // sh)                       # ceil(Hp / sh)
    Wq = -(-Wp // sw)
    # Zero-pad to whole phase groups (+1 extra H row group so every shifted flat
    # window stays in bounds); pad/reshape/transpose fuse into ~one XLA copy.
    Hpad = (Hq + 1) * sh
    Wpad = Wq * sw
    xp = jnp.pad(x, ((0, 0), (ph, Hpad - H - ph), (pw, Wpad - W - pw), (0, 0)))
    L = (Hq + 1) * Wq
    xph = xp.reshape(B, Hq + 1, sh, Wq, sw, C).transpose(0, 2, 4, 1, 3, 5)
    xph = xph.reshape(B, sh, sw, L, C)
    M = Ho * Wq

    vmem = _vmem_limit_bytes([
        ((sh, sw, L, C), xph.dtype, 2),
        ((M, N), out_dtype, 2),
        (tuple(w_taps.shape), w_taps.dtype, 1),
        (tuple(bias_row.shape), bias_row.dtype, 1),
    ])
    flops = 2 * B * M * C * N * KH * KW
    bytes_accessed = int(B * sh * sw * L * C * 2 + w_taps.size * 2
                         + bias_row.size * 4
                         + B * M * N * jnp.dtype(out_dtype).itemsize)

    out = pl.pallas_call(
        functools.partial(_conv_taps_kernel, KH=KH, KW=KW, sh=sh, sw=sw,
                          Wq=Wq, M=M, neg_slope=neg_slope),
        out_shape=jax.ShapeDtypeStruct((B, M, N), out_dtype),
        grid_spec=pltpu.PrefetchScalarGridSpec(
            num_scalar_prefetch=0,
            grid=(B,),
            in_specs=[
                pl.BlockSpec((1, sh, sw, L, C), lambda b: (b, 0, 0, 0, 0)),
                # Constant operands: single resident VMEM copy across the grid
                # (no re-DMA, no dead second pipeline buffer).
                pl.BlockSpec(memory_space=pltpu.MemorySpace.VMEM),
                pl.BlockSpec(memory_space=pltpu.MemorySpace.VMEM),
            ],
            out_specs=pl.BlockSpec((1, M, N), lambda b: (b, 0, 0)),
        ),
        compiler_params=pltpu.CompilerParams(
            dimension_semantics=("parallel",),
            vmem_limit_bytes=vmem),
        cost_estimate=pl.CostEstimate(flops=int(flops), transcendentals=0,
                                      bytes_accessed=bytes_accessed),
    )(xph, w_taps, bias_row)
    # Drop the (Wq - Wo) junk phase columns; this cheap slice fuses with the
    # next layer's pad/phase-split copy.
    out = out.reshape(B, Ho, Wq, N)[:, :, :Wo, :]
    return out


# ----------------------------------------------------------------------------
# Final Cout=1, kernel (3,1) conv: single-launch VPU multiply-accumulate
# (no grid-over-B overhead, no 128-lane MXU padding for a 1-channel output).
# ----------------------------------------------------------------------------
def _final_conv_kernel(x_ref, w_ref, b_ref, o_ref, *, KH):
    # x_ref: (B, Hp, W, C)   w_ref: (KH, C) f32   b_ref: (1, 1) f32   o_ref: (B, H, W) f32
    H = o_ref.shape[1]
    acc = jnp.zeros(o_ref.shape, jnp.float32)
    for kh in range(KH):                                    # static unroll (KH = 3)
        xs = x_ref[:, kh:kh + H, :, :].astype(jnp.float32)  # [B, H, W, C]
        acc = acc + jnp.sum(xs * w_ref[kh:kh + 1, :], axis=-1)
    o_ref[...] = acc + b_ref[...]


def final_conv_1ch(x, wf, bias11):
    """x:[B,H,W,C], wf:[KH,C] f32, bias11:[1,1] f32 -> [B,H,W] f32 (Cout == 1)."""
    B, H, W, C = x.shape
    KH = wf.shape[0]
    ph = (KH - 1) // 2
    xp = jnp.pad(x, ((0, 0), (ph, ph), (0, 0), (0, 0)))
    return pl.pallas_call(
        functools.partial(_final_conv_kernel, KH=KH),
        out_shape=jax.ShapeDtypeStruct((B, H, W), jnp.float32),
        in_specs=[pl.BlockSpec(memory_space=pltpu.MemorySpace.VMEM)] * 3,
        out_specs=pl.BlockSpec(memory_space=pltpu.MemorySpace.VMEM),
        cost_estimate=pl.CostEstimate(
            flops=int(2 * B * H * W * C * KH), transcendentals=0,
            bytes_accessed=int(B * (H + 2 * ph) * W * C * x.dtype.itemsize
                               + KH * C * 4 + 4 + B * H * W * 4)),
    )(xp, wf, bias11)


# ----------------------------------------------------------------------------
# One-time parameter preparation (outside the traced forward):
# weight_norm, per-tap matmul layout [(kh*KW+kw), Cin, Cout] in bf16,
# bias as f32 rows; last layer as a [KH, C] f32 filter for the VPU kernel.
# ----------------------------------------------------------------------------
def apply_weight_norm(v, g):
    # PyTorch weight_norm (dim=0): w = g * v / ||v||, norm over (in, kh, kw)
    norm = jnp.sqrt(jnp.sum(v * v, axis=(1, 2, 3), keepdims=True))
    return g[:, None, None, None] * v / norm


def prepare_params(raw_params):
    prepared = []
    for (v, g, b) in raw_params[:-1]:
        w = apply_weight_norm(v, g)                        # [Cout, Cin, KH, KW]
        co, ci, kh, kw = w.shape
        w_taps = jnp.transpose(w, (2, 3, 1, 0)).reshape(kh * kw, ci, co)
        prepared.append((w_taps.astype(jnp.bfloat16),
                         b.astype(jnp.float32).reshape(1, -1)))
    v, g, b = raw_params[-1]
    w = apply_weight_norm(v, g)                            # [1, Cin, 3, 1]
    wf = jnp.transpose(w[0, :, :, 0], (1, 0))              # [KH=3, Cin]
    prepared.append((wf.astype(jnp.float32),
                     b.astype(jnp.float32).reshape(1, 1)))
    return prepared


def init_params(key, channels_list, kernel_size):
    params = []
    prev = 2
    for ch in channels_list:
        key, k1, k2, k3 = jax.random.split(key, 4)
        v = jax.random.normal(k1, (ch, prev, kernel_size, kernel_size), jnp.float32) * 0.1
        g = jax.random.uniform(k2, (ch,), jnp.float32, 0.5, 1.5)
        b = jax.random.normal(k3, (ch,), jnp.float32) * 0.01
        params.append((v, g, b))
        prev = ch
    key, k1, k2, k3 = jax.random.split(key, 4)
    v = jax.random.normal(k1, (1, prev, 3, 1), jnp.float32) * 0.1
    g = jax.random.uniform(k2, (1,), jnp.float32, 0.5, 1.5)
    b = jax.random.normal(k3, (1,), jnp.float32) * 0.01
    params.append((v, g, b))
    return params


# ----------------------------------------------------------------------------
# Full forward (matches STFT_Discriminator.forward)
# ----------------------------------------------------------------------------
def stft_discriminator_forward(audios, params, stft_basis,
                               kernel_size=5, stride=3, neg_slope=0.1):
    x = stft_features_nhwc(audios, stft_basis)        # [B, F, n_freq, 2] bf16 NHWC
    feature_maps = []
    pad = (kernel_size - 1) // 2
    for (w_taps, b_row) in params[:-1]:
        x = conv2d_nhwc(x, w_taps, b_row, KH=kernel_size, KW=kernel_size,
                        sh=stride, sw=stride, ph=pad, pw=pad, neg_slope=neg_slope)
        # Returned feature maps follow the PyTorch contract (NCHW, f32); the
        # bf16 NHWC activation stays on the hot path.  Transpose+cast fuse into
        # one XLA pass and only feed the returned copies.
        feature_maps.append(jnp.transpose(x, (0, 3, 1, 2)).astype(jnp.float32))
    wf, bf = params[-1]
    y = final_conv_1ch(x, wf, bf)                      # [B, H, W] f32 (Cout == 1)
    feature_maps.append(y[:, None, :, :])              # NCHW [B, 1, H, W]
    out = y.reshape(y.shape[0], -1)                    # == flatten(start_dim=1)
    return out, feature_maps


if __name__ == "__main__":
    key = jax.random.PRNGKey(0)
    k_audio, k_params = jax.random.split(key)

    n_fft = 16                              # hop = 4, win = 16, n_freq = 9
    B, T = 2, 128                           # -> 29 STFT frames
    channels_list = [8, 16, 32, 32, 32]     # small channels, same block structure

    audios = jax.random.normal(k_audio, (B, T), jnp.float32)
    raw_params = init_params(k_params, channels_list, kernel_size=5)

    # One-time preparation (outside the traced forward): weight_norm + per-tap
    # matmul layout + bf16 cast, and the f32 windowed DFT basis.
    prepared = prepare_params(raw_params)
    basis = make_stft_basis(n_fft)

    fwd = jax.jit(stft_discriminator_forward)
    out, fmaps = fwd(audios, prepared, basis)
    jax.block_until_ready(out)
    for f in fmaps:
        jax.block_until_ready(f)

    print("KERNEL_OK")
</pallas_src>

<mosaic_0001>
module attributes {stable_mosaic.version = 11 : i64} {
  func.func @_stft_kernel(%arg0: i32, %arg1: memref<1x32x4xf32, #tpu.memory_space<vmem>>, %arg2: memref<4x4x18xf32, #tpu.memory_space<vmem>>, %arg3: memref<1x29x18xbf16, #tpu.memory_space<vmem>>) attributes {dimension_semantics = [#tpu.dimension_semantics<parallel>], iteration_bounds = array<i64: 2>, scalar_prefetch = 0 : i64, scratch_operands = 0 : i64, tpu.core_type = #tpu.core_type<tc>, window_params = [{transform_indices = @transform_0, window_bounds = array<i64: 1, 32, 4>}, {pipeline_mode = #tpu.pipeline_mode<synchronous>, transform_indices = @transform_1, window_bounds = array<i64: 4, 4, 18>}, {transform_indices = @transform_2, window_bounds = array<i64: 1, 29, 18>}]} {
    %cst = arith.constant 0.000000e+00 : f32
    %0 = vector.broadcast %cst : f32 to vector<29x18xf32>
    %c0 = arith.constant 0 : index
    %c0_0 = arith.constant 0 : index
    %c0_1 = arith.constant 0 : index
    %1 = vector.load %arg1[%c0, %c0_0, %c0_1] : memref<1x32x4xf32, #tpu.memory_space<vmem>>, vector<1x29x4xf32>
    %2 = vector.shape_cast %1 : vector<1x29x4xf32> to vector<29x4xf32>
    %c0_2 = arith.constant 0 : index
    %c0_3 = arith.constant 0 : index
    %c0_4 = arith.constant 0 : index
    %3 = vector.load %arg2[%c0_2, %c0_3, %c0_4] : memref<4x4x18xf32, #tpu.memory_space<vmem>>, vector<1x4x18xf32>
    %4 = vector.shape_cast %3 : vector<1x4x18xf32> to vector<4x18xf32>
    %cst_5 = arith.constant dense<0.000000e+00> : vector<29x18xf32>
    %5 = tpu.matmul %2, %4, %cst_5 {dimension_numbers = #tpu.dot_dimension_numbers<[1], [0], [0], [1], [0, 0, 1, 1], [], []>} : vector<29x4xf32>, vector<4x18xf32>, vector<29x18xf32> -> vector<29x18xf32>
    %6 = arith.addf %0, %5 : vector<29x18xf32>
    %c0_6 = arith.constant 0 : index
    %c1 = arith.constant 1 : index
    %c0_7 = arith.constant 0 : index
    %7 = vector.load %arg1[%c0_6, %c1, %c0_7] : memref<1x32x4xf32, #tpu.memory_space<vmem>>, vector<1x29x4xf32>
    %8 = vector.shape_cast %7 : vector<1x29x4xf32> to vector<29x4xf32>
    %c1_8 = arith.constant 1 : index
    %c0_9 = arith.constant 0 : index
    %c0_10 = arith.constant 0 : index
    %9 = vector.load %arg2[%c1_8, %c0_9, %c0_10] : memref<4x4x18xf32, #tpu.memory_space<vmem>>, vector<1x4x18xf32>
    %10 = vector.shape_cast %9 : vector<1x4x18xf32> to vector<4x18xf32>
    %cst_11 = arith.constant dense<0.000000e+00> : vector<29x18xf32>
    %11 = tpu.matmul %8, %10, %cst_11 {dimension_numbers = #tpu.dot_dimension_numbers<[1], [0], [0], [1], [0, 0, 1, 1], [], []>} : vector<29x4xf32>, vector<4x18xf32>, vector<29x18xf32> -> vector<29x18xf32>
    %12 = arith.addf %6, %11 : vector<29x18xf32>
    %c0_12 = arith.constant 0 : index
    %c2 = arith.constant 2 : index
    %c0_13 = arith.constant 0 : index
    %13 = vector.load %arg1[%c0_12, %c2, %c0_13] : memref<1x32x4xf32, #tpu.memory_space<vmem>>, vector<1x29x4xf32>
    %14 = vector.shape_cast %13 : vector<1x29x4xf32> to vector<29x4xf32>
    %c2_14 = arith.constant 2 : index
    %c0_15 = arith.constant 0 : index
    %c0_16 = arith.constant 0 : index
    %15 = vector.load %arg2[%c2_14, %c0_15, %c0_16] : memref<4x4x18xf32, #tpu.memory_space<vmem>>, vector<1x4x18xf32>
    %16 = vector.shape_cast %15 : vector<1x4x18xf32> to vector<4x18xf32>
    %cst_17 = arith.constant dense<0.000000e+00> : vector<29x18xf32>
    %17 = tpu.matmul %14, %16, %cst_17 {dimension_numbers = #tpu.dot_dimension_numbers<[1], [0], [0], [1], [0, 0, 1, 1], [], []>} : vector<29x4xf32>, vector<4x18xf32>, vector<29x18xf32> -> vector<29x18xf32>
    %18 = arith.addf %12, %17 : vector<29x18xf32>
    %c0_18 = arith.constant 0 : index
    %c3 = arith.constant 3 : index
    %c0_19 = arith.constant 0 : index
    %19 = vector.load %arg1[%c0_18, %c3, %c0_19] : memref<1x32x4xf32, #tpu.memory_space<vmem>>, vector<1x29x4xf32>
    %20 = vector.shape_cast %19 : vector<1x29x4xf32> to vector<29x4xf32>
    %c3_20 = arith.constant 3 : index
    %c0_21 = arith.constant 0 : index
    %c0_22 = arith.constant 0 : index
    %21 = vector.load %arg2[%c3_20, %c0_21, %c0_22] : memref<4x4x18xf32, #tpu.memory_space<vmem>>, vector<1x4x18xf32>
    %22 = vector.shape_cast %21 : vector<1x4x18xf32> to vector<4x18xf32>
    %cst_23 = arith.constant dense<0.000000e+00> : vector<29x18xf32>
    %23 = tpu.matmul %20, %22, %cst_23 {dimension_numbers = #tpu.dot_dimension_numbers<[1], [0], [0], [1], [0, 0, 1, 1], [], []>} : vector<29x4xf32>, vector<4x18xf32>, vector<29x18xf32> -> vector<29x18xf32>
    %24 = arith.addf %18, %23 : vector<29x18xf32>
    %25 = arith.truncf %24 : vector<29x18xf32> to vector<29x18xbf16>
    %c0_24 = arith.constant 0 : index
    %c0_25 = arith.constant 0 : index
    %c0_26 = arith.constant 0 : index
    %26 = vector.load %arg3[%c0_24, %c0_25, %c0_26] : memref<1x29x18xbf16, #tpu.memory_space<vmem>>, vector<1x29x18xbf16>
    %27 = vector.shape_cast %26 : vector<1x29x18xbf16> to vector<29x18xbf16>
    %28 = vector.shape_cast %25 : vector<29x18xbf16> to vector<1x29x18xbf16>
    tpu.vector_store %arg3[%c0_24, %c0_25, %c0_26], %28 {strides = array<i32>} : memref<1x29x18xbf16, #tpu.memory_space<vmem>>, vector<1x29x18xbf16>,
    return
  }
  func.func @transform_0(%arg0: i32) -> (i32, i32, i32) {
    %c0_i32 = arith.constant 0 : i32
    %c0_i32_0 = arith.constant 0 : i32
    %c0_i32_1 = arith.constant 0 : i32
    return %arg0, %c0_i32, %c0_i32_0 : i32, i32, i32
  }
  func.func @transform_1(%arg0: i32) -> (i32, i32, i32) {
    %c0_i32 = arith.constant 0 : i32
    %c0_i32_0 = arith.constant 0 : i32
    %c0_i32_1 = arith.constant 0 : i32
    %c0_i32_2 = arith.constant 0 : i32
    return %c0_i32, %c0_i32_0, %c0_i32_1 : i32, i32, i32
  }
  func.func @transform_2(%arg0: i32) -> (i32, i32, i32) {
    %c0_i32 = arith.constant 0 : i32
    %c0_i32_0 = arith.constant 0 : i32
    %c0_i32_1 = arith.constant 0 : i32
    return %arg0, %c0_i32, %c0_i32_0 : i32, i32, i32
  }
}

module attributes {stable_mosaic.version = 11 : i64} {
  func.func @_conv_taps_kernel(%arg0: i32, %arg1: memref<1x3x3x60x2xbf16, #tpu.memory_space<vmem>>, %arg2: memref<25x2x8xbf16, #tpu.memory_space<vmem>>, %arg3: memref<1x8xf32, #tpu.memory_space<vmem>>, %arg4: memref<1x50x8xbf16, #tpu.memory_space<vmem>>) attributes {dimension_semantics = [#tpu.dimension_semantics<parallel>], iteration_bounds = array<i64: 2>, scalar_prefetch = 0 : i64, scratch_operands = 0 : i64, tpu.core_type = #tpu.core_type<tc>, window_params = [{transform_indices = @transform_0, window_bounds = array<i64: 1, 3, 3, 60, 2>}, {pipeline_mode = #tpu.pipeline_mode<synchronous>, transform_indices = @transform_1, window_bounds = array<i64: 25, 2, 8>}, {pipeline_mode = #tpu.pipeline_mode<synchronous>, transform_indices = @transform_2, window_bounds = array<i64: 1, 8>}, {transform_indices = @transform_3, window_bounds = array<i64: 1, 50, 8>}]} {
    %cst = arith.constant 0.000000e+00 : f32
    %0 = vector.broadcast %cst : f32 to vector<50x8xf32>
    %c0 = arith.constant 0 : index
    %c0_0 = arith.constant 0 : index
    %c0_1 = arith.constant 0 : index
    %c0_2 = arith.constant 0 : index
    %c0_3 = arith.constant 0 : index
    %1 = vector.load %arg1[%c0, %c0_0, %c0_1, %c0_2, %c0_3] : memref<1x3x3x60x2xbf16, #tpu.memory_space<vmem>>, vector<1x1x1x50x2xbf16>
    %2 = vector.shape_cast %1 : vector<1x1x1x50x2xbf16> to vector<50x2xbf16>
    %c0_4 = arith.constant 0 : index
    %c0_5 = arith.constant 0 : index
    %c0_6 = arith.constant 0 : index
    %3 = vector.load %arg2[%c0_4, %c0_5, %c0_6] : memref<25x2x8xbf16, #tpu.memory_space<vmem>>, vector<1x2x8xbf16>
    %4 = vector.shape_cast %3 : vector<1x2x8xbf16> to vector<2x8xbf16>
    %cst_7 = arith.constant dense<0.000000e+00> : vector<50x8xf32>
    %5 = tpu.matmul %2, %4, %cst_7 {dimension_numbers = #tpu.dot_dimension_numbers<[1], [0], [0], [1], [0, 0, 1, 1], [], []>} : vector<50x2xbf16>, vector<2x8xbf16>, vector<50x8xf32> -> vector<50x8xf32>
    %6 = arith.addf %0, %5 : vector<50x8xf32>
    %c0_8 = arith.constant 0 : index
    %c0_9 = arith.constant 0 : index
    %c1 = arith.constant 1 : index
    %c0_10 = arith.constant 0 : index
    %c0_11 = arith.constant 0 : index
    %7 = vector.load %arg1[%c0_8, %c0_9, %c1, %c0_10, %c0_11] : memref<1x3x3x60x2xbf16, #tpu.memory_space<vmem>>, vector<1x1x1x50x2xbf16>
    %8 = vector.shape_cast %7 : vector<1x1x1x50x2xbf16> to vector<50x2xbf16>
    %c1_12 = arith.constant 1 : index
    %c0_13 = arith.constant 0 : index
    %c0_14 = arith.constant 0 : index
    %9 = vector.load %arg2[%c1_12, %c0_13, %c0_14] : memref<25x2x8xbf16, #tpu.memory_space<vmem>>, vector<1x2x8xbf16>
    %10 = vector.shape_cast %9 : vector<1x2x8xbf16> to vector<2x8xbf16>
    %cst_15 = arith.constant dense<0.000000e+00> : vector<50x8xf32>
    %11 = tpu.matmul %8, %10, %cst_15 {dimension_numbers = #tpu.dot_dimension_numbers<[1], [0], [0], [1], [0, 0, 1, 1], [], []>} : vector<50x2xbf16>, vector<2x8xbf16>, vector<50x8xf32> -> vector<50x8xf32>
    %12 = arith.addf %6, %11 : vector<50x8xf32>
    %c0_16 = arith.constant 0 : index
    %c0_17 = arith.constant 0 : index
    %c2 = arith.constant 2 : index
    %c0_18 = arith.constant 0 : index
    %c0_19 = arith.constant 0 : index
    %13 = vector.load %arg1[%c0_16, %c0_17, %c2, %c0_18, %c0_19] : memref<1x3x3x60x2xbf16, #tpu.memory_space<vmem>>, vector<1x1x1x50x2xbf16>
    %14 = vector.shape_cast %13 : vector<1x1x1x50x2xbf16> to vector<50x2xbf16>
    %c2_20 = arith.constant 2 : index
    %c0_21 = arith.constant 0 : index
    %c0_22 = arith.constant 0 : index
    %15 = vector.load %arg2[%c2_20, %c0_21, %c0_22] : memref<25x2x8xbf16, #tpu.memory_space<vmem>>, vector<1x2x8xbf16>
    %16 = vector.shape_cast %15 : vector<1x2x8xbf16> to vector<2x8xbf16>
    %cst_23 = arith.constant dense<0.000000e+00> : vector<50x8xf32>
    %17 = tpu.matmul %14, %16, %cst_23 {dimension_numbers = #tpu.dot_dimension_numbers<[1], [0], [0], [1], [0, 0, 1, 1], [], []>} : vector<50x2xbf16>, vector<2x8xbf16>, vector<50x8xf32> -> vector<50x8xf32>
    %18 = arith.addf %12, %17 : vector<50x8xf32>
    %c0_24 = arith.constant 0 : index
    %c0_25 = arith.constant 0 : index
    %c0_26 = arith.constant 0 : index
    %c1_27 = arith.constant 1 : index
    %c0_28 = arith.constant 0 : index
    %19 = vector.load %arg1[%c0_24, %c0_25, %c0_26, %c1_27, %c0_28] : memref<1x3x3x60x2xbf16, #tpu.memory_space<vmem>>, vector<1x1x1x50x2xbf16>
    %20 = vector.shape_cast %19 : vector<1x1x1x50x2xbf16> to vector<50x2xbf16>
    %c3 = arith.constant 3 : index
    %c0_29 = arith.constant 0 : index
    %c0_30 = arith.constant 0 : index
    %21 = vector.load %arg2[%c3, %c0_29, %c0_30] : memref<25x2x8xbf16, #tpu.memory_space<vmem>>, vector<1x2x8xbf16>
    %22 = vector.shape_cast %21 : vector<1x2x8xbf16> to vector<2x8xbf16>
    %cst_31 = arith.constant dense<0.000000e+00> : vector<50x8xf32>
    %23 = tpu.matmul %20, %22, %cst_31 {dimension_numbers = #tpu.dot_dimension_numbers<[1], [0], [0], [1], [0, 0, 1, 1], [], []>} : vector<50x2xbf16>, vector<2x8xbf16>, vector<50x8xf32> -> vector<50x8xf32>
    %24 = arith.addf %18, %23 : vector<50x8xf32>
    %c0_32 = arith.constant 0 : index
    %c0_33 = arith.constant 0 : index
    %c1_34 = arith.constant 1 : index
    %c1_35 = arith.constant 1 : index
    %c0_36 = arith.constant 0 : index
    %25 = vector.load %arg1[%c0_32, %c0_33, %c1_34, %c1_35, %c0_36] : memref<1x3x3x60x2xbf16, #tpu.memory_space<vmem>>, vector<1x1x1x50x2xbf16>
    %26 = vector.shape_cast %25 : vector<1x1x1x50x2xbf16> to vector<50x2xbf16>
    %c4 = arith.constant 4 : index
    %c0_37 = arith.constant 0 : index
    %c0_38 = arith.constant 0 : index
    %27 = vector.load %arg2[%c4, %c0_37, %c0_38] : memref<25x2x8xbf16, #tpu.memory_space<vmem>>, vector<1x2x8xbf16>
    %28 = vector.shape_cast %27 : vector<1x2x8xbf16> to vector<2x8xbf16>
    %cst_39 = arith.constant dense<0.000000e+00> : vector<50x8xf32>
    %29 = tpu.matmul %26, %28, %cst_39 {dimension_numbers = #tpu.dot_dimension_numbers<[1], [0], [0], [1], [0, 0, 1, 1], [], []>} : vector<50x2xbf16>, vector<2x8xbf16>, vector<50x8xf32> -> vector<50x8xf32>
    %30 = arith.addf %24, %29 : vector<50x8xf32>
    %c0_40 = arith.constant 0 : index
    %c1_41 = arith.constant 1 : index
    %c0_42 = arith.constant 0 : index
    %c0_43 = arith.constant 0 : index
    %c0_44 = arith.constant 0 : index
    %31 = vector.load %arg1[%c0_40, %c1_41, %c0_42, %c0_43, %c0_44] : memref<1x3x3x60x2xbf16, #tpu.memory_space<vmem>>, vector<1x1x1x50x2xbf16>
    %32 = vector.shape_cast %31 : vector<1x1x1x50x2xbf16> to vector<50x2xbf16>
    %c5 = arith.constant 5 : index
    %c0_45 = arith.constant 0 : index
    %c0_46 = arith.constant 0 : index
    %33 = vector.load %arg2[%c5, %c0_45, %c0_46] : memref<25x2x8xbf16, #tpu.memory_space<vmem>>, vector<1x2x8xbf16>
    %34 = vector.shape_cast %33 : vector<1x2x8xbf16> to vector<2x8xbf16>
    %cst_47 = arith.constant dense<0.000000e+00> : vector<50x8xf32>
    %35 = tpu.matmul %32, %34, %cst_47 {dimension_numbers = #tpu.dot_dimension_numbers<[1], [0], [0], [1], [0, 0, 1, 1], [], []>} : vector<50x2xbf16>, vector<2x8xbf16>, vector<50x8xf32> -> vector<50x8xf32>
    %36 = arith.addf %30, %35 : vector<50x8xf32>
    %c0_48 = arith.constant 0 : index
    %c1_49 = arith.constant 1 : index
    %c1_50 = arith.constant 1 : index
    %c0_51 = arith.constant 0 : index
    %c0_52 = arith.constant 0 : index
    %37 = vector.load %arg1[%c0_48, %c1_49, %c1_50, %c0_51, %c0_52] : memref<1x3x3x60x2xbf16, #tpu.memory_space<vmem>>, vector<1x1x1x50x2xbf16>
    %38 = vector.shape_cast %37 : vector<1x1x1x50x2xbf16> to vector<50x2xbf16>
    %c6 = arith.constant 6 : index
    %c0_53 = arith.constant 0 : index
    %c0_54 = arith.constant 0 : index
    %39 = vector.load %arg2[%c6, %c0_53, %c0_54] : memref<25x2x8xbf16, #tpu.memory_space<vmem>>, vector<1x2x8xbf16>
    %40 = vector.shape_cast %39 : vector<1x2x8xbf16> to vector<2x8xbf16>
    %cst_55 = arith.constant dense<0.000000e+00> : vector<50x8xf32>
    %41 = tpu.matmul %38, %40, %cst_55 {dimension_numbers = #tpu.dot_dimension_numbers<[1], [0], [0], [1], [0, 0, 1, 1], [], []>} : vector<50x2xbf16>, vector<2x8xbf16>, vector<50x8xf32> -> vector<50x8xf32>
    %42 = arith.addf %36, %41 : vector<50x8xf32>
    %c0_56 = arith.constant 0 : index
    %c1_57 = arith.constant 1 : index
    %c2_58 = arith.constant 2 : index
    %c0_59 = arith.constant 0 : index
    %c0_60 = arith.constant 0 : index
    %43 = vector.load %arg1[%c0_56, %c1_57, %c2_58, %c0_59, %c0_60] : memref<1x3x3x60x2xbf16, #tpu.memory_space<vmem>>, vector<1x1x1x50x2xbf16>
    %44 = vector.shape_cast %43 : vector<1x1x1x50x2xbf16> to vector<50x2xbf16>
    %c7 = arith.constant 7 : index
    %c0_61 = arith.constant 0 : index
    %c0_62 = arith.constant 0 : index
    %45 = vector.load %arg2[%c7, %c0_61, %c0_62] : memref<25x2x8xbf16, #tpu.memory_space<vmem>>, vector<1x2x8xbf16>
    %46 = vector.shape_cast %45 : vector<1x2x8xbf16> to vector<2x8xbf16>
    %cst_63 = arith.constant dense<0.000000e+00> : vector<50x8xf32>
    %47 = tpu.matmul %44, %46, %cst_63 {dimension_numbers = #tpu.dot_dimension_numbers<[1], [0], [0], [1], [0, 0, 1, 1], [], []>} : vector<50x2xbf16>, vector<2x8xbf16>, vector<50x8xf32> -> vector<50x8xf32>
    %48 = arith.addf %42, %47 : vector<50x8xf32>
    %c0_64 = arith.constant 0 : index
    %c1_65 = arith.constant 1 : index
    %c0_66 = arith.constant 0 : index
    %c1_67 = arith.constant 1 : index
    %c0_68 = arith.constant 0 : index
    %49 = vector.load %arg1[%c0_64, %c1_65, %c0_66, %c1_67, %c0_68] : memref<1x3x3x60x2xbf16, #tpu.memory_space<vmem>>, vector<1x1x1x50x2xbf16>
    %50 = vector.shape_cast %49 : vector<1x1x1x50x2xbf16> to vector<50x2xbf16>
    %c8 = arith.constant 8 : index
    %c0_69 = arith.constant 0 : index
    %c0_70 = arith.constant 0 : index
    %51 = vector.load %arg2[%c8, %c0_69, %c0_70] : memref<25x2x8xbf16, #tpu.memory_space<vmem>>, vector<1x2x8xbf16>
    %52 = vector.shape_cast %51 : vector<1x2x8xbf16> to vector<2x8xbf16>
    %cst_71 = arith.constant dense<0.000000e+00> : vector<50x8xf32>
    %53 = tpu.matmul %50, %52, %cst_71 {dimension_numbers = #tpu.dot_dimension_numbers<[1], [0], [0], [1], [0, 0, 1, 1], [], []>} : vector<50x2xbf16>, vector<2x8xbf16>, vector<50x8xf32> -> vector<50x8xf32>
    %54 = arith.addf %48, %53 : vector<50x8xf32>
    %c0_72 = arith.constant 0 : index
    %c1_73 = arith.constant 1 : index
    %c1_74 = arith.constant 1 : index
    %c1_75 = arith.constant 1 : index
    %c0_76 = arith.constant 0 : index
    %55 = vector.load %arg1[%c0_72, %c1_73, %c1_74, %c1_75, %c0_76] : memref<1x3x3x60x2xbf16, #tpu.memory_space<vmem>>, vector<1x1x1x50x2xbf16>
    %56 = vector.shape_cast %55 : vector<1x1x1x50x2xbf16> to vector<50x2xbf16>
    %c9 = arith.constant 9 : index
    %c0_77 = arith.constant 0 : index
    %c0_78 = arith.constant 0 : index
    %57 = vector.load %arg2[%c9, %c0_77, %c0_78] : memref<25x2x8xbf16, #tpu.memory_space<vmem>>, vector<1x2x8xbf16>
    %58 = vector.shape_cast %57 : vector<1x2x8xbf16> to vector<2x8xbf16>
    %cst_79 = arith.constant dense<0.000000e+00> : vector<50x8xf32>
    %59 = tpu.matmul %56, %58, %cst_79 {dimension_numbers = #tpu.dot_dimension_numbers<[1], [0], [0], [1], [0, 0, 1, 1], [], []>} : vector<50x2xbf16>, vector<2x8xbf16>, vector<50x8xf32> -> vector<50x8xf32>
    %60 = arith.addf %54, %59 : vector<50x8xf32>
    %c0_80 = arith.constant 0 : index
    %c2_81 = arith.constant 2 : index
    %c0_82 = arith.constant 0 : index
    %c0_83 = arith.constant 0 : index
    %c0_84 = arith.constant 0 : index
    %61 = vector.load %arg1[%c0_80, %c2_81, %c0_82, %c0_83, %c0_84] : memref<1x3x3x60x2xbf16, #tpu.memory_space<vmem>>, vector<1x1x1x50x2xbf16>
    %62 = vector.shape_cast %61 : vector<1x1x1x50x2xbf16> to vector<50x2xbf16>
    %c10 = arith.constant 10 : index
    %c0_85 = arith.constant 0 : index
    %c0_86 = arith.constant 0 : index
    %63 = vector.load %arg2[%c10, %c0_85, %c0_86] : memref<25x2x8xbf16, #tpu.memory_space<vmem>>, vector<1x2x8xbf16>
    %64 = vector.shape_cast %63 : vector<1x2x8xbf16> to vector<2x8xbf16>
    %cst_87 = arith.constant dense<0.000000e+00> : vector<50x8xf32>
    %65 = tpu.matmul %62, %64, %cst_87 {dimension_numbers = #tpu.dot_dimension_numbers<[1], [0], [0], [1], [0, 0, 1, 1], [], []>} : vector<50x2xbf16>, vector<2x8xbf16>, vector<50x8xf32> -> vector<50x8xf32>
    %66 = arith.addf %60, %65 : vector<50x8xf32>
    %c0_88 = arith.constant 0 : index
    %c2_89 = arith.constant 2 : index
    %c1_90 = arith.constant 1 : index
    %c0_91 = arith.constant 0 : index
    %c0_92 = arith.constant 0 : index
    %67 = vector.load %arg1[%c0_88, %c2_89, %c1_90, %c0_91, %c0_92] : memref<1x3x3x60x2xbf16, #tpu.memory_space<vmem>>, vector<1x1x1x50x2xbf16>
    %68 = vector.shape_cast %67 : vector<1x1x1x50x2xbf16> to vector<50x2xbf16>
    %c11 = arith.constant 11 : index
    %c0_93 = arith.constant 0 : index
    %c0_94 = arith.constant 0 : index
    %69 = vector.load %arg2[%c11, %c0_93, %c0_94] : memref<25x2x8xbf16, #tpu.memory_space<vmem>>, vector<1x2x8xbf16>
    %70 = vector.shape_cast %69 : vector<1x2x8xbf16> to vector<2x8xbf16>
    %cst_95 = arith.constant dense<0.000000e+00> : vector<50x8xf32>
    %71 = tpu.matmul %68, %70, %cst_95 {dimension_numbers = #tpu.dot_dimension_numbers<[1], [0], [0], [1], [0, 0, 1, 1], [], []>} : vector<50x2xbf16>, vector<2x8xbf16>, vector<50x8xf32> -> vector<50x8xf32>
    %72 = arith.addf %66, %71 : vector<50x8xf32>
    %c0_96 = arith.constant 0 : index
    %c2_97 = arith.constant 2 : index
    %c2_98 = arith.constant 2 : index
    %c0_99 = arith.constant 0 : index
    %c0_100 = arith.constant 0 : index
    %73 = vector.load %arg1[%c0_96, %c2_97, %c2_98, %c0_99, %c0_100] : memref<1x3x3x60x2xbf16, #tpu.memory_space<vmem>>, vector<1x1x1x50x2xbf16>
    %74 = vector.shape_cast %73 : vector<1x1x1x50x2xbf16> to vector<50x2xbf16>
    %c12 = arith.constant 12 : index
    %c0_101 = arith.constant 0 : index
    %c0_102 = arith.constant 0 : index
    %75 = vector.load %arg2[%c12, %c0_101, %c0_102] : memref<25x2x8xbf16, #tpu.memory_space<vmem>>, vector<1x2x8xbf16>
    %76 = vector.shape_cast %75 : vector<1x2x8xbf16> to vector<2x8xbf16>
    %cst_103 = arith.constant dense<0.000000e+00> : vector<50x8xf32>
    %77 = tpu.matmul %74, %76, %cst_103 {dimension_numbers = #tpu.dot_dimension_numbers<[1], [0], [0], [1], [0, 0, 1, 1], [], []>} : vector<50x2xbf16>, vector<2x8xbf16>, vector<50x8xf32> -> vector<50x8xf32>
    %78 = arith.addf %72, %77 : vector<50x8xf32>
    %c0_104 = arith.constant 0 : index
    %c2_105 = arith.constant 2 : index
    %c0_106 = arith.constant 0 : index
    %c1_107 = arith.constant 1 : index
    %c0_108 = arith.constant 0 : index
    %79 = vector.load %arg1[%c0_104, %c2_105, %c0_106, %c1_107, %c0_108] : memref<1x3x3x60x2xbf16, #tpu.memory_space<vmem>>, vector<1x1x1x50x2xbf16>
    %80 = vector.shape_cast %79 : vector<1x1x1x50x2xbf16> to vector<50x2xbf16>
    %c13 = arith.constant 13 : index
    %c0_109 = arith.constant 0 : index
    %c0_110 = arith.constant 0 : index
    %81 = vector.load %arg2[%c13, %c0_109, %c0_110] : memref<25x2x8xbf16, #tpu.memory_space<vmem>>, vector<1x2x8xbf16>
    %82 = vector.shape_cast %81 : vector<1x2x8xbf16> to vector<2x8xbf16>
    %cst_111 = arith.constant dense<0.000000e+00> : vector<50x8xf32>
    %83 = tpu.matmul %80, %82, %cst_111 {dimension_numbers = #tpu.dot_dimension_numbers<[1], [0], [0], [1], [0, 0, 1, 1], [], []>} : vector<50x2xbf16>, vector<2x8xbf16>, vector<50x8xf32> -> vector<50x8xf32>
    %84 = arith.addf %78, %83 : vector<50x8xf32>
    %c0_112 = arith.constant 0 : index
    %c2_113 = arith.constant 2 : index
    %c1_114 = arith.constant 1 : index
    %c1_115 = arith.constant 1 : index
    %c0_116 = arith.constant 0 : index
    %85 = vector.load %arg1[%c0_112, %c2_113, %c1_114, %c1_115, %c0_116] : memref<1x3x3x60x2xbf16, #tpu.memory_space<vmem>>, vector<1x1x1x50x2xbf16>
    %86 = vector.shape_cast %85 : vector<1x1x1x50x2xbf16> to vector<50x2xbf16>
    %c14 = arith.constant 14 : index
    %c0_117 = arith.constant 0 : index
    %c0_118 = arith.constant 0 : index
    %87 = vector.load %arg2[%c14, %c0_117, %c0_118] : memref<25x2x8xbf16, #tpu.memory_space<vmem>>, vector<1x2x8xbf16>
    %88 = vector.shape_cast %87 : vector<1x2x8xbf16> to vector<2x8xbf16>
    %cst_119 = arith.constant dense<0.000000e+00> : vector<50x8xf32>
    %89 = tpu.matmul %86, %88, %cst_119 {dimension_numbers = #tpu.dot_dimension_numbers<[1], [0], [0], [1], [0, 0, 1, 1], [], []>} : vector<50x2xbf16>, vector<2x8xbf16>, vector<50x8xf32> -> vector<50x8xf32>
    %90 = arith.addf %84, %89 : vector<50x8xf32>
    %c0_120 = arith.constant 0 : index
    %c0_121 = arith.constant 0 : index
    %c0_122 = arith.constant 0 : index
    %c5_123 = arith.constant 5 : index
    %c0_124 = arith.constant 0 : index
    %91 = vector.load %arg1[%c0_120, %c0_121, %c0_122, %c5_123, %c0_124] : memref<1x3x3x60x2xbf16, #tpu.memory_space<vmem>>, vector<1x1x1x50x2xbf16>
    %92 = vector.shape_cast %91 : vector<1x1x1x50x2xbf16> to vector<50x2xbf16>
    %c15 = arith.constant 15 : index
    %c0_125 = arith.constant 0 : index
    %c0_126 = arith.constant 0 : index
    %93 = vector.load %arg2[%c15, %c0_125, %c0_126] : memref<25x2x8xbf16, #tpu.memory_space<vmem>>, vector<1x2x8xbf16>
    %94 = vector.shape_cast %93 : vector<1x2x8xbf16> to vector<2x8xbf16>
    %cst_127 = arith.constant dense<0.000000e+00> : vector<50x8xf32>
    %95 = tpu.matmul %92, %94, %cst_127 {dimension_numbers = #tpu.dot_dimension_numbers<[1], [0], [0], [1], [0, 0, 1, 1], [], []>} : vector<50x2xbf16>, vector<2x8xbf16>, vector<50x8xf32> -> vector<50x8xf32>
    %96 = arith.addf %90, %95 : vector<50x8xf32>
    %c0_128 = arith.constant 0 : index
    %c0_129 = arith.constant 0 : index
    %c1_130 = arith.constant 1 : index
    %c5_131 = arith.constant 5 : index
    %c0_132 = arith.constant 0 : index
    %97 = vector.load %arg1[%c0_128, %c0_129, %c1_130, %c5_131, %c0_132] : memref<1x3x3x60x2xbf16, #tpu.memory_space<vmem>>, vector<1x1x1x50x2xbf16>
    %98 = vector.shape_cast %97 : vector<1x1x1x50x2xbf16> to vector<50x2xbf16>
    %c16 = arith.constant 16 : index
    %c0_133 = arith.constant 0 : index
    %c0_134 = arith.constant 0 : index
    %99 = vector.load %arg2[%c16, %c0_133, %c0_134] : memref<25x2x8xbf16, #tpu.memory_space<vmem>>, vector<1x2x8xbf16>
    %100 = vector.shape_cast %99 : vector<1x2x8xbf16> to vector<2x8xbf16>
    %cst_135 = arith.constant dense<0.000000e+00> : vector<50x8xf32>
    %101 = tpu.matmul %98, %100, %cst_135 {dimension_numbers = #tpu.dot_dimension_numbers<[1], [0], [0], [1], [0, 0, 1, 1], [], []>} : vector<50x2xbf16>, vector<2x8xbf16>, vector<50x8xf32> -> vector<50x8xf32>
    %102 = arith.addf %96, %101 : vector<50x8xf32>
    %c0_136 = arith.constant 0 : index
    %c0_137 = arith.constant 0 : index
    %c2_138 = arith.constant 2 : index
    %c5_139 = arith.constant 5 : index
    %c0_140 = arith.constant 0 : index
    %103 = vector.load %arg1[%c0_136, %c0_137, %c2_138, %c5_139, %c0_140] : memref<1x3x3x60x2xbf16, #tpu.memory_space<vmem>>, vector<1x1x1x50x2xbf16>
    %104 = vector.shape_cast %103 : vector<1x1x1x50x2xbf16> to vector<50x2xbf16>
    %c17 = arith.constant 17 : index
    %c0_141 = arith.constant 0 : index
    %c0_142 = arith.constant 0 : index
    %105 = vector.load %arg2[%c17, %c0_141, %c0_142] : memref<25x2x8xbf16, #tpu.memory_space<vmem>>, vector<1x2x8xbf16>
    %106 = vector.shape_cast %105 : vector<1x2x8xbf16> to vector<2x8xbf16>
    %cst_143 = arith.constant dense<0.000000e+00> : vector<50x8xf32>
    %107 = tpu.matmul %104, %106, %cst_143 {dimension_numbers = #tpu.dot_dimension_numbers<[1], [0], [0], [1], [0, 0, 1, 1], [], []>} : vector<50x2xbf16>, vector<2x8xbf16>, vector<50x8xf32> -> vector<50x8xf32>
    %108 = arith.addf %102, %107 : vector<50x8xf32>
    %c0_144 = arith.constant 0 : index
    %c0_145 = arith.constant 0 : index
    %c0_146 = arith.constant 0 : index
    %c6_147 = arith.constant 6 : index
    %c0_148 = arith.constant 0 : index
    %109 = vector.load %arg1[%c0_144, %c0_145, %c0_146, %c6_147, %c0_148] : memref<1x3x3x60x2xbf16, #tpu.memory_space<vmem>>, vector<1x1x1x50x2xbf16>
    %110 = vector.shape_cast %109 : vector<1x1x1x50x2xbf16> to vector<50x2xbf16>
    %c18 = arith.constant 18 : index
    %c0_149 = arith.constant 0 : index
    %c0_150 = arith.constant 0 : index
    %111 = vector.load %arg2[%c18, %c0_149, %c0_150] : memref<25x2x8xbf16, #tpu.memory_space<vmem>>, vector<1x2x8xbf16>
    %112 = vector.shape_cast %111 : vector<1x2x8xbf16> to vector<2x8xbf16>
    %cst_151 = arith.constant dense<0.000000e+00> : vector<50x8xf32>
    %113 = tpu.matmul %110, %112, %cst_151 {dimension_numbers = #tpu.dot_dimension_numbers<[1], [0], [0], [1], [0, 0, 1, 1], [], []>} : vector<50x2xbf16>, vector<2x8xbf16>, vector<50x8xf32> -> vector<50x8xf32>
    %114 = arith.addf %108, %113 : vector<50x8xf32>
    %c0_152 = arith.constant 0 : index
    %c0_153 = arith.constant 0 : index
    %c1_154 = arith.constant 1 : index
    %c6_155 = arith.constant 6 : index
    %c0_156 = arith.constant 0 : index
    %115 = vector.load %arg1[%c0_152, %c0_153, %c1_154, %c6_155, %c0_156] : memref<1x3x3x60x2xbf16, #tpu.memory_space<vmem>>, vector<1x1x1x50x2xbf16>
    %116 = vector.shape_cast %115 : vector<1x1x1x50x2xbf16> to vector<50x2xbf16>
    %c19 = arith.constant 19 : index
    %c0_157 = arith.constant 0 : index
    %c0_158 = arith.constant 0 : index
    %117 = vector.load %arg2[%c19, %c0_157, %c0_158] : memref<25x2x8xbf16, #tpu.memory_space<vmem>>, vector<1x2x8xbf16>
    %118 = vector.shape_cast %117 : vector<1x2x8xbf16> to vector<2x8xbf16>
    %cst_159 = arith.constant dense<0.000000e+00> : vector<50x8xf32>
    %119 = tpu.matmul %116, %118, %cst_159 {dimension_numbers = #tpu.dot_dimension_numbers<[1], [0], [0], [1], [0, 0, 1, 1], [], []>} : vector<50x2xbf16>, vector<2x8xbf16>, vector<50x8xf32> -> vector<50x8xf32>
    %120 = arith.addf %114, %119 : vector<50x8xf32>
    %c0_160 = arith.constant 0 : index
    %c1_161 = arith.constant 1 : index
    %c0_162 = arith.constant 0 : index
    %c5_163 = arith.constant 5 : index
    %c0_164 = arith.constant 0 : index
    %121 = vector.load %arg1[%c0_160, %c1_161, %c0_162, %c5_163, %c0_164] : memref<1x3x3x60x2xbf16, #tpu.memory_space<vmem>>, vector<1x1x1x50x2xbf16>
    %122 = vector.shape_cast %121 : vector<1x1x1x50x2xbf16> to vector<50x2xbf16>
    %c20 = arith.constant 20 : index
    %c0_165 = arith.constant 0 : index
    %c0_166 = arith.constant 0 : index
    %123 = vector.load %arg2[%c20, %c0_165, %c0_166] : memref<25x2x8xbf16, #tpu.memory_space<vmem>>, vector<1x2x8xbf16>
    %124 = vector.shape_cast %123 : vector<1x2x8xbf16> to vector<2x8xbf16>
    %cst_167 = arith.constant dense<0.000000e+00> : vector<50x8xf32>
    %125 = tpu.matmul %122, %124, %cst_167 {dimension_numbers = #tpu.dot_dimension_numbers<[1], [0], [0], [1], [0, 0, 1, 1], [], []>} : vector<50x2xbf16>, vector<2x8xbf16>, vector<50x8xf32> -> vector<50x8xf32>
    %126 = arith.addf %120, %125 : vector<50x8xf32>
    %c0_168 = arith.constant 0 : index
    %c1_169 = arith.constant 1 : index
    %c1_170 = arith.constant 1 : index
    %c5_171 = arith.constant 5 : index
    %c0_172 = arith.constant 0 : index
    %127 = vector.load %arg1[%c0_168, %c1_169, %c1_170, %c5_171, %c0_172] : memref<1x3x3x60x2xbf16, #tpu.memory_space<vmem>>, vector<1x1x1x50x2xbf16>
    %128 = vector.shape_cast %127 : vector<1x1x1x50x2xbf16> to vector<50x2xbf16>
    %c21 = arith.constant 21 : index
    %c0_173 = arith.constant 0 : index
    %c0_174 = arith.constant 0 : index
    %129 = vector.load %arg2[%c21, %c0_173, %c0_174] : memref<25x2x8xbf16, #tpu.memory_space<vmem>>, vector<1x2x8xbf16>
    %130 = vector.shape_cast %129 : vector<1x2x8xbf16> to vector<2x8xbf16>
    %cst_175 = arith.constant dense<0.000000e+00> : vector<50x8xf32>
    %131 = tpu.matmul %128, %130, %cst_175 {dimension_numbers = #tpu.dot_dimension_numbers<[1], [0], [0], [1], [0, 0, 1, 1], [], []>} : vector<50x2xbf16>, vector<2x8xbf16>, vector<50x8xf32> -> vector<50x8xf32>
    %132 = arith.addf %126, %131 : vector<50x8xf32>
    %c0_176 = arith.constant 0 : index
    %c1_177 = arith.constant 1 : index
    %c2_178 = arith.constant 2 : index
    %c5_179 = arith.constant 5 : index
    %c0_180 = arith.constant 0 : index
    %133 = vector.load %arg1[%c0_176, %c1_177, %c2_178, %c5_179, %c0_180] : memref<1x3x3x60x2xbf16, #tpu.memory_space<vmem>>, vector<1x1x1x50x2xbf16>
    %134 = vector.shape_cast %133 : vector<1x1x1x50x2xbf16> to vector<50x2xbf16>
    %c22 = arith.constant 22 : index
    %c0_181 = arith.constant 0 : index
    %c0_182 = arith.constant 0 : index
    %135 = vector.load %arg2[%c22, %c0_181, %c0_182] : memref<25x2x8xbf16, #tpu.memory_space<vmem>>, vector<1x2x8xbf16>
    %136 = vector.shape_cast %135 : vector<1x2x8xbf16> to vector<2x8xbf16>
    %cst_183 = arith.constant dense<0.000000e+00> : vector<50x8xf32>
    %137 = tpu.matmul %134, %136, %cst_183 {dimension_numbers = #tpu.dot_dimension_numbers<[1], [0], [0], [1], [0, 0, 1, 1], [], []>} : vector<50x2xbf16>, vector<2x8xbf16>, vector<50x8xf32> -> vector<50x8xf32>
    %138 = arith.addf %132, %137 : vector<50x8xf32>
    %c0_184 = arith.constant 0 : index
    %c1_185 = arith.constant 1 : index
    %c0_186 = arith.constant 0 : index
    %c6_187 = arith.constant 6 : index
    %c0_188 = arith.constant 0 : index
    %139 = vector.load %arg1[%c0_184, %c1_185, %c0_186, %c6_187, %c0_188] : memref<1x3x3x60x2xbf16, #tpu.memory_space<vmem>>, vector<1x1x1x50x2xbf16>
    %140 = vector.shape_cast %139 : vector<1x1x1x50x2xbf16> to vector<50x2xbf16>
    %c23 = arith.constant 23 : index
    %c0_189 = arith.constant 0 : index
    %c0_190 = arith.constant 0 : index
    %141 = vector.load %arg2[%c23, %c0_189, %c0_190] : memref<25x2x8xbf16, #tpu.memory_space<vmem>>, vector<1x2x8xbf16>
    %142 = vector.shape_cast %141 : vector<1x2x8xbf16> to vector<2x8xbf16>
    %cst_191 = arith.constant dense<0.000000e+00> : vector<50x8xf32>
    %143 = tpu.matmul %140, %142, %cst_191 {dimension_numbers = #tpu.dot_dimension_numbers<[1], [0], [0], [1], [0, 0, 1, 1], [], []>} : vector<50x2xbf16>, vector<2x8xbf16>, vector<50x8xf32> -> vector<50x8xf32>
    %144 = arith.addf %138, %143 : vector<50x8xf32>
    %c0_192 = arith.constant 0 : index
    %c1_193 = arith.constant 1 : index
    %c1_194 = arith.constant 1 : index
    %c6_195 = arith.constant 6 : index
    %c0_196 = arith.constant 0 : index
    %145 = vector.load %arg1[%c0_192, %c1_193, %c1_194, %c6_195, %c0_196] : memref<1x3x3x60x2xbf16, #tpu.memory_space<vmem>>, vector<1x1x1x50x2xbf16>
    %146 = vector.shape_cast %145 : vector<1x1x1x50x2xbf16> to vector<50x2xbf16>
    %c24 = arith.constant 24 : index
    %c0_197 = arith.constant 0 : index
    %c0_198 = arith.constant 0 : index
    %147 = vector.load %arg2[%c24, %c0_197, %c0_198] : memref<25x2x8xbf16, #tpu.memory_space<vmem>>, vector<1x2x8xbf16>
    %148 = vector.shape_cast %147 : vector<1x2x8xbf16> to vector<2x8xbf16>
    %cst_199 = arith.constant dense<0.000000e+00> : vector<50x8xf32>
    %149 = tpu.matmul %146, %148, %cst_199 {dimension_numbers = #tpu.dot_dimension_numbers<[1], [0], [0], [1], [0, 0, 1, 1], [], []>} : vector<50x2xbf16>, vector<2x8xbf16>, vector<50x8xf32> -> vector<50x8xf32>
    %150 = arith.addf %144, %149 : vector<50x8xf32>
    %c0_200 = arith.constant 0 : index
    %c0_201 = arith.constant 0 : index
    %151 = vector.load %arg3[%c0_200, %c0_201] : memref<1x8xf32, #tpu.memory_space<vmem>>, vector<1x8xf32>
    %152 = vector.broadcast %151 : vector<1x8xf32> to vector<50x8xf32>
    %153 = arith.addf %150, %152 : vector<50x8xf32>
    %cst_202 = arith.constant 0.000000e+00 : f32
    %154 = vector.broadcast %cst_202 : f32 to vector<50x8xf32>
    %155 = arith.cmpf ogt, %153, %154 : vector<50x8xf32>
    %cst_203 = arith.constant 1.000000e-01 : f32
    %156 = vector.broadcast %cst_203 : f32 to vector<50x8xf32>
    %157 = arith.mulf %153, %156 : vector<50x8xf32>
    %158 = arith.select %155, %153, %157 : vector<50x8xi1>, vector<50x8xf32>
    %159 = arith.truncf %158 : vector<50x8xf32> to vector<50x8xbf16>
    %c0_204 = arith.constant 0 : index
    %c0_205 = arith.constant 0 : index
    %c0_206 = arith.constant 0 : index
    %160 = vector.load %arg4[%c0_204, %c0_205, %c0_206] : memref<1x50x8xbf16, #tpu.memory_space<vmem>>, vector<1x50x8xbf16>
    %161 = vector.shape_cast %160 : vector<1x50x8xbf16> to vector<50x8xbf16>
    %162 = vector.shape_cast %159 : vector<50x8xbf16> to vector<1x50x8xbf16>
    tpu.vector_store %arg4[%c0_204, %c0_205, %c0_206], %162 {strides = array<i32>} : memref<1x50x8xbf16, #tpu.memory_space<vmem>>, vector<1x50x8xbf16>,
    return
  }
  func.func @transform_0(%arg0: i32) -> (i32, i32, i32, i32, i32) {
    %c0_i32 = arith.constant 0 : i32
    %c0_i32_0 = arith.constant 0 : i32
    %c0_i32_1 = arith.constant 0 : i32
    %c0_i32_2 = arith.constant 0 : i32
    %c0_i32_3 = arith.constant 0 : i32
    return %arg0, %c0_i32, %c0_i32_0, %c0_i32_1, %c0_i32_2 : i32, i32, i32, i32, i32
  }
  func.func @transform_1(%arg0: i32) -> (i32, i32, i32) {
    %c0_i32 = arith.constant 0 : i32
    %c0_i32_0 = arith.constant 0 : i32
    %c0_i32_1 = arith.constant 0 : i32
    %c0_i32_2 = arith.constant 0 : i32
    return %c0_i32, %c0_i32_0, %c0_i32_1 : i32, i32, i32
  }
  func.func @transform_2(%arg0: i32) -> (i32, i32) {
    %c0_i32 = arith.constant 0 : i32
    %c0_i32_0 = arith.constant 0 : i32
    %c0_i32_1 = arith.constant 0 : i32
    return %c0_i32, %c0_i32_0 : i32, i32
  }
  func.func @transform_3(%arg0: i32) -> (i32, i32, i32) {
    %c0_i32 = arith.constant 0 : i32
    %c0_i32_0 = arith.constant 0 : i32
    %c0_i32_1 = arith.constant 0 : i32
    return %arg0, %c0_i32, %c0_i32_0 : i32, i32, i32
  }
}

module attributes {stable_mosaic.version = 11 : i64} {
  func.func @_conv_taps_kernel(%arg0: i32, %arg1: memref<1x3x3x18x8xbf16, #tpu.memory_space<vmem>>, %arg2: memref<25x8x16xbf16, #tpu.memory_space<vmem>>, %arg3: memref<1x16xf32, #tpu.memory_space<vmem>>, %arg4: memref<1x12x16xbf16, #tpu.memory_space<vmem>>) attributes {dimension_semantics = [#tpu.dimension_semantics<parallel>], iteration_bounds = array<i64: 2>, scalar_prefetch = 0 : i64, scratch_operands = 0 : i64, tpu.core_type = #tpu.core_type<tc>, window_params = [{transform_indices = @transform_0, window_bounds = array<i64: 1, 3, 3, 18, 8>}, {pipeline_mode = #tpu.pipeline_mode<synchronous>, transform_indices = @transform_1, window_bounds = array<i64: 25, 8, 16>}, {pipeline_mode = #tpu.pipeline_mode<synchronous>, transform_indices = @transform_2, window_bounds = array<i64: 1, 16>}, {transform_indices = @transform_3, window_bounds = array<i64: 1, 12, 16>}]} {
    %cst = arith.constant 0.000000e+00 : f32
    %0 = vector.broadcast %cst : f32 to vector<12x16xf32>
    %c0 = arith.constant 0 : index
    %c0_0 = arith.constant 0 : index
    %c0_1 = arith.constant 0 : index
    %c0_2 = arith.constant 0 : index
    %c0_3 = arith.constant 0 : index
    %1 = vector.load %arg1[%c0, %c0_0, %c0_1, %c0_2, %c0_3] : memref<1x3x3x18x8xbf16, #tpu.memory_space<vmem>>, vector<1x1x1x12x8xbf16>
    %2 = vector.shape_cast %1 : vector<1x1x1x12x8xbf16> to vector<12x8xbf16>
    %c0_4 = arith.constant 0 : index
    %c0_5 = arith.constant 0 : index
    %c0_6 = arith.constant 0 : index
    %3 = vector.load %arg2[%c0_4, %c0_5, %c0_6] : memref<25x8x16xbf16, #tpu.memory_space<vmem>>, vector<1x8x16xbf16>
    %4 = vector.shape_cast %3 : vector<1x8x16xbf16> to vector<8x16xbf16>
    %cst_7 = arith.constant dense<0.000000e+00> : vector<12x16xf32>
    %5 = tpu.matmul %2, %4, %cst_7 {dimension_numbers = #tpu.dot_dimension_numbers<[1], [0], [0], [1], [0, 0, 1, 1], [], []>} : vector<12x8xbf16>, vector<8x16xbf16>, vector<12x16xf32> -> vector<12x16xf32>
    %6 = arith.addf %0, %5 : vector<12x16xf32>
    %c0_8 = arith.constant 0 : index
    %c0_9 = arith.constant 0 : index
    %c1 = arith.constant 1 : index
    %c0_10 = arith.constant 0 : index
    %c0_11 = arith.constant 0 : index
    %7 = vector.load %arg1[%c0_8, %c0_9, %c1, %c0_10, %c0_11] : memref<1x3x3x18x8xbf16, #tpu.memory_space<vmem>>, vector<1x1x1x12x8xbf16>
    %8 = vector.shape_cast %7 : vector<1x1x1x12x8xbf16> to vector<12x8xbf16>
    %c1_12 = arith.constant 1 : index
    %c0_13 = arith.constant 0 : index
    %c0_14 = arith.constant 0 : index
    %9 = vector.load %arg2[%c1_12, %c0_13, %c0_14] : memref<25x8x16xbf16, #tpu.memory_space<vmem>>, vector<1x8x16xbf16>
    %10 = vector.shape_cast %9 : vector<1x8x16xbf16> to vector<8x16xbf16>
    %cst_15 = arith.constant dense<0.000000e+00> : vector<12x16xf32>
    %11 = tpu.matmul %8, %10, %cst_15 {dimension_numbers = #tpu.dot_dimension_numbers<[1], [0], [0], [1], [0, 0, 1, 1], [], []>} : vector<12x8xbf16>, vector<8x16xbf16>, vector<12x16xf32> -> vector<12x16xf32>
    %12 = arith.addf %6, %11 : vector<12x16xf32>
    %c0_16 = arith.constant 0 : index
    %c0_17 = arith.constant 0 : index
    %c2 = arith.constant 2 : index
    %c0_18 = arith.constant 0 : index
    %c0_19 = arith.constant 0 : index
    %13 = vector.load %arg1[%c0_16, %c0_17, %c2, %c0_18, %c0_19] : memref<1x3x3x18x8xbf16, #tpu.memory_space<vmem>>, vector<1x1x1x12x8xbf16>
    %14 = vector.shape_cast %13 : vector<1x1x1x12x8xbf16> to vector<12x8xbf16>
    %c2_20 = arith.constant 2 : index
    %c0_21 = arith.constant 0 : index
    %c0_22 = arith.constant 0 : index
    %15 = vector.load %arg2[%c2_20, %c0_21, %c0_22] : memref<25x8x16xbf16, #tpu.memory_space<vmem>>, vector<1x8x16xbf16>
    %16 = vector.shape_cast %15 : vector<1x8x16xbf16> to vector<8x16xbf16>
    %cst_23 = arith.constant dense<0.000000e+00> : vector<12x16xf32>
    %17 = tpu.matmul %14, %16, %cst_23 {dimension_numbers = #tpu.dot_dimension_numbers<[1], [0], [0], [1], [0, 0, 1, 1], [], []>} : vector<12x8xbf16>, vector<8x16xbf16>, vector<12x16xf32> -> vector<12x16xf32>
    %18 = arith.addf %12, %17 : vector<12x16xf32>
    %c0_24 = arith.constant 0 : index
    %c0_25 = arith.constant 0 : index
    %c0_26 = arith.constant 0 : index
    %c1_27 = arith.constant 1 : index
    %c0_28 = arith.constant 0 : index
    %19 = vector.load %arg1[%c0_24, %c0_25, %c0_26, %c1_27, %c0_28] : memref<1x3x3x18x8xbf16, #tpu.memory_space<vmem>>, vector<1x1x1x12x8xbf16>
    %20 = vector.shape_cast %19 : vector<1x1x1x12x8xbf16> to vector<12x8xbf16>
    %c3 = arith.constant 3 : index
    %c0_29 = arith.constant 0 : index
    %c0_30 = arith.constant 0 : index
    %21 = vector.load %arg2[%c3, %c0_29, %c0_30] : memref<25x8x16xbf16, #tpu.memory_space<vmem>>, vector<1x8x16xbf16>
    %22 = vector.shape_cast %21 : vector<1x8x16xbf16> to vector<8x16xbf16>
    %cst_31 = arith.constant dense<0.000000e+00> : vector<12x16xf32>
    %23 = tpu.matmul %20, %22, %cst_31 {dimension_numbers = #tpu.dot_dimension_numbers<[1], [0], [0], [1], [0, 0, 1, 1], [], []>} : vector<12x8xbf16>, vector<8x16xbf16>, vector<12x16xf32> -> vector<12x16xf32>
    %24 = arith.addf %18, %23 : vector<12x16xf32>
    %c0_32 = arith.constant 0 : index
    %c0_33 = arith.constant 0 : index
    %c1_34 = arith.constant 1 : index
    %c1_35 = arith.constant 1 : index
    %c0_36 = arith.constant 0 : index
    %25 = vector.load %arg1[%c0_32, %c0_33, %c1_34, %c1_35, %c0_36] : memref<1x3x3x18x8xbf16, #tpu.memory_space<vmem>>, vector<1x1x1x12x8xbf16>
    %26 = vector.shape_cast %25 : vector<1x1x1x12x8xbf16> to vector<12x8xbf16>
    %c4 = arith.constant 4 : index
    %c0_37 = arith.constant 0 : index
    %c0_38 = arith.constant 0 : index
    %27 = vector.load %arg2[%c4, %c0_37, %c0_38] : memref<25x8x16xbf16, #tpu.memory_space<vmem>>, vector<1x8x16xbf16>
    %28 = vector.shape_cast %27 : vector<1x8x16xbf16> to vector<8x16xbf16>
    %cst_39 = arith.constant dense<0.000000e+00> : vector<12x16xf32>
    %29 = tpu.matmul %26, %28, %cst_39 {dimension_numbers = #tpu.dot_dimension_numbers<[1], [0], [0], [1], [0, 0, 1, 1], [], []>} : vector<12x8xbf16>, vector<8x16xbf16>, vector<12x16xf32> -> vector<12x16xf32>
    %30 = arith.addf %24, %29 : vector<12x16xf32>
    %c0_40 = arith.constant 0 : index
    %c1_41 = arith.constant 1 : index
    %c0_42 = arith.constant 0 : index
    %c0_43 = arith.constant 0 : index
    %c0_44 = arith.constant 0 : index
    %31 = vector.load %arg1[%c0_40, %c1_41, %c0_42, %c0_43, %c0_44] : memref<1x3x3x18x8xbf16, #tpu.memory_space<vmem>>, vector<1x1x1x12x8xbf16>
    %32 = vector.shape_cast %31 : vector<1x1x1x12x8xbf16> to vector<12x8xbf16>
    %c5 = arith.constant 5 : index
    %c0_45 = arith.constant 0 : index
    %c0_46 = arith.constant 0 : index
    %33 = vector.load %arg2[%c5, %c0_45, %c0_46] : memref<25x8x16xbf16, #tpu.memory_space<vmem>>, vector<1x8x16xbf16>
    %34 = vector.shape_cast %33 : vector<1x8x16xbf16> to vector<8x16xbf16>
    %cst_47 = arith.constant dense<0.000000e+00> : vector<12x16xf32>
    %35 = tpu.matmul %32, %34, %cst_47 {dimension_numbers = #tpu.dot_dimension_numbers<[1], [0], [0], [1], [0, 0, 1, 1], [], []>} : vector<12x8xbf16>, vector<8x16xbf16>, vector<12x16xf32> -> vector<12x16xf32>
    %36 = arith.addf %30, %35 : vector<12x16xf32>
    %c0_48 = arith.constant 0 : index
    %c1_49 = arith.constant 1 : index
    %c1_50 = arith.constant 1 : index
    %c0_51 = arith.constant 0 : index
    %c0_52 = arith.constant 0 : index
    %37 = vector.load %arg1[%c0_48, %c1_49, %c1_50, %c0_51, %c0_52] : memref<1x3x3x18x8xbf16, #tpu.memory_space<vmem>>, vector<1x1x1x12x8xbf16>
    %38 = vector.shape_cast %37 : vector<1x1x1x12x8xbf16> to vector<12x8xbf16>
    %c6 = arith.constant 6 : index
    %c0_53 = arith.constant 0 : index
    %c0_54 = arith.constant 0 : index
    %39 = vector.load %arg2[%c6, %c0_53, %c0_54] : memref<25x8x16xbf16, #tpu.memory_space<vmem>>, vector<1x8x16xbf16>
    %40 = vector.shape_cast %39 : vector<1x8x16xbf16> to vector<8x16xbf16>
    %cst_55 = arith.constant dense<0.000000e+00> : vector<12x16xf32>
    %41 = tpu.matmul %38, %40, %cst_55 {dimension_numbers = #tpu.dot_dimension_numbers<[1], [0], [0], [1], [0, 0, 1, 1], [], []>} : vector<12x8xbf16>, vector<8x16xbf16>, vector<12x16xf32> -> vector<12x16xf32>
    %42 = arith.addf %36, %41 : vector<12x16xf32>
    %c0_56 = arith.constant 0 : index
    %c1_57 = arith.constant 1 : index
    %c2_58 = arith.constant 2 : index
    %c0_59 = arith.constant 0 : index
    %c0_60 = arith.constant 0 : index
    %43 = vector.load %arg1[%c0_56, %c1_57, %c2_58, %c0_59, %c0_60] : memref<1x3x3x18x8xbf16, #tpu.memory_space<vmem>>, vector<1x1x1x12x8xbf16>
    %44 = vector.shape_cast %43 : vector<1x1x1x12x8xbf16> to vector<12x8xbf16>
    %c7 = arith.constant 7 : index
    %c0_61 = arith.constant 0 : index
    %c0_62 = arith.constant 0 : index
    %45 = vector.load %arg2[%c7, %c0_61, %c0_62] : memref<25x8x16xbf16, #tpu.memory_space<vmem>>, vector<1x8x16xbf16>
    %46 = vector.shape_cast %45 : vector<1x8x16xbf16> to vector<8x16xbf16>
    %cst_63 = arith.constant dense<0.000000e+00> : vector<12x16xf32>
    %47 = tpu.matmul %44, %46, %cst_63 {dimension_numbers = #tpu.dot_dimension_numbers<[1], [0], [0], [1], [0, 0, 1, 1], [], []>} : vector<12x8xbf16>, vector<8x16xbf16>, vector<12x16xf32> -> vector<12x16xf32>
    %48 = arith.addf %42, %47 : vector<12x16xf32>
    %c0_64 = arith.constant 0 : index
    %c1_65 = arith.constant 1 : index
    %c0_66 = arith.constant 0 : index
    %c1_67 = arith.constant 1 : index
    %c0_68 = arith.constant 0 : index
    %49 = vector.load %arg1[%c0_64, %c1_65, %c0_66, %c1_67, %c0_68] : memref<1x3x3x18x8xbf16, #tpu.memory_space<vmem>>, vector<1x1x1x12x8xbf16>
    %50 = vector.shape_cast %49 : vector<1x1x1x12x8xbf16> to vector<12x8xbf16>
    %c8 = arith.constant 8 : index
    %c0_69 = arith.constant 0 : index
    %c0_70 = arith.constant 0 : index
    %51 = vector.load %arg2[%c8, %c0_69, %c0_70] : memref<25x8x16xbf16, #tpu.memory_space<vmem>>, vector<1x8x16xbf16>
    %52 = vector.shape_cast %51 : vector<1x8x16xbf16> to vector<8x16xbf16>
    %cst_71 = arith.constant dense<0.000000e+00> : vector<12x16xf32>
    %53 = tpu.matmul %50, %52, %cst_71 {dimension_numbers = #tpu.dot_dimension_numbers<[1], [0], [0], [1], [0, 0, 1, 1], [], []>} : vector<12x8xbf16>, vector<8x16xbf16>, vector<12x16xf32> -> vector<12x16xf32>
    %54 = arith.addf %48, %53 : vector<12x16xf32>
    %c0_72 = arith.constant 0 : index
    %c1_73 = arith.constant 1 : index
    %c1_74 = arith.constant 1 : index
    %c1_75 = arith.constant 1 : index
    %c0_76 = arith.constant 0 : index
    %55 = vector.load %arg1[%c0_72, %c1_73, %c1_74, %c1_75, %c0_76] : memref<1x3x3x18x8xbf16, #tpu.memory_space<vmem>>, vector<1x1x1x12x8xbf16>
    %56 = vector.shape_cast %55 : vector<1x1x1x12x8xbf16> to vector<12x8xbf16>
    %c9 = arith.constant 9 : index
    %c0_77 = arith.constant 0 : index
    %c0_78 = arith.constant 0 : index
    %57 = vector.load %arg2[%c9, %c0_77, %c0_78] : memref<25x8x16xbf16, #tpu.memory_space<vmem>>, vector<1x8x16xbf16>
    %58 = vector.shape_cast %57 : vector<1x8x16xbf16> to vector<8x16xbf16>
    %cst_79 = arith.constant dense<0.000000e+00> : vector<12x16xf32>
    %59 = tpu.matmul %56, %58, %cst_79 {dimension_numbers = #tpu.dot_dimension_numbers<[1], [0], [0], [1], [0, 0, 1, 1], [], []>} : vector<12x8xbf16>, vector<8x16xbf16>, vector<12x16xf32> -> vector<12x16xf32>
    %60 = arith.addf %54, %59 : vector<12x16xf32>
    %c0_80 = arith.constant 0 : index
    %c2_81 = arith.constant 2 : index
    %c0_82 = arith.constant 0 : index
    %c0_83 = arith.constant 0 : index
    %c0_84 = arith.constant 0 : index
    %61 = vector.load %arg1[%c0_80, %c2_81, %c0_82, %c0_83, %c0_84] : memref<1x3x3x18x8xbf16, #tpu.memory_space<vmem>>, vector<1x1x1x12x8xbf16>
    %62 = vector.shape_cast %61 : vector<1x1x1x12x8xbf16> to vector<12x8xbf16>
    %c10 = arith.constant 10 : index
    %c0_85 = arith.constant 0 : index
    %c0_86 = arith.constant 0 : index
    %63 = vector.load %arg2[%c10, %c0_85, %c0_86] : memref<25x8x16xbf16, #tpu.memory_space<vmem>>, vector<1x8x16xbf16>
    %64 = vector.shape_cast %63 : vector<1x8x16xbf16> to vector<8x16xbf16>
    %cst_87 = arith.constant dense<0.000000e+00> : vector<12x16xf32>
    %65 = tpu.matmul %62, %64, %cst_87 {dimension_numbers = #tpu.dot_dimension_numbers<[1], [0], [0], [1], [0, 0, 1, 1], [], []>} : vector<12x8xbf16>, vector<8x16xbf16>, vector<12x16xf32> -> vector<12x16xf32>
    %66 = arith.addf %60, %65 : vector<12x16xf32>
    %c0_88 = arith.constant 0 : index
    %c2_89 = arith.constant 2 : index
    %c1_90 = arith.constant 1 : index
    %c0_91 = arith.constant 0 : index
    %c0_92 = arith.constant 0 : index
    %67 = vector.load %arg1[%c0_88, %c2_89, %c1_90, %c0_91, %c0_92] : memref<1x3x3x18x8xbf16, #tpu.memory_space<vmem>>, vector<1x1x1x12x8xbf16>
    %68 = vector.shape_cast %67 : vector<1x1x1x12x8xbf16> to vector<12x8xbf16>
    %c11 = arith.constant 11 : index
    %c0_93 = arith.constant 0 : index
    %c0_94 = arith.constant 0 : index
    %69 = vector.load %arg2[%c11, %c0_93, %c0_94] : memref<25x8x16xbf16, #tpu.memory_space<vmem>>, vector<1x8x16xbf16>
    %70 = vector.shape_cast %69 : vector<1x8x16xbf16> to vector<8x16xbf16>
    %cst_95 = arith.constant dense<0.000000e+00> : vector<12x16xf32>
    %71 = tpu.matmul %68, %70, %cst_95 {dimension_numbers = #tpu.dot_dimension_numbers<[1], [0], [0], [1], [0, 0, 1, 1], [], []>} : vector<12x8xbf16>, vector<8x16xbf16>, vector<12x16xf32> -> vector<12x16xf32>
    %72 = arith.addf %66, %71 : vector<12x16xf32>
    %c0_96 = arith.constant 0 : index
    %c2_97 = arith.constant 2 : index
    %c2_98 = arith.constant 2 : index
    %c0_99 = arith.constant 0 : index
    %c0_100 = arith.constant 0 : index
    %73 = vector.load %arg1[%c0_96, %c2_97, %c2_98, %c0_99, %c0_100] : memref<1x3x3x18x8xbf16, #tpu.memory_space<vmem>>, vector<1x1x1x12x8xbf16>
    %74 = vector.shape_cast %73 : vector<1x1x1x12x8xbf16> to vector<12x8xbf16>
    %c12 = arith.constant 12 : index
    %c0_101 = arith.constant 0 : index
    %c0_102 = arith.constant 0 : index
    %75 = vector.load %arg2[%c12, %c0_101, %c0_102] : memref<25x8x16xbf16, #tpu.memory_space<vmem>>, vector<1x8x16xbf16>
    %76 = vector.shape_cast %75 : vector<1x8x16xbf16> to vector<8x16xbf16>
    %cst_103 = arith.constant dense<0.000000e+00> : vector<12x16xf32>
    %77 = tpu.matmul %74, %76, %cst_103 {dimension_numbers = #tpu.dot_dimension_numbers<[1], [0], [0], [1], [0, 0, 1, 1], [], []>} : vector<12x8xbf16>, vector<8x16xbf16>, vector<12x16xf32> -> vector<12x16xf32>
    %78 = arith.addf %72, %77 : vector<12x16xf32>
    %c0_104 = arith.constant 0 : index
    %c2_105 = arith.constant 2 : index
    %c0_106 = arith.constant 0 : index
    %c1_107 = arith.constant 1 : index
    %c0_108 = arith.constant 0 : index
    %79 = vector.load %arg1[%c0_104, %c2_105, %c0_106, %c1_107, %c0_108] : memref<1x3x3x18x8xbf16, #tpu.memory_space<vmem>>, vector<1x1x1x12x8xbf16>
    %80 = vector.shape_cast %79 : vector<1x1x1x12x8xbf16> to vector<12x8xbf16>
    %c13 = arith.constant 13 : index
    %c0_109 = arith.constant 0 : index
    %c0_110 = arith.constant 0 : index
    %81 = vector.load %arg2[%c13, %c0_109, %c0_110] : memref<25x8x16xbf16, #tpu.memory_space<vmem>>, vector<1x8x16xbf16>
    %82 = vector.shape_cast %81 : vector<1x8x16xbf16> to vector<8x16xbf16>
    %cst_111 = arith.constant dense<0.000000e+00> : vector<12x16xf32>
    %83 = tpu.matmul %80, %82, %cst_111 {dimension_numbers = #tpu.dot_dimension_numbers<[1], [0], [0], [1], [0, 0, 1, 1], [], []>} : vector<12x8xbf16>, vector<8x16xbf16>, vector<12x16xf32> -> vector<12x16xf32>
    %84 = arith.addf %78, %83 : vector<12x16xf32>
    %c0_112 = arith.constant 0 : index
    %c2_113 = arith.constant 2 : index
    %c1_114 = arith.constant 1 : index
    %c1_115 = arith.constant 1 : index
    %c0_116 = arith.constant 0 : index
    %85 = vector.load %arg1[%c0_112, %c2_113, %c1_114, %c1_115, %c0_116] : memref<1x3x3x18x8xbf16, #tpu.memory_space<vmem>>, vector<1x1x1x12x8xbf16>
    %86 = vector.shape_cast %85 : vector<1x1x1x12x8xbf16> to vector<12x8xbf16>
    %c14 = arith.constant 14 : index
    %c0_117 = arith.constant 0 : index
    %c0_118 = arith.constant 0 : index
    %87 = vector.load %arg2[%c14, %c0_117, %c0_118] : memref<25x8x16xbf16, #tpu.memory_space<vmem>>, vector<1x8x16xbf16>
    %88 = vector.shape_cast %87 : vector<1x8x16xbf16> to vector<8x16xbf16>
    %cst_119 = arith.constant dense<0.000000e+00> : vector<12x16xf32>
    %89 = tpu.matmul %86, %88, %cst_119 {dimension_numbers = #tpu.dot_dimension_numbers<[1], [0], [0], [1], [0, 0, 1, 1], [], []>} : vector<12x8xbf16>, vector<8x16xbf16>, vector<12x16xf32> -> vector<12x16xf32>
    %90 = arith.addf %84, %89 : vector<12x16xf32>
    %c0_120 = arith.constant 0 : index
    %c0_121 = arith.constant 0 : index
    %c0_122 = arith.constant 0 : index
    %c3_123 = arith.constant 3 : index
    %c0_124 = arith.constant 0 : index
    %91 = vector.load %arg1[%c0_120, %c0_121, %c0_122, %c3_123, %c0_124] : memref<1x3x3x18x8xbf16, #tpu.memory_space<vmem>>, vector<1x1x1x12x8xbf16>
    %92 = vector.shape_cast %91 : vector<1x1x1x12x8xbf16> to vector<12x8xbf16>
    %c15 = arith.constant 15 : index
    %c0_125 = arith.constant 0 : index
    %c0_126 = arith.constant 0 : index
    %93 = vector.load %arg2[%c15, %c0_125, %c0_126] : memref<25x8x16xbf16, #tpu.memory_space<vmem>>, vector<1x8x16xbf16>
    %94 = vector.shape_cast %93 : vector<1x8x16xbf16> to vector<8x16xbf16>
    %cst_127 = arith.constant dense<0.000000e+00> : vector<12x16xf32>
    %95 = tpu.matmul %92, %94, %cst_127 {dimension_numbers = #tpu.dot_dimension_numbers<[1], [0], [0], [1], [0, 0, 1, 1], [], []>} : vector<12x8xbf16>, vector<8x16xbf16>, vector<12x16xf32> -> vector<12x16xf32>
    %96 = arith.addf %90, %95 : vector<12x16xf32>
    %c0_128 = arith.constant 0 : index
    %c0_129 = arith.constant 0 : index
    %c1_130 = arith.constant 1 : index
    %c3_131 = arith.constant 3 : index
    %c0_132 = arith.constant 0 : index
    %97 = vector.load %arg1[%c0_128, %c0_129, %c1_130, %c3_131, %c0_132] : memref<1x3x3x18x8xbf16, #tpu.memory_space<vmem>>, vector<1x1x1x12x8xbf16>
    %98 = vector.shape_cast %97 : vector<1x1x1x12x8xbf16> to vector<12x8xbf16>
    %c16 = arith.constant 16 : index
    %c0_133 = arith.constant 0 : index
    %c0_134 = arith.constant 0 : index
    %99 = vector.load %arg2[%c16, %c0_133, %c0_134] : memref<25x8x16xbf16, #tpu.memory_space<vmem>>, vector<1x8x16xbf16>
    %100 = vector.shape_cast %99 : vector<1x8x16xbf16> to vector<8x16xbf16>
    %cst_135 = arith.constant dense<0.000000e+00> : vector<12x16xf32>
    %101 = tpu.matmul %98, %100, %cst_135 {dimension_numbers = #tpu.dot_dimension_numbers<[1], [0], [0], [1], [0, 0, 1, 1], [], []>} : vector<12x8xbf16>, vector<8x16xbf16>, vector<12x16xf32> -> vector<12x16xf32>
    %102 = arith.addf %96, %101 : vector<12x16xf32>
    %c0_136 = arith.constant 0 : index
    %c0_137 = arith.constant 0 : index
    %c2_138 = arith.constant 2 : index
    %c3_139 = arith.constant 3 : index
    %c0_140 = arith.constant 0 : index
    %103 = vector.load %arg1[%c0_136, %c0_137, %c2_138, %c3_139, %c0_140] : memref<1x3x3x18x8xbf16, #tpu.memory_space<vmem>>, vector<1x1x1x12x8xbf16>
    %104 = vector.shape_cast %103 : vector<1x1x1x12x8xbf16> to vector<12x8xbf16>
    %c17 = arith.constant 17 : index
    %c0_141 = arith.constant 0 : index
    %c0_142 = arith.constant 0 : index
    %105 = vector.load %arg2[%c17, %c0_141, %c0_142] : memref<25x8x16xbf16, #tpu.memory_space<vmem>>, vector<1x8x16xbf16>
    %106 = vector.shape_cast %105 : vector<1x8x16xbf16> to vector<8x16xbf16>
    %cst_143 = arith.constant dense<0.000000e+00> : vector<12x16xf32>
    %107 = tpu.matmul %104, %106, %cst_143 {dimension_numbers = #tpu.dot_dimension_numbers<[1], [0], [0], [1], [0, 0, 1, 1], [], []>} : vector<12x8xbf16>, vector<8x16xbf16>, vector<12x16xf32> -> vector<12x16xf32>
    %108 = arith.addf %102, %107 : vector<12x16xf32>
    %c0_144 = arith.constant 0 : index
    %c0_145 = arith.constant 0 : index
    %c0_146 = arith.constant 0 : index
    %c4_147 = arith.constant 4 : index
    %c0_148 = arith.constant 0 : index
    %109 = vector.load %arg1[%c0_144, %c0_145, %c0_146, %c4_147, %c0_148] : memref<1x3x3x18x8xbf16, #tpu.memory_space<vmem>>, vector<1x1x1x12x8xbf16>
    %110 = vector.shape_cast %109 : vector<1x1x1x12x8xbf16> to vector<12x8xbf16>
    %c18 = arith.constant 18 : index
    %c0_149 = arith.constant 0 : index
    %c0_150 = arith.constant 0 : index
    %111 = vector.load %arg2[%c18, %c0_149, %c0_150] : memref<25x8x16xbf16, #tpu.memory_space<vmem>>, vector<1x8x16xbf16>
    %112 = vector.shape_cast %111 : vector<1x8x16xbf16> to vector<8x16xbf16>
    %cst_151 = arith.constant dense<0.000000e+00> : vector<12x16xf32>
    %113 = tpu.matmul %110, %112, %cst_151 {dimension_numbers = #tpu.dot_dimension_numbers<[1], [0], [0], [1], [0, 0, 1, 1], [], []>} : vector<12x8xbf16>, vector<8x16xbf16>, vector<12x16xf32> -> vector<12x16xf32>
    %114 = arith.addf %108, %113 : vector<12x16xf32>
    %c0_152 = arith.constant 0 : index
    %c0_153 = arith.constant 0 : index
    %c1_154 = arith.constant 1 : index
    %c4_155 = arith.constant 4 : index
    %c0_156 = arith.constant 0 : index
    %115 = vector.load %arg1[%c0_152, %c0_153, %c1_154, %c4_155, %c0_156] : memref<1x3x3x18x8xbf16, #tpu.memory_space<vmem>>, vector<1x1x1x12x8xbf16>
    %116 = vector.shape_cast %115 : vector<1x1x1x12x8xbf16> to vector<12x8xbf16>
    %c19 = arith.constant 19 : index
    %c0_157 = arith.constant 0 : index
    %c0_158 = arith.constant 0 : index
    %117 = vector.load %arg2[%c19, %c0_157, %c0_158] : memref<25x8x16xbf16, #tpu.memory_space<vmem>>, vector<1x8x16xbf16>
    %118 = vector.shape_cast %117 : vector<1x8x16xbf16> to vector<8x16xbf16>
    %cst_159 = arith.constant dense<0.000000e+00> : vector<12x16xf32>
    %119 = tpu.matmul %116, %118, %cst_159 {dimension_numbers = #tpu.dot_dimension_numbers<[1], [0], [0], [1], [0, 0, 1, 1], [], []>} : vector<12x8xbf16>, vector<8x16xbf16>, vector<12x16xf32> -> vector<12x16xf32>
    %120 = arith.addf %114, %119 : vector<12x16xf32>
    %c0_160 = arith.constant 0 : index
    %c1_161 = arith.constant 1 : index
    %c0_162 = arith.constant 0 : index
    %c3_163 = arith.constant 3 : index
    %c0_164 = arith.constant 0 : index
    %121 = vector.load %arg1[%c0_160, %c1_161, %c0_162, %c3_163, %c0_164] : memref<1x3x3x18x8xbf16, #tpu.memory_space<vmem>>, vector<1x1x1x12x8xbf16>
    %122 = vector.shape_cast %121 : vector<1x1x1x12x8xbf16> to vector<12x8xbf16>
    %c20 = arith.constant 20 : index
    %c0_165 = arith.constant 0 : index
    %c0_166 = arith.constant 0 : index
    %123 = vector.load %arg2[%c20, %c0_165, %c0_166] : memref<25x8x16xbf16, #tpu.memory_space<vmem>>, vector<1x8x16xbf16>
    %124 = vector.shape_cast %123 : vector<1x8x16xbf16> to vector<8x16xbf16>
    %cst_167 = arith.constant dense<0.000000e+00> : vector<12x16xf32>
    %125 = tpu.matmul %122, %124, %cst_167 {dimension_numbers = #tpu.dot_dimension_numbers<[1], [0], [0], [1], [0, 0, 1, 1], [], []>} : vector<12x8xbf16>, vector<8x16xbf16>, vector<12x16xf32> -> vector<12x16xf32>
    %126 = arith.addf %120, %125 : vector<12x16xf32>
    %c0_168 = arith.constant 0 : index
    %c1_169 = arith.constant 1 : index
    %c1_170 = arith.constant 1 : index
    %c3_171 = arith.constant 3 : index
    %c0_172 = arith.constant 0 : index
    %127 = vector.load %arg1[%c0_168, %c1_169, %c1_170, %c3_171, %c0_172] : memref<1x3x3x18x8xbf16, #tpu.memory_space<vmem>>, vector<1x1x1x12x8xbf16>
    %128 = vector.shape_cast %127 : vector<1x1x1x12x8xbf16> to vector<12x8xbf16>
    %c21 = arith.constant 21 : index
    %c0_173 = arith.constant 0 : index
    %c0_174 = arith.constant 0 : index
    %129 = vector.load %arg2[%c21, %c0_173, %c0_174] : memref<25x8x16xbf16, #tpu.memory_space<vmem>>, vector<1x8x16xbf16>
    %130 = vector.shape_cast %129 : vector<1x8x16xbf16> to vector<8x16xbf16>
    %cst_175 = arith.constant dense<0.000000e+00> : vector<12x16xf32>
    %131 = tpu.matmul %128, %130, %cst_175 {dimension_numbers = #tpu.dot_dimension_numbers<[1], [0], [0], [1], [0, 0, 1, 1], [], []>} : vector<12x8xbf16>, vector<8x16xbf16>, vector<12x16xf32> -> vector<12x16xf32>
    %132 = arith.addf %126, %131 : vector<12x16xf32>
    %c0_176 = arith.constant 0 : index
    %c1_177 = arith.constant 1 : index
    %c2_178 = arith.constant 2 : index
    %c3_179 = arith.constant 3 : index
    %c0_180 = arith.constant 0 : index
    %133 = vector.load %arg1[%c0_176, %c1_177, %c2_178, %c3_179, %c0_180] : memref<1x3x3x18x8xbf16, #tpu.memory_space<vmem>>, vector<1x1x1x12x8xbf16>
    %134 = vector.shape_cast %133 : vector<1x1x1x12x8xbf16> to vector<12x8xbf16>
    %c22 = arith.constant 22 : index
    %c0_181 = arith.constant 0 : index
    %c0_182 = arith.constant 0 : index
    %135 = vector.load %arg2[%c22, %c0_181, %c0_182] : memref<25x8x16xbf16, #tpu.memory_space<vmem>>, vector<1x8x16xbf16>
    %136 = vector.shape_cast %135 : vector<1x8x16xbf16> to vector<8x16xbf16>
    %cst_183 = arith.constant dense<0.000000e+00> : vector<12x16xf32>
    %137 = tpu.matmul %134, %136, %cst_183 {dimension_numbers = #tpu.dot_dimension_numbers<[1], [0], [0], [1], [0, 0, 1, 1], [], []>} : vector<12x8xbf16>, vector<8x16xbf16>, vector<12x16xf32> -> vector<12x16xf32>
    %138 = arith.addf %132, %137 : vector<12x16xf32>
    %c0_184 = arith.constant 0 : index
    %c1_185 = arith.constant 1 : index
    %c0_186 = arith.constant 0 : index
    %c4_187 = arith.constant 4 : index
    %c0_188 = arith.constant 0 : index
    %139 = vector.load %arg1[%c0_184, %c1_185, %c0_186, %c4_187, %c0_188] : memref<1x3x3x18x8xbf16, #tpu.memory_space<vmem>>, vector<1x1x1x12x8xbf16>
    %140 = vector.shape_cast %139 : vector<1x1x1x12x8xbf16> to vector<12x8xbf16>
    %c23 = arith.constant 23 : index
    %c0_189 = arith.constant 0 : index
    %c0_190 = arith.constant 0 : index
    %141 = vector.load %arg2[%c23, %c0_189, %c0_190] : memref<25x8x16xbf16, #tpu.memory_space<vmem>>, vector<1x8x16xbf16>
    %142 = vector.shape_cast %141 : vector<1x8x16xbf16> to vector<8x16xbf16>
    %cst_191 = arith.constant dense<0.000000e+00> : vector<12x16xf32>
    %143 = tpu.matmul %140, %142, %cst_191 {dimension_numbers = #tpu.dot_dimension_numbers<[1], [0], [0], [1], [0, 0, 1, 1], [], []>} : vector<12x8xbf16>, vector<8x16xbf16>, vector<12x16xf32> -> vector<12x16xf32>
    %144 = arith.addf %138, %143 : vector<12x16xf32>
    %c0_192 = arith.constant 0 : index
    %c1_193 = arith.constant 1 : index
    %c1_194 = arith.constant 1 : index
    %c4_195 = arith.constant 4 : index
    %c0_196 = arith.constant 0 : index
    %145 = vector.load %arg1[%c0_192, %c1_193, %c1_194, %c4_195, %c0_196] : memref<1x3x3x18x8xbf16, #tpu.memory_space<vmem>>, vector<1x1x1x12x8xbf16>
    %146 = vector.shape_cast %145 : vector<1x1x1x12x8xbf16> to vector<12x8xbf16>
    %c24 = arith.constant 24 : index
    %c0_197 = arith.constant 0 : index
    %c0_198 = arith.constant 0 : index
    %147 = vector.load %arg2[%c24, %c0_197, %c0_198] : memref<25x8x16xbf16, #tpu.memory_space<vmem>>, vector<1x8x16xbf16>
    %148 = vector.shape_cast %147 : vector<1x8x16xbf16> to vector<8x16xbf16>
    %cst_199 = arith.constant dense<0.000000e+00> : vector<12x16xf32>
    %149 = tpu.matmul %146, %148, %cst_199 {dimension_numbers = #tpu.dot_dimension_numbers<[1], [0], [0], [1], [0, 0, 1, 1], [], []>} : vector<12x8xbf16>, vector<8x16xbf16>, vector<12x16xf32> -> vector<12x16xf32>
    %150 = arith.addf %144, %149 : vector<12x16xf32>
    %c0_200 = arith.constant 0 : index
    %c0_201 = arith.constant 0 : index
    %151 = vector.load %arg3[%c0_200, %c0_201] : memref<1x16xf32, #tpu.memory_space<vmem>>, vector<1x16xf32>
    %152 = vector.broadcast %151 : vector<1x16xf32> to vector<12x16xf32>
    %153 = arith.addf %150, %152 : vector<12x16xf32>
    %cst_202 = arith.constant 0.000000e+00 : f32
    %154 = vector.broadcast %cst_202 : f32 to vector<12x16xf32>
    %155 = arith.cmpf ogt, %153, %154 : vector<12x16xf32>
    %cst_203 = arith.constant 1.000000e-01 : f32
    %156 = vector.broadcast %cst_203 : f32 to vector<12x16xf32>
    %157 = arith.mulf %153, %156 : vector<12x16xf32>
    %158 = arith.select %155, %153, %157 : vector<12x16xi1>, vector<12x16xf32>
    %159 = arith.truncf %158 : vector<12x16xf32> to vector<12x16xbf16>
    %c0_204 = arith.constant 0 : index
    %c0_205 = arith.constant 0 : index
    %c0_206 = arith.constant 0 : index
    %160 = vector.load %arg4[%c0_204, %c0_205, %c0_206] : memref<1x12x16xbf16, #tpu.memory_space<vmem>>, vector<1x12x16xbf16>
    %161 = vector.shape_cast %160 : vector<1x12x16xbf16> to vector<12x16xbf16>
    %162 = vector.shape_cast %159 : vector<12x16xbf16> to vector<1x12x16xbf16>
    tpu.vector_store %arg4[%c0_204, %c0_205, %c0_206], %162 {strides = array<i32>} : memref<1x12x16xbf16, #tpu.memory_space<vmem>>, vector<1x12x16xbf16>,
    return
  }
  func.func @transform_0(%arg0: i32) -> (i32, i32, i32, i32, i32) {
    %c0_i32 = arith.constant 0 : i32
    %c0_i32_0 = arith.constant 0 : i32
    %c0_i32_1 = arith.constant 0 : i32
    %c0_i32_2 = arith.constant 0 : i32
    %c0_i32_3 = arith.constant 0 : i32
    return %arg0, %c0_i32, %c0_i32_0, %c0_i32_1, %c0_i32_2 : i32, i32, i32, i32, i32
  }
  func.func @transform_1(%arg0: i32) -> (i32, i32, i32) {
    %c0_i32 = arith.constant 0 : i32
    %c0_i32_0 = arith.constant 0 : i32
    %c0_i32_1 = arith.constant 0 : i32
    %c0_i32_2 = arith.constant 0 : i32
    return %c0_i32, %c0_i32_0, %c0_i32_1 : i32, i32, i32
  }
  func.func @transform_2(%arg0: i32) -> (i32, i32) {
    %c0_i32 = arith.constant 0 : i32
    %c0_i32_0 = arith.constant 0 : i32
    %c0_i32_1 = arith.constant 0 : i32
    return %c0_i32, %c0_i32_0 : i32, i32
  }
  func.func @transform_3(%arg0: i32) -> (i32, i32, i32) {
    %c0_i32 = arith.constant 0 : i32
    %c0_i32_0 = arith.constant 0 : i32
    %c0_i32_1 = arith.constant 0 : i32
    return %arg0, %c0_i32, %c0_i32_0 : i32, i32, i32
  }
}

module attributes {stable_mosaic.version = 11 : i64} {
  func.func @_conv_taps_kernel(%arg0: i32, %arg1: memref<1x3x3x8x16xbf16, #tpu.memory_space<vmem>>, %arg2: memref<25x16x32xbf16, #tpu.memory_space<vmem>>, %arg3: memref<1x32xf32, #tpu.memory_space<vmem>>, %arg4: memref<1x4x32xbf16, #tpu.memory_space<vmem>>) attributes {dimension_semantics = [#tpu.dimension_semantics<parallel>], iteration_bounds = array<i64: 2>, scalar_prefetch = 0 : i64, scratch_operands = 0 : i64, tpu.core_type = #tpu.core_type<tc>, window_params = [{transform_indices = @transform_0, window_bounds = array<i64: 1, 3, 3, 8, 16>}, {pipeline_mode = #tpu.pipeline_mode<synchronous>, transform_indices = @transform_1, window_bounds = array<i64: 25, 16, 32>}, {pipeline_mode = #tpu.pipeline_mode<synchronous>, transform_indices = @transform_2, window_bounds = array<i64: 1, 32>}, {transform_indices = @transform_3, window_bounds = array<i64: 1, 4, 32>}]} {
    %cst = arith.constant 0.000000e+00 : f32
    %0 = vector.broadcast %cst : f32 to vector<4x32xf32>
    %c0 = arith.constant 0 : index
    %c0_0 = arith.constant 0 : index
    %c0_1 = arith.constant 0 : index
    %c0_2 = arith.constant 0 : index
    %c0_3 = arith.constant 0 : index
    %1 = vector.load %arg1[%c0, %c0_0, %c0_1, %c0_2, %c0_3] : memref<1x3x3x8x16xbf16, #tpu.memory_space<vmem>>, vector<1x1x1x4x16xbf16>
    %2 = vector.shape_cast %1 : vector<1x1x1x4x16xbf16> to vector<4x16xbf16>
    %c0_4 = arith.constant 0 : index
    %c0_5 = arith.constant 0 : index
    %c0_6 = arith.constant 0 : index
    %3 = vector.load %arg2[%c0_4, %c0_5, %c0_6] : memref<25x16x32xbf16, #tpu.memory_space<vmem>>, vector<1x16x32xbf16>
    %4 = vector.shape_cast %3 : vector<1x16x32xbf16> to vector<16x32xbf16>
    %cst_7 = arith.constant dense<0.000000e+00> : vector<4x32xf32>
    %5 = tpu.matmul %2, %4, %cst_7 {dimension_numbers = #tpu.dot_dimension_numbers<[1], [0], [0], [1], [0, 0, 1, 1], [], []>} : vector<4x16xbf16>, vector<16x32xbf16>, vector<4x32xf32> -> vector<4x32xf32>
    %6 = arith.addf %0, %5 : vector<4x32xf32>
    %c0_8 = arith.constant 0 : index
    %c0_9 = arith.constant 0 : index
    %c1 = arith.constant 1 : index
    %c0_10 = arith.constant 0 : index
    %c0_11 = arith.constant 0 : index
    %7 = vector.load %arg1[%c0_8, %c0_9, %c1, %c0_10, %c0_11] : memref<1x3x3x8x16xbf16, #tpu.memory_space<vmem>>, vector<1x1x1x4x16xbf16>
    %8 = vector.shape_cast %7 : vector<1x1x1x4x16xbf16> to vector<4x16xbf16>
    %c1_12 = arith.constant 1 : index
    %c0_13 = arith.constant 0 : index
    %c0_14 = arith.constant 0 : index
    %9 = vector.load %arg2[%c1_12, %c0_13, %c0_14] : memref<25x16x32xbf16, #tpu.memory_space<vmem>>, vector<1x16x32xbf16>
    %10 = vector.shape_cast %9 : vector<1x16x32xbf16> to vector<16x32xbf16>
    %cst_15 = arith.constant dense<0.000000e+00> : vector<4x32xf32>
    %11 = tpu.matmul %8, %10, %cst_15 {dimension_numbers = #tpu.dot_dimension_numbers<[1], [0], [0], [1], [0, 0, 1, 1], [], []>} : vector<4x16xbf16>, vector<16x32xbf16>, vector<4x32xf32> -> vector<4x32xf32>
    %12 = arith.addf %6, %11 : vector<4x32xf32>
    %c0_16 = arith.constant 0 : index
    %c0_17 = arith.constant 0 : index
    %c2 = arith.constant 2 : index
    %c0_18 = arith.constant 0 : index
    %c0_19 = arith.constant 0 : index
    %13 = vector.load %arg1[%c0_16, %c0_17, %c2, %c0_18, %c0_19] : memref<1x3x3x8x16xbf16, #tpu.memory_space<vmem>>, vector<1x1x1x4x16xbf16>
    %14 = vector.shape_cast %13 : vector<1x1x1x4x16xbf16> to vector<4x16xbf16>
    %c2_20 = arith.constant 2 : index
    %c0_21 = arith.constant 0 : index
    %c0_22 = arith.constant 0 : index
    %15 = vector.load %arg2[%c2_20, %c0_21, %c0_22] : memref<25x16x32xbf16, #tpu.memory_space<vmem>>, vector<1x16x32xbf16>
    %16 = vector.shape_cast %15 : vector<1x16x32xbf16> to vector<16x32xbf16>
    %cst_23 = arith.constant dense<0.000000e+00> : vector<4x32xf32>
    %17 = tpu.matmul %14, %16, %cst_23 {dimension_numbers = #tpu.dot_dimension_numbers<[1], [0], [0], [1], [0, 0, 1, 1], [], []>} : vector<4x16xbf16>, vector<16x32xbf16>, vector<4x32xf32> -> vector<4x32xf32>
    %18 = arith.addf %12, %17 : vector<4x32xf32>
    %c0_24 = arith.constant 0 : index
    %c0_25 = arith.constant 0 : index
    %c0_26 = arith.constant 0 : index
    %c1_27 = arith.constant 1 : index
    %c0_28 = arith.constant 0 : index
    %19 = vector.load %arg1[%c0_24, %c0_25, %c0_26, %c1_27, %c0_28] : memref<1x3x3x8x16xbf16, #tpu.memory_space<vmem>>, vector<1x1x1x4x16xbf16>
    %20 = vector.shape_cast %19 : vector<1x1x1x4x16xbf16> to vector<4x16xbf16>
    %c3 = arith.constant 3 : index
    %c0_29 = arith.constant 0 : index
    %c0_30 = arith.constant 0 : index
    %21 = vector.load %arg2[%c3, %c0_29, %c0_30] : memref<25x16x32xbf16, #tpu.memory_space<vmem>>, vector<1x16x32xbf16>
    %22 = vector.shape_cast %21 : vector<1x16x32xbf16> to vector<16x32xbf16>
    %cst_31 = arith.constant dense<0.000000e+00> : vector<4x32xf32>
    %23 = tpu.matmul %20, %22, %cst_31 {dimension_numbers = #tpu.dot_dimension_numbers<[1], [0], [0], [1], [0, 0, 1, 1], [], []>} : vector<4x16xbf16>, vector<16x32xbf16>, vector<4x32xf32> -> vector<4x32xf32>
    %24 = arith.addf %18, %23 : vector<4x32xf32>
    %c0_32 = arith.constant 0 : index
    %c0_33 = arith.constant 0 : index
    %c1_34 = arith.constant 1 : index
    %c1_35 = arith.constant 1 : index
    %c0_36 = arith.constant 0 : index
    %25 = vector.load %arg1[%c0_32, %c0_33, %c1_34, %c1_35, %c0_36] : memref<1x3x3x8x16xbf16, #tpu.memory_space<vmem>>, vector<1x1x1x4x16xbf16>
    %26 = vector.shape_cast %25 : vector<1x1x1x4x16xbf16> to vector<4x16xbf16>
    %c4 = arith.constant 4 : index
    %c0_37 = arith.constant 0 : index
    %c0_38 = arith.constant 0 : index
    %27 = vector.load %arg2[%c4, %c0_37, %c0_38] : memref<25x16x32xbf16, #tpu.memory_space<vmem>>, vector<1x16x32xbf16>
    %28 = vector.shape_cast %27 : vector<1x16x32xbf16> to vector<16x32xbf16>
    %cst_39 = arith.constant dense<0.000000e+00> : vector<4x32xf32>
    %29 = tpu.matmul %26, %28, %cst_39 {dimension_numbers = #tpu.dot_dimension_numbers<[1], [0], [0], [1], [0, 0, 1, 1], [], []>} : vector<4x16xbf16>, vector<16x32xbf16>, vector<4x32xf32> -> vector<4x32xf32>
    %30 = arith.addf %24, %29 : vector<4x32xf32>
    %c0_40 = arith.constant 0 : index
    %c1_41 = arith.constant 1 : index
    %c0_42 = arith.constant 0 : index
    %c0_43 = arith.constant 0 : index
    %c0_44 = arith.constant 0 : index
    %31 = vector.load %arg1[%c0_40, %c1_41, %c0_42, %c0_43, %c0_44] : memref<1x3x3x8x16xbf16, #tpu.memory_space<vmem>>, vector<1x1x1x4x16xbf16>
    %32 = vector.shape_cast %31 : vector<1x1x1x4x16xbf16> to vector<4x16xbf16>
    %c5 = arith.constant 5 : index
    %c0_45 = arith.constant 0 : index
    %c0_46 = arith.constant 0 : index
    %33 = vector.load %arg2[%c5, %c0_45, %c0_46] : memref<25x16x32xbf16, #tpu.memory_space<vmem>>, vector<1x16x32xbf16>
    %34 = vector.shape_cast %33 : vector<1x16x32xbf16> to vector<16x32xbf16>
    %cst_47 = arith.constant dense<0.000000e+00> : vector<4x32xf32>
    %35 = tpu.matmul %32, %34, %cst_47 {dimension_numbers = #tpu.dot_dimension_numbers<[1], [0], [0], [1], [0, 0, 1, 1], [], []>} : vector<4x16xbf16>, vector<16x32xbf16>, vector<4x32xf32> -> vector<4x32xf32>
    %36 = arith.addf %30, %35 : vector<4x32xf32>
    %c0_48 = arith.constant 0 : index
    %c1_49 = arith.constant 1 : index
    %c1_50 = arith.constant 1 : index
    %c0_51 = arith.constant 0 : index
    %c0_52 = arith.constant 0 : index
    %37 = vector.load %arg1[%c0_48, %c1_49, %c1_50, %c0_51, %c0_52] : memref<1x3x3x8x16xbf16, #tpu.memory_space<vmem>>, vector<1x1x1x4x16xbf16>
    %38 = vector.shape_cast %37 : vector<1x1x1x4x16xbf16> to vector<4x16xbf16>
    %c6 = arith.constant 6 : index
    %c0_53 = arith.constant 0 : index
    %c0_54 = arith.constant 0 : index
    %39 = vector.load %arg2[%c6, %c0_53, %c0_54] : memref<25x16x32xbf16, #tpu.memory_space<vmem>>, vector<1x16x32xbf16>
    %40 = vector.shape_cast %39 : vector<1x16x32xbf16> to vector<16x32xbf16>
    %cst_55 = arith.constant dense<0.000000e+00> : vector<4x32xf32>
    %41 = tpu.matmul %38, %40, %cst_55 {dimension_numbers = #tpu.dot_dimension_numbers<[1], [0], [0], [1], [0, 0, 1, 1], [], []>} : vector<4x16xbf16>, vector<16x32xbf16>, vector<4x32xf32> -> vector<4x32xf32>
    %42 = arith.addf %36, %41 : vector<4x32xf32>
    %c0_56 = arith.constant 0 : index
    %c1_57 = arith.constant 1 : index
    %c2_58 = arith.constant 2 : index
    %c0_59 = arith.constant 0 : index
    %c0_60 = arith.constant 0 : index
    %43 = vector.load %arg1[%c0_56, %c1_57, %c2_58, %c0_59, %c0_60] : memref<1x3x3x8x16xbf16, #tpu.memory_space<vmem>>, vector<1x1x1x4x16xbf16>
    %44 = vector.shape_cast %43 : vector<1x1x1x4x16xbf16> to vector<4x16xbf16>
    %c7 = arith.constant 7 : index
    %c0_61 = arith.constant 0 : index
    %c0_62 = arith.constant 0 : index
    %45 = vector.load %arg2[%c7, %c0_61, %c0_62] : memref<25x16x32xbf16, #tpu.memory_space<vmem>>, vector<1x16x32xbf16>
    %46 = vector.shape_cast %45 : vector<1x16x32xbf16> to vector<16x32xbf16>
    %cst_63 = arith.constant dense<0.000000e+00> : vector<4x32xf32>
    %47 = tpu.matmul %44, %46, %cst_63 {dimension_numbers = #tpu.dot_dimension_numbers<[1], [0], [0], [1], [0, 0, 1, 1], [], []>} : vector<4x16xbf16>, vector<16x32xbf16>, vector<4x32xf32> -> vector<4x32xf32>
    %48 = arith.addf %42, %47 : vector<4x32xf32>
    %c0_64 = arith.constant 0 : index
    %c1_65 = arith.constant 1 : index
    %c0_66 = arith.constant 0 : index
    %c1_67 = arith.constant 1 : index
    %c0_68 = arith.constant 0 : index
    %49 = vector.load %arg1[%c0_64, %c1_65, %c0_66, %c1_67, %c0_68] : memref<1x3x3x8x16xbf16, #tpu.memory_space<vmem>>, vector<1x1x1x4x16xbf16>
    %50 = vector.shape_cast %49 : vector<1x1x1x4x16xbf16> to vector<4x16xbf16>
    %c8 = arith.constant 8 : index
    %c0_69 = arith.constant 0 : index
    %c0_70 = arith.constant 0 : index
    %51 = vector.load %arg2[%c8, %c0_69, %c0_70] : memref<25x16x32xbf16, #tpu.memory_space<vmem>>, vector<1x16x32xbf16>
    %52 = vector.shape_cast %51 : vector<1x16x32xbf16> to vector<16x32xbf16>
    %cst_71 = arith.constant dense<0.000000e+00> : vector<4x32xf32>
    %53 = tpu.matmul %50, %52, %cst_71 {dimension_numbers = #tpu.dot_dimension_numbers<[1], [0], [0], [1], [0, 0, 1, 1], [], []>} : vector<4x16xbf16>, vector<16x32xbf16>, vector<4x32xf32> -> vector<4x32xf32>
    %54 = arith.addf %48, %53 : vector<4x32xf32>
    %c0_72 = arith.constant 0 : index
    %c1_73 = arith.constant 1 : index
    %c1_74 = arith.constant 1 : index
    %c1_75 = arith.constant 1 : index
    %c0_76 = arith.constant 0 : index
    %55 = vector.load %arg1[%c0_72, %c1_73, %c1_74, %c1_75, %c0_76] : memref<1x3x3x8x16xbf16, #tpu.memory_space<vmem>>, vector<1x1x1x4x16xbf16>
    %56 = vector.shape_cast %55 : vector<1x1x1x4x16xbf16> to vector<4x16xbf16>
    %c9 = arith.constant 9 : index
    %c0_77 = arith.constant 0 : index
    %c0_78 = arith.constant 0 : index
    %57 = vector.load %arg2[%c9, %c0_77, %c0_78] : memref<25x16x32xbf16, #tpu.memory_space<vmem>>, vector<1x16x32xbf16>
    %58 = vector.shape_cast %57 : vector<1x16x32xbf16> to vector<16x32xbf16>
    %cst_79 = arith.constant dense<0.000000e+00> : vector<4x32xf32>
    %59 = tpu.matmul %56, %58, %cst_79 {dimension_numbers = #tpu.dot_dimension_numbers<[1], [0], [0], [1], [0, 0, 1, 1], [], []>} : vector<4x16xbf16>, vector<16x32xbf16>, vector<4x32xf32> -> vector<4x32xf32>
    %60 = arith.addf %54, %59 : vector<4x32xf32>
    %c0_80 = arith.constant 0 : index
    %c2_81 = arith.constant 2 : index
    %c0_82 = arith.constant 0 : index
    %c0_83 = arith.constant 0 : index
    %c0_84 = arith.constant 0 : index
    %61 = vector.load %arg1[%c0_80, %c2_81, %c0_82, %c0_83, %c0_84] : memref<1x3x3x8x16xbf16, #tpu.memory_space<vmem>>, vector<1x1x1x4x16xbf16>
    %62 = vector.shape_cast %61 : vector<1x1x1x4x16xbf16> to vector<4x16xbf16>
    %c10 = arith.constant 10 : index
    %c0_85 = arith.constant 0 : index
    %c0_86 = arith.constant 0 : index
    %63 = vector.load %arg2[%c10, %c0_85, %c0_86] : memref<25x16x32xbf16, #tpu.memory_space<vmem>>, vector<1x16x32xbf16>
    %64 = vector.shape_cast %63 : vector<1x16x32xbf16> to vector<16x32xbf16>
    %cst_87 = arith.constant dense<0.000000e+00> : vector<4x32xf32>
    %65 = tpu.matmul %62, %64, %cst_87 {dimension_numbers = #tpu.dot_dimension_numbers<[1], [0], [0], [1], [0, 0, 1, 1], [], []>} : vector<4x16xbf16>, vector<16x32xbf16>, vector<4x32xf32> -> vector<4x32xf32>
    %66 = arith.addf %60, %65 : vector<4x32xf32>
    %c0_88 = arith.constant 0 : index
    %c2_89 = arith.constant 2 : index
    %c1_90 = arith.constant 1 : index
    %c0_91 = arith.constant 0 : index
    %c0_92 = arith.constant 0 : index
    %67 = vector.load %arg1[%c0_88, %c2_89, %c1_90, %c0_91, %c0_92] : memref<1x3x3x8x16xbf16, #tpu.memory_space<vmem>>, vector<1x1x1x4x16xbf16>
    %68 = vector.shape_cast %67 : vector<1x1x1x4x16xbf16> to vector<4x16xbf16>
    %c11 = arith.constant 11 : index
    %c0_93 = arith.constant 0 : index
    %c0_94 = arith.constant 0 : index
    %69 = vector.load %arg2[%c11, %c0_93, %c0_94] : memref<25x16x32xbf16, #tpu.memory_space<vmem>>, vector<1x16x32xbf16>
    %70 = vector.shape_cast %69 : vector<1x16x32xbf16> to vector<16x32xbf16>
    %cst_95 = arith.constant dense<0.000000e+00> : vector<4x32xf32>
    %71 = tpu.matmul %68, %70, %cst_95 {dimension_numbers = #tpu.dot_dimension_numbers<[1], [0], [0], [1], [0, 0, 1, 1], [], []>} : vector<4x16xbf16>, vector<16x32xbf16>, vector<4x32xf32> -> vector<4x32xf32>
    %72 = arith.addf %66, %71 : vector<4x32xf32>
    %c0_96 = arith.constant 0 : index
    %c2_97 = arith.constant 2 : index
    %c2_98 = arith.constant 2 : index
    %c0_99 = arith.constant 0 : index
    %c0_100 = arith.constant 0 : index
    %73 = vector.load %arg1[%c0_96, %c2_97, %c2_98, %c0_99, %c0_100] : memref<1x3x3x8x16xbf16, #tpu.memory_space<vmem>>, vector<1x1x1x4x16xbf16>
    %74 = vector.shape_cast %73 : vector<1x1x1x4x16xbf16> to vector<4x16xbf16>
    %c12 = arith.constant 12 : index
    %c0_101 = arith.constant 0 : index
    %c0_102 = arith.constant 0 : index
    %75 = vector.load %arg2[%c12, %c0_101, %c0_102] : memref<25x16x32xbf16, #tpu.memory_space<vmem>>, vector<1x16x32xbf16>
    %76 = vector.shape_cast %75 : vector<1x16x32xbf16> to vector<16x32xbf16>
    %cst_103 = arith.constant dense<0.000000e+00> : vector<4x32xf32>
    %77 = tpu.matmul %74, %76, %cst_103 {dimension_numbers = #tpu.dot_dimension_numbers<[1], [0], [0], [1], [0, 0, 1, 1], [], []>} : vector<4x16xbf16>, vector<16x32xbf16>, vector<4x32xf32> -> vector<4x32xf32>
    %78 = arith.addf %72, %77 : vector<4x32xf32>
    %c0_104 = arith.constant 0 : index
    %c2_105 = arith.constant 2 : index
    %c0_106 = arith.constant 0 : index
    %c1_107 = arith.constant 1 : index
    %c0_108 = arith.constant 0 : index
    %79 = vector.load %arg1[%c0_104, %c2_105, %c0_106, %c1_107, %c0_108] : memref<1x3x3x8x16xbf16, #tpu.memory_space<vmem>>, vector<1x1x1x4x16xbf16>
    %80 = vector.shape_cast %79 : vector<1x1x1x4x16xbf16> to vector<4x16xbf16>
    %c13 = arith.constant 13 : index
    %c0_109 = arith.constant 0 : index
    %c0_110 = arith.constant 0 : index
    %81 = vector.load %arg2[%c13, %c0_109, %c0_110] : memref<25x16x32xbf16, #tpu.memory_space<vmem>>, vector<1x16x32xbf16>
    %82 = vector.shape_cast %81 : vector<1x16x32xbf16> to vector<16x32xbf16>
    %cst_111 = arith.constant dense<0.000000e+00> : vector<4x32xf32>
    %83 = tpu.matmul %80, %82, %cst_111 {dimension_numbers = #tpu.dot_dimension_numbers<[1], [0], [0], [1], [0, 0, 1, 1], [], []>} : vector<4x16xbf16>, vector<16x32xbf16>, vector<4x32xf32> -> vector<4x32xf32>
    %84 = arith.addf %78, %83 : vector<4x32xf32>
    %c0_112 = arith.constant 0 : index
    %c2_113 = arith.constant 2 : index
    %c1_114 = arith.constant 1 : index
    %c1_115 = arith.constant 1 : index
    %c0_116 = arith.constant 0 : index
    %85 = vector.load %arg1[%c0_112, %c2_113, %c1_114, %c1_115, %c0_116] : memref<1x3x3x8x16xbf16, #tpu.memory_space<vmem>>, vector<1x1x1x4x16xbf16>
    %86 = vector.shape_cast %85 : vector<1x1x1x4x16xbf16> to vector<4x16xbf16>
    %c14 = arith.constant 14 : index
    %c0_117 = arith.constant 0 : index
    %c0_118 = arith.constant 0 : index
    %87 = vector.load %arg2[%c14, %c0_117, %c0_118] : memref<25x16x32xbf16, #tpu.memory_space<vmem>>, vector<1x16x32xbf16>
    %88 = vector.shape_cast %87 : vector<1x16x32xbf16> to vector<16x32xbf16>
    %cst_119 = arith.constant dense<0.000000e+00> : vector<4x32xf32>
    %89 = tpu.matmul %86, %88, %cst_119 {dimension_numbers = #tpu.dot_dimension_numbers<[1], [0], [0], [1], [0, 0, 1, 1], [], []>} : vector<4x16xbf16>, vector<16x32xbf16>, vector<4x32xf32> -> vector<4x32xf32>
    %90 = arith.addf %84, %89 : vector<4x32xf32>
    %c0_120 = arith.constant 0 : index
    %c0_121 = arith.constant 0 : index
    %c0_122 = arith.constant 0 : index
    %c2_123 = arith.constant 2 : index
    %c0_124 = arith.constant 0 : index
    %91 = vector.load %arg1[%c0_120, %c0_121, %c0_122, %c2_123, %c0_124] : memref<1x3x3x8x16xbf16, #tpu.memory_space<vmem>>, vector<1x1x1x4x16xbf16>
    %92 = vector.shape_cast %91 : vector<1x1x1x4x16xbf16> to vector<4x16xbf16>
    %c15 = arith.constant 15 : index
    %c0_125 = arith.constant 0 : index
    %c0_126 = arith.constant 0 : index
    %93 = vector.load %arg2[%c15, %c0_125, %c0_126] : memref<25x16x32xbf16, #tpu.memory_space<vmem>>, vector<1x16x32xbf16>
    %94 = vector.shape_cast %93 : vector<1x16x32xbf16> to vector<16x32xbf16>
    %cst_127 = arith.constant dense<0.000000e+00> : vector<4x32xf32>
    %95 = tpu.matmul %92, %94, %cst_127 {dimension_numbers = #tpu.dot_dimension_numbers<[1], [0], [0], [1], [0, 0, 1, 1], [], []>} : vector<4x16xbf16>, vector<16x32xbf16>, vector<4x32xf32> -> vector<4x32xf32>
    %96 = arith.addf %90, %95 : vector<4x32xf32>
    %c0_128 = arith.constant 0 : index
    %c0_129 = arith.constant 0 : index
    %c1_130 = arith.constant 1 : index
    %c2_131 = arith.constant 2 : index
    %c0_132 = arith.constant 0 : index
    %97 = vector.load %arg1[%c0_128, %c0_129, %c1_130, %c2_131, %c0_132] : memref<1x3x3x8x16xbf16, #tpu.memory_space<vmem>>, vector<1x1x1x4x16xbf16>
    %98 = vector.shape_cast %97 : vector<1x1x1x4x16xbf16> to vector<4x16xbf16>
    %c16 = arith.constant 16 : index
    %c0_133 = arith.constant 0 : index
    %c0_134 = arith.constant 0 : index
    %99 = vector.load %arg2[%c16, %c0_133, %c0_134] : memref<25x16x32xbf16, #tpu.memory_space<vmem>>, vector<1x16x32xbf16>
    %100 = vector.shape_cast %99 : vector<1x16x32xbf16> to vector<16x32xbf16>
    %cst_135 = arith.constant dense<0.000000e+00> : vector<4x32xf32>
    %101 = tpu.matmul %98, %100, %cst_135 {dimension_numbers = #tpu.dot_dimension_numbers<[1], [0], [0], [1], [0, 0, 1, 1], [], []>} : vector<4x16xbf16>, vector<16x32xbf16>, vector<4x32xf32> -> vector<4x32xf32>
    %102 = arith.addf %96, %101 : vector<4x32xf32>
    %c0_136 = arith.constant 0 : index
    %c0_137 = arith.constant 0 : index
    %c2_138 = arith.constant 2 : index
    %c2_139 = arith.constant 2 : index
    %c0_140 = arith.constant 0 : index
    %103 = vector.load %arg1[%c0_136, %c0_137, %c2_138, %c2_139, %c0_140] : memref<1x3x3x8x16xbf16, #tpu.memory_space<vmem>>, vector<1x1x1x4x16xbf16>
    %104 = vector.shape_cast %103 : vector<1x1x1x4x16xbf16> to vector<4x16xbf16>
    %c17 = arith.constant 17 : index
    %c0_141 = arith.constant 0 : index
    %c0_142 = arith.constant 0 : index
    %105 = vector.load %arg2[%c17, %c0_141, %c0_142] : memref<25x16x32xbf16, #tpu.memory_space<vmem>>, vector<1x16x32xbf16>
    %106 = vector.shape_cast %105 : vector<1x16x32xbf16> to vector<16x32xbf16>
    %cst_143 = arith.constant dense<0.000000e+00> : vector<4x32xf32>
    %107 = tpu.matmul %104, %106, %cst_143 {dimension_numbers = #tpu.dot_dimension_numbers<[1], [0], [0], [1], [0, 0, 1, 1], [], []>} : vector<4x16xbf16>, vector<16x32xbf16>, vector<4x32xf32> -> vector<4x32xf32>
    %108 = arith.addf %102, %107 : vector<4x32xf32>
    %c0_144 = arith.constant 0 : index
    %c0_145 = arith.constant 0 : index
    %c0_146 = arith.constant 0 : index
    %c3_147 = arith.constant 3 : index
    %c0_148 = arith.constant 0 : index
    %109 = vector.load %arg1[%c0_144, %c0_145, %c0_146, %c3_147, %c0_148] : memref<1x3x3x8x16xbf16, #tpu.memory_space<vmem>>, vector<1x1x1x4x16xbf16>
    %110 = vector.shape_cast %109 : vector<1x1x1x4x16xbf16> to vector<4x16xbf16>
    %c18 = arith.constant 18 : index
    %c0_149 = arith.constant 0 : index
    %c0_150 = arith.constant 0 : index
    %111 = vector.load %arg2[%c18, %c0_149, %c0_150] : memref<25x16x32xbf16, #tpu.memory_space<vmem>>, vector<1x16x32xbf16>
    %112 = vector.shape_cast %111 : vector<1x16x32xbf16> to vector<16x32xbf16>
    %cst_151 = arith.constant dense<0.000000e+00> : vector<4x32xf32>
    %113 = tpu.matmul %110, %112, %cst_151 {dimension_numbers = #tpu.dot_dimension_numbers<[1], [0], [0], [1], [0, 0, 1, 1], [], []>} : vector<4x16xbf16>, vector<16x32xbf16>, vector<4x32xf32> -> vector<4x32xf32>
    %114 = arith.addf %108, %113 : vector<4x32xf32>
    %c0_152 = arith.constant 0 : index
    %c0_153 = arith.constant 0 : index
    %c1_154 = arith.constant 1 : index
    %c3_155 = arith.constant 3 : index
    %c0_156 = arith.constant 0 : index
    %115 = vector.load %arg1[%c0_152, %c0_153, %c1_154, %c3_155, %c0_156] : memref<1x3x3x8x16xbf16, #tpu.memory_space<vmem>>, vector<1x1x1x4x16xbf16>
    %116 = vector.shape_cast %115 : vector<1x1x1x4x16xbf16> to vector<4x16xbf16>
    %c19 = arith.constant 19 : index
    %c0_157 = arith.constant 0 : index
    %c0_158 = arith.constant 0 : index
    %117 = vector.load %arg2[%c19, %c0_157, %c0_158] : memref<25x16x32xbf16, #tpu.memory_space<vmem>>, vector<1x16x32xbf16>
    %118 = vector.shape_cast %117 : vector<1x16x32xbf16> to vector<16x32xbf16>
    %cst_159 = arith.constant dense<0.000000e+00> : vector<4x32xf32>
    %119 = tpu.matmul %116, %118, %cst_159 {dimension_numbers = #tpu.dot_dimension_numbers<[1], [0], [0], [1], [0, 0, 1, 1], [], []>} : vector<4x16xbf16>, vector<16x32xbf16>, vector<4x32xf32> -> vector<4x32xf32>
    %120 = arith.addf %114, %119 : vector<4x32xf32>
    %c0_160 = arith.constant 0 : index
    %c1_161 = arith.constant 1 : index
    %c0_162 = arith.constant 0 : index
    %c2_163 = arith.constant 2 : index
    %c0_164 = arith.constant 0 : index
    %121 = vector.load %arg1[%c0_160, %c1_161, %c0_162, %c2_163, %c0_164] : memref<1x3x3x8x16xbf16, #tpu.memory_space<vmem>>, vector<1x1x1x4x16xbf16>
    %122 = vector.shape_cast %121 : vector<1x1x1x4x16xbf16> to vector<4x16xbf16>
    %c20 = arith.constant 20 : index
    %c0_165 = arith.constant 0 : index
    %c0_166 = arith.constant 0 : index
    %123 = vector.load %arg2[%c20, %c0_165, %c0_166] : memref<25x16x32xbf16, #tpu.memory_space<vmem>>, vector<1x16x32xbf16>
    %124 = vector.shape_cast %123 : vector<1x16x32xbf16> to vector<16x32xbf16>
    %cst_167 = arith.constant dense<0.000000e+00> : vector<4x32xf32>
    %125 = tpu.matmul %122, %124, %cst_167 {dimension_numbers = #tpu.dot_dimension_numbers<[1], [0], [0], [1], [0, 0, 1, 1], [], []>} : vector<4x16xbf16>, vector<16x32xbf16>, vector<4x32xf32> -> vector<4x32xf32>
    %126 = arith.addf %120, %125 : vector<4x32xf32>
    %c0_168 = arith.constant 0 : index
    %c1_169 = arith.constant 1 : index
    %c1_170 = arith.constant 1 : index
    %c2_171 = arith.constant 2 : index
    %c0_172 = arith.constant 0 : index
    %127 = vector.load %arg1[%c0_168, %c1_169, %c1_170, %c2_171, %c0_172] : memref<1x3x3x8x16xbf16, #tpu.memory_space<vmem>>, vector<1x1x1x4x16xbf16>
    %128 = vector.shape_cast %127 : vector<1x1x1x4x16xbf16> to vector<4x16xbf16>
    %c21 = arith.constant 21 : index
    %c0_173 = arith.constant 0 : index
    %c0_174 = arith.constant 0 : index
    %129 = vector.load %arg2[%c21, %c0_173, %c0_174] : memref<25x16x32xbf16, #tpu.memory_space<vmem>>, vector<1x16x32xbf16>
    %130 = vector.shape_cast %129 : vector<1x16x32xbf16> to vector<16x32xbf16>
    %cst_175 = arith.constant dense<0.000000e+00> : vector<4x32xf32>
    %131 = tpu.matmul %128, %130, %cst_175 {dimension_numbers = #tpu.dot_dimension_numbers<[1], [0], [0], [1], [0, 0, 1, 1], [], []>} : vector<4x16xbf16>, vector<16x32xbf16>, vector<4x32xf32> -> vector<4x32xf32>
    %132 = arith.addf %126, %131 : vector<4x32xf32>
    %c0_176 = arith.constant 0 : index
    %c1_177 = arith.constant 1 : index
    %c2_178 = arith.constant 2 : index
    %c2_179 = arith.constant 2 : index
    %c0_180 = arith.constant 0 : index
    %133 = vector.load %arg1[%c0_176, %c1_177, %c2_178, %c2_179, %c0_180] : memref<1x3x3x8x16xbf16, #tpu.memory_space<vmem>>, vector<1x1x1x4x16xbf16>
    %134 = vector.shape_cast %133 : vector<1x1x1x4x16xbf16> to vector<4x16xbf16>
    %c22 = arith.constant 22 : index
    %c0_181 = arith.constant 0 : index
    %c0_182 = arith.constant 0 : index
    %135 = vector.load %arg2[%c22, %c0_181, %c0_182] : memref<25x16x32xbf16, #tpu.memory_space<vmem>>, vector<1x16x32xbf16>
    %136 = vector.shape_cast %135 : vector<1x16x32xbf16> to vector<16x32xbf16>
    %cst_183 = arith.constant dense<0.000000e+00> : vector<4x32xf32>
    %137 = tpu.matmul %134, %136, %cst_183 {dimension_numbers = #tpu.dot_dimension_numbers<[1], [0], [0], [1], [0, 0, 1, 1], [], []>} : vector<4x16xbf16>, vector<16x32xbf16>, vector<4x32xf32> -> vector<4x32xf32>
    %138 = arith.addf %132, %137 : vector<4x32xf32>
    %c0_184 = arith.constant 0 : index
    %c1_185 = arith.constant 1 : index
    %c0_186 = arith.constant 0 : index
    %c3_187 = arith.constant 3 : index
    %c0_188 = arith.constant 0 : index
    %139 = vector.load %arg1[%c0_184, %c1_185, %c0_186, %c3_187, %c0_188] : memref<1x3x3x8x16xbf16, #tpu.memory_space<vmem>>, vector<1x1x1x4x16xbf16>
    %140 = vector.shape_cast %139 : vector<1x1x1x4x16xbf16> to vector<4x16xbf16>
    %c23 = arith.constant 23 : index
    %c0_189 = arith.constant 0 : index
    %c0_190 = arith.constant 0 : index
    %141 = vector.load %arg2[%c23, %c0_189, %c0_190] : memref<25x16x32xbf16, #tpu.memory_space<vmem>>, vector<1x16x32xbf16>
    %142 = vector.shape_cast %141 : vector<1x16x32xbf16> to vector<16x32xbf16>
    %cst_191 = arith.constant dense<0.000000e+00> : vector<4x32xf32>
    %143 = tpu.matmul %140, %142, %cst_191 {dimension_numbers = #tpu.dot_dimension_numbers<[1], [0], [0], [1], [0, 0, 1, 1], [], []>} : vector<4x16xbf16>, vector<16x32xbf16>, vector<4x32xf32> -> vector<4x32xf32>
    %144 = arith.addf %138, %143 : vector<4x32xf32>
    %c0_192 = arith.constant 0 : index
    %c1_193 = arith.constant 1 : index
    %c1_194 = arith.constant 1 : index
    %c3_195 = arith.constant 3 : index
    %c0_196 = arith.constant 0 : index
    %145 = vector.load %arg1[%c0_192, %c1_193, %c1_194, %c3_195, %c0_196] : memref<1x3x3x8x16xbf16, #tpu.memory_space<vmem>>, vector<1x1x1x4x16xbf16>
    %146 = vector.shape_cast %145 : vector<1x1x1x4x16xbf16> to vector<4x16xbf16>
    %c24 = arith.constant 24 : index
    %c0_197 = arith.constant 0 : index
    %c0_198 = arith.constant 0 : index
    %147 = vector.load %arg2[%c24, %c0_197, %c0_198] : memref<25x16x32xbf16, #tpu.memory_space<vmem>>, vector<1x16x32xbf16>
    %148 = vector.shape_cast %147 : vector<1x16x32xbf16> to vector<16x32xbf16>
    %cst_199 = arith.constant dense<0.000000e+00> : vector<4x32xf32>
    %149 = tpu.matmul %146, %148, %cst_199 {dimension_numbers = #tpu.dot_dimension_numbers<[1], [0], [0], [1], [0, 0, 1, 1], [], []>} : vector<4x16xbf16>, vector<16x32xbf16>, vector<4x32xf32> -> vector<4x32xf32>
    %150 = arith.addf %144, %149 : vector<4x32xf32>
    %c0_200 = arith.constant 0 : index
    %c0_201 = arith.constant 0 : index
    %151 = vector.load %arg3[%c0_200, %c0_201] : memref<1x32xf32, #tpu.memory_space<vmem>>, vector<1x32xf32>
    %152 = vector.broadcast %151 : vector<1x32xf32> to vector<4x32xf32>
    %153 = arith.addf %150, %152 : vector<4x32xf32>
    %cst_202 = arith.constant 0.000000e+00 : f32
    %154 = vector.broadcast %cst_202 : f32 to vector<4x32xf32>
    %155 = arith.cmpf ogt, %153, %154 : vector<4x32xf32>
    %cst_203 = arith.constant 1.000000e-01 : f32
    %156 = vector.broadcast %cst_203 : f32 to vector<4x32xf32>
    %157 = arith.mulf %153, %156 : vector<4x32xf32>
    %158 = arith.select %155, %153, %157 : vector<4x32xi1>, vector<4x32xf32>
    %159 = arith.truncf %158 : vector<4x32xf32> to vector<4x32xbf16>
    %c0_204 = arith.constant 0 : index
    %c0_205 = arith.constant 0 : index
    %c0_206 = arith.constant 0 : index
    %160 = vector.load %arg4[%c0_204, %c0_205, %c0_206] : memref<1x4x32xbf16, #tpu.memory_space<vmem>>, vector<1x4x32xbf16>
    %161 = vector.shape_cast %160 : vector<1x4x32xbf16> to vector<4x32xbf16>
    %162 = vector.shape_cast %159 : vector<4x32xbf16> to vector<1x4x32xbf16>
    tpu.vector_store %arg4[%c0_204, %c0_205, %c0_206], %162 {strides = array<i32>} : memref<1x4x32xbf16, #tpu.memory_space<vmem>>, vector<1x4x32xbf16>,
    return
  }
  func.func @transform_0(%arg0: i32) -> (i32, i32, i32, i32, i32) {
    %c0_i32 = arith.constant 0 : i32
    %c0_i32_0 = arith.constant 0 : i32
    %c0_i32_1 = arith.constant 0 : i32
    %c0_i32_2 = arith.constant 0 : i32
    %c0_i32_3 = arith.constant 0 : i32
    return %arg0, %c0_i32, %c0_i32_0, %c0_i32_1, %c0_i32_2 : i32, i32, i32, i32, i32
  }
  func.func @transform_1(%arg0: i32) -> (i32, i32, i32) {
    %c0_i32 = arith.constant 0 : i32
    %c0_i32_0 = arith.constant 0 : i32
    %c0_i32_1 = arith.constant 0 : i32
    %c0_i32_2 = arith.constant 0 : i32
    return %c0_i32, %c0_i32_0, %c0_i32_1 : i32, i32, i32
  }
  func.func @transform_2(%arg0: i32) -> (i32, i32) {
    %c0_i32 = arith.constant 0 : i32
    %c0_i32_0 = arith.constant 0 : i32
    %c0_i32_1 = arith.constant 0 : i32
    return %c0_i32, %c0_i32_0 : i32, i32
  }
  func.func @transform_3(%arg0: i32) -> (i32, i32, i32) {
    %c0_i32 = arith.constant 0 : i32
    %c0_i32_0 = arith.constant 0 : i32
    %c0_i32_1 = arith.constant 0 : i32
    return %arg0, %c0_i32, %c0_i32_0 : i32, i32, i32
  }
}

module attributes {stable_mosaic.version = 11 : i64} {
  func.func @_conv_taps_kernel(%arg0: i32, %arg1: memref<1x3x3x6x32xbf16, #tpu.memory_space<vmem>>, %arg2: memref<25x32x32xbf16, #tpu.memory_space<vmem>>, %arg3: memref<1x32xf32, #tpu.memory_space<vmem>>, %arg4: memref<1x2x32xbf16, #tpu.memory_space<vmem>>) attributes {dimension_semantics = [#tpu.dimension_semantics<parallel>], iteration_bounds = array<i64: 2>, scalar_prefetch = 0 : i64, scratch_operands = 0 : i64, tpu.core_type = #tpu.core_type<tc>, window_params = [{transform_indices = @transform_0, window_bounds = array<i64: 1, 3, 3, 6, 32>}, {pipeline_mode = #tpu.pipeline_mode<synchronous>, transform_indices = @transform_1, window_bounds = array<i64: 25, 32, 32>}, {pipeline_mode = #tpu.pipeline_mode<synchronous>, transform_indices = @transform_2, window_bounds = array<i64: 1, 32>}, {transform_indices = @transform_3, window_bounds = array<i64: 1, 2, 32>}]} {
    %cst = arith.constant 0.000000e+00 : f32
    %0 = vector.broadcast %cst : f32 to vector<2x32xf32>
    %c0 = arith.constant 0 : index
    %c0_0 = arith.constant 0 : index
    %c0_1 = arith.constant 0 : index
    %c0_2 = arith.constant 0 : index
    %c0_3 = arith.constant 0 : index
    %1 = vector.load %arg1[%c0, %c0_0, %c0_1, %c0_2, %c0_3] : memref<1x3x3x6x32xbf16, #tpu.memory_space<vmem>>, vector<1x1x1x2x32xbf16>
    %2 = vector.shape_cast %1 : vector<1x1x1x2x32xbf16> to vector<2x32xbf16>
    %c0_4 = arith.constant 0 : index
    %c0_5 = arith.constant 0 : index
    %c0_6 = arith.constant 0 : index
    %3 = vector.load %arg2[%c0_4, %c0_5, %c0_6] : memref<25x32x32xbf16, #tpu.memory_space<vmem>>, vector<1x32x32xbf16>
    %4 = vector.shape_cast %3 : vector<1x32x32xbf16> to vector<32x32xbf16>
    %cst_7 = arith.constant dense<0.000000e+00> : vector<2x32xf32>
    %5 = tpu.matmul %2, %4, %cst_7 {dimension_numbers = #tpu.dot_dimension_numbers<[1], [0], [0], [1], [0, 0, 1, 1], [], []>} : vector<2x32xbf16>, vector<32x32xbf16>, vector<2x32xf32> -> vector<2x32xf32>
    %6 = arith.addf %0, %5 : vector<2x32xf32>
    %c0_8 = arith.constant 0 : index
    %c0_9 = arith.constant 0 : index
    %c1 = arith.constant 1 : index
    %c0_10 = arith.constant 0 : index
    %c0_11 = arith.constant 0 : index
    %7 = vector.load %arg1[%c0_8, %c0_9, %c1, %c0_10, %c0_11] : memref<1x3x3x6x32xbf16, #tpu.memory_space<vmem>>, vector<1x1x1x2x32xbf16>
    %8 = vector.shape_cast %7 : vector<1x1x1x2x32xbf16> to vector<2x32xbf16>
    %c1_12 = arith.constant 1 : index
    %c0_13 = arith.constant 0 : index
    %c0_14 = arith.constant 0 : index
    %9 = vector.load %arg2[%c1_12, %c0_13, %c0_14] : memref<25x32x32xbf16, #tpu.memory_space<vmem>>, vector<1x32x32xbf16>
    %10 = vector.shape_cast %9 : vector<1x32x32xbf16> to vector<32x32xbf16>
    %cst_15 = arith.constant dense<0.000000e+00> : vector<2x32xf32>
    %11 = tpu.matmul %8, %10, %cst_15 {dimension_numbers = #tpu.dot_dimension_numbers<[1], [0], [0], [1], [0, 0, 1, 1], [], []>} : vector<2x32xbf16>, vector<32x32xbf16>, vector<2x32xf32> -> vector<2x32xf32>
    %12 = arith.addf %6, %11 : vector<2x32xf32>
    %c0_16 = arith.constant 0 : index
    %c0_17 = arith.constant 0 : index
    %c2 = arith.constant 2 : index
    %c0_18 = arith.constant 0 : index
    %c0_19 = arith.constant 0 : index
    %13 = vector.load %arg1[%c0_16, %c0_17, %c2, %c0_18, %c0_19] : memref<1x3x3x6x32xbf16, #tpu.memory_space<vmem>>, vector<1x1x1x2x32xbf16>
    %14 = vector.shape_cast %13 : vector<1x1x1x2x32xbf16> to vector<2x32xbf16>
    %c2_20 = arith.constant 2 : index
    %c0_21 = arith.constant 0 : index
    %c0_22 = arith.constant 0 : index
    %15 = vector.load %arg2[%c2_20, %c0_21, %c0_22] : memref<25x32x32xbf16, #tpu.memory_space<vmem>>, vector<1x32x32xbf16>
    %16 = vector.shape_cast %15 : vector<1x32x32xbf16> to vector<32x32xbf16>
    %cst_23 = arith.constant dense<0.000000e+00> : vector<2x32xf32>
    %17 = tpu.matmul %14, %16, %cst_23 {dimension_numbers = #tpu.dot_dimension_numbers<[1], [0], [0], [1], [0, 0, 1, 1], [], []>} : vector<2x32xbf16>, vector<32x32xbf16>, vector<2x32xf32> -> vector<2x32xf32>
    %18 = arith.addf %12, %17 : vector<2x32xf32>
    %c0_24 = arith.constant 0 : index
    %c0_25 = arith.constant 0 : index
    %c0_26 = arith.constant 0 : index
    %c1_27 = arith.constant 1 : index
    %c0_28 = arith.constant 0 : index
    %19 = vector.load %arg1[%c0_24, %c0_25, %c0_26, %c1_27, %c0_28] : memref<1x3x3x6x32xbf16, #tpu.memory_space<vmem>>, vector<1x1x1x2x32xbf16>
    %20 = vector.shape_cast %19 : vector<1x1x1x2x32xbf16> to vector<2x32xbf16>
    %c3 = arith.constant 3 : index
    %c0_29 = arith.constant 0 : index
    %c0_30 = arith.constant 0 : index
    %21 = vector.load %arg2[%c3, %c0_29, %c0_30] : memref<25x32x32xbf16, #tpu.memory_space<vmem>>, vector<1x32x32xbf16>
    %22 = vector.shape_cast %21 : vector<1x32x32xbf16> to vector<32x32xbf16>
    %cst_31 = arith.constant dense<0.000000e+00> : vector<2x32xf32>
    %23 = tpu.matmul %20, %22, %cst_31 {dimension_numbers = #tpu.dot_dimension_numbers<[1], [0], [0], [1], [0, 0, 1, 1], [], []>} : vector<2x32xbf16>, vector<32x32xbf16>, vector<2x32xf32> -> vector<2x32xf32>
    %24 = arith.addf %18, %23 : vector<2x32xf32>
    %c0_32 = arith.constant 0 : index
    %c0_33 = arith.constant 0 : index
    %c1_34 = arith.constant 1 : index
    %c1_35 = arith.constant 1 : index
    %c0_36 = arith.constant 0 : index
    %25 = vector.load %arg1[%c0_32, %c0_33, %c1_34, %c1_35, %c0_36] : memref<1x3x3x6x32xbf16, #tpu.memory_space<vmem>>, vector<1x1x1x2x32xbf16>
    %26 = vector.shape_cast %25 : vector<1x1x1x2x32xbf16> to vector<2x32xbf16>
    %c4 = arith.constant 4 : index
    %c0_37 = arith.constant 0 : index
    %c0_38 = arith.constant 0 : index
    %27 = vector.load %arg2[%c4, %c0_37, %c0_38] : memref<25x32x32xbf16, #tpu.memory_space<vmem>>, vector<1x32x32xbf16>
    %28 = vector.shape_cast %27 : vector<1x32x32xbf16> to vector<32x32xbf16>
    %cst_39 = arith.constant dense<0.000000e+00> : vector<2x32xf32>
    %29 = tpu.matmul %26, %28, %cst_39 {dimension_numbers = #tpu.dot_dimension_numbers<[1], [0], [0], [1], [0, 0, 1, 1], [], []>} : vector<2x32xbf16>, vector<32x32xbf16>, vector<2x32xf32> -> vector<2x32xf32>
    %30 = arith.addf %24, %29 : vector<2x32xf32>
    %c0_40 = arith.constant 0 : index
    %c1_41 = arith.constant 1 : index
    %c0_42 = arith.constant 0 : index
    %c0_43 = arith.constant 0 : index
    %c0_44 = arith.constant 0 : index
    %31 = vector.load %arg1[%c0_40, %c1_41, %c0_42, %c0_43, %c0_44] : memref<1x3x3x6x32xbf16, #tpu.memory_space<vmem>>, vector<1x1x1x2x32xbf16>
    %32 = vector.shape_cast %31 : vector<1x1x1x2x32xbf16> to vector<2x32xbf16>
    %c5 = arith.constant 5 : index
    %c0_45 = arith.constant 0 : index
    %c0_46 = arith.constant 0 : index
    %33 = vector.load %arg2[%c5, %c0_45, %c0_46] : memref<25x32x32xbf16, #tpu.memory_space<vmem>>, vector<1x32x32xbf16>
    %34 = vector.shape_cast %33 : vector<1x32x32xbf16> to vector<32x32xbf16>
    %cst_47 = arith.constant dense<0.000000e+00> : vector<2x32xf32>
    %35 = tpu.matmul %32, %34, %cst_47 {dimension_numbers = #tpu.dot_dimension_numbers<[1], [0], [0], [1], [0, 0, 1, 1], [], []>} : vector<2x32xbf16>, vector<32x32xbf16>, vector<2x32xf32> -> vector<2x32xf32>
    %36 = arith.addf %30, %35 : vector<2x32xf32>
    %c0_48 = arith.constant 0 : index
    %c1_49 = arith.constant 1 : index
    %c1_50 = arith.constant 1 : index
    %c0_51 = arith.constant 0 : index
    %c0_52 = arith.constant 0 : index
    %37 = vector.load %arg1[%c0_48, %c1_49, %c1_50, %c0_51, %c0_52] : memref<1x3x3x6x32xbf16, #tpu.memory_space<vmem>>, vector<1x1x1x2x32xbf16>
    %38 = vector.shape_cast %37 : vector<1x1x1x2x32xbf16> to vector<2x32xbf16>
    %c6 = arith.constant 6 : index
    %c0_53 = arith.constant 0 : index
    %c0_54 = arith.constant 0 : index
    %39 = vector.load %arg2[%c6, %c0_53, %c0_54] : memref<25x32x32xbf16, #tpu.memory_space<vmem>>, vector<1x32x32xbf16>
    %40 = vector.shape_cast %39 : vector<1x32x32xbf16> to vector<32x32xbf16>
    %cst_55 = arith.constant dense<0.000000e+00> : vector<2x32xf32>
    %41 = tpu.matmul %38, %40, %cst_55 {dimension_numbers = #tpu.dot_dimension_numbers<[1], [0], [0], [1], [0, 0, 1, 1], [], []>} : vector<2x32xbf16>, vector<32x32xbf16>, vector<2x32xf32> -> vector<2x32xf32>
    %42 = arith.addf %36, %41 : vector<2x32xf32>
    %c0_56 = arith.constant 0 : index
    %c1_57 = arith.constant 1 : index
    %c2_58 = arith.constant 2 : index
    %c0_59 = arith.constant 0 : index
    %c0_60 = arith.constant 0 : index
    %43 = vector.load %arg1[%c0_56, %c1_57, %c2_58, %c0_59, %c0_60] : memref<1x3x3x6x32xbf16, #tpu.memory_space<vmem>>, vector<1x1x1x2x32xbf16>
    %44 = vector.shape_cast %43 : vector<1x1x1x2x32xbf16> to vector<2x32xbf16>
    %c7 = arith.constant 7 : index
    %c0_61 = arith.constant 0 : index
    %c0_62 = arith.constant 0 : index
    %45 = vector.load %arg2[%c7, %c0_61, %c0_62] : memref<25x32x32xbf16, #tpu.memory_space<vmem>>, vector<1x32x32xbf16>
    %46 = vector.shape_cast %45 : vector<1x32x32xbf16> to vector<32x32xbf16>
    %cst_63 = arith.constant dense<0.000000e+00> : vector<2x32xf32>
    %47 = tpu.matmul %44, %46, %cst_63 {dimension_numbers = #tpu.dot_dimension_numbers<[1], [0], [0], [1], [0, 0, 1, 1], [], []>} : vector<2x32xbf16>, vector<32x32xbf16>, vector<2x32xf32> -> vector<2x32xf32>
    %48 = arith.addf %42, %47 : vector<2x32xf32>
    %c0_64 = arith.constant 0 : index
    %c1_65 = arith.constant 1 : index
    %c0_66 = arith.constant 0 : index
    %c1_67 = arith.constant 1 : index
    %c0_68 = arith.constant 0 : index
    %49 = vector.load %arg1[%c0_64, %c1_65, %c0_66, %c1_67, %c0_68] : memref<1x3x3x6x32xbf16, #tpu.memory_space<vmem>>, vector<1x1x1x2x32xbf16>
    %50 = vector.shape_cast %49 : vector<1x1x1x2x32xbf16> to vector<2x32xbf16>
    %c8 = arith.constant 8 : index
    %c0_69 = arith.constant 0 : index
    %c0_70 = arith.constant 0 : index
    %51 = vector.load %arg2[%c8, %c0_69, %c0_70] : memref<25x32x32xbf16, #tpu.memory_space<vmem>>, vector<1x32x32xbf16>
    %52 = vector.shape_cast %51 : vector<1x32x32xbf16> to vector<32x32xbf16>
    %cst_71 = arith.constant dense<0.000000e+00> : vector<2x32xf32>
    %53 = tpu.matmul %50, %52, %cst_71 {dimension_numbers = #tpu.dot_dimension_numbers<[1], [0], [0], [1], [0, 0, 1, 1], [], []>} : vector<2x32xbf16>, vector<32x32xbf16>, vector<2x32xf32> -> vector<2x32xf32>
    %54 = arith.addf %48, %53 : vector<2x32xf32>
    %c0_72 = arith.constant 0 : index
    %c1_73 = arith.constant 1 : index
    %c1_74 = arith.constant 1 : index
    %c1_75 = arith.constant 1 : index
    %c0_76 = arith.constant 0 : index
    %55 = vector.load %arg1[%c0_72, %c1_73, %c1_74, %c1_75, %c0_76] : memref<1x3x3x6x32xbf16, #tpu.memory_space<vmem>>, vector<1x1x1x2x32xbf16>
    %56 = vector.shape_cast %55 : vector<1x1x1x2x32xbf16> to vector<2x32xbf16>
    %c9 = arith.constant 9 : index
    %c0_77 = arith.constant 0 : index
    %c0_78 = arith.constant 0 : index
    %57 = vector.load %arg2[%c9, %c0_77, %c0_78] : memref<25x32x32xbf16, #tpu.memory_space<vmem>>, vector<1x32x32xbf16>
    %58 = vector.shape_cast %57 : vector<1x32x32xbf16> to vector<32x32xbf16>
    %cst_79 = arith.constant dense<0.000000e+00> : vector<2x32xf32>
    %59 = tpu.matmul %56, %58, %cst_79 {dimension_numbers = #tpu.dot_dimension_numbers<[1], [0], [0], [1], [0, 0, 1, 1], [], []>} : vector<2x32xbf16>, vector<32x32xbf16>, vector<2x32xf32> -> vector<2x32xf32>
    %60 = arith.addf %54, %59 : vector<2x32xf32>
    %c0_80 = arith.constant 0 : index
    %c2_81 = arith.constant 2 : index
    %c0_82 = arith.constant 0 : index
    %c0_83 = arith.constant 0 : index
    %c0_84 = arith.constant 0 : index
    %61 = vector.load %arg1[%c0_80, %c2_81, %c0_82, %c0_83, %c0_84] : memref<1x3x3x6x32xbf16, #tpu.memory_space<vmem>>, vector<1x1x1x2x32xbf16>
    %62 = vector.shape_cast %61 : vector<1x1x1x2x32xbf16> to vector<2x32xbf16>
    %c10 = arith.constant 10 : index
    %c0_85 = arith.constant 0 : index
    %c0_86 = arith.constant 0 : index
    %63 = vector.load %arg2[%c10, %c0_85, %c0_86] : memref<25x32x32xbf16, #tpu.memory_space<vmem>>, vector<1x32x32xbf16>
    %64 = vector.shape_cast %63 : vector<1x32x32xbf16> to vector<32x32xbf16>
    %cst_87 = arith.constant dense<0.000000e+00> : vector<2x32xf32>
    %65 = tpu.matmul %62, %64, %cst_87 {dimension_numbers = #tpu.dot_dimension_numbers<[1], [0], [0], [1], [0, 0, 1, 1], [], []>} : vector<2x32xbf16>, vector<32x32xbf16>, vector<2x32xf32> -> vector<2x32xf32>
    %66 = arith.addf %60, %65 : vector<2x32xf32>
    %c0_88 = arith.constant 0 : index
    %c2_89 = arith.constant 2 : index
    %c1_90 = arith.constant 1 : index
    %c0_91 = arith.constant 0 : index
    %c0_92 = arith.constant 0 : index
    %67 = vector.load %arg1[%c0_88, %c2_89, %c1_90, %c0_91, %c0_92] : memref<1x3x3x6x32xbf16, #tpu.memory_space<vmem>>, vector<1x1x1x2x32xbf16>
    %68 = vector.shape_cast %67 : vector<1x1x1x2x32xbf16> to vector<2x32xbf16>
    %c11 = arith.constant 11 : index
    %c0_93 = arith.constant 0 : index
    %c0_94 = arith.constant 0 : index
    %69 = vector.load %arg2[%c11, %c0_93, %c0_94] : memref<25x32x32xbf16, #tpu.memory_space<vmem>>, vector<1x32x32xbf16>
    %70 = vector.shape_cast %69 : vector<1x32x32xbf16> to vector<32x32xbf16>
    %cst_95 = arith.constant dense<0.000000e+00> : vector<2x32xf32>
    %71 = tpu.matmul %68, %70, %cst_95 {dimension_numbers = #tpu.dot_dimension_numbers<[1], [0], [0], [1], [0, 0, 1, 1], [], []>} : vector<2x32xbf16>, vector<32x32xbf16>, vector<2x32xf32> -> vector<2x32xf32>
    %72 = arith.addf %66, %71 : vector<2x32xf32>
    %c0_96 = arith.constant 0 : index
    %c2_97 = arith.constant 2 : index
    %c2_98 = arith.constant 2 : index
    %c0_99 = arith.constant 0 : index
    %c0_100 = arith.constant 0 : index
    %73 = vector.load %arg1[%c0_96, %c2_97, %c2_98, %c0_99, %c0_100] : memref<1x3x3x6x32xbf16, #tpu.memory_space<vmem>>, vector<1x1x1x2x32xbf16>
    %74 = vector.shape_cast %73 : vector<1x1x1x2x32xbf16> to vector<2x32xbf16>
    %c12 = arith.constant 12 : index
    %c0_101 = arith.constant 0 : index
    %c0_102 = arith.constant 0 : index
    %75 = vector.load %arg2[%c12, %c0_101, %c0_102] : memref<25x32x32xbf16, #tpu.memory_space<vmem>>, vector<1x32x32xbf16>
    %76 = vector.shape_cast %75 : vector<1x32x32xbf16> to vector<32x32xbf16>
    %cst_103 = arith.constant dense<0.000000e+00> : vector<2x32xf32>
    %77 = tpu.matmul %74, %76, %cst_103 {dimension_numbers = #tpu.dot_dimension_numbers<[1], [0], [0], [1], [0, 0, 1, 1], [], []>} : vector<2x32xbf16>, vector<32x32xbf16>, vector<2x32xf32> -> vector<2x32xf32>
    %78 = arith.addf %72, %77 : vector<2x32xf32>
    %c0_104 = arith.constant 0 : index
    %c2_105 = arith.constant 2 : index
    %c0_106 = arith.constant 0 : index
    %c1_107 = arith.constant 1 : index
    %c0_108 = arith.constant 0 : index
    %79 = vector.load %arg1[%c0_104, %c2_105, %c0_106, %c1_107, %c0_108] : memref<1x3x3x6x32xbf16, #tpu.memory_space<vmem>>, vector<1x1x1x2x32xbf16>
    %80 = vector.shape_cast %79 : vector<1x1x1x2x32xbf16> to vector<2x32xbf16>
    %c13 = arith.constant 13 : index
    %c0_109 = arith.constant 0 : index
    %c0_110 = arith.constant 0 : index
    %81 = vector.load %arg2[%c13, %c0_109, %c0_110] : memref<25x32x32xbf16, #tpu.memory_space<vmem>>, vector<1x32x32xbf16>
    %82 = vector.shape_cast %81 : vector<1x32x32xbf16> to vector<32x32xbf16>
    %cst_111 = arith.constant dense<0.000000e+00> : vector<2x32xf32>
    %83 = tpu.matmul %80, %82, %cst_111 {dimension_numbers = #tpu.dot_dimension_numbers<[1], [0], [0], [1], [0, 0, 1, 1], [], []>} : vector<2x32xbf16>, vector<32x32xbf16>, vector<2x32xf32> -> vector<2x32xf32>
    %84 = arith.addf %78, %83 : vector<2x32xf32>
    %c0_112 = arith.constant 0 : index
    %c2_113 = arith.constant 2 : index
    %c1_114 = arith.constant 1 : index
    %c1_115 = arith.constant 1 : index
    %c0_116 = arith.constant 0 : index
    %85 = vector.load %arg1[%c0_112, %c2_113, %c1_114, %c1_115, %c0_116] : memref<1x3x3x6x32xbf16, #tpu.memory_space<vmem>>, vector<1x1x1x2x32xbf16>
    %86 = vector.shape_cast %85 : vector<1x1x1x2x32xbf16> to vector<2x32xbf16>
    %c14 = arith.constant 14 : index
    %c0_117 = arith.constant 0 : index
    %c0_118 = arith.constant 0 : index
    %87 = vector.load %arg2[%c14, %c0_117, %c0_118] : memref<25x32x32xbf16, #tpu.memory_space<vmem>>, vector<1x32x32xbf16>
    %88 = vector.shape_cast %87 : vector<1x32x32xbf16> to vector<32x32xbf16>
    %cst_119 = arith.constant dense<0.000000e+00> : vector<2x32xf32>
    %89 = tpu.matmul %86, %88, %cst_119 {dimension_numbers = #tpu.dot_dimension_numbers<[1], [0], [0], [1], [0, 0, 1, 1], [], []>} : vector<2x32xbf16>, vector<32x32xbf16>, vector<2x32xf32> -> vector<2x32xf32>
    %90 = arith.addf %84, %89 : vector<2x32xf32>
    %c0_120 = arith.constant 0 : index
    %c0_121 = arith.constant 0 : index
    %c0_122 = arith.constant 0 : index
    %c2_123 = arith.constant 2 : index
    %c0_124 = arith.constant 0 : index
    %91 = vector.load %arg1[%c0_120, %c0_121, %c0_122, %c2_123, %c0_124] : memref<1x3x3x6x32xbf16, #tpu.memory_space<vmem>>, vector<1x1x1x2x32xbf16>
    %92 = vector.shape_cast %91 : vector<1x1x1x2x32xbf16> to vector<2x32xbf16>
    %c15 = arith.constant 15 : index
    %c0_125 = arith.constant 0 : index
    %c0_126 = arith.constant 0 : index
    %93 = vector.load %arg2[%c15, %c0_125, %c0_126] : memref<25x32x32xbf16, #tpu.memory_space<vmem>>, vector<1x32x32xbf16>
    %94 = vector.shape_cast %93 : vector<1x32x32xbf16> to vector<32x32xbf16>
    %cst_127 = arith.constant dense<0.000000e+00> : vector<2x32xf32>
    %95 = tpu.matmul %92, %94, %cst_127 {dimension_numbers = #tpu.dot_dimension_numbers<[1], [0], [0], [1], [0, 0, 1, 1], [], []>} : vector<2x32xbf16>, vector<32x32xbf16>, vector<2x32xf32> -> vector<2x32xf32>
    %96 = arith.addf %90, %95 : vector<2x32xf32>
    %c0_128 = arith.constant 0 : index
    %c0_129 = arith.constant 0 : index
    %c1_130 = arith.constant 1 : index
    %c2_131 = arith.constant 2 : index
    %c0_132 = arith.constant 0 : index
    %97 = vector.load %arg1[%c0_128, %c0_129, %c1_130, %c2_131, %c0_132] : memref<1x3x3x6x32xbf16, #tpu.memory_space<vmem>>, vector<1x1x1x2x32xbf16>
    %98 = vector.shape_cast %97 : vector<1x1x1x2x32xbf16> to vector<2x32xbf16>
    %c16 = arith.constant 16 : index
    %c0_133 = arith.constant 0 : index
    %c0_134 = arith.constant 0 : index
    %99 = vector.load %arg2[%c16, %c0_133, %c0_134] : memref<25x32x32xbf16, #tpu.memory_space<vmem>>, vector<1x32x32xbf16>
    %100 = vector.shape_cast %99 : vector<1x32x32xbf16> to vector<32x32xbf16>
    %cst_135 = arith.constant dense<0.000000e+00> : vector<2x32xf32>
    %101 = tpu.matmul %98, %100, %cst_135 {dimension_numbers = #tpu.dot_dimension_numbers<[1], [0], [0], [1], [0, 0, 1, 1], [], []>} : vector<2x32xbf16>, vector<32x32xbf16>, vector<2x32xf32> -> vector<2x32xf32>
    %102 = arith.addf %96, %101 : vector<2x32xf32>
    %c0_136 = arith.constant 0 : index
    %c0_137 = arith.constant 0 : index
    %c2_138 = arith.constant 2 : index
    %c2_139 = arith.constant 2 : index
    %c0_140 = arith.constant 0 : index
    %103 = vector.load %arg1[%c0_136, %c0_137, %c2_138, %c2_139, %c0_140] : memref<1x3x3x6x32xbf16, #tpu.memory_space<vmem>>, vector<1x1x1x2x32xbf16>
    %104 = vector.shape_cast %103 : vector<1x1x1x2x32xbf16> to vector<2x32xbf16>
    %c17 = arith.constant 17 : index
    %c0_141 = arith.constant 0 : index
    %c0_142 = arith.constant 0 : index
    %105 = vector.load %arg2[%c17, %c0_141, %c0_142] : memref<25x32x32xbf16, #tpu.memory_space<vmem>>, vector<1x32x32xbf16>
    %106 = vector.shape_cast %105 : vector<1x32x32xbf16> to vector<32x32xbf16>
    %cst_143 = arith.constant dense<0.000000e+00> : vector<2x32xf32>
    %107 = tpu.matmul %104, %106, %cst_143 {dimension_numbers = #tpu.dot_dimension_numbers<[1], [0], [0], [1], [0, 0, 1, 1], [], []>} : vector<2x32xbf16>, vector<32x32xbf16>, vector<2x32xf32> -> vector<2x32xf32>
    %108 = arith.addf %102, %107 : vector<2x32xf32>
    %c0_144 = arith.constant 0 : index
    %c0_145 = arith.constant 0 : index
    %c0_146 = arith.constant 0 : index
    %c3_147 = arith.constant 3 : index
    %c0_148 = arith.constant 0 : index
    %109 = vector.load %arg1[%c0_144, %c0_145, %c0_146, %c3_147, %c0_148] : memref<1x3x3x6x32xbf16, #tpu.memory_space<vmem>>, vector<1x1x1x2x32xbf16>
    %110 = vector.shape_cast %109 : vector<1x1x1x2x32xbf16> to vector<2x32xbf16>
    %c18 = arith.constant 18 : index
    %c0_149 = arith.constant 0 : index
    %c0_150 = arith.constant 0 : index
    %111 = vector.load %arg2[%c18, %c0_149, %c0_150] : memref<25x32x32xbf16, #tpu.memory_space<vmem>>, vector<1x32x32xbf16>
    %112 = vector.shape_cast %111 : vector<1x32x32xbf16> to vector<32x32xbf16>
    %cst_151 = arith.constant dense<0.000000e+00> : vector<2x32xf32>
    %113 = tpu.matmul %110, %112, %cst_151 {dimension_numbers = #tpu.dot_dimension_numbers<[1], [0], [0], [1], [0, 0, 1, 1], [], []>} : vector<2x32xbf16>, vector<32x32xbf16>, vector<2x32xf32> -> vector<2x32xf32>
    %114 = arith.addf %108, %113 : vector<2x32xf32>
    %c0_152 = arith.constant 0 : index
    %c0_153 = arith.constant 0 : index
    %c1_154 = arith.constant 1 : index
    %c3_155 = arith.constant 3 : index
    %c0_156 = arith.constant 0 : index
    %115 = vector.load %arg1[%c0_152, %c0_153, %c1_154, %c3_155, %c0_156] : memref<1x3x3x6x32xbf16, #tpu.memory_space<vmem>>, vector<1x1x1x2x32xbf16>
    %116 = vector.shape_cast %115 : vector<1x1x1x2x32xbf16> to vector<2x32xbf16>
    %c19 = arith.constant 19 : index
    %c0_157 = arith.constant 0 : index
    %c0_158 = arith.constant 0 : index
    %117 = vector.load %arg2[%c19, %c0_157, %c0_158] : memref<25x32x32xbf16, #tpu.memory_space<vmem>>, vector<1x32x32xbf16>
    %118 = vector.shape_cast %117 : vector<1x32x32xbf16> to vector<32x32xbf16>
    %cst_159 = arith.constant dense<0.000000e+00> : vector<2x32xf32>
    %119 = tpu.matmul %116, %118, %cst_159 {dimension_numbers = #tpu.dot_dimension_numbers<[1], [0], [0], [1], [0, 0, 1, 1], [], []>} : vector<2x32xbf16>, vector<32x32xbf16>, vector<2x32xf32> -> vector<2x32xf32>
    %120 = arith.addf %114, %119 : vector<2x32xf32>
    %c0_160 = arith.constant 0 : index
    %c1_161 = arith.constant 1 : index
    %c0_162 = arith.constant 0 : index
    %c2_163 = arith.constant 2 : index
    %c0_164 = arith.constant 0 : index
    %121 = vector.load %arg1[%c0_160, %c1_161, %c0_162, %c2_163, %c0_164] : memref<1x3x3x6x32xbf16, #tpu.memory_space<vmem>>, vector<1x1x1x2x32xbf16>
    %122 = vector.shape_cast %121 : vector<1x1x1x2x32xbf16> to vector<2x32xbf16>
    %c20 = arith.constant 20 : index
    %c0_165 = arith.constant 0 : index
    %c0_166 = arith.constant 0 : index
    %123 = vector.load %arg2[%c20, %c0_165, %c0_166] : memref<25x32x32xbf16, #tpu.memory_space<vmem>>, vector<1x32x32xbf16>
    %124 = vector.shape_cast %123 : vector<1x32x32xbf16> to vector<32x32xbf16>
    %cst_167 = arith.constant dense<0.000000e+00> : vector<2x32xf32>
    %125 = tpu.matmul %122, %124, %cst_167 {dimension_numbers = #tpu.dot_dimension_numbers<[1], [0], [0], [1], [0, 0, 1, 1], [], []>} : vector<2x32xbf16>, vector<32x32xbf16>, vector<2x32xf32> -> vector<2x32xf32>
    %126 = arith.addf %120, %125 : vector<2x32xf32>
    %c0_168 = arith.constant 0 : index
    %c1_169 = arith.constant 1 : index
    %c1_170 = arith.constant 1 : index
    %c2_171 = arith.constant 2 : index
    %c0_172 = arith.constant 0 : index
    %127 = vector.load %arg1[%c0_168, %c1_169, %c1_170, %c2_171, %c0_172] : memref<1x3x3x6x32xbf16, #tpu.memory_space<vmem>>, vector<1x1x1x2x32xbf16>
    %128 = vector.shape_cast %127 : vector<1x1x1x2x32xbf16> to vector<2x32xbf16>
    %c21 = arith.constant 21 : index
    %c0_173 = arith.constant 0 : index
    %c0_174 = arith.constant 0 : index
    %129 = vector.load %arg2[%c21, %c0_173, %c0_174] : memref<25x32x32xbf16, #tpu.memory_space<vmem>>, vector<1x32x32xbf16>
    %130 = vector.shape_cast %129 : vector<1x32x32xbf16> to vector<32x32xbf16>
    %cst_175 = arith.constant dense<0.000000e+00> : vector<2x32xf32>
    %131 = tpu.matmul %128, %130, %cst_175 {dimension_numbers = #tpu.dot_dimension_numbers<[1], [0], [0], [1], [0, 0, 1, 1], [], []>} : vector<2x32xbf16>, vector<32x32xbf16>, vector<2x32xf32> -> vector<2x32xf32>
    %132 = arith.addf %126, %131 : vector<2x32xf32>
    %c0_176 = arith.constant 0 : index
    %c1_177 = arith.constant 1 : index
    %c2_178 = arith.constant 2 : index
    %c2_179 = arith.constant 2 : index
    %c0_180 = arith.constant 0 : index
    %133 = vector.load %arg1[%c0_176, %c1_177, %c2_178, %c2_179, %c0_180] : memref<1x3x3x6x32xbf16, #tpu.memory_space<vmem>>, vector<1x1x1x2x32xbf16>
    %134 = vector.shape_cast %133 : vector<1x1x1x2x32xbf16> to vector<2x32xbf16>
    %c22 = arith.constant 22 : index
    %c0_181 = arith.constant 0 : index
    %c0_182 = arith.constant 0 : index
    %135 = vector.load %arg2[%c22, %c0_181, %c0_182] : memref<25x32x32xbf16, #tpu.memory_space<vmem>>, vector<1x32x32xbf16>
    %136 = vector.shape_cast %135 : vector<1x32x32xbf16> to vector<32x32xbf16>
    %cst_183 = arith.constant dense<0.000000e+00> : vector<2x32xf32>
    %137 = tpu.matmul %134, %136, %cst_183 {dimension_numbers = #tpu.dot_dimension_numbers<[1], [0], [0], [1], [0, 0, 1, 1], [], []>} : vector<2x32xbf16>, vector<32x32xbf16>, vector<2x32xf32> -> vector<2x32xf32>
    %138 = arith.addf %132, %137 : vector<2x32xf32>
    %c0_184 = arith.constant 0 : index
    %c1_185 = arith.constant 1 : index
    %c0_186 = arith.constant 0 : index
    %c3_187 = arith.constant 3 : index
    %c0_188 = arith.constant 0 : index
    %139 = vector.load %arg1[%c0_184, %c1_185, %c0_186, %c3_187, %c0_188] : memref<1x3x3x6x32xbf16, #tpu.memory_space<vmem>>, vector<1x1x1x2x32xbf16>
    %140 = vector.shape_cast %139 : vector<1x1x1x2x32xbf16> to vector<2x32xbf16>
    %c23 = arith.constant 23 : index
    %c0_189 = arith.constant 0 : index
    %c0_190 = arith.constant 0 : index
    %141 = vector.load %arg2[%c23, %c0_189, %c0_190] : memref<25x32x32xbf16, #tpu.memory_space<vmem>>, vector<1x32x32xbf16>
    %142 = vector.shape_cast %141 : vector<1x32x32xbf16> to vector<32x32xbf16>
    %cst_191 = arith.constant dense<0.000000e+00> : vector<2x32xf32>
    %143 = tpu.matmul %140, %142, %cst_191 {dimension_numbers = #tpu.dot_dimension_numbers<[1], [0], [0], [1], [0, 0, 1, 1], [], []>} : vector<2x32xbf16>, vector<32x32xbf16>, vector<2x32xf32> -> vector<2x32xf32>
    %144 = arith.addf %138, %143 : vector<2x32xf32>
    %c0_192 = arith.constant 0 : index
    %c1_193 = arith.constant 1 : index
    %c1_194 = arith.constant 1 : index
    %c3_195 = arith.constant 3 : index
    %c0_196 = arith.constant 0 : index
    %145 = vector.load %arg1[%c0_192, %c1_193, %c1_194, %c3_195, %c0_196] : memref<1x3x3x6x32xbf16, #tpu.memory_space<vmem>>, vector<1x1x1x2x32xbf16>
    %146 = vector.shape_cast %145 : vector<1x1x1x2x32xbf16> to vector<2x32xbf16>
    %c24 = arith.constant 24 : index
    %c0_197 = arith.constant 0 : index
    %c0_198 = arith.constant 0 : index
    %147 = vector.load %arg2[%c24, %c0_197, %c0_198] : memref<25x32x32xbf16, #tpu.memory_space<vmem>>, vector<1x32x32xbf16>
    %148 = vector.shape_cast %147 : vector<1x32x32xbf16> to vector<32x32xbf16>
    %cst_199 = arith.constant dense<0.000000e+00> : vector<2x32xf32>
    %149 = tpu.matmul %146, %148, %cst_199 {dimension_numbers = #tpu.dot_dimension_numbers<[1], [0], [0], [1], [0, 0, 1, 1], [], []>} : vector<2x32xbf16>, vector<32x32xbf16>, vector<2x32xf32> -> vector<2x32xf32>
    %150 = arith.addf %144, %149 : vector<2x32xf32>
    %c0_200 = arith.constant 0 : index
    %c0_201 = arith.constant 0 : index
    %151 = vector.load %arg3[%c0_200, %c0_201] : memref<1x32xf32, #tpu.memory_space<vmem>>, vector<1x32xf32>
    %152 = vector.broadcast %151 : vector<1x32xf32> to vector<2x32xf32>
    %153 = arith.addf %150, %152 : vector<2x32xf32>
    %cst_202 = arith.constant 0.000000e+00 : f32
    %154 = vector.broadcast %cst_202 : f32 to vector<2x32xf32>
    %155 = arith.cmpf ogt, %153, %154 : vector<2x32xf32>
    %cst_203 = arith.constant 1.000000e-01 : f32
    %156 = vector.broadcast %cst_203 : f32 to vector<2x32xf32>
    %157 = arith.mulf %153, %156 : vector<2x32xf32>
    %158 = arith.select %155, %153, %157 : vector<2x32xi1>, vector<2x32xf32>
    %159 = arith.truncf %158 : vector<2x32xf32> to vector<2x32xbf16>
    %c0_204 = arith.constant 0 : index
    %c0_205 = arith.constant 0 : index
    %c0_206 = arith.constant 0 : index
    %160 = vector.load %arg4[%c0_204, %c0_205, %c0_206] : memref<1x2x32xbf16, #tpu.memory_space<vmem>>, vector<1x2x32xbf16>
    %161 = vector.shape_cast %160 : vector<1x2x32xbf16> to vector<2x32xbf16>
    %162 = vector.shape_cast %159 : vector<2x32xbf16> to vector<1x2x32xbf16>
    tpu.vector_store %arg4[%c0_204, %c0_205, %c0_206], %162 {strides = array<i32>} : memref<1x2x32xbf16, #tpu.memory_space<vmem>>, vector<1x2x32xbf16>,
    return
  }
  func.func @transform_0(%arg0: i32) -> (i32, i32, i32, i32, i32) {
    %c0_i32 = arith.constant 0 : i32
    %c0_i32_0 = arith.constant 0 : i32
    %c0_i32_1 = arith.constant 0 : i32
    %c0_i32_2 = arith.constant 0 : i32
    %c0_i32_3 = arith.constant 0 : i32
    return %arg0, %c0_i32, %c0_i32_0, %c0_i32_1, %c0_i32_2 : i32, i32, i32, i32, i32
  }
  func.func @transform_1(%arg0: i32) -> (i32, i32, i32) {
    %c0_i32 = arith.constant 0 : i32
    %c0_i32_0 = arith.constant 0 : i32
    %c0_i32_1 = arith.constant 0 : i32
    %c0_i32_2 = arith.constant 0 : i32
    return %c0_i32, %c0_i32_0, %c0_i32_1 : i32, i32, i32
  }
  func.func @transform_2(%arg0: i32) -> (i32, i32) {
    %c0_i32 = arith.constant 0 : i32
    %c0_i32_0 = arith.constant 0 : i32
    %c0_i32_1 = arith.constant 0 : i32
    return %c0_i32, %c0_i32_0 : i32, i32
  }
  func.func @transform_3(%arg0: i32) -> (i32, i32, i32) {
    %c0_i32 = arith.constant 0 : i32
    %c0_i32_0 = arith.constant 0 : i32
    %c0_i32_1 = arith.constant 0 : i32
    return %arg0, %c0_i32, %c0_i32_0 : i32, i32, i32
  }
}

module attributes {stable_mosaic.version = 11 : i64} {
  func.func @_final_conv_kernel(%arg0: memref<2x3x1x32xbf16, #tpu.memory_space<vmem>>, %arg1: memref<3x32xf32, #tpu.memory_space<vmem>>, %arg2: memref<1x1xf32, #tpu.memory_space<vmem>>, %arg3: memref<2x1x1xf32, #tpu.memory_space<vmem>>) attributes {dimension_semantics = [], scalar_prefetch = 0 : i64, scratch_operands = 0 : i64, tpu.core_type = #tpu.core_type<tc>} {
    %cst = arith.constant 0.000000e+00 : f32
    %0 = vector.broadcast %cst : f32 to vector<2x1x1xf32>
    %c0 = arith.constant 0 : index
    %c0_0 = arith.constant 0 : index
    %c0_1 = arith.constant 0 : index
    %c0_2 = arith.constant 0 : index
    %1 = vector.load %arg0[%c0, %c0_0, %c0_1, %c0_2] : memref<2x3x1x32xbf16, #tpu.memory_space<vmem>>, vector<2x1x1x32xbf16>
    %2 = arith.extf %1 : vector<2x1x1x32xbf16> to vector<2x1x1x32xf32>
    %c0_3 = arith.constant 0 : index
    %c0_4 = arith.constant 0 : index
    %3 = vector.load %arg1[%c0_3, %c0_4] : memref<3x32xf32, #tpu.memory_space<vmem>>, vector<1x32xf32>
    %4 = vector.shape_cast %3 : vector<1x32xf32> to vector<1x1x1x32xf32>
    %5 = vector.broadcast %4 : vector<1x1x1x32xf32> to vector<2x1x1x32xf32>
    %6 = arith.mulf %2, %5 : vector<2x1x1x32xf32>
    %cst_5 = arith.constant dense<0.000000e+00> : vector<2x1x1xf32>
    %7 = vector.multi_reduction <add>, %6, %cst_5 [3] : vector<2x1x1x32xf32> to vector<2x1x1xf32>
    %8 = arith.addf %0, %7 : vector<2x1x1xf32>
    %c0_6 = arith.constant 0 : index
    %c1 = arith.constant 1 : index
    %c0_7 = arith.constant 0 : index
    %c0_8 = arith.constant 0 : index
    %9 = vector.load %arg0[%c0_6, %c1, %c0_7, %c0_8] : memref<2x3x1x32xbf16, #tpu.memory_space<vmem>>, vector<2x1x1x32xbf16>
    %10 = arith.extf %9 : vector<2x1x1x32xbf16> to vector<2x1x1x32xf32>
    %c1_9 = arith.constant 1 : index
    %c0_10 = arith.constant 0 : index
    %11 = vector.load %arg1[%c1_9, %c0_10] : memref<3x32xf32, #tpu.memory_space<vmem>>, vector<1x32xf32>
    %12 = vector.shape_cast %11 : vector<1x32xf32> to vector<1x1x1x32xf32>
    %13 = vector.broadcast %12 : vector<1x1x1x32xf32> to vector<2x1x1x32xf32>
    %14 = arith.mulf %10, %13 : vector<2x1x1x32xf32>
    %cst_11 = arith.constant dense<0.000000e+00> : vector<2x1x1xf32>
    %15 = vector.multi_reduction <add>, %14, %cst_11 [3] : vector<2x1x1x32xf32> to vector<2x1x1xf32>
    %16 = arith.addf %8, %15 : vector<2x1x1xf32>
    %c0_12 = arith.constant 0 : index
    %c2 = arith.constant 2 : index
    %c0_13 = arith.constant 0 : index
    %c0_14 = arith.constant 0 : index
    %17 = vector.load %arg0[%c0_12, %c2, %c0_13, %c0_14] : memref<2x3x1x32xbf16, #tpu.memory_space<vmem>>, vector<2x1x1x32xbf16>
    %18 = arith.extf %17 : vector<2x1x1x32xbf16> to vector<2x1x1x32xf32>
    %c2_15 = arith.constant 2 : index
    %c0_16 = arith.constant 0 : index
    %19 = vector.load %arg1[%c2_15, %c0_16] : memref<3x32xf32, #tpu.memory_space<vmem>>, vector<1x32xf32>
    %20 = vector.shape_cast %19 : vector<1x32xf32> to vector<1x1x1x32xf32>
    %21 = vector.broadcast %20 : vector<1x1x1x32xf32> to vector<2x1x1x32xf32>
    %22 = arith.mulf %18, %21 : vector<2x1x1x32xf32>
    %cst_17 = arith.constant dense<0.000000e+00> : vector<2x1x1xf32>
    %23 = vector.multi_reduction <add>, %22, %cst_17 [3] : vector<2x1x1x32xf32> to vector<2x1x1xf32>
    %24 = arith.addf %16, %23 : vector<2x1x1xf32>
    %c0_18 = arith.constant 0 : index
    %c0_19 = arith.constant 0 : index
    %25 = vector.load %arg2[%c0_18, %c0_19] : memref<1x1xf32, #tpu.memory_space<vmem>>, vector<1x1xf32>
    %26 = vector.shape_cast %25 : vector<1x1xf32> to vector<1x1x1xf32>
    %27 = vector.broadcast %26 : vector<1x1x1xf32> to vector<2x1x1xf32>
    %28 = arith.addf %24, %27 : vector<2x1x1xf32>
    %c0_20 = arith.constant 0 : index
    %c0_21 = arith.constant 0 : index
    %c0_22 = arith.constant 0 : index
    %29 = vector.load %arg3[%c0_20, %c0_21, %c0_22] : memref<2x1x1xf32, #tpu.memory_space<vmem>>, vector<2x1x1xf32>
    tpu.vector_store %arg3[%c0_20, %c0_21, %c0_22], %28 {strides = array<i32>} : memref<2x1x1xf32, #tpu.memory_space<vmem>>, vector<2x1x1xf32>,
    return
  }
}

</mosaic_0001>

<bundles_post_ra>
// kernel: stft_discriminator_forward.7
= control target key start
LH: loop header
LB: loop body
LE: loop exit
PB: predicated region body
PF: predicated region fallthrough
CT: control target
= control target key end

     0   :  { %s785_s9 = smov 0   ;;  %s863_s0 = inlined_call_operand.vmem [shape: f32[2,32,4], index: 0, kind: input, shape index: {}]   ;;  %s864_s1 = inlined_call_operand.vmem [shape: f32[4,4,18], index: 1, kind: input, shape index: {}]   ;;  %s865_s2 = inlined_call_operand.vmem [shape: bf16[2,29,18], index: 2, kind: output, shape index: {}]  }
   0x1 LB: > { %s658_s10 = sadd.s32 4294967295, %s768_s9   ;;  %p662_p0 = scmp.ge.s32.totalorder %s768_s9, 1  ;;  %s768_s9 = sphi %s785_s9, %s12_s9  }
   0x2   : > { %p112_p1 = scmp.lt.s32.totalorder %s768_s9, 3 }
   0x4   : > { %p113_p2 = pnand %p662_p0, %p112_p1 }
   0x5   : > { %p134_p3 = scmp.lt.s32.totalorder (!%p113_p2), %s658_s10, 1 }
   0x6   : > { %116 = sbr.rel (%p113_p2) target bundleno = 230 (0xe6), region = 28 }
   0xb   : > { %v667_v0 = vld [vmem:[%s864_s1 + $0x4] sm:$0xf]  ;;  %vm168_vm0 = vcmask 1043456   ;;  %v148_v1 = vld [vmem:[%s864_s1] sm:$0xf]  ;;  %s867_s10 = smov (!%p134_p3, %s658_s10), 1 }
   0xc   : > { %722 = vmatprep.subr.msk.mxu0 %vm168_vm0, %v667_v0  ;;  %730 = vmatprep.subr.msk.mxu1 %vm168_vm0, %v148_v1  ;;  %v678_v2 = vld [vmem:[%s864_s1 + $0x8] sm:$0xf]  ;;  %v684_v3 = vld [vmem:[%s864_s1 + $0xc] sm:$0xf]  ;;  %s696_s19 = sshll.u32 %s867_s10, 5  ;;  %vm155_vm1 = vcmask 31744  }
   0xd   : > { %723 = vmatpush3.msk.msra.mxu0 %vm168_vm0, %v667_v0  ;;  %731 = vmatpush3.msk.msra.mxu1 %vm168_vm0, %v148_v1  ;;  %s817_s22 = scalar_lea.vmem %s863_s0, %s696_s19  ;;  %s697_s23 = sshll.u32 %s867_s10, 4  ;;  %vm593_vm2 = vcmask 142336   ;;  %vm597_vm3 = vcmask 141312   ;;  %vm598_vm4 = vsmask.f32 2304 }
   0xe   : > { %738 = vmatprep.subr.msk.mxu0 %vm168_vm0, %v678_v2  ;;  %746 = vmatprep.subr.msk.mxu1 %vm168_vm0, %v684_v3  ;;  %v149_v4 = vld [vmem:[%s817_s22 + $0x1] sm:$0xff]  ;;  %v150_v6 = vld [vmem:[%s817_s22 + $0x9] sm:$0xff]  ;;  %v151_v8 = vld [vmem:[%s817_s22 + $0x11] sm:$0xff]  ;;  %s143_s26 = scalar_lea.vmem %s865_s2, %s697_s23 }
   0xf   : > { %v144_v5 = vld [vmem:[%s817_s22] sm:$0xff]  ;;  %724 = vmatprep.mubr.msk.f32.mxu0 %vm155_vm1, %v149_v4  ;;  %v145_v7 = vld [vmem:[%s817_s22 + $0x8] sm:$0xff]  ;;  %v146_v9 = vld [vmem:[%s817_s22 + $0x10] sm:$0xff] }
  0x10   : > { %732 = vmatprep.mubr.msk.f32.mxu1 %vm155_vm1, %v144_v5  ;;  %725 = vmatmul.mubr.msk.f32.vlgmr.msra.gmra.mxu0 %vm155_vm1, %v150_v6  ;;  %v152_v10 = vld [vmem:[%s817_s22 + $0x19] sm:$0x1f]  ;;  %v357_v12 = vld [vmem:[%s817_s22 + $0x2] sm:$0xff]  ;;  %v358_v14 = vld [vmem:[%s817_s22 + $0xa] sm:$0xff] }
  0x11   : > { %733 = vmatmul.mubr.msk.f32.vlgmr.msra.gmra.mxu1 %vm155_vm1, %v145_v7  ;;  %739 = vmatpush3.msk.msra.mxu0 %vm168_vm0, %v678_v2  ;;  %v147_v11 = vld [vmem:[%s817_s22 + $0x18] sm:$0x1f]  ;;  %v467_v13 = vld [vmem:[%s817_s22 + $0x3] sm:$0xff]  ;;  %v468_v15 = vld [vmem:[%s817_s22 + $0xb] sm:$0xff] }
  0x12   : > { %747 = vmatpush3.msk.msra.mxu1 %vm168_vm0, %v684_v3  ;;  %727 = vmatprep.mubr.msk.f32.mxu0 %vm155_vm1, %v151_v8  ;;  %v359_v16 = vld [vmem:[%s817_s22 + $0x12] sm:$0xff]  ;;  %v360_v18 = vld [vmem:[%s817_s22 + $0x1a] sm:$0x1f]  ;;  %vm599_vm5 = vmand %vm597_vm3, %vm598_vm4 }
  0x13   : > { %735 = vmatprep.mubr.msk.f32.mxu1 %vm155_vm1, %v146_v9  ;;  %v469_v17 = vld [vmem:[%s817_s22 + $0x13] sm:$0xff]  ;;  %v470_v19 = vld [vmem:[%s817_s22 + $0x1b] sm:$0x1f]  ;;  %v600_v48 = vld [vmem:[%s143_s26 + $0xc] sm:$0x7] }
  0x14   : > { %728 = vmatmul.mubr.msk.f32.gmra.mxu0 %vm155_vm1, %v152_v10 }
  0x15   : > { %736 = vmatmul.mubr.msk.f32.gmra.mxu1 %vm155_vm1, %v147_v11  ;;  %740 = vmatprep.mubr.msk.f32.mxu0 %vm155_vm1, %v357_v12 }
  0x16   : > { %748 = vmatprep.mubr.msk.f32.mxu1 %vm155_vm1, %v467_v13 }
  0x18   : > { %741 = vmatmul.mubr.msk.f32.vlgmr.msra.gmra.mxu0 %vm155_vm1, %v358_v14 }
  0x19   : > { %749 = vmatmul.mubr.msk.f32.vlgmr.msra.gmra.mxu1 %vm155_vm1, %v468_v15  ;;  %743 = vmatprep.mubr.msk.f32.mxu0 %vm155_vm1, %v359_v16 }
  0x1a   : > { %751 = vmatprep.mubr.msk.f32.mxu1 %vm155_vm1, %v469_v17 }
  0x1c   : > { %744 = vmatmul.mubr.msk.f32.gmra.mxu0 %vm155_vm1, %v360_v18 }
  0x1d   : > { %752 = vmatmul.mubr.msk.f32.gmra.mxu1 %vm155_vm1, %v470_v19 }
  0xd0   : > { %v726_v20 = vpop.f32.mrf.mxu0 }
  0xd1   : > { %v734_v21 = vpop.f32.mrf.mxu1 }
  0xd2   : > { %v238_v22 = vpop.f32.mrf.mxu0  ;;  %v344_v28 = vadd.f32 %v734_v21, %v726_v20 }
  0xd3   : > { %v338_v23 = vpop.f32.mrf.mxu1 }
  0xd4   : > { %v729_v24 = vpop.f32.mrf.mxu0  ;;  %v339_v31 = vadd.f32 %v338_v23, %v238_v22 }
  0xd5   : > { %v737_v25 = vpop.f32.mrf.mxu1 }
  0xd6   : > { %v248_v26 = vpop.f32.mrf.mxu0  ;;  %v354_v35 = vadd.f32 %v737_v25, %v729_v24 }
  0xd7   : > { %v348_v27 = vpop.f32.mrf.mxu1 }
  0xd8   : > { %v742_v29 = vpop.f32.mrf.mxu0  ;;  %v349_v40 = vadd.f32 %v348_v27, %v248_v26 }
  0xd9   : > { %v750_v30 = vpop.f32.mrf.mxu1  ;;  %v464_v32 = vadd.f32 %v742_v29, %v344_v28 }
  0xda   : > { %v444_v33 = vpop.f32.mrf.mxu0 }
  0xdb   : > { %v554_v34 = vpop.f32.mrf.mxu1  ;;  %v574_v36 = vadd.f32 %v750_v30, %v464_v32  ;;  %v463_v37 = vadd.f32 %v444_v33, %v339_v31 }
  0xdc   : > { %v745_v38 = vpop.f32.mrf.mxu0 }
  0xdd   : > { %v753_v39 = vpop.f32.mrf.mxu1  ;;  %v699_v41 = vpack.c.bf16 %v574_v36, %v574_v36  ;;  %v573_v42 = vadd.f32 %v554_v34, %v463_v37  ;;  %v466_v43 = vadd.f32 %v745_v38, %v354_v35 }
  0xde   : > { %v454_v44 = vpop.f32.mrf.mxu0 }
  0xdf   : > { %595 = vst.msk [vmem:[%s143_s26 + $0x4] sm:$0xf] %vm593_vm2, %v699_v41  ;;  %v698_v45 = vpack.c.bf16 %v573_v42, %v573_v42  ;;  %v576_v46 = vadd.f32 %v753_v39, %v466_v43  ;;  %v465_v47 = vadd.f32 %v454_v44, %v349_v40  ;;  %v564_v49 = vpop.f32.mrf.mxu1 }
  0xe1   : > { %594 = vst.msk [vmem:[%s143_s26] sm:$0xf] %vm593_vm2, %v698_v45  ;;  %v701_v50 = vpack.c.bf16 %v576_v46, %v576_v46  ;;  %v575_v51 = vadd.f32 %v564_v49, %v465_v47 }
  0xe3   : > { %v601_v52 = vsel %vm599_vm5, %v701_v50, %v600_v48  ;;  %v700_v53 = vpack.c.bf16 %v575_v51, %v575_v51 }
  0xe4   : > { %602 = vst [vmem:[%s143_s26 + $0xc] sm:$0x7] %v601_v52 }
  0xe5   : > { %596 = vst.msk [vmem:[%s143_s26 + $0x8] sm:$0xf] %vm593_vm2, %v700_v53 }
  0xe6 PF: > { %s12_s9 = sadd.s32 1, %s768_s9  }
  0xe7   : > { %p9_p4 = scmp.ge.s32.totalorder %s12_s9, 4  }
  0xe9   :  { %11 = sbr.rel (!%p9_p4) target bundleno = 1 (0x1), region = 61 }

// kernel: stft_discriminator_forward.8
= control target key start
LH: loop header
LB: loop body
LE: loop exit
PB: predicated region body
PF: predicated region fallthrough
CT: control target
= control target key end

     0   :  { %s3953_s12 = smov 0   ;;  %s4701_s0 = inlined_call_operand.vmem [shape: bf16[2,3,3,60,2], index: 0, kind: input, shape index: {}]   ;;  %s4702_s1 = inlined_call_operand.vmem [shape: bf16[25,2,8], index: 1, kind: input, shape index: {}]   ;;  %s4703_s2 = inlined_call_operand.vmem [shape: f32[1,8], index: 2, kind: input, shape index: {}]   ;;  %s4704_s3 = inlined_call_operand.vmem [shape: bf16[2,50,8], index: 3, kind: output, shape index: {}]  }
   0x1 LB: > { %s3173_s13 = sadd.s32 4294967295, %s3931_s12   ;;  %p3177_p0 = scmp.ge.s32.totalorder %s3931_s12, 1  ;;  %s3931_s12 = sphi %s3953_s12, %s13_s12  }
   0x2   : > { %p137_p1 = scmp.lt.s32.totalorder %s3931_s12, 3 }
   0x4   : > { %p138_p2 = pnand %p3177_p0, %p137_p1 }
   0x5   : > { %p161_p3 = scmp.lt.s32.totalorder (!%p138_p2), %s3173_s13, 1 }
   0x6   : > { %141 = sbr.rel (%p138_p2) target bundleno = 420 (0x1a4), region = 32 }
   0xb   : > { %v3187_v0 = vld [vmem:[%s4702_s1 + $0x1] sm:$0x1]  ;;  %vm221_vm0 = vcmask 1040384   ;;  %v179_v2 = vld [vmem:[%s4702_s1] sm:$0x1]  ;;  %s4708_s13 = smov (!%p161_p3, %s3173_s13), 1 }
   0xc   : > { %3831 = vmatprep.subr.msk.bf16.mxu1 %vm221_vm0, %v3187_v0  ;;  %3830 = vmatprep.subr.msk.bf16.mxu0 %vm221_vm0, %v3187_v0  ;;  %v223_v1 = vsel %vm221_vm0, %v3187_v0, 0  ;;  %v3211_v3 = vld [vmem:[%s4702_s1 + $0x2] sm:$0x1]  ;;  %s3856_s20 = smul.u32 288, %s4708_s13  ;;  %vm208_vm1 = vcmask 15360   ;;  %v320_v13 = vsel %vm221_vm0, %v179_v2, 0 }
   0xd   : > { %3829 = vmatpush3.bf16.msra.mxu1 %v223_v1  ;;  %3579 = vmatpush3.bf16.msra.mxu0 %v223_v1  ;;  %v427_v9 = vsel %vm221_vm0, %v3211_v3, 0  ;;  %v3227_v11 = vld [vmem:[%s4702_s1 + $0x4] sm:$0x1]  ;;  %v3220_v17 = vld [vmem:[%s4702_s1 + $0x3] sm:$0x1]  ;;  %vm2283_vm4 = vcmask 1044480  }
   0xe   : > { %3832 = vmatprep.subr.msk.bf16.mxu1 %vm221_vm0, %v179_v2  ;;  %3833 = vmatprep.subr.msk.bf16.mxu0 %vm221_vm0, %v3211_v3  ;;  %s3981_s23 = scalar_lea.vmem %s4701_s0, %s3856_s20  ;;  %v668_v27 = vsel %vm221_vm0, %v3227_v11, 0  ;;  %v548_v28 = vsel %vm221_vm0, %v3220_v17, 0  ;;  %v3256_v30 = vld [vmem:[%s4702_s1 + $0x6] sm:$0x1]  ;;  %v3240_v35 = vld [vmem:[%s4702_s1 + $0x5] sm:$0x1] }
   0xf   : > { %v3180_v4 = vld [vmem:[%s3981_s23 + $0x20] sm:$0xf]  ;;  %v3985_v5 = vld [vmem:[%s3981_s23 + $0x24] sm:$0xf]  ;;  %v3989_v7 = vld [vmem:[%s3981_s23 + $0x30] sm:$0xff]   ;;  %v896_v63 = vsel %vm221_vm0, %v3256_v30, 0 }
  0x10   : > { %v3188_v6 = vcombine.low %v3180_v4, %v3985_v5  ;;  %v3992_v8 = vld [vmem:[%s3981_s23 + $0x28] sm:$0xff]   ;;  %3584 = vmatprep.mubr.msk.bf16.mxu1 %vm208_vm1, %v3989_v7  ;;  %v172_v10 = vld [vmem:[%s3981_s23] sm:$0xf]  ;;  %v3870_v12 = vld [vmem:[%s3981_s23 + $0x38] ss:$0 sps:$4 sm:$0x11]  }
  0x11   : > { %v4007_v14 = vld [vmem:[%s3981_s23 + $0x4] sm:$0xf]  ;;  %v3204_v16 = vld [vmem:[%s3981_s23 + $0x40] sm:$0xf]  ;;  %3585 = vmatmul.mubr.msk.bf16.vlgmr.msra.gmra.mxu1 %vm208_vm1, %v3870_v12  ;;  %v4023_v21 = vld [vmem:[%s3981_s23 + $0x48] sm:$0xff]   ;;  %v633_v34 = vshll.u32 %v3992_v8, 16 }
  0x12   : > { %3580 = vmatprep.mubr.msk.bf16.mxu0 %vm208_vm1, %v3188_v6  ;;  %v3196_v15 = vcombine.low %v172_v10, %v4007_v14  ;;  %v629_v18 = vshll.u32 %v3188_v6, 16  ;;  %v4016_v19 = vld [vmem:[%s3981_s23 + $0x44] sm:$0xf]  ;;  %3589 = vmatpush3.bf16.msra.mxu1 %v320_v13  ;;  %v4027_v22 = vld [vmem:[%s3981_s23 + $0x50] sm:$0xff]   ;;  %v627_v24 = vshrl.u32 %v3188_v6, 16  ;;  %v4030_v26 = vld [vmem:[%s3981_s23 + $0x8] sm:$0xff]  }
  0x13   : > { %3581 = vmatmul.mubr.msk.bf16.vlgmr.msra.gmra.mxu0 %vm208_vm1, %v3992_v8  ;;  %v3212_v20 = vcombine.low %v3204_v16, %v4016_v19  ;;  %3834 = vmatprep.subr.msk.bf16.mxu1 %vm221_vm0, %v3220_v17  ;;  %v4035_v29 = vld [vmem:[%s3981_s23 + $0x10] sm:$0xff]   ;;  %v513_v33 = vshll.u32 %v4030_v26, 16  ;;  %v3880_v36 = vld [vmem:[%s3981_s23 + $0x58] ss:$0 sps:$4 sm:$0x11]   ;;  %v635_v38 = vrot.slane %v633_v34, 1 }
  0x14   : > { %3599 = vmatpush3.bf16.msra.mxu0 %v427_v9  ;;  %3590 = vmatprep.mubr.msk.bf16.mxu1 %vm208_vm1, %v3196_v15  ;;  %v509_v23 = vshll.u32 %v3196_v15, 16  ;;  %v631_v25 = vrot.slane %v629_v18, 1  ;;  %v507_v31 = vshrl.u32 %v3196_v15, 16  ;;  %vm506_vm2 = vsmask.f32 7424  ;;  %s3857_s20 = smul.u32 28, %s4708_s13 }
  0x15   : > { %3835 = vmatprep.subr.msk.bf16.mxu0 %vm221_vm0, %v3227_v11  ;;  %3600 = vmatprep.mubr.msk.bf16.mxu0 %vm208_vm1, %v3212_v20  ;;  %v3882_v39 = vld [vmem:[%s3981_s23 + $0x38] ss:$0 sps:$4 sm:$0x33]   ;;  %v515_v41 = vrot.slane %v513_v33, 1  ;;  %v640_v42 = vshll.u32 %v3989_v7, 16  ;;  %v637_v44 = vshrl.u32 %v3992_v8, 16 }
  0x16   : > { %v511_v32 = vrot.slane %v509_v23, 1  ;;  %v632_v37 = vor.u32 %v631_v25, %v627_v24  ;;  %v3881_v43 = vld [vmem:[%s3981_s23 + $0x18] ss:$0 sps:$4 sm:$0x33]   ;;  %v520_v47 = vshll.u32 %v4035_v29, 16  ;;  %v644_v48 = vshrl.u32 %v3989_v7, 16  ;;  %s4677_s22 = scalar_lea.vmem %s4704_s3, %s3857_s20 }
  0x17   : > { %v3879_v45 = vld [vmem:[%s3981_s23 + $0x18] ss:$0 sps:$4 sm:$0x11]   ;;  %v648_v49 = vshll.u32 %v3882_v39, 16  ;;  %v517_v50 = vshrl.u32 %v4030_v26, 16  ;;  %v524_v51 = vshrl.u32 %v4035_v29, 16  ;;  %v639_v55 = vor.u32 %v637_v44, %v635_v38 }
  0x18   : > { %v512_v40 = vor.u32 %v511_v32, %v507_v31  ;;  %v636_v46 = vsel %vm506_vm2, %v632_v37, %v635_v38  ;;  %v642_v53 = vrot.slane %v640_v42, 1  ;;  %v528_v54 = vshll.u32 %v3881_v43, 16  ;;  %v3282_v2 = vld [vmem:[%s4702_s1 + $0x8] sm:$0x1]  ;;  %v3249_v9 = vld [vmem:[%s3981_s23 + $0x80] sm:$0xf] }
  0x19   : > { %3591 = vmatmul.mubr.msk.bf16.vlgmr.msra.gmra.mxu1 %vm208_vm1, %v4030_v26  ;;  %v522_v56 = vrot.slane %v520_v47, 1  ;;  %v650_v58 = vrot.slane %v648_v49, 1  ;;  %v519_v59 = vor.u32 %v517_v50, %v515_v41  ;;  %v782_v3 = vsel %vm221_vm0, %v3240_v35, 0  ;;  %v3272_v10 = vld [vmem:[%s4702_s1 + $0x7] sm:$0x1]  ;;  %v4123_v24 = vld [vmem:[%s3981_s23 + $0x68] sm:$0xff]  }
  0x1a   : > { %3609 = vmatpush3.bf16.msra.mxu1 %v548_v28  ;;  %3594 = vmatprep.mubr.msk.bf16.mxu1 %vm208_vm1, %v4035_v29  ;;  %v516_v52 = vsel %vm506_vm2, %v512_v40, %v515_v41  ;;  %v646_v57 = vor.u32 %v644_v48, %v642_v53  ;;  %v530_v61 = vrot.slane %v528_v54, 1  ;;  %v643_v62 = vsel %vm506_vm2, %v639_v55, %v642_v53  ;;  %v4104_v12 = vld [vmem:[%s3981_s23 + $0x84] sm:$0xf]  ;;  %v3233_v15 = vld [vmem:[%s3981_s23 + $0x60] sm:$0xf]  ;;  %v4126_v25 = vld [vmem:[%s3981_s23 + $0x88] sm:$0xff]  }
  0x1b   : > { %3601 = vmatmul.mubr.msk.bf16.vlgmr.msra.gmra.mxu0 %vm208_vm1, %v4023_v21  ;;  %3836 = vmatprep.subr.msk.bf16.mxu1 %vm221_vm0, %v3240_v35  ;;  %v526_v60 = vor.u32 %v524_v51, %v522_v56  ;;  %v523_v1 = vsel %vm506_vm2, %v519_v59, %v522_v56  ;;  %v652_v6 = vshrl.u32 %v3882_v39, 16  ;;  %v532_v11 = vshrl.u32 %v3881_v43, 16  ;;  %v4110_v16 = vld [vmem:[%s3981_s23 + $0x64] sm:$0xf]  ;;  %v4130_v28 = vld [vmem:[%s3981_s23 + $0x90] sm:$0xff]  }
  0x1c   : > { %3619 = vmatpush3.bf16.msra.mxu0 %v668_v27  ;;  %3604 = vmatprep.mubr.msk.bf16.mxu0 %vm208_vm1, %v4027_v22  ;;  %v651_v0 = vsel %vm506_vm2, %v646_v57, %v650_v58  ;;  %v4114_v17 = vcombine.low %v3249_v9, %v4104_v12  ;;  %v3241_v20 = vcombine.low %v3233_v15, %v4110_v16  ;;  %v1130_v27 = vsel %vm221_vm0, %v3282_v2, 0  ;;  %v4134_v35 = vld [vmem:[%s3981_s23 + $0x70] sm:$0xff]   ;;  %v3289_v38 = vld [vmem:[%s4702_s1 + $0x9] sm:$0x1]  ;;  %v1905_v43 = vld [vmem:[%s3981_s23] sm:$0xc] }
  0x1d   : > { %3837 = vmatprep.subr.msk.bf16.mxu0 %vm221_vm0, %v3256_v30  ;;  %v531_v4 = vsel %vm506_vm2, %v526_v60, %v530_v61  ;;  %v654_v13 = vor.u32 %v652_v6, %v650_v58  ;;  %v534_v18 = vor.u32 %v532_v11, %v530_v61  ;;  %v1095_v32 = vshll.u32 %v4123_v24, 16  ;;  %v4153_v41 = vld [vmem:[%s3981_s23 + $0x78] ss:$0 sps:$4 sm:$0x33]   ;;  %v4161_v49 = vld [vmem:[%s3981_s23 + $0xa4] sm:$0xf] }
  0x1e   : > { %v1091_v23 = vshll.u32 %v3241_v20, 16  ;;  %v1089_v30 = vshrl.u32 %v3241_v20, 16  ;;  %v1010_v37 = vsel %vm221_vm0, %v3272_v10, 0  ;;  %v3891_v53 = vld [vmem:[%s3981_s23 + $0x78] ss:$0 sps:$4 sm:$0x11]   ;;  %v3358_v59 = vcombine.low %v1905_v43, %v4007_v14 }
  0x1f   : > { %v1097_v40 = vrot.slane %v1095_v32, 1  ;;  %v1099_v54 = vshrl.u32 %v4123_v24, 16  ;;  %v3373_v55 = vld [vmem:[%s3981_s23 + $0x40] sm:$0xc]  ;;  %v1106_v57 = vshrl.u32 %v4134_v35, 16  ;;  %v1110_v58 = vshll.u32 %v4153_v41, 16 }
  0x20   : > { %v1093_v31 = vrot.slane %v1091_v23, 1  ;;  %v2174_v60 = vshrl.u32 %v4027_v22, 16  ;;  %v1211_v6 = vshll.u32 %v4114_v17, 16  ;;  %v1917_v9 = vshrl.u32 %v3358_v59, 16 }
  0x21   : > { %3595 = vmatmul.mubr.msk.bf16.gmra.mxu1 %vm208_vm1, %v3879_v45  ;;  %v3892_v45 = vld [vmem:[%s3981_s23 + $0x98] ss:$0 sps:$4 sm:$0x11]   ;;  %v1924_v11 = vrot.slane %v517_v50, 2  ;;  %v1209_v15 = vshrl.u32 %v4114_v17, 16  ;;  %v1215_v23 = vshll.u32 %v4126_v25, 16 }
  0x22   : > { %3610 = vmatprep.mubr.msk.bf16.mxu1 %vm208_vm1, %v516_v52  ;;  %v1094_v39 = vor.u32 %v1093_v31, %v1089_v30  ;;  %v1102_v52 = vshll.u32 %v4134_v35, 16  ;;  %v4202_v31 = vld [vmem:[%s3981_s23 + $0xa8] sm:$0xff]   ;;  %vm1915_vm3 = vsmask.f32 5376  ;;  %v1250_v43 = vsel %vm221_vm0, %v3289_v38, 0 }
  0x23   : > { %3605 = vmatmul.mubr.msk.bf16.gmra.mxu0 %vm208_vm1, %v3880_v36  ;;  %v3302_v36 = vld [vmem:[%s4702_s1 + $0xa] sm:$0x1]  ;;  %vm3109_vm5 = vcmask 60416   ;;  %vm3116_vm12 = vcmask 57344  }
  0x24   : > { %3620 = vmatprep.mubr.msk.bf16.mxu0 %vm208_vm1, %v636_v46  ;;  %v3265_v46 = vld [vmem:[%s3981_s23 + $0xa0] sm:$0xf]  ;;  %v1098_v56 = vsel %vm506_vm2, %v1094_v39, %v1097_v40  ;;  %v2045_v39 = vrot.slane %v637_v44, 2 }
  0x25   : > { %v3273_v61 = vcombine.low %v3265_v46, %v4161_v49  ;;  %v1929_v46 = vrot.slane %v520_v47, 3 }
  0x29   : > { %3611 = vmatmul.mubr.msk.bf16.vlgmr.msra.gmra.mxu1 %vm208_vm1, %v523_v1  ;;  %v1364_v1 = vsel %vm221_vm0, %v3302_v36, 0 }
  0x2a   : > { %3629 = vmatpush3.bf16.msra.mxu1 %v782_v3  ;;  %3614 = vmatprep.mubr.msk.bf16.mxu1 %vm208_vm1, %v531_v4  ;;  %v1112_v4 = vrot.slane %v1110_v58, 1 }
  0x2b   : > { %3621 = vmatmul.mubr.msk.bf16.vlgmr.msra.gmra.mxu0 %vm208_vm1, %v643_v62  ;;  %3838 = vmatprep.subr.msk.bf16.mxu1 %vm221_vm0, %v3272_v10  ;;  %v1104_v62 = vrot.slane %v1102_v52, 1  ;;  %v1920_v10 = vshll.u32 %v3358_v59, 16  ;;  %v3898_v59 = vld [vmem:[%s3981_s23 + $0xb8] ss:$0 sps:$4 sm:$0x11]  }
  0x2c   : > { %3639 = vmatpush3.bf16.msra.mxu0 %v896_v63  ;;  %3624 = vmatprep.mubr.msk.bf16.mxu0 %vm208_vm1, %v651_v0  ;;  %v4178_v63 = vcombine.low %v3373_v55, %v4016_v19  ;;  %v1101_v0 = vor.u32 %v1099_v54, %v1097_v40  ;;  %v2176_v19 = vrot.slane %v2174_v60, 2  ;;  %v2046_v40 = vrot.slane %v633_v34, 3  ;;  %v4228_v34 = vld [vmem:[%s4702_s1 + $0xb] sm:$0x1] }
  0x2d   : > { %3839 = vmatprep.subr.msk.bf16.mxu0 %vm221_vm0, %v3282_v2  ;;  %v2177_v2 = vshll.u32 %v4027_v22, 16  ;;  %v1108_v3 = vor.u32 %v1106_v57, %v1104_v62  ;;  %v1928_v22 = vrot.slane %v524_v51, 2  ;;  %v1922_v30 = vrot.slane %v1920_v10, 3 }
  0x2e   : > { %v2159_v55 = vshrl.u32 %v4178_v63, 16  ;;  %v1226_v10 = vshrl.u32 %v4130_v28, 16 }
  0x2f   : > { %v1113_v50 = vsel %vm506_vm2, %v1108_v3, %v1112_v4  ;;  %v4241_v47 = vor.u32 %v1929_v46, %v1928_v22  ;;  %v1222_v3 = vshll.u32 %v4130_v28, 16  ;;  %v4310_v46 = vld [vmem:[%s3981_s23 + $0xd0] sm:$0xff]  }
  0x31   : > { %3615 = vmatmul.mubr.msk.bf16.gmra.mxu1 %vm208_vm1, %v534_v18  ;;  %v1925_v18 = vrot.slane %v513_v33, 3  ;;  %v4211_v33 = vld [vmem:[%s4702_s1 + $0xc] sm:$0x1] }
  0x32   : > { %3630 = vmatprep.mubr.msk.bf16.mxu1 %vm208_vm1, %v3241_v20  ;;  %v1105_v20 = vsel %vm506_vm2, %v1101_v0, %v1104_v62  ;;  %v4256_v62 = vld [vmem:[%s3981_s23 + $0x98] ss:$0 sps:$4 sm:$0x33]  }
  0x33   : > { %3625 = vmatmul.mubr.msk.bf16.gmra.mxu0 %vm208_vm1, %v654_v13  ;;  %v2049_v13 = vrot.slane %v644_v48, 2  ;;  %v1926_v51 = vor.u32 %v1925_v18, %v1924_v11  ;;  %v4206_v48 = vld [vmem:[%s3981_s23 + $0xb0] sm:$0xff]   ;;  %v2169_v11 = vshll.u32 %v4023_v21, 16  ;;  %v2285_v18 = vrot.slane %v4030_v26, 3 }
  0x34   : > { %3640 = vmatprep.mubr.msk.bf16.mxu0 %vm208_vm1, %v4114_v17 }
  0x35   : > { %v4260_v0 = vsel %vm1915_vm3, %v1926_v51, %v4241_v47 }
  0x39   : > { %3631 = vmatmul.mubr.msk.bf16.vlgmr.msra.gmra.mxu1 %vm208_vm1, %v4123_v24 }
  0x3a   : > { %3649 = vmatpush3.bf16.msra.mxu1 %v1010_v37  ;;  %3634 = vmatprep.mubr.msk.bf16.mxu1 %vm208_vm1, %v4134_v35  ;;  %v2179_v37 = vrot.slane %v2177_v2, 3  ;;  %v4268_v2 = vld [vmem:[%s3981_s23 + $0xc0] sm:$0xff]  }
  0x3b   : > { %3641 = vmatmul.mubr.msk.bf16.vlgmr.msra.gmra.mxu0 %vm208_vm1, %v4126_v25  ;;  %3840 = vmatprep.subr.msk.bf16.mxu1 %vm221_vm0, %v3289_v38  ;;  %v4233_v38 = vor.u32 %v2046_v40, %v2045_v39 }
  0x3c   : > { %3659 = vmatpush3.bf16.msra.mxu0 %v1130_v27  ;;  %3644 = vmatprep.mubr.msk.bf16.mxu0 %vm208_vm1, %v4130_v28  ;;  %v1919_v27 = vrot.slane %v1917_v9, 2  ;;  %v4249_v58 = vor.u32 %v2179_v37, %v2176_v19  ;;  %v2166_v19 = vshrl.u32 %v4023_v21, 16  ;;  %v1224_v21 = vrot.slane %v1222_v3, 1  ;;  %v4298_v37 = vld [vmem:[%s3981_s23 + $0xc8] sm:$0xff]  }
  0x3d   : > { %3841 = vmatprep.subr.msk.bf16.mxu0 %vm221_vm0, %v3302_v36  ;;  %v1213_v36 = vrot.slane %v1211_v6, 1  ;;  %v2162_v6 = vshll.u32 %v4178_v63, 16  ;;  %v1230_v63 = vshll.u32 %v4256_v62, 16 }
  0x3e   : > { %v1923_v17 = vor.u32 %v1922_v30, %v1919_v27  ;;  %v2287_v30 = vrot.slane %v4035_v29, 3 }
  0x3f   : > { %v1214_v7 = vor.u32 %v1213_v36, %v1209_v15  ;;  %v2168_v15 = vrot.slane %v2166_v19, 2  ;;  %v1232_v39 = vrot.slane %v1230_v63, 1 }
  0x40   : > { %v4231_v44 = vsel %vm1915_vm3, %v1923_v17, %v1926_v51  ;;  %v4292_v36 = vsel %vm2283_vm4, %v2285_v18, %v2287_v30  ;;  %v1228_v17 = vor.u32 %v1226_v10, %v1224_v21 }
  0x41   : > { %3635 = vmatmul.mubr.msk.bf16.gmra.mxu1 %vm208_vm1, %v3891_v53  ;;  %v2050_v53 = vrot.slane %v640_v42, 3  ;;  %v1217_v42 = vrot.slane %v1215_v23, 1 }
  0x42   : > { %3650 = vmatprep.mubr.msk.bf16.mxu1 %vm208_vm1, %v3273_v61  ;;  %v1219_v61 = vshrl.u32 %v4126_v25, 16 }
  0x43   : > { %3645 = vmatmul.mubr.msk.bf16.gmra.mxu0 %vm208_vm1, %v3892_v45  ;;  %v1114_v45 = vshrl.u32 %v4153_v41, 16  ;;  %v4243_v41 = vor.u32 %v2050_v53, %v2049_v13  ;;  %v1218_v9 = vsel %vm506_vm2, %v1214_v7, %v1217_v42  ;;  %v2164_v13 = vrot.slane %v2162_v6, 3  ;;  %v3413_v53 = vld [vmem:[%s3981_s23 + $0xa0] sm:$0xc] }
  0x44   : > { %3660 = vmatprep.mubr.msk.bf16.mxu0 %vm208_vm1, %v1098_v56  ;;  %v2277_v56 = vld [vmem:[%s3981_s23] sm:$0x8]  ;;  %v1221_v51 = vor.u32 %v1219_v61, %v1217_v42  ;;  %v1592_v7 = vsel %vm221_vm0, %v4211_v33, 0  ;;  %v2494_v42 = vrot.slane %v1099_v54, 2  ;;  %v1478_v54 = vsel %vm221_vm0, %v4228_v34, 0 }
  0x45   : > { %v1116_v60 = vor.u32 %v1114_v45, %v1112_v4  ;;  %v2161_v4 = vrot.slane %v2159_v55, 2  ;;  %v3383_v22 = vcombine.low %v2277_v56, %v4007_v14  ;;  %v2498_v45 = vrot.slane %v1106_v57, 2  ;;  %v3351_v57 = vld [vmem:[%s4702_s1 + $0xe] sm:$0x1] }
  0x46   : > { %v2495_v55 = vrot.slane %v1095_v32, 3  ;;  %v2744_v56 = vshrl.u32 %v4206_v48, 16  ;;  %v1233_v32 = vsel %vm506_vm2, %v1228_v17, %v1232_v39  ;;  %v3416_v6 = vcombine.low %v3413_v53, %v4161_v49 }
  0x47   : > { %v2284_v27 = vrot.slane %v3383_v22, 3  ;;  %v2165_v14 = vor.u32 %v2164_v13, %v2161_v4  ;;  %v2747_v4 = vshll.u32 %v4206_v48, 16  ;;  %v2615_v19 = vrot.slane %v1219_v61, 2  ;;  %v3903_v13 = vld [vmem:[%s3981_s23 + $0xd8] ss:$0 sps:$4 sm:$0x11]  }
  0x48   : > { %v2619_v22 = vrot.slane %v1226_v10, 2  ;;  %v2732_v63 = vshll.u32 %v3416_v6, 16  ;;  %v2620_v61 = vrot.slane %v1222_v3, 3 }
  0x49   : > { %3651 = vmatmul.mubr.msk.bf16.vlgmr.msra.gmra.mxu1 %vm208_vm1, %v4202_v31 }
  0x4a   : > { %3669 = vmatpush3.bf16.msra.mxu1 %v1250_v43  ;;  %3654 = vmatprep.mubr.msk.bf16.mxu1 %vm208_vm1, %v4206_v48 }
  0x4b   : > { %3661 = vmatmul.mubr.msk.bf16.vlgmr.msra.gmra.mxu0 %vm208_vm1, %v1105_v20  ;;  %3842 = vmatprep.subr.msk.bf16.mxu1 %vm221_vm0, %v4228_v34  ;;  %v2171_v20 = vrot.slane %v2169_v11, 3  ;;  %v1234_v34 = vshrl.u32 %v4256_v62, 16  ;;  %v2749_v11 = vrot.slane %v2747_v4, 3  ;;  %v3905_v62 = vld [vmem:[%s3981_s23 + $0x100] sm:$0xff]   ;;  %v2854_v4 = vrot.slane %v4123_v24, 3 }
  0x4c   : > { %3679 = vmatpush3.bf16.msra.mxu0 %v1364_v1  ;;  %3664 = vmatprep.mubr.msk.bf16.mxu0 %vm208_vm1, %v1113_v50  ;;  %v4265_v1 = vsel %vm1915_vm3, %v4233_v38, %v4243_v41  ;;  %v4287_v50 = vsel %vm2283_vm4, %v2284_v27, %v2285_v18  ;;  %v2729_v18 = vshrl.u32 %v3416_v6, 16  ;;  %v4706_v24 = vrot.slane %v4134_v35, 3 }
  0x4d   : > { %3843 = vmatprep.subr.msk.bf16.mxu0 %vm221_vm0, %v4211_v33  ;;  %v2172_v26 = vor.u32 %v2171_v20, %v2168_v15  ;;  %v4332_v33 = vor.u32 %v2495_v55, %v2494_v42  ;;  %v2616_v15 = vrot.slane %v1215_v23, 3  ;;  %v2736_v20 = vshrl.u32 %v4202_v31, 16  ;;  %v3906_v42 = vld [vmem:[%s3981_s23 + $0xe8] sm:$0xff]  }
  0x4e   : > { %v1236_v27 = vor.u32 %v1234_v34, %v1232_v39  ;;  %v3907_v55 = vld [vmem:[%s3981_s23 + $0x108] sm:$0xff]   ;;  %v2953_v34 = vrot.slane %v4126_v25, 3 }
  0x4f   : > { %v4301_v40 = vsel %vm1915_vm3, %v2165_v14, %v2172_v26  ;;  %v4305_v43 = vsel %vm1915_vm3, %v2172_v26, %v4249_v58  ;;  %v2739_v14 = vshll.u32 %v4202_v31, 16  ;;  %v4363_v10 = vor.u32 %v2616_v15, %v2615_v19 }
  0x50   : > { %v2731_v26 = vrot.slane %v2729_v18, 2  ;;  %v2738_v17 = vrot.slane %v2736_v20, 2  ;;  %v1671_v15 = vshrl.u32 %v4268_v2, 16  ;;  %v3357_v20 = vld [vmem:[%s4702_s1 + $0xf] sm:$0x1] }
  0x51   : > { %3655 = vmatmul.mubr.msk.bf16.gmra.mxu1 %vm208_vm1, %v3898_v59  ;;  %v1225_v59 = vsel %vm506_vm2, %v1221_v51, %v1224_v21  ;;  %v3904_v21 = vld [vmem:[%s3981_s23 + $0xe0] sm:$0xff]   ;;  %v2734_v51 = vrot.slane %v2732_v63, 3  ;;  %v2741_v23 = vrot.slane %v2739_v14, 3  ;;  %v1677_v63 = vshll.u32 %v4298_v37, 16 }
  0x52   : > { %3670 = vmatprep.mubr.msk.bf16.mxu1 %vm208_vm1, %v1218_v9  ;;  %v2746_v9 = vrot.slane %v2744_v56, 2  ;;  %v1793_v3 = vshll.u32 %v3904_v21, 16  ;;  %v1673_v56 = vshll.u32 %v4268_v2, 16  ;;  %v1791_v6 = vshrl.u32 %v3904_v21, 16 }
  0x53   : > { %3665 = vmatmul.mubr.msk.bf16.gmra.mxu0 %vm208_vm1, %v1116_v60  ;;  %v2499_v60 = vrot.slane %v1102_v52, 3  ;;  %v3344_v52 = vld [vmem:[%s4702_s1 + $0xd] sm:$0x1]  ;;  %v2735_v31 = vor.u32 %v2734_v51, %v2731_v26  ;;  %v2742_v53 = vor.u32 %v2741_v23, %v2738_v17  ;;  %v3911_v26 = vld [vmem:[%s3981_s23 + $0x118] ss:$0 sps:$4 sm:$0x11]  }
  0x54   : > { %3680 = vmatprep.mubr.msk.bf16.mxu0 %vm208_vm1, %v4268_v2  ;;  %v4368_v39 = vor.u32 %v2749_v11, %v2746_v9  ;;  %v1795_v19 = vrot.slane %v1793_v3, 1  ;;  %v1797_v9 = vshll.u32 %v3906_v42, 16  ;;  %v4705_v11 = vrot.slane %v4134_v35, 3 }
  0x55   : > { %v4340_v48 = vor.u32 %v2499_v60, %v2498_v45  ;;  %v4366_v45 = vor.u32 %v2620_v61, %v2619_v22  ;;  %v2955_v22 = vrot.slane %v4130_v28, 3  ;;  %v1675_v18 = vrot.slane %v1673_v56, 1  ;;  %v3913_v61 = vld [vmem:[%s3981_s23 + $0xf8] ss:$0 sps:$4 sm:$0x33]  }
  0x56   : > { %v4386_v60 = vsel %vm1915_vm3, %v2742_v53, %v4368_v39  ;;  %v1799_v14 = vrot.slane %v1797_v9, 1  ;;  %v1679_v23 = vrot.slane %v1677_v63, 1  ;;  %v1684_v3 = vshll.u32 %v4310_v46, 16  ;;  %v3910_v56 = vld [vmem:[%s3981_s23 + $0xf8] ss:$0 sps:$4 sm:$0x11]  }
  0x57   : > { %v4349_v49 = vsel %vm1915_vm3, %v4332_v33, %v4340_v48  ;;  %v4414_v2 = vsel %vm2283_vm4, %v2953_v34, %v2955_v22  ;;  %v1676_v17 = vor.u32 %v1675_v18, %v1671_v15  ;;  %v1688_v15 = vshrl.u32 %v4310_v46, 16 }
  0x58   : > { %v1686_v63 = vrot.slane %v1684_v3, 1 }
  0x59   : > { %3671 = vmatmul.mubr.msk.bf16.vlgmr.msra.gmra.mxu1 %vm208_vm1, %v1225_v59  ;;  %v4382_v59 = vsel %vm1915_vm3, %v2735_v31, %v2742_v53  ;;  %v3912_v31 = vld [vmem:[%s3981_s23 + $0xd8] ss:$0 sps:$4 sm:$0x33]   ;;  %v1801_v53 = vshrl.u32 %v3906_v42, 16 }
  0x5a   : > { %3689 = vmatpush3.bf16.msra.mxu1 %v1478_v54  ;;  %3674 = vmatprep.mubr.msk.bf16.mxu1 %vm208_vm1, %v1233_v32  ;;  %v1832_v54 = vsel %vm221_vm0, %v3351_v57, 0  ;;  %v3909_v32 = vld [vmem:[%s3981_s23 + $0x110] sm:$0xff]   ;;  %v1692_v18 = vshll.u32 %v3912_v31, 16 }
  0x5b   : > { %3681 = vmatmul.mubr.msk.bf16.vlgmr.msra.gmra.mxu0 %vm208_vm1, %v4298_v37  ;;  %3844 = vmatprep.subr.msk.bf16.mxu1 %vm221_vm0, %v3344_v52 }
  0x5c   : > { %3699 = vmatpush3.bf16.msra.mxu0 %v1592_v7  ;;  %3684 = vmatprep.mubr.msk.bf16.mxu0 %vm208_vm1, %v4310_v46  ;;  %v4375_v7 = vsel %vm1915_vm3, %v4363_v10, %v4366_v45 }
  0x5d   : > { %3845 = vmatprep.subr.msk.bf16.mxu0 %vm221_vm0, %v3351_v57  ;;  %v3366_v57 = vld [vmem:[%s4702_s1 + $0x10] sm:$0x1] }
  0x61   : > { %3675 = vmatmul.mubr.msk.bf16.gmra.mxu1 %vm208_vm1, %v1236_v27  ;;  %v1796_v27 = vor.u32 %v1795_v19, %v1791_v6  ;;  %v1812_v6 = vshll.u32 %v3913_v61, 16  ;;  %v1681_v19 = vshrl.u32 %v4298_v37, 16 }
  0x62   : > { %3690 = vmatprep.mubr.msk.bf16.mxu1 %vm208_vm1, %v3904_v21  ;;  %v3364_v21 = vld [vmem:[%s3981_s23 + $0x20] sm:$0xc] }
  0x63   : > { %3685 = vmatmul.mubr.msk.bf16.gmra.mxu0 %vm208_vm1, %v3903_v13  ;;  %v1712_v13 = vsel %vm221_vm0, %v3344_v52, 0  ;;  %v4407_v52 = vsel %vm2283_vm4, %v2854_v4, %v4705_v11  ;;  %v1803_v11 = vor.u32 %v1801_v53, %v1799_v14  ;;  %v1683_v37 = vor.u32 %v1681_v19, %v1679_v23 }
  0x64   : > { %3700 = vmatprep.mubr.msk.bf16.mxu0 %vm208_vm1, %v3905_v62  ;;  %v3908_v62 = vld [vmem:[%s3981_s23 + $0xf0] sm:$0xff]   ;;  %v1696_v19 = vshrl.u32 %v3912_v31, 16 }
  0x65   : > { %v1804_v51 = vshll.u32 %v3908_v62, 16 }
  0x67   : > { %v1806_v9 = vrot.slane %v1804_v51, 1  ;;  %v1694_v51 = vrot.slane %v1692_v18, 1 }
  0x69   : > { %3691 = vmatmul.mubr.msk.bf16.vlgmr.msra.gmra.mxu1 %vm208_vm1, %v3906_v42  ;;  %v1807_v46 = vsel %vm506_vm2, %v1803_v11, %v1806_v9 }
  0x6a   : > { %3709 = vmatpush3.bf16.msra.mxu1 %v1712_v13  ;;  %3694 = vmatprep.mubr.msk.bf16.mxu1 %vm208_vm1, %v3908_v62  ;;  %v1680_v13 = vsel %vm506_vm2, %v1676_v17, %v1679_v23  ;;  %v2075_v17 = vsel %vm221_vm0, %v3366_v57, 0  ;;  %v3382_v23 = vld [vmem:[%s4702_s1 + $0x12] sm:$0x1] }
  0x6b   : > { %3701 = vmatmul.mubr.msk.bf16.vlgmr.msra.gmra.mxu0 %vm208_vm1, %v3907_v55  ;;  %3846 = vmatprep.subr.msk.bf16.mxu1 %vm221_vm0, %v3357_v20  ;;  %v3367_v55 = vcombine.low %v3364_v21, %v3985_v5 }
  0x6c   : > { %3719 = vmatpush3.bf16.msra.mxu0 %v1832_v54  ;;  %3704 = vmatprep.mubr.msk.bf16.mxu0 %vm208_vm1, %v3909_v32  ;;  %v1800_v54 = vsel %vm506_vm2, %v1796_v27, %v1799_v14  ;;  %v1808_v32 = vshrl.u32 %v3908_v62, 16  ;;  %v1814_v62 = vrot.slane %v1812_v6, 1  ;;  %v3375_v6 = vld [vmem:[%s4702_s1 + $0x11] sm:$0x1] }
  0x6d   : > { %3847 = vmatprep.subr.msk.bf16.mxu0 %vm221_vm0, %v3366_v57  ;;  %v2038_v27 = vshrl.u32 %v3367_v55, 16  ;;  %v2041_v21 = vshll.u32 %v3367_v55, 16  ;;  %v1954_v55 = vsel %vm221_vm0, %v3357_v20, 0  ;;  %v4453_v57 = vld [vmem:[%s3981_s23 + $0x18] ss:$0 sps:$4 sm:$0xff]  }
  0x6e   : > { %v1810_v42 = vor.u32 %v1808_v32, %v1806_v9  ;;  %v1816_v32 = vshrl.u32 %v3913_v61, 16  ;;  %v1936_v18 = vshll.u32 %v4453_v57, 16 }
  0x6f   : > { %v2040_v3 = vrot.slane %v2038_v27, 2  ;;  %v2043_v53 = vrot.slane %v2041_v21, 3 }
  0x70   : > { %v1815_v14 = vsel %vm506_vm2, %v1810_v42, %v1814_v62  ;;  %v1818_v61 = vor.u32 %v1816_v32, %v1814_v62 }
  0x71   : > { %3695 = vmatmul.mubr.msk.bf16.gmra.mxu1 %vm208_vm1, %v3910_v56  ;;  %v1687_v56 = vsel %vm506_vm2, %v1683_v37, %v1686_v63  ;;  %v2044_v9 = vor.u32 %v2043_v53, %v2040_v3  ;;  %v1938_v37 = vrot.slane %v1936_v18, 3  ;;  %v3917_v3 = vld [vmem:[%s3981_s23 + $0x58] ss:$0 sps:$4 sm:$0xff]  }
  0x72   : > { %3710 = vmatprep.mubr.msk.bf16.mxu1 %vm208_vm1, %v1680_v13 }
  0x73   : > { %3705 = vmatmul.mubr.msk.bf16.gmra.mxu0 %vm208_vm1, %v3911_v26  ;;  %v1690_v26 = vor.u32 %v1688_v15, %v1686_v63  ;;  %v1933_v15 = vshrl.u32 %v4453_v57, 16  ;;  %v1698_v63 = vor.u32 %v1696_v19, %v1694_v51  ;;  %v2048_v31 = vsel %vm1915_vm3, %v2044_v9, %v4233_v38 }
  0x74   : > { %3720 = vmatprep.mubr.msk.bf16.mxu0 %vm208_vm1, %v1800_v54  ;;  %v4443_v54 = vld [vmem:[%s3981_s23 + $0x38] ss:$0 sps:$4 sm:$0xff]  }
  0x75   : > { %v1695_v11 = vsel %vm506_vm2, %v1690_v26, %v1694_v51  ;;  %v2054_v20 = vshrl.u32 %v4443_v54, 16  ;;  %v2057_v13 = vshll.u32 %v4443_v54, 16  ;;  %v1935_v21 = vrot.slane %v1933_v15, 2 }
  0x76   : > { %v2304_v51 = vsel %vm221_vm0, %v3382_v23, 0 }
  0x77   : > { %v2056_v42 = vrot.slane %v2054_v20, 2  ;;  %v2059_v27 = vrot.slane %v2057_v13, 3  ;;  %v1939_v26 = vor.u32 %v1938_v37, %v1935_v21  ;;  %v3924_v37 = vld [vmem:[%s3981_s23 + $0x30] sm:$0xff]  }
  0x79   : > { %3711 = vmatmul.mubr.msk.bf16.vlgmr.msra.gmra.mxu1 %vm208_vm1, %v1687_v56  ;;  %v2060_v62 = vor.u32 %v2059_v27, %v2056_v42 }
  0x7a   : > { %3729 = vmatpush3.bf16.msra.mxu1 %v1954_v55  ;;  %3714 = vmatprep.mubr.msk.bf16.mxu1 %vm208_vm1, %v1695_v11 }
  0x7b   : > { %3721 = vmatmul.mubr.msk.bf16.vlgmr.msra.gmra.mxu0 %vm208_vm1, %v1807_v46  ;;  %3848 = vmatprep.subr.msk.bf16.mxu1 %vm221_vm0, %v3375_v6  ;;  %v2061_v38 = vsel %vm1915_vm3, %v4243_v41, %v2060_v62  ;;  %v3397_v46 = vld [vmem:[%s4702_s1 + $0x14] sm:$0x1]  ;;  %v3395_v41 = vld [vmem:[%s3981_s23 + $0x60] sm:$0xc] }
  0x7c   : > { %3739 = vmatpush3.bf16.msra.mxu0 %v2075_v17  ;;  %3724 = vmatprep.mubr.msk.bf16.mxu0 %vm208_vm1, %v1815_v14  ;;  %v2204_v17 = vsel %vm221_vm0, %v3375_v6, 0  ;;  %v1940_v14 = vsel %vm1915_vm3, %v4241_v47, %v1939_v26  ;;  %v2183_v47 = vshrl.u32 %v3917_v3, 16  ;;  %v3398_v53 = vcombine.low %v3395_v41, %v4110_v16  ;;  %v3388_v6 = vld [vmem:[%s3981_s23 + $0x20] sm:$0x8] }
  0x7d   : > { %3849 = vmatprep.subr.msk.bf16.mxu0 %vm221_vm0, %v3382_v23  ;;  %v2524_v19 = vsel %vm221_vm0, %v3397_v46, 0  ;;  %v3390_v29 = vcombine.low %v3388_v6, %v3985_v5 }
  0x7e   : > { %v2185_v56 = vrot.slane %v2183_v47, 2  ;;  %v2487_v55 = vshrl.u32 %v3398_v53, 16  ;;  %v2490_v11 = vshll.u32 %v3398_v53, 16 }
  0x7f   : > { %v2383_v5 = vrot.slane %v3390_v29, 3 }
  0x80   : > { %v2489_v20 = vrot.slane %v2487_v55, 2  ;;  %v2492_v13 = vrot.slane %v2490_v11, 3 }
  0x81   : > { %3715 = vmatmul.mubr.msk.bf16.gmra.mxu1 %vm208_vm1, %v1698_v63  ;;  %v3404_v63 = vld [vmem:[%s3981_s23 + $0x80] sm:$0xc] }
  0x82   : > { %3730 = vmatprep.mubr.msk.bf16.mxu1 %vm208_vm1, %v4231_v44  ;;  %v3389_v44 = vld [vmem:[%s4702_s1 + $0x13] sm:$0x1]  ;;  %v2493_v15 = vor.u32 %v2492_v13, %v2489_v20  ;;  %v3407_v27 = vcombine.low %v3404_v63, %v4104_v12  ;;  %v3429_v20 = vld [vmem:[%s3981_s23 + $0x80] sm:$0x8] }
  0x83   : > { %3725 = vmatmul.mubr.msk.bf16.gmra.mxu0 %vm208_vm1, %v1818_v61 }
  0x84   : > { %3740 = vmatprep.mubr.msk.bf16.mxu0 %vm208_vm1, %v2048_v31 }
  0x89   : > { %3731 = vmatmul.mubr.msk.bf16.vlgmr.msra.gmra.mxu1 %vm208_vm1, %v4260_v0  ;;  %v2289_v0 = vrot.slane %v4453_v57, 3  ;;  %v3415_v57 = vld [vmem:[%s4702_s1 + $0x16] sm:$0x1] }
  0x8a   : > { %3749 = vmatpush3.bf16.msra.mxu1 %v2204_v17  ;;  %3734 = vmatprep.mubr.msk.bf16.mxu1 %vm208_vm1, %v1940_v14  ;;  %v3921_v17 = vld [vmem:[%s3981_s23 + $0xb8] ss:$0 sps:$4 sm:$0xff]  }
  0x8b   : > { %3741 = vmatmul.mubr.msk.bf16.vlgmr.msra.gmra.mxu0 %vm208_vm1, %v4265_v1  ;;  %3850 = vmatprep.subr.msk.bf16.mxu1 %vm221_vm0, %v3389_v44  ;;  %v2186_v1 = vshll.u32 %v3917_v3, 16  ;;  %v2290_v9 = vsel %vm2283_vm4, %v2287_v30, %v2289_v0  ;;  %v3406_v30 = vld [vmem:[%s4702_s1 + $0x15] sm:$0x1]  ;;  %v3430_v3 = vld [vmem:[%s4702_s1 + $0x18] sm:$0x1]  ;;  %v2753_v53 = vshrl.u32 %v3921_v17, 16 }
  0x8c   : > { %3759 = vmatpush3.bf16.msra.mxu0 %v2304_v51  ;;  %3744 = vmatprep.mubr.msk.bf16.mxu0 %vm208_vm1, %v2061_v38  ;;  %v2611_v51 = vshll.u32 %v3407_v27, 16  ;;  %v2774_v38 = vsel %vm221_vm0, %v3415_v57, 0 }
  0x8d   : > { %3851 = vmatprep.subr.msk.bf16.mxu0 %vm221_vm0, %v3397_v46  ;;  %v2188_v23 = vrot.slane %v2186_v1, 3  ;;  %v3920_v1 = vld [vmem:[%s3981_s23 + $0x98] ss:$0 sps:$4 sm:$0xff]   ;;  %v2755_v55 = vrot.slane %v2753_v53, 2 }
  0x8e   : > { %v2613_v47 = vrot.slane %v2611_v51, 3 }
  0x8f   : > { %v2189_v32 = vor.u32 %v2188_v23, %v2185_v56  ;;  %v2624_v23 = vshrl.u32 %v3920_v1, 16 }
  0x91   : > { %3735 = vmatmul.mubr.msk.bf16.gmra.mxu1 %vm208_vm1, %v1939_v26  ;;  %v2190_v61 = vsel %vm1915_vm3, %v4249_v58, %v2189_v32  ;;  %v2384_v58 = vrot.slane %v3992_v8, 3  ;;  %v2608_v26 = vshrl.u32 %v3407_v27, 16  ;;  %v2626_v6 = vrot.slane %v2624_v23, 2 }
  0x92   : > { %3750 = vmatprep.mubr.msk.bf16.mxu1 %vm208_vm1, %v4301_v40  ;;  %v2403_v40 = vsel %vm221_vm0, %v3389_v44, 0  ;;  %v2645_v44 = vsel %vm221_vm0, %v3406_v30, 0 }
  0x93   : > { %3745 = vmatmul.mubr.msk.bf16.gmra.mxu0 %vm208_vm1, %v2060_v62  ;;  %v2385_v21 = vsel %vm2283_vm4, %v2383_v5, %v2384_v58  ;;  %v2386_v62 = vrot.slane %v3924_v37, 3  ;;  %v2610_v41 = vrot.slane %v2608_v26, 2 }
  0x94   : > { %3760 = vmatprep.mubr.msk.bf16.mxu0 %vm208_vm1, %v4287_v50  ;;  %v4510_v50 = vld [vmem:[%s3981_s23 + $0x78] ss:$0 sps:$4 sm:$0xff]  }
  0x95   : > { %v2506_v18 = vshll.u32 %v4510_v50, 16  ;;  %v2387_v14 = vsel %vm2283_vm4, %v2384_v58, %v2386_v62  ;;  %v2614_v56 = vor.u32 %v2613_v47, %v2610_v41 }
  0x97   : > { %v2508_v42 = vrot.slane %v2506_v18, 3 }
  0x99   : > { %3751 = vmatmul.mubr.msk.bf16.vlgmr.msra.gmra.mxu1 %vm208_vm1, %v4305_v43  ;;  %v2497_v43 = vsel %vm1915_vm3, %v2493_v15, %v4332_v33  ;;  %v2388_v33 = vrot.slane %v4443_v54, 3 }
  0x9a   : > { %3769 = vmatpush3.bf16.msra.mxu1 %v2403_v40  ;;  %3754 = vmatprep.mubr.msk.bf16.mxu1 %vm208_vm1, %v2190_v61  ;;  %v2972_v40 = vsel %vm221_vm0, %v3430_v3, 0 }
  0x9b   : > { %3761 = vmatmul.mubr.msk.bf16.vlgmr.msra.gmra.mxu0 %vm208_vm1, %v4292_v36  ;;  %v2503_v36 = vshrl.u32 %v4510_v50, 16  ;;  %3852 = vmatprep.subr.msk.bf16.mxu1 %vm221_vm0, %v3406_v30  ;;  %v2389_v54 = vsel %vm2283_vm4, %v2386_v62, %v2388_v33 }
  0x9c   : > { %3779 = vmatpush3.bf16.msra.mxu0 %v2524_v19  ;;  %3764 = vmatprep.mubr.msk.bf16.mxu0 %vm208_vm1, %v2290_v9 }
  0x9d   : > { %3853 = vmatprep.subr.msk.bf16.mxu0 %vm221_vm0, %v3415_v57  ;;  %v2505_v31 = vrot.slane %v2503_v36, 2  ;;  %v3422_v57 = vld [vmem:[%s3981_s23 + $0x60] sm:$0x8] }
  0x9e   : > { %v3424_v30 = vcombine.low %v3422_v57, %v4110_v16 }
  0x9f   : > { %v2509_v8 = vor.u32 %v2508_v42, %v2505_v31 }
  0xa1   : > { %3755 = vmatmul.mubr.msk.bf16.gmra.mxu1 %vm208_vm1, %v2189_v32  ;;  %v2510_v46 = vsel %vm1915_vm3, %v4340_v48, %v2509_v8  ;;  %v3423_v48 = vld [vmem:[%s4702_s1 + $0x17] sm:$0x1]  ;;  %v2618_v32 = vsel %vm1915_vm3, %v2614_v56, %v4363_v10  ;;  %v3431_v10 = vcombine.low %v3429_v20, %v4104_v12  ;;  %v2853_v12 = vrot.slane %v3424_v30, 3 }
  0xa2   : > { %3770 = vmatprep.mubr.msk.bf16.mxu1 %vm208_vm1, %v2385_v21 }
  0xa3   : > { %3765 = vmatmul.mubr.msk.bf16.gmra.mxu0 %vm208_vm1, %v2289_v0  ;;  %v2627_v0 = vshll.u32 %v3920_v1, 16  ;;  %v2952_v15 = vrot.slane %v3431_v10, 3  ;;  %v2855_v16 = vsel %vm2283_vm4, %v2853_v12, %v2854_v4 }
  0xa4   : > { %3780 = vmatprep.mubr.msk.bf16.mxu0 %vm208_vm1, %v2497_v43 }
  0xa5   : > { %v2629_v19 = vrot.slane %v2627_v0, 3 }
  0xa7   : > { %v2630_v13 = vor.u32 %v2629_v19, %v2626_v6 }
  0xa9   : > { %3771 = vmatmul.mubr.msk.bf16.vlgmr.msra.gmra.mxu1 %vm208_vm1, %v2387_v14  ;;  %v2631_v29 = vsel %vm1915_vm3, %v4366_v45, %v2630_v13  ;;  %v2957_v45 = vrot.slane %v3920_v1, 3 }
  0xaa   : > { %3789 = vmatpush3.bf16.msra.mxu1 %v2645_v44  ;;  %3774 = vmatprep.mubr.msk.bf16.mxu1 %vm208_vm1, %v2389_v54 }
  0xab   : > { %3781 = vmatmul.mubr.msk.bf16.vlgmr.msra.gmra.mxu0 %vm208_vm1, %v4349_v49  ;;  %v2756_v49 = vshll.u32 %v3921_v17, 16  ;;  %3854 = vmatprep.subr.msk.bf16.mxu1 %vm221_vm0, %v3423_v48  ;;  %v2958_v25 = vsel %vm2283_vm4, %v2955_v22, %v2957_v45 }
  0xac   : > { %3799 = vmatpush3.bf16.msra.mxu0 %v2774_v38  ;;  %3784 = vmatprep.mubr.msk.bf16.mxu0 %vm208_vm1, %v2510_v46 }
  0xad   : > { %3855 = vmatprep.subr.msk.bf16.mxu0 %vm221_vm0, %v3430_v3  ;;  %v2758_v11 = vrot.slane %v2756_v49, 3 }
  0xaf   : > { %v2759_v9 = vor.u32 %v2758_v11, %v2755_v55 }
  0xb1   : > { %3775 = vmatmul.mubr.msk.bf16.gmra.mxu1 %vm208_vm1, %v2388_v33  ;;  %v2760_v61 = vsel %vm1915_vm3, %v4368_v39, %v2759_v9  ;;  %v2954_v39 = vsel %vm2283_vm4, %v2952_v15, %v2953_v34 }
  0xb2   : > { %3790 = vmatprep.mubr.msk.bf16.mxu1 %vm208_vm1, %v2618_v32 }
  0xb3   : > { %3785 = vmatmul.mubr.msk.bf16.gmra.mxu0 %vm208_vm1, %v2509_v8 }
  0xb4   : > { %3800 = vmatprep.mubr.msk.bf16.mxu0 %vm208_vm1, %v4382_v59  ;;  %v2873_v59 = vsel %vm221_vm0, %v3423_v48, 0 }
  0xb9   : > { %3791 = vmatmul.mubr.msk.bf16.vlgmr.msra.gmra.mxu1 %vm208_vm1, %v4375_v7  ;;  %v2858_v7 = vrot.slane %v4510_v50, 3 }
  0xba   : > { %3809 = vmatpush3.bf16.msra.mxu1 %v2873_v59  ;;  %3794 = vmatprep.mubr.msk.bf16.mxu1 %vm208_vm1, %v2631_v29 }
  0xbb   : > { %3801 = vmatmul.mubr.msk.bf16.vlgmr.msra.gmra.mxu0 %vm208_vm1, %v4386_v60  ;;  %v2859_v60 = vsel %vm2283_vm4, %v4706_v24, %v2858_v7 }
  0xbc   : > { %3819 = vmatpush3.bf16.msra.mxu0 %v2972_v40  ;;  %3804 = vmatprep.mubr.msk.bf16.mxu0 %vm208_vm1, %v2760_v61 }
  0xc1   : > { %3795 = vmatmul.mubr.msk.bf16.gmra.mxu1 %vm208_vm1, %v2630_v13 }
  0xc2   : > { %3810 = vmatprep.mubr.msk.bf16.mxu1 %vm208_vm1, %v2855_v16 }
  0xc3   : > { %3805 = vmatmul.mubr.msk.bf16.gmra.mxu0 %vm208_vm1, %v2759_v9 }
  0xc4   : > { %3820 = vmatprep.mubr.msk.bf16.mxu0 %vm208_vm1, %v2954_v39 }
  0xc9   : > { %3811 = vmatmul.mubr.msk.bf16.vlgmr.msra.gmra.mxu1 %vm208_vm1, %v4407_v52 }
  0xca   : > { %3814 = vmatprep.mubr.msk.bf16.mxu1 %vm208_vm1, %v2859_v60 }
  0xcb   : > { %3821 = vmatmul.mubr.msk.bf16.vlgmr.msra.gmra.mxu0 %vm208_vm1, %v4414_v2 }
  0xcc   : > { %3824 = vmatprep.mubr.msk.bf16.mxu0 %vm208_vm1, %v2958_v25 }
  0xd1   : > { %v3586_v28 = vpop.f32.mrf.mxu1  ;;  %3815 = vmatmul.mubr.msk.bf16.gmra.mxu1 %vm208_vm1, %v2858_v7 }
  0xd3   : > { %v3582_v4 = vpop.f32.mrf.mxu0  ;;  %3825 = vmatmul.mubr.msk.bf16.gmra.mxu0 %vm208_vm1, %v2957_v45  ;;  %v275_v22 = vpop.f32.mrf.mxu1 }
  0xd5   : > { %v259_v34 = vpop.f32.mrf.mxu0  ;;  %v3587_v50 = vpop.f32.mrf.mxu1 }
  0xd7   : > { %v3583_v2 = vpop.f32.mrf.mxu0  ;;  %v278_v36 = vpop.f32.mrf.mxu1 }
  0xd9   : > { %v262_v35 = vpop.f32.mrf.mxu0  ;;  %v3592_v5 = vpop.f32.mrf.mxu1 }
  0xda   : > { %v365_v63 = vadd.f32 %v3592_v5, %v3582_v4 }
  0xdb   : > { %v3602_v18 = vpop.f32.mrf.mxu0  ;;  %v356_v43 = vpop.f32.mrf.mxu1 }
  0xdc   : > { %v495_v31 = vadd.f32 %v3602_v18, %v365_v63  ;;  %v357_v42 = vadd.f32 %v356_v43, %v259_v34 }
  0xdd   : > { %v463_v58 = vpop.f32.mrf.mxu0  ;;  %v3593_v27 = vpop.f32.mrf.mxu1 }
  0xde   : > { %v493_v8 = vadd.f32 %v463_v58, %v357_v42  ;;  %v368_v37 = vadd.f32 %v3593_v27, %v3583_v2 }
  0xdf   : > { %v3603_v52 = vpop.f32.mrf.mxu0  ;;  %v359_v62 = vpop.f32.mrf.mxu1 }
  0xe0   : > { %v496_v26 = vadd.f32 %v3603_v52, %v368_v37  ;;  %v360_v51 = vadd.f32 %v359_v62, %v262_v35 }
  0xe1   : > { %v466_v21 = vpop.f32.mrf.mxu0  ;;  %v3596_v38 = vpop.f32.mrf.mxu1 }
  0xe2   : > { %v494_v17 = vadd.f32 %v466_v21, %v360_v51  ;;  %v381_v14 = vadd.f32 %v3596_v38, %v3586_v28 }
  0xe3   : > { %v3606_v33 = vpop.f32.mrf.mxu0  ;;  %v372_v3 = vpop.f32.mrf.mxu1 }
  0xe4   : > { %v499_v54 = vadd.f32 %v3606_v33, %v381_v14  ;;  %v373_v41 = vadd.f32 %v372_v3, %v275_v22 }
  0xe5   : > { %v479_v46 = vpop.f32.mrf.mxu0  ;;  %v3597_v47 = vpop.f32.mrf.mxu1 }
  0xe6   : > { %v497_v48 = vadd.f32 %v479_v46, %v373_v41 }
  0xe7   : > { %v3607_v44 = vpop.f32.mrf.mxu0  ;;  %v375_v53 = vpop.f32.mrf.mxu1 }
  0xe8   : > { %v376_v56 = vadd.f32 %v375_v53, %v278_v36 }
  0xe9   : > { %v482_v1 = vpop.f32.mrf.mxu0  ;;  %v3612_v23 = vpop.f32.mrf.mxu1 }
  0xea   : > { %v498_v55 = vadd.f32 %v482_v1, %v376_v56  ;;  %v616_v11 = vadd.f32 %v3612_v23, %v495_v31 }
  0xeb   : > { %v3622_v49 = vpop.f32.mrf.mxu0  ;;  %v584_v32 = vpop.f32.mrf.mxu1 }
  0xec   : > { %v736_v19 = vadd.f32 %v3622_v49, %v616_v11  ;;  %v614_v9 = vadd.f32 %v584_v32, %v493_v8 }
  0xed   : > { %v704_v0 = vpop.f32.mrf.mxu0  ;;  %v3613_v20 = vpop.f32.mrf.mxu1 }
  0xee   : > { %v734_v57 = vadd.f32 %v704_v0, %v614_v9  ;;  %v617_v40 = vadd.f32 %v3613_v20, %v496_v26 }
  0xef   : > { %v3623_v6 = vpop.f32.mrf.mxu0  ;;  %v587_v61 = vpop.f32.mrf.mxu1 }
  0xf0   : > { %v737_v59 = vadd.f32 %v3623_v6, %v617_v40  ;;  %v615_v29 = vadd.f32 %v587_v61, %v494_v17 }
  0xf1   : > { %v707_v13 = vpop.f32.mrf.mxu0  ;;  %v3616_v30 = vpop.f32.mrf.mxu1 }
  0xf2   : > { %v735_v12 = vadd.f32 %v707_v13, %v615_v29  ;;  %v620_v39 = vadd.f32 %v3616_v30, %v499_v54 }
  0xf3   : > { %v3626_v10 = vpop.f32.mrf.mxu0  ;;  %v600_v16 = vpop.f32.mrf.mxu1 }
  0xf4   : > { %v740_v7 = vadd.f32 %v3626_v10, %v620_v39  ;;  %v618_v25 = vadd.f32 %v600_v16, %v497_v48 }
  0xf5   : > { %v720_v15 = vpop.f32.mrf.mxu0  ;;  %v3617_v24 = vpop.f32.mrf.mxu1 }
  0xf6   : > { %v738_v4 = vadd.f32 %v720_v15, %v618_v25 }
  0xf7   : > { %v3627_v45 = vpop.f32.mrf.mxu0  ;;  %v603_v28 = vpop.f32.mrf.mxu1 }
  0xf8   : > { %v619_v22 = vadd.f32 %v603_v28, %v498_v55 }
  0xf9   : > { %v723_v60 = vpop.f32.mrf.mxu0  ;;  %v3632_v2 = vpop.f32.mrf.mxu1 }
  0xfa   : > { %v739_v35 = vadd.f32 %v723_v60, %v619_v22  ;;  %v850_v36 = vadd.f32 %v3632_v2, %v736_v19 }
  0xfb   : > { %v3642_v34 = vpop.f32.mrf.mxu0  ;;  %v818_v18 = vpop.f32.mrf.mxu1 }
  0xfc   : > { %v964_v58 = vadd.f32 %v3642_v34, %v850_v36  ;;  %v848_v63 = vadd.f32 %v818_v18, %v734_v57 }
  0xfd   : > { %v932_v50 = vpop.f32.mrf.mxu0  ;;  %v3633_v43 = vpop.f32.mrf.mxu1 }
  0xfe   : > { %v962_v31 = vadd.f32 %v932_v50, %v848_v63  ;;  %v851_v42 = vadd.f32 %v3633_v43, %v737_v59 }
  0xff   : > { %v3643_v5 = vpop.f32.mrf.mxu0  ;;  %v821_v27 = vpop.f32.mrf.mxu1 }
 0x100   : > { %v965_v8 = vadd.f32 %v3643_v5, %v851_v42  ;;  %v849_v37 = vadd.f32 %v821_v27, %v735_v12 }
 0x101   : > { %v935_v52 = vpop.f32.mrf.mxu0  ;;  %v3636_v62 = vpop.f32.mrf.mxu1 }
 0x102   : > { %v963_v26 = vadd.f32 %v935_v52, %v849_v37  ;;  %v854_v51 = vadd.f32 %v3636_v62, %v740_v7 }
 0x103   : > { %v3646_v21 = vpop.f32.mrf.mxu0  ;;  %v834_v38 = vpop.f32.mrf.mxu1 }
 0x104   : > { %v968_v17 = vadd.f32 %v3646_v21, %v854_v51  ;;  %v852_v14 = vadd.f32 %v834_v38, %v738_v4 }
 0x105   : > { %v948_v33 = vpop.f32.mrf.mxu0  ;;  %v3637_v3 = vpop.f32.mrf.mxu1 }
 0x106   : > { %v966_v54 = vadd.f32 %v948_v33, %v852_v14 }
 0x107   : > { %v3647_v46 = vpop.f32.mrf.mxu0  ;;  %v837_v41 = vpop.f32.mrf.mxu1 }
 0x108   : > { %v853_v1 = vadd.f32 %v837_v41, %v739_v35 }
 0x109   : > { %v951_v44 = vpop.f32.mrf.mxu0  ;;  %v3652_v48 = vpop.f32.mrf.mxu1 }
 0x10a   : > { %v967_v49 = vadd.f32 %v951_v44, %v853_v1  ;;  %v1078_v56 = vadd.f32 %v3652_v48, %v964_v58 }
 0x10b   : > { %v3662_v47 = vpop.f32.mrf.mxu0  ;;  %v1046_v23 = vpop.f32.mrf.mxu1 }
 0x10c   : > { %v1198_v55 = vadd.f32 %v3662_v47, %v1078_v56  ;;  %v1076_v11 = vadd.f32 %v1046_v23, %v962_v31 }
 0x10d   : > { %v1166_v53 = vpop.f32.mrf.mxu0  ;;  %v3653_v32 = vpop.f32.mrf.mxu1 }
 0x10e   : > { %v1196_v19 = vadd.f32 %v1166_v53, %v1076_v11  ;;  %v1079_v9 = vadd.f32 %v3653_v32, %v965_v8 }
 0x10f   : > { %v3663_v0 = vpop.f32.mrf.mxu0  ;;  %v1049_v20 = vpop.f32.mrf.mxu1 }
 0x110   : > { %v1199_v57 = vadd.f32 %v3663_v0, %v1079_v9  ;;  %v1077_v40 = vadd.f32 %v1049_v20, %v963_v26 }
 0x111   : > { %v1169_v6 = vpop.f32.mrf.mxu0  ;;  %v3656_v61 = vpop.f32.mrf.mxu1 }
 0x112   : > { %v1197_v59 = vadd.f32 %v1169_v6, %v1077_v40  ;;  %v1082_v29 = vadd.f32 %v3656_v61, %v968_v17 }
 0x113   : > { %v3666_v13 = vpop.f32.mrf.mxu0  ;;  %v1062_v30 = vpop.f32.mrf.mxu1 }
 0x114   : > { %v1202_v12 = vadd.f32 %v3666_v13, %v1082_v29  ;;  %v1080_v39 = vadd.f32 %v1062_v30, %v966_v54 }
 0x115   : > { %v1182_v10 = vpop.f32.mrf.mxu0  ;;  %v3657_v16 = vpop.f32.mrf.mxu1 }
 0x116   : > { %v1200_v7 = vadd.f32 %v1182_v10, %v1080_v39 }
 0x117   : > { %v3667_v15 = vpop.f32.mrf.mxu0  ;;  %v1065_v25 = vpop.f32.mrf.mxu1 }
 0x118   : > { %v1081_v60 = vadd.f32 %v1065_v25, %v967_v49 }
 0x119   : > { %v1185_v45 = vpop.f32.mrf.mxu0  ;;  %v3672_v4 = vpop.f32.mrf.mxu1 }
 0x11a   : > { %v1201_v34 = vadd.f32 %v1185_v45, %v1081_v60  ;;  %v1318_v22 = vadd.f32 %v3672_v4, %v1198_v55 }
 0x11b   : > { %v3682_v24 = vpop.f32.mrf.mxu0  ;;  %v1286_v2 = vpop.f32.mrf.mxu1 }
 0x11c   : > { %v1432_v35 = vadd.f32 %v3682_v24, %v1318_v22  ;;  %v1316_v36 = vadd.f32 %v1286_v2, %v1196_v19 }
 0x11d   : > { %v1400_v28 = vpop.f32.mrf.mxu0  ;;  %v3673_v18 = vpop.f32.mrf.mxu1 }
 0x11e   : > { %v1430_v58 = vadd.f32 %v1400_v28, %v1316_v36  ;;  %v1319_v63 = vadd.f32 %v3673_v18, %v1199_v57 }
 0x11f   : > { %v3683_v50 = vpop.f32.mrf.mxu0  ;;  %v1289_v43 = vpop.f32.mrf.mxu1 }
 0x120   : > { %v1433_v31 = vadd.f32 %v3683_v50, %v1319_v63  ;;  %v1317_v42 = vadd.f32 %v1289_v43, %v1197_v59 }
 0x121   : > { %v1403_v5 = vpop.f32.mrf.mxu0  ;;  %v3676_v27 = vpop.f32.mrf.mxu1 }
 0x122   : > { %v1431_v8 = vadd.f32 %v1403_v5, %v1317_v42  ;;  %v1322_v37 = vadd.f32 %v3676_v27, %v1202_v12 }
 0x123   : > { %v3686_v52 = vpop.f32.mrf.mxu0  ;;  %v1302_v62 = vpop.f32.mrf.mxu1 }
 0x124   : > { %v1436_v26 = vadd.f32 %v3686_v52, %v1322_v37  ;;  %v1320_v51 = vadd.f32 %v1302_v62, %v1200_v7 }
 0x125   : > { %v1416_v21 = vpop.f32.mrf.mxu0  ;;  %v3677_v38 = vpop.f32.mrf.mxu1 }
 0x126   : > { %v1434_v17 = vadd.f32 %v1416_v21, %v1320_v51 }
 0x127   : > { %v3687_v33 = vpop.f32.mrf.mxu0  ;;  %v1305_v14 = vpop.f32.mrf.mxu1 }
 0x128   : > { %v1321_v44 = vadd.f32 %v1305_v14, %v1201_v34 }
 0x129   : > { %v1419_v46 = vpop.f32.mrf.mxu0  ;;  %v3692_v54 = vpop.f32.mrf.mxu1 }
 0x12a   : > { %v1435_v47 = vadd.f32 %v1419_v46, %v1321_v44  ;;  %v1546_v1 = vadd.f32 %v3692_v54, %v1432_v35 }
 0x12b   : > { %v3702_v3 = vpop.f32.mrf.mxu0  ;;  %v1514_v48 = vpop.f32.mrf.mxu1 }
 0x12c   : > { %v1660_v49 = vadd.f32 %v3702_v3, %v1546_v1  ;;  %v1544_v56 = vadd.f32 %v1514_v48, %v1430_v58 }
 0x12d   : > { %v1628_v41 = vpop.f32.mrf.mxu0  ;;  %v3693_v23 = vpop.f32.mrf.mxu1 }
 0x12e   : > { %v1658_v55 = vadd.f32 %v1628_v41, %v1544_v56  ;;  %v1547_v11 = vadd.f32 %v3693_v23, %v1433_v31 }
 0x12f   : > { %v3703_v53 = vpop.f32.mrf.mxu0  ;;  %v1517_v32 = vpop.f32.mrf.mxu1 }
 0x130   : > { %v1661_v19 = vadd.f32 %v3703_v53, %v1547_v11  ;;  %v1545_v9 = vadd.f32 %v1517_v32, %v1431_v8 }
 0x131   : > { %v1631_v0 = vpop.f32.mrf.mxu0  ;;  %v3696_v20 = vpop.f32.mrf.mxu1 }
 0x132   : > { %v1659_v57 = vadd.f32 %v1631_v0, %v1545_v9  ;;  %v1550_v40 = vadd.f32 %v3696_v20, %v1436_v26 }
 0x133   : > { %v3706_v6 = vpop.f32.mrf.mxu0  ;;  %v1530_v61 = vpop.f32.mrf.mxu1 }
 0x134   : > { %v1664_v59 = vadd.f32 %v3706_v6, %v1550_v40  ;;  %v1548_v29 = vadd.f32 %v1530_v61, %v1434_v17 }
 0x135   : > { %v1644_v13 = vpop.f32.mrf.mxu0  ;;  %v3697_v30 = vpop.f32.mrf.mxu1 }
 0x136   : > { %v1662_v12 = vadd.f32 %v1644_v13, %v1548_v29 }
 0x137   : > { %v3707_v10 = vpop.f32.mrf.mxu0  ;;  %v1533_v39 = vpop.f32.mrf.mxu1 }
 0x138   : > { %v1549_v45 = vadd.f32 %v1533_v39, %v1435_v47 }
 0x139   : > { %v1647_v15 = vpop.f32.mrf.mxu0  ;;  %v3712_v7 = vpop.f32.mrf.mxu1 }
 0x13a   : > { %v1663_v24 = vadd.f32 %v1647_v15, %v1549_v45  ;;  %v1780_v60 = vadd.f32 %v3712_v7, %v1660_v49 }
 0x13b   : > { %v3722_v16 = vpop.f32.mrf.mxu0  ;;  %v1748_v4 = vpop.f32.mrf.mxu1 }
 0x13c   : > { %v4613_v34 = vadd.f32 %v3722_v16, %v1780_v60  ;;  %v1778_v22 = vadd.f32 %v1748_v4, %v1658_v55 }
 0x13d   : > { %v1868_v25 = vpop.f32.mrf.mxu0  ;;  %v3713_v2 = vpop.f32.mrf.mxu1 }
 0x13e   : > { %v4615_v35 = vadd.f32 %v1868_v25, %v1778_v22  ;;  %v1781_v36 = vadd.f32 %v3713_v2, %v1661_v19 }
 0x13f   : > { %v3723_v28 = vpop.f32.mrf.mxu0  ;;  %v1751_v18 = vpop.f32.mrf.mxu1 }
 0x140   : > { %v4617_v58 = vadd.f32 %v3723_v28, %v1781_v36  ;;  %v1779_v63 = vadd.f32 %v1751_v18, %v1659_v57 }
 0x141   : > { %v1871_v50 = vpop.f32.mrf.mxu0  ;;  %v3716_v43 = vpop.f32.mrf.mxu1 }
 0x142   : > { %v4619_v31 = vadd.f32 %v1871_v50, %v1779_v63  ;;  %v1784_v42 = vadd.f32 %v3716_v43, %v1664_v59 }
 0x143   : > { %v3726_v5 = vpop.f32.mrf.mxu0  ;;  %v1764_v27 = vpop.f32.mrf.mxu1 }
 0x144   : > { %v4621_v8 = vadd.f32 %v3726_v5, %v1784_v42  ;;  %v1782_v37 = vadd.f32 %v1764_v27, %v1662_v12 }
 0x145   : > { %v1884_v52 = vpop.f32.mrf.mxu0  ;;  %v3717_v62 = vpop.f32.mrf.mxu1 }
 0x146   : > { %v4623_v26 = vadd.f32 %v1884_v52, %v1782_v37 }
 0x147   : > { %v3727_v21 = vpop.f32.mrf.mxu0  ;;  %v1767_v51 = vpop.f32.mrf.mxu1 }
 0x148   : > { %v1783_v46 = vadd.f32 %v1767_v51, %v1663_v24 }
 0x149   : > { %v1887_v33 = vpop.f32.mrf.mxu0  ;;  %v3732_v17 = vpop.f32.mrf.mxu1 }
 0x14a   : > { %v4625_v3 = vadd.f32 %v1887_v33, %v1783_v46  ;;  %v2022_v36 = vadd.f32 %v3732_v17, %v4613_v34 }
 0x14b   : > { %v3742_v38 = vpop.f32.mrf.mxu0  ;;  %v1990_v44 = vpop.f32.mrf.mxu1 }
 0x14c   : > { %v2020_v63 = vadd.f32 %v1990_v44, %v4615_v35  ;;  %v2143_v42 = vadd.f32 %v3742_v38, %v2022_v36 }
 0x14d   : > { %v2111_v14 = vpop.f32.mrf.mxu0  ;;  %v3733_v41 = vpop.f32.mrf.mxu1 }
 0x14e   : > { %v2023_v27 = vadd.f32 %v3733_v41, %v4617_v58  ;;  %v2141_v62 = vadd.f32 %v2111_v14, %v2020_v63 }
 0x14f   : > { %v3743_v54 = vpop.f32.mrf.mxu0  ;;  %v1993_v1 = vpop.f32.mrf.mxu1 }
 0x150   : > { %v2021_v51 = vadd.f32 %v1993_v1, %v4619_v31 }
 0x151   : > { %v2114_v47 = vpop.f32.mrf.mxu0  ;;  %v3736_v53 = vpop.f32.mrf.mxu1 }
 0x152   : > { %v2026_v17 = vadd.f32 %v3736_v53, %v4621_v8  ;;  %v2142_v36 = vadd.f32 %v2114_v47, %v2021_v51 }
 0x153   : > { %v4627_v48 = vpop.f32.mrf.mxu0  ;;  %v2006_v56 = vpop.f32.mrf.mxu1 }
 0x154   : > { %v2024_v35 = vadd.f32 %v2006_v56, %v4623_v26 }
 0x155   : > { %v2127_v49 = vpop.f32.mrf.mxu0  ;;  %v3737_v0 = vpop.f32.mrf.mxu1 }
 0x156   : > { %v2144_v0 = vadd.f32 %v3743_v54, %v2023_v27  ;;  %v2145_v31 = vadd.f32 %v2127_v49, %v2024_v35 }
 0x157   : > { %v3747_v23 = vpop.f32.mrf.mxu0  ;;  %v2009_v11 = vpop.f32.mrf.mxu1 }
 0x158   : > { %v2025_v1 = vadd.f32 %v2009_v11, %v4625_v3 }
 0x159   : > { %v4629_v55 = vpop.f32.mrf.mxu0  ;;  %v3752_v6 = vpop.f32.mrf.mxu1 }
 0x15a   : > { %v2272_v33 = vadd.f32 %v3752_v6, %v2143_v42  ;;  %v2147_v6 = vadd.f32 %v4627_v48, %v2026_v17  ;;  %v2146_v42 = vadd.f32 %v4629_v55, %v2025_v1 }
 0x15b   : > { %v3762_v32 = vpop.f32.mrf.mxu0  ;;  %v2240_v9 = vpop.f32.mrf.mxu1 }
 0x15c   : > { %v2270_v34 = vadd.f32 %v2240_v9, %v2141_v62 }
 0x15d   : > { %v2340_v19 = vpop.f32.mrf.mxu0  ;;  %v3753_v13 = vpop.f32.mrf.mxu1 }
 0x15e   : > { %v2273_v38 = vadd.f32 %v3753_v13, %v2144_v0 }
 0x15f   : > { %v3763_v20 = vpop.f32.mrf.mxu0  ;;  %v2243_v40 = vpop.f32.mrf.mxu1 }
 0x160   : > { %v2271_v54 = vadd.f32 %v2243_v40, %v2142_v36  ;;  %v2373_v8 = vadd.f32 %v3763_v20, %v2273_v38 }
 0x161   : > { %v4631_v57 = vpop.f32.mrf.mxu0  ;;  %v3756_v10 = vpop.f32.mrf.mxu1 }
 0x162   : > { %v2276_v26 = vadd.f32 %v3756_v10, %v2147_v6 }
 0x163   : > { %v4633_v61 = vpop.f32.mrf.mxu0  ;;  %v2256_v29 = vpop.f32.mrf.mxu1 }
 0x164   : > { %v2274_v56 = vadd.f32 %v2256_v29, %v2145_v31  ;;  %v2376_v3 = vadd.f32 %v4633_v61, %v2276_v26 }
 0x165   : > { %v4635_v59 = vpop.f32.mrf.mxu0  ;;  %v3757_v15 = vpop.f32.mrf.mxu1 }
 0x166   : > { %v2372_v15 = vadd.f32 %v3762_v32, %v2272_v33  ;;  %v2374_v11 = vadd.f32 %v4635_v59, %v2274_v56 }
 0x167   : > { %v3767_v30 = vpop.f32.mrf.mxu0  ;;  %v2259_v39 = vpop.f32.mrf.mxu1 }
 0x168   : > { %v2275_v20 = vadd.f32 %v2259_v39, %v2146_v42 }
 0x169   : > { %v4637_v12 = vpop.f32.mrf.mxu0  ;;  %v3772_v45 = vpop.f32.mrf.mxu1 }
 0x16a   : > { %v2471_v14 = vadd.f32 %v3772_v45, %v2372_v15 }
 0x16b   : > { %v3782_v16 = vpop.f32.mrf.mxu0  ;;  %v2439_v25 = vpop.f32.mrf.mxu1 }
 0x16c   : > { %v2592_v13 = vadd.f32 %v3782_v16, %v2471_v14 }
 0x16d   : > { %v2560_v7 = vpop.f32.mrf.mxu0  ;;  %v3773_v60 = vpop.f32.mrf.mxu1 }
 0x16e   : > { %v2472_v47 = vadd.f32 %v3773_v60, %v2373_v8 }
 0x16f   : > { %v3783_v24 = vpop.f32.mrf.mxu0  ;;  %v2442_v28 = vpop.f32.mrf.mxu1 }
 0x171   : > { %v4639_v4 = vpop.f32.mrf.mxu0  ;;  %v3776_v2 = vpop.f32.mrf.mxu1 }
 0x172   : > { %v2475_v60 = vadd.f32 %v3776_v2, %v2376_v3 }
 0x173   : > { %v4641_v22 = vpop.f32.mrf.mxu0  ;;  %v2455_v18 = vpop.f32.mrf.mxu1 }
 0x174   : > { %v2473_v62 = vadd.f32 %v2455_v18, %v2374_v11  ;;  %v4668_v18 = vld [vmem:[%s4703_s2] ss:$0 sm:$0xff] }
 0x175   : > { %v4643_v50 = vpop.f32.mrf.mxu0  ;;  %v3777_v43 = vpop.f32.mrf.mxu1 }
 0x177   : > { %v3787_v5 = vpop.f32.mrf.mxu0  ;;  %v2458_v21 = vpop.f32.mrf.mxu1 }
 0x178   : > { %v2370_v5 = vadd.f32 %v2340_v19, %v2270_v34  ;;  %v2371_v19 = vadd.f32 %v4631_v57, %v2271_v54 }
 0x179   : > { %v4647_v52 = vpop.f32.mrf.mxu0  ;;  %v3792_v46 = vpop.f32.mrf.mxu1 }
 0x17a   : > { %v2469_v53 = vadd.f32 %v2439_v25, %v2370_v5  ;;  %v2713_v27 = vadd.f32 %v3792_v46, %v2592_v13  ;;  %v2470_v40 = vadd.f32 %v2442_v28, %v2371_v19  ;;  %v2593_v25 = vadd.f32 %v3783_v24, %v2472_v47 }
 0x17b   : > { %v3802_v37 = vpop.f32.mrf.mxu0  ;;  %v2681_v44 = vpop.f32.mrf.mxu1  ;;  %v2596_v28 = vadd.f32 %v4641_v22, %v2475_v60  ;;  %v2594_v24 = vadd.f32 %v4643_v50, %v2473_v62 }
 0x17c   : > { %v2590_v49 = vadd.f32 %v2560_v7, %v2469_v53  ;;  %v2842_v57 = vadd.f32 %v3802_v37, %v2713_v27  ;;  %v2375_v7 = vadd.f32 %v4637_v12, %v2275_v20  ;;  %v2591_v46 = vadd.f32 %v4639_v4, %v2470_v40 }
 0x17d   : > { %v2810_v23 = vpop.f32.mrf.mxu0  ;;  %v3793_v58 = vpop.f32.mrf.mxu1 }
 0x17e   : > { %v2711_v16 = vadd.f32 %v2681_v44, %v2590_v49  ;;  %v2714_v51 = vadd.f32 %v3793_v58, %v2593_v25  ;;  %v2474_v34 = vadd.f32 %v2458_v21, %v2375_v7 }
 0x17f   : > { %v3803_v30 = vpop.f32.mrf.mxu0  ;;  %v2684_v9 = vpop.f32.mrf.mxu1 }
 0x180   : > { %v2840_v59 = vadd.f32 %v2810_v23, %v2711_v16  ;;  %v2712_v2 = vadd.f32 %v2684_v9, %v2591_v46  ;;  %v2843_v17 = vadd.f32 %v3803_v30, %v2714_v51  ;;  %v2595_v36 = vadd.f32 %v4647_v52, %v2474_v34 }
 0x181   : > { %v2813_v41 = vpop.f32.mrf.mxu0  ;;  %v3796_v43 = vpop.f32.mrf.mxu1 }
 0x182   : > { %v2717_v44 = vadd.f32 %v3796_v43, %v2596_v28  ;;  %v2841_v58 = vadd.f32 %v2813_v41, %v2712_v2 }
 0x183   : > { %v3806_v63 = vpop.f32.mrf.mxu0  ;;  %v2697_v45 = vpop.f32.mrf.mxu1 }
 0x184   : > { %v2715_v23 = vadd.f32 %v2697_v45, %v2594_v24  ;;  %v2846_v1 = vadd.f32 %v3806_v63, %v2717_v44 }
 0x185   : > { %v2826_v32 = vpop.f32.mrf.mxu0  ;;  %v3797_v10 = vpop.f32.mrf.mxu1 }
 0x186   : > { %v2844_v54 = vadd.f32 %v2826_v32, %v2715_v23 }
 0x187   : > { %v3807_v48 = vpop.f32.mrf.mxu0  ;;  %v2700_v55 = vpop.f32.mrf.mxu1 }
 0x188   : > { %v2716_v9 = vadd.f32 %v2700_v55, %v2595_v36 }
 0x189   : > { %v4659_v29 = vpop.f32.mrf.mxu0  ;;  %v3812_v61 = vpop.f32.mrf.mxu1 }
 0x18a   : > { %v2941_v39 = vadd.f32 %v3812_v61, %v2842_v57  ;;  %v2845_v11 = vadd.f32 %v4659_v29, %v2716_v9 }
 0x18b   : > { %v3822_v33 = vpop.f32.mrf.mxu0  ;;  %v2909_v37 = vpop.f32.mrf.mxu1 }
 0x18c   : > { %v3040_v4 = vadd.f32 %v3822_v33, %v2941_v39  ;;  %v2939_v35 = vadd.f32 %v2909_v37, %v2840_v59 }
 0x18d   : > { %v3008_v0 = vpop.f32.mrf.mxu0  ;;  %v3813_v15 = vpop.f32.mrf.mxu1 }
 0x18e   : > { %v3054_v22 = vadd.f32 %v4668_v18, %v3040_v4  ;;  %v3038_v50 = vadd.f32 %v3008_v0, %v2939_v35  ;;  %v2942_v21 = vadd.f32 %v3813_v15, %v2843_v17 }
 0x18f   : > { %v3823_v12 = vpop.f32.mrf.mxu0  ;;  %v2912_v5 = vpop.f32.mrf.mxu1 }
 0x190   : > { %vm3061_vm6 = vcmp.gt.f32.partialorder %v3054_v22, 0.0  ;;  %v3068_v6 = vmul.f32 0.1, %v3054_v22  ;;  %v3052_v30 = vadd.f32 %v4668_v18, %v3038_v50  ;;  %v3041_v31 = vadd.f32 %v3823_v12, %v2942_v21 }
 0x191   : > { %v3011_v38 = vpop.f32.mrf.mxu0  ;;  %v2940_v8 = vadd.f32 %v2912_v5, %v2841_v58  ;;  %v3816_v53 = vpop.f32.mrf.mxu1 }
 0x192   : > { %v3075_v52 = vsel %vm3061_vm6, %v3054_v22, %v3068_v6  ;;  %vm3059_vm7 = vcmp.gt.f32.partialorder %v3052_v30, 0.0  ;;  %v3066_v41 = vmul.f32 0.1, %v3052_v30  ;;  %v3055_v56 = vadd.f32 %v4668_v18, %v3041_v31 }
 0x193   : > { %v3826_v14 = vpop.f32.mrf.mxu0  ;;  %v3448_v43 = vpack.c.bf16 %v3075_v52, %v3075_v52  ;;  %v3039_v13 = vadd.f32 %v3011_v38, %v2940_v8  ;;  %v2945_v63 = vadd.f32 %v3816_v53, %v2846_v1  ;;  %v2925_v32 = vpop.f32.mrf.mxu1 }
 0x194   : > { %v3073_v42 = vsel %vm3059_vm7, %v3052_v30, %v3066_v41  ;;  %vm3062_vm8 = vcmp.gt.f32.partialorder %v3055_v56, 0.0  ;;  %v3069_v19 = vmul.f32 0.1, %v3055_v56  ;;  %v2943_v45 = vadd.f32 %v2925_v32, %v2844_v54 }
 0x195   : > { %v3024_v26 = vpop.f32.mrf.mxu0  ;;  %3112 = vst.msk [vmem:[%s4677_s22 + $0x8] sm:$0xf] %vm3109_vm5, %v3448_v43  ;;  %v3446_v48 = vpack.c.bf16 %v3073_v42, %v3073_v42  ;;  %v3053_v49 = vadd.f32 %v4668_v18, %v3039_v13  ;;  %v3044_v27 = vadd.f32 %v3826_v14, %v2945_v63  ;;  %v3817_v3 = vpop.f32.mrf.mxu1 }
 0x196   : > { %v3076_v20 = vsel %vm3062_vm8, %v3055_v56, %v3069_v19  ;;  %v3042_v40 = vadd.f32 %v3024_v26, %v2943_v45 }
 0x197   : > { %v3827_v47 = vpop.f32.mrf.mxu0  ;;  %3110 = vst.msk [vmem:[%s4677_s22] sm:$0xf] %vm3109_vm5, %v3446_v48  ;;  %v3449_v10 = vpack.c.bf16 %v3076_v20, %v3076_v20  ;;  %vm3060_vm9 = vcmp.gt.f32.partialorder %v3053_v49, 0.0  ;;  %v3067_v25 = vmul.f32 0.1, %v3053_v49  ;;  %v3058_v16 = vadd.f32 %v4668_v18, %v3044_v27  ;;  %v2928_v60 = vpop.f32.mrf.mxu1 }
 0x198   : > { %v3056_v55 = vadd.f32 %v4668_v18, %v3042_v40  ;;  %v2944_v33 = vadd.f32 %v2928_v60, %v2845_v11 }
 0x199   : > { %v3027_v62 = vpop.f32.mrf.mxu0  ;;  %3113 = vst.msk [vmem:[%s4677_s22 + $0xc] sm:$0xf] %vm3109_vm5, %v3449_v10  ;;  %v3074_v57 = vsel %vm3060_vm9, %v3053_v49, %v3067_v25  ;;  %vm3065_vm10 = vcmp.gt.f32.partialorder %v3058_v16, 0.0  ;;  %v3072_v29 = vmul.f32 0.1, %v3058_v16 }
 0x19a   : > { %v3447_v51 = vpack.c.bf16 %v3074_v57, %v3074_v57  ;;  %vm3063_vm11 = vcmp.gt.f32.partialorder %v3056_v55, 0.0  ;;  %v3070_v7 = vmul.f32 0.1, %v3056_v55  ;;  %v3043_v46 = vadd.f32 %v3027_v62, %v2944_v33 }
 0x19b   : > { %v3079_v61 = vsel %vm3065_vm10, %v3058_v16, %v3072_v29 }
 0x19c   : > { %3111 = vst.msk [vmem:[%s4677_s22 + $0x4] sm:$0xf] %vm3109_vm5, %v3447_v51  ;;  %v3452_v0 = vpack.c.bf16 %v3079_v61, %v3079_v61  ;;  %v3077_v59 = vsel %vm3063_vm11, %v3056_v55, %v3070_v7  ;;  %v3057_v39 = vadd.f32 %v4668_v18, %v3043_v46 }
 0x19d   : > { %v3450_v28 = vpack.c.bf16 %v3077_v59, %v3077_v59 }
 0x19e   : > { %3117 = vst.msk [vmem:[%s4677_s22 + $0x18] sm:$0x1] %vm3116_vm12, %v3452_v0  ;;  %vm3064_vm13 = vcmp.gt.f32.partialorder %v3057_v39, 0.0  ;;  %v3071_v24 = vmul.f32 0.1, %v3057_v39 }
 0x19f   : > { %3114 = vst.msk [vmem:[%s4677_s22 + $0x10] sm:$0xf] %vm3109_vm5, %v3450_v28 }
 0x1a0   : > { %v3078_v34 = vsel %vm3064_vm13, %v3057_v39, %v3071_v24 }
 0x1a1   : > { %v3451_v2 = vpack.c.bf16 %v3078_v34, %v3078_v34 }
 0x1a3   : > { %3115 = vst.msk [vmem:[%s4677_s22 + $0x14] sm:$0xf] %vm3109_vm5, %v3451_v2 }
 0x1a4 PF: > { %s13_s12 = sadd.s32 1, %s3931_s12  }
 0x1a5   : > { %p10_p4 = scmp.ge.s32.totalorder %s13_s12, 4  }
 0x1a7   :  { %12 = sbr.rel (!%p10_p4) target bundleno = 1 (0x1), region = 94 }

// kernel: stft_discriminator_forward.9
= control target key start
LH: loop header
LB: loop body
LE: loop exit
PB: predicated region body
PF: predicated region fallthrough
CT: control target
= control target key end

     0   :  { %s2163_s12 = smov 0   ;;  %s2436_s0 = inlined_call_operand.vmem [shape: bf16[2,3,3,18,8], index: 0, kind: input, shape index: {}]   ;;  %s2437_s1 = inlined_call_operand.vmem [shape: bf16[25,8,16], index: 1, kind: input, shape index: {}]   ;;  %s2438_s2 = inlined_call_operand.vmem [shape: f32[1,16], index: 2, kind: input, shape index: {}]   ;;  %s2439_s3 = inlined_call_operand.vmem [shape: bf16[2,12,16], index: 3, kind: output, shape index: {}]  }
   0x1 LB: > { %s1773_s13 = sadd.s32 4294967295, %s2139_s12   ;;  %p1777_p0 = scmp.ge.s32.totalorder %s2139_s12, 1  ;;  %s2139_s12 = sphi %s2163_s12, %s13_s12  }
   0x2   : > { %p137_p1 = scmp.lt.s32.totalorder %s2139_s12, 3 }
   0x4   : > { %p138_p2 = pnand %p1777_p0, %p137_p1 }
   0x5   : > { %p161_p3 = scmp.lt.s32.totalorder (!%p138_p2), %s1773_s13, 1 }
   0x6   : > { %141 = sbr.rel (%p138_p2) target bundleno = 322 (0x142), region = 32 }
   0xb   : > { %v1783_v0 = vld [vmem:[%s2437_s1 + $0x4] sm:$0xf]  ;;  %vm189_vm0 = vcmask 1043456   ;;  %v174_v1 = vld [vmem:[%s2437_s1] sm:$0xf]  ;;  %v2141_v2 = vmov 0.0  }
   0xc   : > { %1947 = vmatprep.subr.bf16.mxu0 %v2141_v2  ;;  %v191_v3 = vsel %vm189_vm0, %v1783_v0, 0  ;;  %1953 = vmatprep.subr.bf16.mxu1 %v2141_v2  ;;  %v243_v4 = vsel %vm189_vm0, %v174_v1, 0  ;;  %vm2142_vm1 = vmmov 0   ;;  %s2441_s13 = smov (!%p161_p3, %s1773_s13), 1  ;;  %v1790_v5 = vld [vmem:[%s2437_s1 + $0x8] sm:$0xf] }
   0xd   : > { %1948 = vmatpush3.bf16.msra.mxu0 %v191_v3  ;;  %1954 = vmatpush3.bf16.msra.mxu1 %v243_v4  ;;  %s2097_s20 = smul.u32 108, %s2441_s13  ;;  %vm185_vm2 = vcmask 64512   ;;  %v300_v6 = vsel %vm189_vm0, %v1790_v5, 0  ;;  %v1793_v7 = vld [vmem:[%s2437_s1 + $0xc] sm:$0xf]  ;;  %vm1714_vm4 = vcmask 125952  }
   0xe   : > { %1949 = vmatprep.mubr.msk.bf16.mxu0 %vm2142_vm1, %v2141_v2  ;;  %1955 = vmatprep.mubr.msk.bf16.mxu1 %vm2142_vm1, %v2141_v2  ;;  %v362_v17 = vsel %vm189_vm0, %v1793_v7, 0  ;;  %v1797_v21 = vld [vmem:[%s2437_s1 + $0x10] sm:$0xf]  ;;  %v1802_v25 = vld [vmem:[%s2437_s1 + $0x14] sm:$0xf]  ;;  %vm1716_vm6 = vcmask 123904  }
   0xf   : > { %1959 = vmatprep.subr.bf16.mxu0 %v2141_v2  ;;  %1965 = vmatprep.subr.bf16.mxu1 %v2141_v2  ;;  %s2196_s23 = scalar_lea.vmem %s2436_s0, %s2097_s20  ;;  %v424_v27 = vsel %vm189_vm0, %v1797_v21, 0  ;;  %v483_v28 = vsel %vm189_vm0, %v1802_v25, 0  ;;  %v1807_v33 = vld [vmem:[%s2437_s1 + $0x18] sm:$0xf]  ;;  %v1812_v35 = vld [vmem:[%s2437_s1 + $0x1c] sm:$0xf] }
  0x10   : > { %v1781_v8 = vld [vmem:[%s2196_s23 + $0xc] sm:$0xf]  ;;  %v1782_v9 = vld [vmem:[%s2196_s23 + $0x10] sm:$0x3]  ;;  %v172_v12 = vld [vmem:[%s2196_s23] sm:$0xf] }
  0x11   : > { %v1796_v10 = vld [vmem:[%s2196_s23 + $0x10] sm:$0x7]  ;;  %v1784_v11 = vcombine.low %v1781_v8, %v1782_v9  ;;  %v173_v13 = vld [vmem:[%s2196_s23 + $0x4] sm:$0x3]  ;;  %v2112_v24 = vld [vmem:[%s2196_s23 + $0x18] sm:$0x3f]  }
  0x12   : > { %v345_v14 = vld [vmem:[%s2196_s23 + $0x4] sm:$0x7]  ;;  %v1786_v15 = vcombine.low %v172_v12, %v173_v13  ;;  %v1798_v18 = vcombine.low %v1781_v8, %v1796_v10  ;;  %v1801_v32 = vld [vmem:[%s2196_s23 + $0x28] sm:$0x3]  ;;  %v542_v38 = vsel %vm189_vm0, %v1807_v33, 0  ;;  %v601_v40 = vsel %vm189_vm0, %v1812_v35, 0 }
  0x13   : > { %v1794_v16 = vcombine.low %v172_v12, %v345_v14  ;;  %1950 = vmatmul.mubr.msk.bf16.vlgmr.msra.gmra.mxu0 %vm185_vm2, %v1784_v11  ;;  %v1800_v31 = vld [vmem:[%s2196_s23 + $0x24] sm:$0xf]  ;;  %v1815_v37 = vld [vmem:[%s2196_s23 + $0x28] sm:$0x7]  ;;  %v1819_v39 = vld [vmem:[%s2196_s23 + $0x34] sm:$0x7] }
  0x14   : > { %1956 = vmatmul.mubr.msk.bf16.vlgmr.msra.gmra.mxu1 %vm185_vm2, %v1786_v15  ;;  %1960 = vmatpush3.bf16.msra.mxu0 %v300_v6  ;;  %v416_v23 = vshll.u32 %v1798_v18, 16  ;;  %v414_v29 = vshrl.u32 %v1798_v18, 16  ;;  %v1803_v36 = vcombine.low %v1800_v31, %v1801_v32  ;;  %v1817_v41 = vcombine.low %v1800_v31, %v1815_v37  ;;  %v1805_v42 = vld [vmem:[%s2196_s23 + $0x30] sm:$0xf]  ;;  %v1806_v43 = vld [vmem:[%s2196_s23 + $0x34] sm:$0x3] }
  0x15   : > { %v352_v19 = vshrl.u32 %v1794_v16, 16  ;;  %v354_v20 = vshll.u32 %v1794_v16, 16  ;;  %1966 = vmatpush3.bf16.msra.mxu1 %v362_v17  ;;  %1961 = vmatprep.mubr.msk.bf16.mxu0 %vm2142_vm1, %v2141_v2  ;;  %v1821_v44 = vcombine.low %v1805_v42, %v1819_v39  ;;  %v1816_v45 = vld [vmem:[%s2437_s1 + $0x20] sm:$0xf]  ;;  %v1808_v46 = vcombine.low %v1805_v42, %v1806_v43  ;;  %v1820_v47 = vld [vmem:[%s2437_s1 + $0x24] sm:$0xf] }
  0x16   : > { %1967 = vmatprep.mubr.msk.bf16.mxu1 %vm2142_vm1, %v2141_v2  ;;  %1971 = vmatprep.subr.bf16.mxu0 %v2141_v2  ;;  %v418_v30 = vrot.slane %v416_v23, 1  ;;  %v655_v48 = vshll.u32 %v1817_v41, 16  ;;  %v2117_v49 = vld [vmem:[%s2196_s23 + $0x3c] sm:$0x3f]   ;;  %v663_v51 = vsel %vm189_vm0, %v1816_v45, 0  ;;  %v725_v52 = vsel %vm189_vm0, %v1820_v47, 0 }
  0x17   : > { %v356_v22 = vrot.slane %v354_v20, 1  ;;  %1977 = vmatprep.subr.bf16.mxu1 %v2141_v2  ;;  %v717_v50 = vshll.u32 %v1821_v44, 16  ;;  %v653_v53 = vshrl.u32 %v1817_v41, 16  ;;  %v715_v55 = vshrl.u32 %v1821_v44, 16  ;;  %v1825_v57 = vld [vmem:[%s2437_s1 + $0x28] sm:$0xf] }
  0x18   : > { %v419_v34 = vor.u32 %v418_v30, %v414_v29  ;;  %v657_v54 = vrot.slane %v655_v48, 1  ;;  %v1830_v59 = vld [vmem:[%s2437_s1 + $0x2c] sm:$0xf]  ;;  %v784_v61 = vsel %vm189_vm0, %v1825_v57, 0  ;;  %v1823_v0 = vld [vmem:[%s2196_s23 + $0x48] sm:$0xf] }
  0x19   : > { %v357_v26 = vor.u32 %v356_v22, %v352_v19  ;;  %v719_v56 = vrot.slane %v717_v50, 1  ;;  %v1838_v62 = vld [vmem:[%s2196_s23 + $0x4c] sm:$0x7]  ;;  %v843_v63 = vsel %vm189_vm0, %v1830_v59, 0  ;;  %v1828_v4 = vld [vmem:[%s2196_s23 + $0x54] sm:$0xf] }
  0x1a   : > { %v658_v58 = vor.u32 %v657_v54, %v653_v53  ;;  %v1824_v1 = vld [vmem:[%s2196_s23 + $0x4c] sm:$0x3]  ;;  %v1840_v3 = vcombine.low %v1823_v0, %v1838_v62  ;;  %v1829_v5 = vld [vmem:[%s2196_s23 + $0x58] sm:$0x3]  ;;  %v1835_v6 = vld [vmem:[%s2437_s1 + $0x30] sm:$0xf] }
  0x1b   : > { %1962 = vmatmul.mubr.msk.bf16.vlgmr.msra.gmra.mxu0 %vm185_vm2, %v2112_v24  ;;  %v720_v60 = vor.u32 %v719_v56, %v715_v55  ;;  %v1826_v7 = vcombine.low %v1823_v0, %v1824_v1  ;;  %v1839_v8 = vld [vmem:[%s2437_s1 + $0x34] sm:$0xf]  ;;  %v1831_v9 = vcombine.low %v1828_v4, %v1829_v5  ;;  %v1842_v10 = vld [vmem:[%s2196_s23 + $0x58] sm:$0x7]  ;;  %v902_v12 = vsel %vm189_vm0, %v1835_v6, 0  ;;  %s1894_s20 = sshll.u32 %s2441_s13, 3 }
  0x1c   : > { %1968 = vmatmul.mubr.msk.bf16.vlgmr.msra.gmra.mxu1 %vm185_vm2, %v357_v26  ;;  %1972 = vmatpush3.bf16.msra.mxu0 %v424_v27  ;;  %v956_v11 = vshll.u32 %v1840_v3, 16  ;;  %v1071_v13 = vld [vmem:[%s2196_s23] sm:$0xe]  ;;  %v2304_v14 = vld [vmem:[%s2196_s23 + $0x4] sm:$0xf]  ;;  %v964_v15 = vsel %vm189_vm0, %v1839_v8, 0  ;;  %v1844_v16 = vcombine.low %v1828_v4, %v1842_v10  ;;  %s170_s24 = scalar_lea.vmem %s2439_s3, %s1894_s20 }
  0x1d   : > { %1978 = vmatpush3.bf16.msra.mxu1 %v483_v28  ;;  %1973 = vmatprep.mubr.msk.bf16.mxu0 %vm2142_vm1, %v2141_v2  ;;  %v954_v17 = vshrl.u32 %v1840_v3, 16  ;;  %v1847_v19 = vcombine.low %v1071_v13, %v2304_v14  ;;  %v1843_v20 = vld [vmem:[%s2437_s1 + $0x38] sm:$0xf]  ;;  %v2122_v21 = vld [vmem:[%s2196_s23 + $0x60] sm:$0x3f]  }
  0x1e   : > { %1979 = vmatprep.mubr.msk.bf16.mxu1 %vm2142_vm1, %v2141_v2  ;;  %1983 = vmatprep.subr.bf16.mxu0 %v2141_v2  ;;  %v958_v18 = vrot.slane %v956_v11, 1  ;;  %v1846_v22 = vld [vmem:[%s2437_s1 + $0x3c] sm:$0xf]  ;;  %v1018_v23 = vshll.u32 %v1844_v16, 16  ;;  %v1849_v27 = vld [vmem:[%s2196_s23 + $0xc] sm:$0xe] }
  0x1f   : > { %1989 = vmatprep.subr.bf16.mxu1 %v2141_v2  ;;  %v1081_v25 = vshrl.u32 %v1847_v19, 16  ;;  %v1084_v26 = vshll.u32 %v1847_v19, 16  ;;  %v2325_v28 = vld [vmem:[%s2196_s23 + $0x10] sm:$0xf]  ;;  %v1026_v29 = vsel %vm189_vm0, %v1843_v20, 0  ;;  %v1092_v30 = vsel %vm189_vm0, %v1846_v22, 0 }
  0x20   : > { %v959_v24 = vor.u32 %v958_v18, %v954_v17  ;;  %v1016_v31 = vshrl.u32 %v1844_v16, 16  ;;  %v1020_v32 = vrot.slane %v1018_v23, 1  ;;  %v1852_v33 = vcombine.low %v1849_v27, %v2325_v28  ;;  %v1851_v37 = vld [vmem:[%s2437_s1 + $0x40] sm:$0xf]  ;;  %v1856_v39 = vld [vmem:[%s2437_s1 + $0x44] sm:$0xf] }
  0x21   : > { %v1086_v35 = vrot.slane %v1084_v26, 2  ;;  %v1158_v45 = vsel %vm189_vm0, %v1851_v37, 0  ;;  %v1863_v53 = vld [vmem:[%s2437_s1 + $0x4c] sm:$0xf]  ;;  %v1269_v54 = vld [vmem:[%s2196_s23] sm:$0xc] }
  0x22   : > { %v1150_v41 = vshll.u32 %v1852_v33, 16  ;;  %v1866_v57 = vld [vmem:[%s2196_s23 + $0x24] sm:$0xe]  ;;  %v1862_v59 = vld [vmem:[%s2196_s23 + $0xc] sm:$0xc]  ;;  %v1336_v62 = vsel %vm189_vm0, %v1863_v53, 0 }
  0x23   : > { %1974 = vmatmul.mubr.msk.bf16.vlgmr.msra.gmra.mxu0 %vm185_vm2, %v419_v34  ;;  %v1083_v34 = vrot.slane %v1081_v25, 1  ;;  %v1864_v1 = vcombine.low %v1862_v59, %v2325_v28  ;;  %v1868_v4 = vld [vmem:[%s2437_s1 + $0x50] sm:$0xf]  ;;  %v1873_v6 = vld [vmem:[%s2437_s1 + $0x54] sm:$0xf] }
  0x24   : > { %1980 = vmatmul.mubr.msk.bf16.vlgmr.msra.gmra.mxu1 %vm185_vm2, %v1803_v36  ;;  %1984 = vmatpush3.bf16.msra.mxu0 %v542_v38  ;;  %v2125_v36 = vld [vmem:[%s2196_s23 + $0x18] sm:$0xfe]   ;;  %v1021_v38 = vor.u32 %v1020_v32, %v1016_v31  ;;  %v1152_v48 = vrot.slane %v1150_v41, 2  ;;  %v1468_v13 = vsel %vm189_vm0, %v1873_v6, 0  ;;  %v1881_v26 = vld [vmem:[%s2196_s23 + $0x24] sm:$0xc] }
  0x25   : > { %1990 = vmatpush3.bf16.msra.mxu1 %v601_v40  ;;  %1985 = vmatprep.mubr.msk.bf16.mxu0 %vm2142_vm1, %v2141_v2  ;;  %v1147_v40 = vshrl.u32 %v1852_v33, 16  ;;  %v1087_v42 = vor.u32 %v1086_v35, %v1083_v34  ;;  %v1213_v43 = vshrl.u32 %v2125_v36, 16  ;;  %v1216_v44 = vshll.u32 %v2125_v36, 16  ;;  %v2130_v16 = vld [vmem:[%s2196_s23 + $0x3c] sm:$0xfe]  }
  0x26   : > { %1991 = vmatprep.mubr.msk.bf16.mxu1 %vm2142_vm1, %v2141_v2  ;;  %1995 = vmatprep.subr.bf16.mxu0 %v2141_v2  ;;  %v1878_v19 = vld [vmem:[%s2437_s1 + $0x58] sm:$0xf]  ;;  %v1523_v22 = vshrl.u32 %v2130_v16, 16  ;;  %v1526_v23 = vshll.u32 %v2130_v16, 16  ;;  %v1886_v31 = vld [vmem:[%s2437_s1 + $0x60] sm:$0xf] }
  0x27   : > { %2001 = vmatprep.subr.bf16.mxu1 %v2141_v2  ;;  %v1149_v47 = vrot.slane %v1147_v40, 1  ;;  %v1218_v50 = vrot.slane %v1216_v44, 2  ;;  %v1534_v25 = vsel %vm189_vm0, %v1878_v19, 0  ;;  %v1885_v34 = vld [vmem:[%s2196_s23 + $0x30] sm:$0xc]  ;;  %v1646_v35 = vsel %vm189_vm0, %v1886_v31, 0 }
  0x28   : > { %v1525_v28 = vrot.slane %v1523_v22, 1 }
  0x2b   : > { %1986 = vmatmul.mubr.msk.bf16.vlgmr.msra.gmra.mxu0 %vm185_vm2, %v1808_v46  ;;  %v1224_v46 = vsel %vm189_vm0, %v1856_v39, 0 }
  0x2c   : > { %1992 = vmatmul.mubr.msk.bf16.vlgmr.msra.gmra.mxu1 %vm185_vm2, %v2117_v49  ;;  %1996 = vmatpush3.bf16.msra.mxu0 %v663_v51  ;;  %v1215_v49 = vrot.slane %v1213_v43, 1  ;;  %v1859_v51 = vld [vmem:[%s2437_s1 + $0x48] sm:$0xf] }
  0x2d   : > { %2002 = vmatpush3.bf16.msra.mxu1 %v725_v52  ;;  %1997 = vmatprep.mubr.msk.bf16.mxu0 %vm2142_vm1, %v2141_v2  ;;  %v1153_v52 = vor.u32 %v1152_v48, %v1149_v47  ;;  %v1280_v56 = vsel %vm189_vm0, %v1859_v51, 0 }
  0x2e   : > { %2003 = vmatprep.mubr.msk.bf16.mxu1 %vm2142_vm1, %v2141_v2  ;;  %2007 = vmatprep.subr.bf16.mxu0 %v2141_v2  ;;  %v1219_v55 = vor.u32 %v1218_v50, %v1215_v49 }
  0x2f   : > { %2013 = vmatprep.subr.bf16.mxu1 %v2141_v2 }
  0x33   : > { %1998 = vmatmul.mubr.msk.bf16.vlgmr.msra.gmra.mxu0 %vm185_vm2, %v658_v58  ;;  %v1867_v58 = vld [vmem:[%s2196_s23 + $0x28] sm:$0xf] }
  0x34   : > { %2004 = vmatmul.mubr.msk.bf16.vlgmr.msra.gmra.mxu1 %vm185_vm2, %v720_v60  ;;  %2008 = vmatpush3.bf16.msra.mxu0 %v784_v61  ;;  %v1871_v60 = vld [vmem:[%s2196_s23 + $0x30] sm:$0xe]  ;;  %v2368_v61 = vld [vmem:[%s2196_s23 + $0x34] sm:$0xf]  ;;  %v1869_v0 = vcombine.low %v1866_v57, %v1867_v58 }
  0x35   : > { %2014 = vmatpush3.bf16.msra.mxu1 %v843_v63  ;;  %2009 = vmatprep.mubr.msk.bf16.mxu0 %vm2142_vm1, %v2141_v2  ;;  %v1860_v63 = vcombine.low %v1269_v54, %v2304_v14  ;;  %v1874_v3 = vcombine.low %v1871_v60, %v2368_v61  ;;  %v1887_v36 = vcombine.low %v1885_v34, %v2368_v61 }
  0x36   : > { %2015 = vmatprep.mubr.msk.bf16.mxu1 %vm2142_vm1, %v2141_v2  ;;  %2019 = vmatprep.subr.bf16.mxu0 %v2141_v2  ;;  %v1394_v8 = vshll.u32 %v1869_v0, 16 }
  0x37   : > { %2025 = vmatprep.subr.bf16.mxu1 %v2141_v2  ;;  %v1275_v5 = vrot.slane %v1860_v63, 2  ;;  %v1457_v10 = vshrl.u32 %v1874_v3, 16  ;;  %v1460_v11 = vshll.u32 %v1874_v3, 16  ;;  %v1641_v37 = vrot.slane %v1887_v36, 2 }
  0x39   : > { %v1459_v17 = vrot.slane %v1457_v10, 1  ;;  %v1462_v18 = vrot.slane %v1460_v11, 2 }
  0x3b   : > { %2010 = vmatmul.mubr.msk.bf16.vlgmr.msra.gmra.mxu0 %vm185_vm2, %v1826_v7  ;;  %v1391_v7 = vshrl.u32 %v1869_v0, 16 }
  0x3c   : > { %2016 = vmatmul.mubr.msk.bf16.vlgmr.msra.gmra.mxu1 %vm185_vm2, %v1831_v9  ;;  %2020 = vmatpush3.bf16.msra.mxu0 %v902_v12  ;;  %v1331_v9 = vrot.slane %v1864_v1, 2  ;;  %v1402_v12 = vsel %vm189_vm0, %v1868_v4, 0 }
  0x3d   : > { %2026 = vmatpush3.bf16.msra.mxu1 %v964_v15  ;;  %2021 = vmatprep.mubr.msk.bf16.mxu0 %vm2142_vm1, %v2141_v2  ;;  %v1393_v14 = vrot.slane %v1391_v7, 1  ;;  %v1396_v15 = vrot.slane %v1394_v8, 2 }
  0x3e   : > { %2027 = vmatprep.mubr.msk.bf16.mxu1 %vm2142_vm1, %v2141_v2  ;;  %2031 = vmatprep.subr.bf16.mxu0 %v2141_v2 }
  0x3f   : > { %2037 = vmatprep.subr.bf16.mxu1 %v2141_v2  ;;  %v1397_v20 = vor.u32 %v1396_v15, %v1393_v14 }
  0x43   : > { %2022 = vmatmul.mubr.msk.bf16.vlgmr.msra.gmra.mxu0 %vm185_vm2, %v2122_v21  ;;  %v1882_v21 = vld [vmem:[%s2437_s1 + $0x5c] sm:$0xf] }
  0x44   : > { %2028 = vmatmul.mubr.msk.bf16.vlgmr.msra.gmra.mxu1 %vm185_vm2, %v959_v24  ;;  %2032 = vmatpush3.bf16.msra.mxu0 %v1026_v29  ;;  %v1463_v24 = vor.u32 %v1462_v18, %v1459_v17  ;;  %v1590_v27 = vsel %vm189_vm0, %v1882_v21, 0  ;;  %v1528_v29 = vrot.slane %v1526_v23, 2 }
  0x45   : > { %2038 = vmatpush3.bf16.msra.mxu1 %v1092_v30  ;;  %2033 = vmatprep.mubr.msk.bf16.mxu0 %vm2142_vm1, %v2141_v2  ;;  %v1883_v30 = vcombine.low %v1881_v26, %v1867_v58 }
  0x46   : > { %2039 = vmatprep.mubr.msk.bf16.mxu1 %vm2142_vm1, %v2141_v2  ;;  %2043 = vmatprep.subr.bf16.mxu0 %v2141_v2  ;;  %v1529_v32 = vor.u32 %v1528_v29, %v1525_v28 }
  0x47   : > { %2049 = vmatprep.subr.bf16.mxu1 %v2141_v2  ;;  %v1585_v33 = vrot.slane %v1883_v30, 2 }
  0x4b   : > { %2034 = vmatmul.mubr.msk.bf16.vlgmr.msra.gmra.mxu0 %vm185_vm2, %v1021_v38 }
  0x4c   : > { %2040 = vmatmul.mubr.msk.bf16.vlgmr.msra.gmra.mxu1 %vm185_vm2, %v1087_v42  ;;  %2044 = vmatpush3.bf16.msra.mxu0 %v1158_v45 }
  0x4d   : > { %2050 = vmatpush3.bf16.msra.mxu1 %v1224_v46  ;;  %2045 = vmatprep.mubr.msk.bf16.mxu0 %vm2142_vm1, %v2141_v2 }
  0x4e   : > { %2051 = vmatprep.mubr.msk.bf16.mxu1 %vm2142_vm1, %v2141_v2  ;;  %2055 = vmatprep.subr.bf16.mxu0 %v2141_v2 }
  0x4f   : > { %2061 = vmatprep.subr.bf16.mxu1 %v2141_v2 }
  0x53   : > { %2046 = vmatmul.mubr.msk.bf16.vlgmr.msra.gmra.mxu0 %vm185_vm2, %v1153_v52 }
  0x54   : > { %2052 = vmatmul.mubr.msk.bf16.vlgmr.msra.gmra.mxu1 %vm185_vm2, %v1219_v55  ;;  %2056 = vmatpush3.bf16.msra.mxu0 %v1280_v56 }
  0x55   : > { %2062 = vmatpush3.bf16.msra.mxu1 %v1336_v62  ;;  %2057 = vmatprep.mubr.msk.bf16.mxu0 %vm2142_vm1, %v2141_v2 }
  0x56   : > { %2063 = vmatprep.mubr.msk.bf16.mxu1 %vm2142_vm1, %v2141_v2  ;;  %2067 = vmatprep.subr.bf16.mxu0 %v2141_v2 }
  0x57   : > { %2073 = vmatprep.subr.bf16.mxu1 %v2141_v2 }
  0x5b   : > { %2058 = vmatmul.mubr.msk.bf16.vlgmr.msra.gmra.mxu0 %vm185_vm2, %v1275_v5 }
  0x5c   : > { %2064 = vmatmul.mubr.msk.bf16.vlgmr.msra.gmra.mxu1 %vm185_vm2, %v1331_v9  ;;  %2068 = vmatpush3.bf16.msra.mxu0 %v1402_v12 }
  0x5d   : > { %2074 = vmatpush3.bf16.msra.mxu1 %v1468_v13  ;;  %2069 = vmatprep.mubr.msk.bf16.mxu0 %vm2142_vm1, %v2141_v2 }
  0x5e   : > { %2075 = vmatprep.mubr.msk.bf16.mxu1 %vm2142_vm1, %v2141_v2  ;;  %2079 = vmatprep.subr.bf16.mxu0 %v2141_v2 }
  0x5f   : > { %2085 = vmatprep.subr.bf16.mxu1 %v2141_v2 }
  0x63   : > { %2070 = vmatmul.mubr.msk.bf16.vlgmr.msra.gmra.mxu0 %vm185_vm2, %v1397_v20 }
  0x64   : > { %2076 = vmatmul.mubr.msk.bf16.vlgmr.msra.gmra.mxu1 %vm185_vm2, %v1463_v24  ;;  %2080 = vmatpush3.bf16.msra.mxu0 %v1534_v25 }
  0x65   : > { %2086 = vmatpush3.bf16.msra.mxu1 %v1590_v27  ;;  %2081 = vmatprep.mubr.msk.bf16.mxu0 %vm2142_vm1, %v2141_v2 }
  0x66   : > { %2087 = vmatprep.mubr.msk.bf16.mxu1 %vm2142_vm1, %v2141_v2  ;;  %2091 = vmatprep.subr.bf16.mxu0 %v2141_v2 }
  0x6b   : > { %2082 = vmatmul.mubr.msk.bf16.vlgmr.msra.gmra.mxu0 %vm185_vm2, %v1529_v32 }
  0x6c   : > { %2088 = vmatmul.mubr.msk.bf16.vlgmr.msra.gmra.mxu1 %vm185_vm2, %v1585_v33  ;;  %2092 = vmatpush3.bf16.msra.mxu0 %v1646_v35 }
  0x6d   : > { %2093 = vmatprep.mubr.msk.bf16.mxu0 %vm2142_vm1, %v2141_v2 }
  0x73   : > { %2094 = vmatmul.mubr.msk.bf16.vlgmr.msra.gmra.mxu0 %vm185_vm2, %v1641_v37 }
  0xd3   : > { %v227_v38 = vpop.f32.mrf.mxu0 }
  0xd4   : > { %v279_v39 = vpop.f32.mrf.mxu1 }
  0xd5   : > { %v1951_v40 = vpop.f32.mrf.mxu0  ;;  %v280_v3 = vadd.f32 %v279_v39, %v227_v38 }
  0xd6   : > { %v1957_v41 = vpop.f32.mrf.mxu1 }
  0xd7   : > { %v230_v42 = vpop.f32.mrf.mxu0 }
  0xd8   : > { %v282_v43 = vpop.f32.mrf.mxu1 }
  0xd9   : > { %v1952_v44 = vpop.f32.mrf.mxu0  ;;  %v283_v9 = vadd.f32 %v282_v43, %v230_v42 }
  0xda   : > { %v1958_v45 = vpop.f32.mrf.mxu1 }
  0xdb   : > { %v336_v46 = vpop.f32.mrf.mxu0 }
  0xdc   : > { %v398_v47 = vpop.f32.mrf.mxu1  ;;  %v343_v6 = vadd.f32 %v336_v46, %v280_v3 }
  0xdd   : > { %v1963_v48 = vpop.f32.mrf.mxu0 }
  0xde   : > { %v1969_v49 = vpop.f32.mrf.mxu1  ;;  %v405_v12 = vadd.f32 %v398_v47, %v343_v6 }
  0xdf   : > { %v339_v50 = vpop.f32.mrf.mxu0 }
  0xe0   : > { %v401_v51 = vpop.f32.mrf.mxu1  ;;  %v344_v13 = vadd.f32 %v339_v50, %v283_v9 }
  0xe1   : > { %v1964_v52 = vpop.f32.mrf.mxu0 }
  0xe2   : > { %v1970_v53 = vpop.f32.mrf.mxu1  ;;  %v406_v19 = vadd.f32 %v401_v51, %v344_v13 }
  0xe3   : > { %v460_v2 = vpop.f32.mrf.mxu0 }
  0xe4   : > { %v519_v54 = vpop.f32.mrf.mxu1  ;;  %v467_v16 = vadd.f32 %v460_v2, %v405_v12 }
  0xe5   : > { %v1975_v55 = vpop.f32.mrf.mxu0 }
  0xe6   : > { %v1981_v56 = vpop.f32.mrf.mxu1  ;;  %v526_v22 = vadd.f32 %v519_v54, %v467_v16 }
  0xe7   : > { %v463_v57 = vpop.f32.mrf.mxu0 }
  0xe8   : > { %v522_v58 = vpop.f32.mrf.mxu1  ;;  %v468_v23 = vadd.f32 %v463_v57, %v406_v19 }
  0xe9   : > { %v1976_v59 = vpop.f32.mrf.mxu0 }
  0xea   : > { %v1982_v60 = vpop.f32.mrf.mxu1  ;;  %v527_v29 = vadd.f32 %v522_v58, %v468_v23 }
  0xeb   : > { %v578_v61 = vpop.f32.mrf.mxu0 }
  0xec   : > { %v637_v62 = vpop.f32.mrf.mxu1  ;;  %v585_v26 = vadd.f32 %v578_v61, %v526_v22 }
  0xed   : > { %v1987_v63 = vpop.f32.mrf.mxu0 }
  0xee   : > { %v1993_v0 = vpop.f32.mrf.mxu1  ;;  %v644_v32 = vadd.f32 %v637_v62, %v585_v26 }
  0xef   : > { %v581_v1 = vpop.f32.mrf.mxu0 }
  0xf0   : > { %v640_v4 = vpop.f32.mrf.mxu1  ;;  %v586_v33 = vadd.f32 %v581_v1, %v527_v29 }
  0xf1   : > { %v1988_v5 = vpop.f32.mrf.mxu0 }
  0xf2   : > { %v1994_v7 = vpop.f32.mrf.mxu1  ;;  %v645_v39 = vadd.f32 %v640_v4, %v586_v33 }
  0xf3   : > { %v699_v8 = vpop.f32.mrf.mxu0 }
  0xf4   : > { %v761_v10 = vpop.f32.mrf.mxu1  ;;  %v706_v36 = vadd.f32 %v699_v8, %v644_v32 }
  0xf5   : > { %v1999_v11 = vpop.f32.mrf.mxu0 }
  0xf6   : > { %v2005_v14 = vpop.f32.mrf.mxu1  ;;  %v768_v42 = vadd.f32 %v761_v10, %v706_v36 }
  0xf7   : > { %v702_v15 = vpop.f32.mrf.mxu0 }
  0xf8   : > { %v764_v17 = vpop.f32.mrf.mxu1  ;;  %v707_v43 = vadd.f32 %v702_v15, %v645_v39 }
  0xf9   : > { %v2000_v18 = vpop.f32.mrf.mxu0 }
  0xfa   : > { %v2006_v20 = vpop.f32.mrf.mxu1  ;;  %v769_v49 = vadd.f32 %v764_v17, %v707_v43 }
  0xfb   : > { %v820_v21 = vpop.f32.mrf.mxu0 }
  0xfc   : > { %v879_v24 = vpop.f32.mrf.mxu1  ;;  %v827_v46 = vadd.f32 %v820_v21, %v768_v42 }
  0xfd   : > { %v2011_v25 = vpop.f32.mrf.mxu0 }
  0xfe   : > { %v2017_v27 = vpop.f32.mrf.mxu1  ;;  %v886_v52 = vadd.f32 %v879_v24, %v827_v46 }
  0xff   : > { %v823_v28 = vpop.f32.mrf.mxu0 }
 0x100   : > { %v882_v30 = vpop.f32.mrf.mxu1  ;;  %v828_v53 = vadd.f32 %v823_v28, %v769_v49 }
 0x101   : > { %v2012_v31 = vpop.f32.mrf.mxu0 }
 0x102   : > { %v2018_v34 = vpop.f32.mrf.mxu1  ;;  %v887_v58 = vadd.f32 %v882_v30, %v828_v53 }
 0x103   : > { %v938_v35 = vpop.f32.mrf.mxu0 }
 0x104   : > { %v1000_v37 = vpop.f32.mrf.mxu1  ;;  %v945_v55 = vadd.f32 %v938_v35, %v886_v52  ;;  %v1889_v52 = vld [vmem:[%s2438_s2] ss:$0 sm:$0xff] }
 0x105   : > { %v2023_v38 = vpop.f32.mrf.mxu0 }
 0x106   : > { %v2029_v40 = vpop.f32.mrf.mxu1  ;;  %v1007_v61 = vadd.f32 %v1000_v37, %v945_v55 }
 0x107   : > { %v941_v41 = vpop.f32.mrf.mxu0 }
 0x108   : > { %v1003_v44 = vpop.f32.mrf.mxu1  ;;  %v946_v62 = vadd.f32 %v941_v41, %v887_v58 }
 0x109   : > { %v2024_v45 = vpop.f32.mrf.mxu0 }
 0x10a   : > { %v2030_v47 = vpop.f32.mrf.mxu1  ;;  %v1008_v5 = vadd.f32 %v1003_v44, %v946_v62 }
 0x10b   : > { %v1062_v48 = vpop.f32.mrf.mxu0 }
 0x10c   : > { %v1128_v50 = vpop.f32.mrf.mxu1  ;;  %v1069_v1 = vadd.f32 %v1062_v48, %v1007_v61 }
 0x10d   : > { %v2035_v51 = vpop.f32.mrf.mxu0 }
 0x10e   : > { %v2041_v2 = vpop.f32.mrf.mxu1  ;;  %v1135_v8 = vadd.f32 %v1128_v50, %v1069_v1 }
 0x10f   : > { %v1065_v54 = vpop.f32.mrf.mxu0 }
 0x110   : > { %v1131_v56 = vpop.f32.mrf.mxu1  ;;  %v1070_v9 = vadd.f32 %v1065_v54, %v1008_v5 }
 0x111   : > { %v2036_v57 = vpop.f32.mrf.mxu0 }
 0x112   : > { %v2042_v59 = vpop.f32.mrf.mxu1  ;;  %v1136_v15 = vadd.f32 %v1131_v56, %v1070_v9 }
 0x113   : > { %v1194_v60 = vpop.f32.mrf.mxu0 }
 0x114   : > { %v1260_v63 = vpop.f32.mrf.mxu1  ;;  %v1201_v12 = vadd.f32 %v1194_v60, %v1135_v8 }
 0x115   : > { %v2047_v0 = vpop.f32.mrf.mxu0 }
 0x116   : > { %v2053_v3 = vpop.f32.mrf.mxu1  ;;  %v1267_v18 = vadd.f32 %v1260_v63, %v1201_v12 }
 0x117   : > { %v1197_v4 = vpop.f32.mrf.mxu0 }
 0x118   : > { %v1263_v6 = vpop.f32.mrf.mxu1  ;;  %v1202_v19 = vadd.f32 %v1197_v4, %v1136_v15 }
 0x119   : > { %v2048_v7 = vpop.f32.mrf.mxu0 }
 0x11a   : > { %v2054_v10 = vpop.f32.mrf.mxu1  ;;  %v1268_v25 = vadd.f32 %v1263_v6, %v1202_v19 }
 0x11b   : > { %v1316_v11 = vpop.f32.mrf.mxu0 }
 0x11c   : > { %v1372_v13 = vpop.f32.mrf.mxu1  ;;  %v1323_v22 = vadd.f32 %v1316_v11, %v1267_v18 }
 0x11d   : > { %v2059_v14 = vpop.f32.mrf.mxu0 }
 0x11e   : > { %v2065_v16 = vpop.f32.mrf.mxu1  ;;  %v1379_v28 = vadd.f32 %v1372_v13, %v1323_v22 }
 0x11f   : > { %v1319_v17 = vpop.f32.mrf.mxu0 }
 0x120   : > { %v1375_v20 = vpop.f32.mrf.mxu1  ;;  %v1324_v29 = vadd.f32 %v1319_v17, %v1268_v25 }
 0x121   : > { %v2060_v21 = vpop.f32.mrf.mxu0 }
 0x122   : > { %v2066_v23 = vpop.f32.mrf.mxu1  ;;  %v1380_v35 = vadd.f32 %v1375_v20, %v1324_v29 }
 0x123   : > { %v1438_v24 = vpop.f32.mrf.mxu0 }
 0x124   : > { %v1504_v26 = vpop.f32.mrf.mxu1  ;;  %v1445_v32 = vadd.f32 %v1438_v24, %v1379_v28 }
 0x125   : > { %v2071_v27 = vpop.f32.mrf.mxu0 }
 0x126   : > { %v2077_v30 = vpop.f32.mrf.mxu1  ;;  %v1511_v38 = vadd.f32 %v1504_v26, %v1445_v32 }
 0x127   : > { %v1441_v31 = vpop.f32.mrf.mxu0 }
 0x128   : > { %v1507_v33 = vpop.f32.mrf.mxu1  ;;  %v1446_v39 = vadd.f32 %v1441_v31, %v1380_v35 }
 0x129   : > { %v2072_v34 = vpop.f32.mrf.mxu0 }
 0x12a   : > { %v2078_v36 = vpop.f32.mrf.mxu1  ;;  %v1512_v45 = vadd.f32 %v1507_v33, %v1446_v39 }
 0x12b   : > { %v1570_v37 = vpop.f32.mrf.mxu0 }
 0x12c   : > { %v1626_v40 = vpop.f32.mrf.mxu1  ;;  %v1577_v42 = vadd.f32 %v1570_v37, %v1511_v38 }
 0x12d   : > { %v2083_v41 = vpop.f32.mrf.mxu0 }
 0x12e   : > { %v2089_v43 = vpop.f32.mrf.mxu1  ;;  %v1633_v48 = vadd.f32 %v1626_v40, %v1577_v42 }
 0x12f   : > { %v1573_v44 = vpop.f32.mrf.mxu0 }
 0x130   : > { %v1629_v46 = vpop.f32.mrf.mxu1  ;;  %v1578_v49 = vadd.f32 %v1573_v44, %v1512_v45 }
 0x131   : > { %v2084_v47 = vpop.f32.mrf.mxu0 }
 0x132   : > { %v2090_v50 = vpop.f32.mrf.mxu1  ;;  %v1634_v54 = vadd.f32 %v1629_v46, %v1578_v49 }
 0x133   : > { %v1682_v51 = vpop.f32.mrf.mxu0 }
 0x134   : > { %v1689_v53 = vadd.f32 %v1682_v51, %v1633_v48 }
 0x135   : > { %v2095_v2 = vpop.f32.mrf.mxu0 }
 0x136   : > { %v1698_v55 = vadd.f32 %v1889_v52, %v1689_v53 }
 0x137   : > { %v1685_v56 = vpop.f32.mrf.mxu0 }
 0x138   : > { %vm1700_vm3 = vcmp.gt.f32.partialorder %v1698_v55, 0.0  ;;  %v1702_v57 = vmul.f32 0.1, %v1698_v55  ;;  %v1690_v58 = vadd.f32 %v1685_v56, %v1634_v54 }
 0x139   : > { %v2096_v59 = vpop.f32.mrf.mxu0 }
 0x13a   : > { %v1704_v60 = vsel %vm1700_vm3, %v1698_v55, %v1702_v57  ;;  %v1699_v61 = vadd.f32 %v1889_v52, %v1690_v58 }
 0x13b   : > { %v1895_v62 = vpack.c.bf16 %v1704_v60, %v1704_v60 }
 0x13c   : > { %vm1701_vm5 = vcmp.gt.f32.partialorder %v1699_v61, 0.0  ;;  %v1703_v63 = vmul.f32 0.1, %v1699_v61 }
 0x13d   : > { %1715 = vst.msk [vmem:[%s170_s24] sm:$0xf] %vm1714_vm4, %v1895_v62 }
 0x13e   : > { %v1705_v0 = vsel %vm1701_vm5, %v1699_v61, %v1703_v63 }
 0x13f   : > { %v1896_v1 = vpack.c.bf16 %v1705_v0, %v1705_v0 }
 0x141   : > { %1717 = vst.msk [vmem:[%s170_s24 + $0x4] sm:$0x3] %vm1716_vm6, %v1896_v1 }
 0x142 PF: > { %s13_s12 = sadd.s32 1, %s2139_s12  }
 0x143   : > { %p10_p4 = scmp.ge.s32.totalorder %s13_s12, 4  }
 0x145   :  { %12 = sbr.rel (!%p10_p4) target bundleno = 1 (0x1), region = 94 }

// kernel: stft_discriminator_forward.10
= control target key start
LH: loop header
LB: loop body
LE: loop exit
PB: predicated region body
PF: predicated region fallthrough
CT: control target
= control target key end

     0   :  { %s2148_s12 = smov 0   ;;  %s2374_s0 = inlined_call_operand.vmem [shape: bf16[2,3,3,8,16], index: 0, kind: input, shape index: {}]   ;;  %s2375_s1 = inlined_call_operand.vmem [shape: bf16[25,16,32], index: 1, kind: input, shape index: {}]   ;;  %s2376_s2 = inlined_call_operand.vmem [shape: f32[1,32], index: 2, kind: input, shape index: {}]   ;;  %s2377_s3 = inlined_call_operand.vmem [shape: bf16[2,4,32], index: 3, kind: output, shape index: {}]  }
   0x1 LB: > { %s1721_s13 = sadd.s32 4294967295, %s2124_s12   ;;  %p1725_p0 = scmp.ge.s32.totalorder %s2124_s12, 1  ;;  %s2124_s12 = sphi %s2148_s12, %s13_s12  }
   0x2   : > { %p137_p1 = scmp.lt.s32.totalorder %s2124_s12, 3 }
   0x4   : > { %p138_p2 = pnand %p1725_p0, %p137_p1 }
   0x5   : > { %p160_p3 = scmp.lt.s32.totalorder (!%p138_p2), %s1721_s13, 1 }
   0x6   : > { %141 = sbr.rel (%p138_p2) target bundleno = 315 (0x13b), region = 32 }
   0xb   : > { %v2077_v0 = vld [vmem:[%s2375_s1 + $0x8] sm:$0xff]   ;;  %v2126_v1 = vmov 0.0   ;;  %v2078_v2 = vld [vmem:[%s2375_s1] sm:$0xff]   ;;  %vm2127_vm0 = vmmov 0   ;;  %s2379_s13 = smov (!%p160_p3, %s1721_s13), 1  ;;  %v2079_v3 = vld [vmem:[%s2375_s1 + $0x10] sm:$0xff]  }
   0xc   : > { %1916 = vmatprep.subr.bf16.mxu0 %v2126_v1  ;;  %1922 = vmatprep.subr.bf16.mxu1 %v2126_v1  ;;  %s2066_s18 = smul.u32 36, %s2379_s13  ;;  %vm184_vm1 = vcmask 130048   ;;  %v2080_v4 = vld [vmem:[%s2375_s1 + $0x18] sm:$0xff]   ;;  %v2082_v11 = vld [vmem:[%s2375_s1 + $0x20] sm:$0xff]   ;;  %v2083_v15 = vld [vmem:[%s2375_s1 + $0x28] sm:$0xff]   ;;  %s1727_s20 = sshll.u32 %s2379_s13, 1 }
   0xd   : > { %1917 = vmatpush3.bf16.msra.mxu0 %v2077_v0  ;;  %1918 = vmatprep.mubr.msk.bf16.mxu0 %vm2127_vm0, %v2126_v1  ;;  %v2085_v19 = vld [vmem:[%s2375_s1 + $0x30] sm:$0xff]   ;;  %v2086_v22 = vld [vmem:[%s2375_s1 + $0x38] sm:$0xff]   ;;  %v2087_v25 = vld [vmem:[%s2375_s1 + $0x40] sm:$0xff]   ;;  %s168_s23 = scalar_lea.vmem %s2377_s3, %s1727_s20  ;;  %vm1666_vm3 = vcmask 254976  }
   0xe   : > { %1923 = vmatpush3.bf16.msra.mxu1 %v2078_v2  ;;  %1924 = vmatprep.mubr.msk.bf16.mxu1 %vm2127_vm0, %v2126_v1  ;;  %s2182_s25 = scalar_lea.vmem %s2374_s0, %s2066_s18  ;;  %v2088_v26 = vld [vmem:[%s2375_s1 + $0x48] sm:$0xff]   ;;  %v2091_v37 = vld [vmem:[%s2375_s1 + $0x50] sm:$0xff]   ;;  %v2092_v38 = vld [vmem:[%s2375_s1 + $0x58] sm:$0xff]  }
   0xf   : > { %1928 = vmatprep.subr.bf16.mxu0 %v2126_v1  ;;  %1934 = vmatprep.subr.bf16.mxu1 %v2126_v1  ;;  %v1728_v5 = vld [vmem:[%s2182_s25 + $0x4] sm:$0x3]  ;;  %v170_v6 = vld [vmem:[%s2182_s25] sm:$0x3]  ;;  %v1735_v14 = vld [vmem:[%s2182_s25 + $0x8] sm:$0x3] }
  0x10   : > { %1919 = vmatmul.mubr.msk.bf16.vlgmr.msra.gmra.mxu0 %vm184_vm1, %v1728_v5  ;;  %v2081_v7 = vld [vmem:[%s2182_s25] ss:$0 sps:$4 sm:$0x77]   ;;  %v2084_v8 = vld [vmem:[%s2182_s25 + $0x4] ss:$0 sps:$4 sm:$0x77]  }
  0x11   : > { %1925 = vmatmul.mubr.msk.bf16.vlgmr.msra.gmra.mxu1 %vm184_vm1, %v170_v6  ;;  %1929 = vmatpush3.bf16.msra.mxu0 %v2079_v3  ;;  %v340_v9 = vshrl.u32 %v2081_v7, 16  ;;  %v342_v10 = vshll.u32 %v2081_v7, 16  ;;  %v406_v13 = vshll.u32 %v2084_v8, 16  ;;  %v404_v17 = vshrl.u32 %v2084_v8, 16  ;;  %v1751_v21 = vld [vmem:[%s2182_s25 + $0xc] sm:$0x3] }
  0x12   : > { %1935 = vmatpush3.bf16.msra.mxu1 %v2080_v4  ;;  %1930 = vmatprep.mubr.msk.bf16.mxu0 %vm2127_vm0, %v2126_v1  ;;  %v2089_v23 = vld [vmem:[%s2182_s25 + $0xc] ss:$0 sps:$4 sm:$0x77]   ;;  %v2090_v24 = vld [vmem:[%s2182_s25 + $0x10] ss:$0 sps:$4 sm:$0x77]  }
  0x13   : > { %1936 = vmatprep.mubr.msk.bf16.mxu1 %vm2127_vm0, %v2126_v1  ;;  %1940 = vmatprep.subr.bf16.mxu0 %v2126_v1  ;;  %v344_v12 = vrot.slane %v342_v10, 1  ;;  %v408_v18 = vrot.slane %v406_v13, 1  ;;  %v1756_v27 = vld [vmem:[%s2182_s25 + $0x10] sm:$0x3]  ;;  %v635_v28 = vshll.u32 %v2089_v23, 16  ;;  %v699_v29 = vshll.u32 %v2090_v24, 16 }
  0x14   : > { %1946 = vmatprep.subr.bf16.mxu1 %v2126_v1  ;;  %v1761_v30 = vld [vmem:[%s2182_s25 + $0x14] sm:$0x3]  ;;  %v633_v31 = vshrl.u32 %v2089_v23, 16  ;;  %v697_v33 = vshrl.u32 %v2090_v24, 16  ;;  %v1778_v40 = vld [vmem:[%s2182_s25 + $0x18] sm:$0x3] }
  0x15   : > { %v345_v16 = vor.u32 %v344_v12, %v340_v9  ;;  %v409_v20 = vor.u32 %v408_v18, %v404_v17  ;;  %v637_v32 = vrot.slane %v635_v28, 1  ;;  %v701_v34 = vrot.slane %v699_v29, 1  ;;  %v2095_v39 = vld [vmem:[%s2182_s25 + $0x18] ss:$0 sps:$4 sm:$0x77]   ;;  %v2093_v43 = vld [vmem:[%s2375_s1 + $0x60] sm:$0xff]  }
  0x16   : > { %v928_v41 = vshll.u32 %v2095_v39, 16  ;;  %v1783_v42 = vld [vmem:[%s2182_s25 + $0x1c] sm:$0x3]  ;;  %v2094_v44 = vld [vmem:[%s2375_s1 + $0x68] sm:$0xff]   ;;  %v926_v45 = vshrl.u32 %v2095_v39, 16  ;;  %v2096_v51 = vld [vmem:[%s2375_s1 + $0x70] sm:$0xff]  }
  0x17   : > { %v638_v35 = vor.u32 %v637_v32, %v633_v31  ;;  %v702_v36 = vor.u32 %v701_v34, %v697_v33  ;;  %v2098_v47 = vld [vmem:[%s2182_s25 + $0x1c] ss:$0 sps:$4 sm:$0x77]   ;;  %v1788_v50 = vld [vmem:[%s2182_s25 + $0x20] sm:$0x3]  ;;  %v2101_v59 = vld [vmem:[%s2375_s1 + $0x88] sm:$0xff]  }
  0x18   : > { %1931 = vmatmul.mubr.msk.bf16.vlgmr.msra.gmra.mxu0 %vm184_vm1, %v1735_v14  ;;  %v930_v46 = vrot.slane %v928_v41, 1  ;;  %v992_v49 = vshll.u32 %v2098_v47, 16  ;;  %v2097_v52 = vld [vmem:[%s2375_s1 + $0x78] sm:$0xff]   ;;  %v990_v53 = vshrl.u32 %v2098_v47, 16  ;;  %v2100_v58 = vld [vmem:[%s2375_s1 + $0x80] sm:$0xff]   ;;  %v2104_v7 = vld [vmem:[%s2375_s1 + $0x90] sm:$0xff]  }
  0x19   : > { %1937 = vmatmul.mubr.msk.bf16.vlgmr.msra.gmra.mxu1 %vm184_vm1, %v345_v16  ;;  %1941 = vmatpush3.bf16.msra.mxu0 %v2082_v11  ;;  %v2099_v55 = vld [vmem:[%s2182_s25] ss:$0 sps:$4 sm:$0x66]   ;;  %v2102_v60 = vld [vmem:[%s2182_s25 + $0x4] ss:$0 sps:$4 sm:$0x66]  }
  0x1a   : > { %1947 = vmatpush3.bf16.msra.mxu1 %v2083_v15  ;;  %1942 = vmatprep.mubr.msk.bf16.mxu0 %vm2127_vm0, %v2126_v1  ;;  %v931_v48 = vor.u32 %v930_v46, %v926_v45  ;;  %v994_v54 = vrot.slane %v992_v49, 1  ;;  %v1053_v57 = vrot.slane %v2099_v55, 1  ;;  %v2103_v61 = vld [vmem:[%s2182_s25 + $0x8] ss:$0 sps:$4 sm:$0x66]   ;;  %v1111_v0 = vrot.slane %v2102_v60, 1 }
  0x1b   : > { %1948 = vmatprep.mubr.msk.bf16.mxu1 %vm2127_vm0, %v2126_v1  ;;  %1952 = vmatprep.subr.bf16.mxu0 %v2126_v1  ;;  %v2106_v62 = vld [vmem:[%s2182_s25] ss:$0 sps:$4 sm:$0xee]   ;;  %v2107_v63 = vld [vmem:[%s2182_s25 + $0x4] ss:$0 sps:$4 sm:$0xee]  }
  0x1c   : > { %1958 = vmatprep.subr.bf16.mxu1 %v2126_v1  ;;  %v995_v56 = vor.u32 %v994_v54, %v990_v53  ;;  %v1169_v2 = vrot.slane %v2103_v61, 1  ;;  %v1228_v3 = vshrl.u32 %v2106_v62, 16  ;;  %v1231_v4 = vshll.u32 %v2106_v62, 16  ;;  %v2105_v8 = vld [vmem:[%s2375_s1 + $0x98] sm:$0xff]   ;;  %v2108_v15 = vld [vmem:[%s2375_s1 + $0xa0] sm:$0xff]   ;;  %v2109_v16 = vld [vmem:[%s2375_s1 + $0xa8] sm:$0xff]  }
  0x1d   : > { %v1293_v5 = vshrl.u32 %v2107_v63, 16  ;;  %v1296_v6 = vshll.u32 %v2107_v63, 16  ;;  %v2110_v17 = vld [vmem:[%s2182_s25 + $0xc] ss:$0 sps:$4 sm:$0x66]   ;;  %v2112_v24 = vld [vmem:[%s2375_s1 + $0xb0] sm:$0xff]  }
  0x1e   : > { %v1230_v9 = vrot.slane %v1228_v3, 1  ;;  %v1233_v10 = vrot.slane %v1231_v4, 2  ;;  %v2111_v18 = vld [vmem:[%s2182_s25 + $0x10] ss:$0 sps:$4 sm:$0x66]   ;;  %v2116_v34 = vld [vmem:[%s2375_s1 + $0xc0] sm:$0xff]  }
  0x1f   : > { %v1295_v11 = vrot.slane %v1293_v5, 1  ;;  %v1298_v12 = vrot.slane %v1296_v6, 2  ;;  %v2117_v29 = vld [vmem:[%s2182_s25 + $0x10] ss:$0 sps:$4 sm:$0xee]  }
  0x20   : > { %1943 = vmatmul.mubr.msk.bf16.vlgmr.msra.gmra.mxu0 %vm184_vm1, %v409_v20  ;;  %v1234_v13 = vor.u32 %v1233_v10, %v1230_v9  ;;  %v1357_v20 = vrot.slane %v2110_v17, 1  ;;  %v1597_v32 = vshrl.u32 %v2117_v29, 16  ;;  %v1600_v33 = vshll.u32 %v2117_v29, 16 }
  0x21   : > { %1949 = vmatmul.mubr.msk.bf16.vlgmr.msra.gmra.mxu1 %vm184_vm1, %v1751_v21  ;;  %1953 = vmatpush3.bf16.msra.mxu0 %v2085_v19  ;;  %v1299_v14 = vor.u32 %v1298_v12, %v1295_v11  ;;  %v2115_v19 = vld [vmem:[%s2182_s25 + $0xc] ss:$0 sps:$4 sm:$0xee]   ;;  %v1415_v21 = vrot.slane %v2111_v18, 1 }
  0x22   : > { %1959 = vmatpush3.bf16.msra.mxu1 %v2086_v22  ;;  %1954 = vmatprep.mubr.msk.bf16.mxu0 %vm2127_vm0, %v2126_v1  ;;  %v1532_v22 = vshrl.u32 %v2115_v19, 16  ;;  %v1535_v23 = vshll.u32 %v2115_v19, 16 }
  0x23   : > { %1960 = vmatprep.mubr.msk.bf16.mxu1 %vm2127_vm0, %v2126_v1  ;;  %1964 = vmatprep.subr.bf16.mxu0 %v2126_v1 }
  0x24   : > { %1970 = vmatprep.subr.bf16.mxu1 %v2126_v1  ;;  %v1537_v28 = vrot.slane %v1535_v23, 2 }
  0x28   : > { %1955 = vmatmul.mubr.msk.bf16.vlgmr.msra.gmra.mxu0 %vm184_vm1, %v1756_v27  ;;  %v1534_v27 = vrot.slane %v1532_v22, 1 }
  0x29   : > { %1961 = vmatmul.mubr.msk.bf16.vlgmr.msra.gmra.mxu1 %vm184_vm1, %v1761_v30  ;;  %1965 = vmatpush3.bf16.msra.mxu0 %v2087_v25  ;;  %v2113_v25 = vld [vmem:[%s2375_s1 + $0xb8] sm:$0xff]  }
  0x2a   : > { %1971 = vmatpush3.bf16.msra.mxu1 %v2088_v26  ;;  %1966 = vmatprep.mubr.msk.bf16.mxu0 %vm2127_vm0, %v2126_v1  ;;  %v2114_v26 = vld [vmem:[%s2182_s25 + $0x14] ss:$0 sps:$4 sm:$0x66]   ;;  %v1538_v31 = vor.u32 %v1537_v28, %v1534_v27 }
  0x2b   : > { %1972 = vmatprep.mubr.msk.bf16.mxu1 %vm2127_vm0, %v2126_v1  ;;  %1976 = vmatprep.subr.bf16.mxu0 %v2126_v1  ;;  %v1473_v30 = vrot.slane %v2114_v26, 1 }
  0x2c   : > { %1982 = vmatprep.subr.bf16.mxu1 %v2126_v1 }
  0x30   : > { %1967 = vmatmul.mubr.msk.bf16.vlgmr.msra.gmra.mxu0 %vm184_vm1, %v638_v35  ;;  %v1599_v35 = vrot.slane %v1597_v32, 1 }
  0x31   : > { %1973 = vmatmul.mubr.msk.bf16.vlgmr.msra.gmra.mxu1 %vm184_vm1, %v702_v36  ;;  %1977 = vmatpush3.bf16.msra.mxu0 %v2091_v37  ;;  %v1602_v36 = vrot.slane %v1600_v33, 2 }
  0x32   : > { %1983 = vmatpush3.bf16.msra.mxu1 %v2092_v38  ;;  %1978 = vmatprep.mubr.msk.bf16.mxu0 %vm2127_vm0, %v2126_v1 }
  0x33   : > { %1984 = vmatprep.mubr.msk.bf16.mxu1 %vm2127_vm0, %v2126_v1  ;;  %1988 = vmatprep.subr.bf16.mxu0 %v2126_v1  ;;  %v1603_v37 = vor.u32 %v1602_v36, %v1599_v35 }
  0x34   : > { %1994 = vmatprep.subr.bf16.mxu1 %v2126_v1 }
  0x38   : > { %1979 = vmatmul.mubr.msk.bf16.vlgmr.msra.gmra.mxu0 %vm184_vm1, %v1778_v40 }
  0x39   : > { %1985 = vmatmul.mubr.msk.bf16.vlgmr.msra.gmra.mxu1 %vm184_vm1, %v1783_v42  ;;  %1989 = vmatpush3.bf16.msra.mxu0 %v2093_v43 }
  0x3a   : > { %1995 = vmatpush3.bf16.msra.mxu1 %v2094_v44  ;;  %1990 = vmatprep.mubr.msk.bf16.mxu0 %vm2127_vm0, %v2126_v1 }
  0x3b   : > { %1996 = vmatprep.mubr.msk.bf16.mxu1 %vm2127_vm0, %v2126_v1  ;;  %2000 = vmatprep.subr.bf16.mxu0 %v2126_v1 }
  0x3c   : > { %2006 = vmatprep.subr.bf16.mxu1 %v2126_v1 }
  0x40   : > { %1991 = vmatmul.mubr.msk.bf16.vlgmr.msra.gmra.mxu0 %vm184_vm1, %v1788_v50 }
  0x41   : > { %1997 = vmatmul.mubr.msk.bf16.vlgmr.msra.gmra.mxu1 %vm184_vm1, %v931_v48  ;;  %2001 = vmatpush3.bf16.msra.mxu0 %v2096_v51 }
  0x42   : > { %2007 = vmatpush3.bf16.msra.mxu1 %v2097_v52  ;;  %2002 = vmatprep.mubr.msk.bf16.mxu0 %vm2127_vm0, %v2126_v1 }
  0x43   : > { %2008 = vmatprep.mubr.msk.bf16.mxu1 %vm2127_vm0, %v2126_v1  ;;  %2012 = vmatprep.subr.bf16.mxu0 %v2126_v1 }
  0x44   : > { %2018 = vmatprep.subr.bf16.mxu1 %v2126_v1 }
  0x48   : > { %2003 = vmatmul.mubr.msk.bf16.vlgmr.msra.gmra.mxu0 %vm184_vm1, %v995_v56 }
  0x49   : > { %2009 = vmatmul.mubr.msk.bf16.vlgmr.msra.gmra.mxu1 %vm184_vm1, %v1053_v57  ;;  %2013 = vmatpush3.bf16.msra.mxu0 %v2100_v58 }
  0x4a   : > { %2019 = vmatpush3.bf16.msra.mxu1 %v2101_v59  ;;  %2014 = vmatprep.mubr.msk.bf16.mxu0 %vm2127_vm0, %v2126_v1 }
  0x4b   : > { %2020 = vmatprep.mubr.msk.bf16.mxu1 %vm2127_vm0, %v2126_v1  ;;  %2024 = vmatprep.subr.bf16.mxu0 %v2126_v1 }
  0x4c   : > { %2030 = vmatprep.subr.bf16.mxu1 %v2126_v1 }
  0x50   : > { %2015 = vmatmul.mubr.msk.bf16.vlgmr.msra.gmra.mxu0 %vm184_vm1, %v1111_v0 }
  0x51   : > { %2021 = vmatmul.mubr.msk.bf16.vlgmr.msra.gmra.mxu1 %vm184_vm1, %v1169_v2  ;;  %2025 = vmatpush3.bf16.msra.mxu0 %v2104_v7 }
  0x52   : > { %2031 = vmatpush3.bf16.msra.mxu1 %v2105_v8  ;;  %2026 = vmatprep.mubr.msk.bf16.mxu0 %vm2127_vm0, %v2126_v1 }
  0x53   : > { %2032 = vmatprep.mubr.msk.bf16.mxu1 %vm2127_vm0, %v2126_v1  ;;  %2036 = vmatprep.subr.bf16.mxu0 %v2126_v1 }
  0x54   : > { %2042 = vmatprep.subr.bf16.mxu1 %v2126_v1 }
  0x58   : > { %2027 = vmatmul.mubr.msk.bf16.vlgmr.msra.gmra.mxu0 %vm184_vm1, %v1234_v13 }
  0x59   : > { %2033 = vmatmul.mubr.msk.bf16.vlgmr.msra.gmra.mxu1 %vm184_vm1, %v1299_v14  ;;  %2037 = vmatpush3.bf16.msra.mxu0 %v2108_v15 }
  0x5a   : > { %2043 = vmatpush3.bf16.msra.mxu1 %v2109_v16  ;;  %2038 = vmatprep.mubr.msk.bf16.mxu0 %vm2127_vm0, %v2126_v1 }
  0x5b   : > { %2044 = vmatprep.mubr.msk.bf16.mxu1 %vm2127_vm0, %v2126_v1  ;;  %2048 = vmatprep.subr.bf16.mxu0 %v2126_v1 }
  0x5c   : > { %2054 = vmatprep.subr.bf16.mxu1 %v2126_v1 }
  0x60   : > { %2039 = vmatmul.mubr.msk.bf16.vlgmr.msra.gmra.mxu0 %vm184_vm1, %v1357_v20 }
  0x61   : > { %2045 = vmatmul.mubr.msk.bf16.vlgmr.msra.gmra.mxu1 %vm184_vm1, %v1415_v21  ;;  %2049 = vmatpush3.bf16.msra.mxu0 %v2112_v24 }
  0x62   : > { %2055 = vmatpush3.bf16.msra.mxu1 %v2113_v25  ;;  %2050 = vmatprep.mubr.msk.bf16.mxu0 %vm2127_vm0, %v2126_v1 }
  0x63   : > { %2056 = vmatprep.mubr.msk.bf16.mxu1 %vm2127_vm0, %v2126_v1  ;;  %2060 = vmatprep.subr.bf16.mxu0 %v2126_v1 }
  0x68   : > { %2051 = vmatmul.mubr.msk.bf16.vlgmr.msra.gmra.mxu0 %vm184_vm1, %v1473_v30 }
  0x69   : > { %2057 = vmatmul.mubr.msk.bf16.vlgmr.msra.gmra.mxu1 %vm184_vm1, %v1538_v31  ;;  %2061 = vmatpush3.bf16.msra.mxu0 %v2116_v34 }
  0x6a   : > { %2062 = vmatprep.mubr.msk.bf16.mxu0 %vm2127_vm0, %v2126_v1 }
  0x70   : > { %2063 = vmatmul.mubr.msk.bf16.vlgmr.msra.gmra.mxu0 %vm184_vm1, %v1603_v37 }
  0xd0   : > { %v222_v38 = vpop.f32.mrf.mxu0 }
  0xd1   : > { %v271_v39 = vpop.f32.mrf.mxu1 }
  0xd2   : > { %v1920_v40 = vpop.f32.mrf.mxu0  ;;  %v272_v4 = vadd.f32 %v271_v39, %v222_v38 }
  0xd3   : > { %v1926_v41 = vpop.f32.mrf.mxu1 }
  0xd4   : > { %v225_v42 = vpop.f32.mrf.mxu0 }
  0xd5   : > { %v274_v43 = vpop.f32.mrf.mxu1 }
  0xd6   : > { %v1921_v44 = vpop.f32.mrf.mxu0 }
  0xd7   : > { %v1927_v45 = vpop.f32.mrf.mxu1 }
  0xd8   : > { %v325_v46 = vpop.f32.mrf.mxu0 }
  0xd9   : > { %v389_v47 = vpop.f32.mrf.mxu1  ;;  %v331_v7 = vadd.f32 %v325_v46, %v272_v4 }
  0xda   : > { %v1932_v48 = vpop.f32.mrf.mxu0 }
  0xdb   : > { %v1938_v49 = vpop.f32.mrf.mxu1  ;;  %v395_v12 = vadd.f32 %v389_v47, %v331_v7 }
  0xdc   : > { %v328_v50 = vpop.f32.mrf.mxu0 }
  0xdd   : > { %v392_v51 = vpop.f32.mrf.mxu1 }
  0xde   : > { %v1933_v52 = vpop.f32.mrf.mxu0 }
  0xdf   : > { %v1939_v53 = vpop.f32.mrf.mxu1 }
  0xe0   : > { %v453_v1 = vpop.f32.mrf.mxu0 }
  0xe1   : > { %v508_v54 = vpop.f32.mrf.mxu1  ;;  %v459_v15 = vadd.f32 %v453_v1, %v395_v12 }
  0xe2   : > { %v1944_v55 = vpop.f32.mrf.mxu0 }
  0xe3   : > { %v1950_v56 = vpop.f32.mrf.mxu1  ;;  %v514_v20 = vadd.f32 %v508_v54, %v459_v15 }
  0xe4   : > { %v456_v57 = vpop.f32.mrf.mxu0 }
  0xe5   : > { %v511_v58 = vpop.f32.mrf.mxu1 }
  0xe6   : > { %v1945_v59 = vpop.f32.mrf.mxu0 }
  0xe7   : > { %v1951_v60 = vpop.f32.mrf.mxu1 }
  0xe8   : > { %v563_v61 = vpop.f32.mrf.mxu0 }
  0xe9   : > { %v618_v62 = vpop.f32.mrf.mxu1  ;;  %v569_v23 = vadd.f32 %v563_v61, %v514_v20 }
  0xea   : > { %v1956_v63 = vpop.f32.mrf.mxu0 }
  0xeb   : > { %v1962_v0 = vpop.f32.mrf.mxu1  ;;  %v624_v28 = vadd.f32 %v618_v62, %v569_v23 }
  0xec   : > { %v566_v2 = vpop.f32.mrf.mxu0 }
  0xed   : > { %v621_v3 = vpop.f32.mrf.mxu1 }
  0xee   : > { %v1957_v5 = vpop.f32.mrf.mxu0 }
  0xef   : > { %v1963_v6 = vpop.f32.mrf.mxu1 }
  0xf0   : > { %v682_v8 = vpop.f32.mrf.mxu0 }
  0xf1   : > { %v746_v9 = vpop.f32.mrf.mxu1  ;;  %v688_v31 = vadd.f32 %v682_v8, %v624_v28 }
  0xf2   : > { %v1968_v10 = vpop.f32.mrf.mxu0 }
  0xf3   : > { %v1974_v11 = vpop.f32.mrf.mxu1  ;;  %v752_v36 = vadd.f32 %v746_v9, %v688_v31 }
  0xf4   : > { %v685_v13 = vpop.f32.mrf.mxu0 }
  0xf5   : > { %v749_v14 = vpop.f32.mrf.mxu1 }
  0xf6   : > { %v1969_v16 = vpop.f32.mrf.mxu0 }
  0xf7   : > { %v1975_v17 = vpop.f32.mrf.mxu1 }
  0xf8   : > { %v801_v18 = vpop.f32.mrf.mxu0 }
  0xf9   : > { %v856_v19 = vpop.f32.mrf.mxu1  ;;  %v807_v39 = vadd.f32 %v801_v18, %v752_v36 }
  0xfa   : > { %v1980_v21 = vpop.f32.mrf.mxu0 }
  0xfb   : > { %v1986_v22 = vpop.f32.mrf.mxu1  ;;  %v862_v44 = vadd.f32 %v856_v19, %v807_v39 }
  0xfc   : > { %v804_v24 = vpop.f32.mrf.mxu0 }
  0xfd   : > { %v859_v25 = vpop.f32.mrf.mxu1 }
  0xfe   : > { %v1981_v26 = vpop.f32.mrf.mxu0 }
  0xff   : > { %v1987_v27 = vpop.f32.mrf.mxu1 }
 0x100   : > { %v911_v29 = vpop.f32.mrf.mxu0 }
 0x101   : > { %v975_v30 = vpop.f32.mrf.mxu1  ;;  %v917_v47 = vadd.f32 %v911_v29, %v862_v44 }
 0x102   : > { %v1992_v32 = vpop.f32.mrf.mxu0 }
 0x103   : > { %v1998_v33 = vpop.f32.mrf.mxu1  ;;  %v981_v52 = vadd.f32 %v975_v30, %v917_v47  ;;  %v1863_v30 = vld [vmem:[%s2376_s2] ss:$0 sm:$0xff] }
 0x104   : > { %v914_v34 = vpop.f32.mrf.mxu0 }
 0x105   : > { %v978_v35 = vpop.f32.mrf.mxu1 }
 0x106   : > { %v1993_v37 = vpop.f32.mrf.mxu0 }
 0x107   : > { %v1999_v38 = vpop.f32.mrf.mxu1 }
 0x108   : > { %v1039_v40 = vpop.f32.mrf.mxu0 }
 0x109   : > { %v1097_v41 = vpop.f32.mrf.mxu1  ;;  %v1045_v54 = vadd.f32 %v1039_v40, %v981_v52 }
 0x10a   : > { %v2004_v42 = vpop.f32.mrf.mxu0 }
 0x10b   : > { %v2010_v43 = vpop.f32.mrf.mxu1  ;;  %v1103_v59 = vadd.f32 %v1097_v41, %v1045_v54 }
 0x10c   : > { %v1042_v45 = vpop.f32.mrf.mxu0 }
 0x10d   : > { %v1100_v46 = vpop.f32.mrf.mxu1 }
 0x10e   : > { %v2005_v48 = vpop.f32.mrf.mxu0 }
 0x10f   : > { %v2011_v49 = vpop.f32.mrf.mxu1 }
 0x110   : > { %v1155_v50 = vpop.f32.mrf.mxu0 }
 0x111   : > { %v1213_v51 = vpop.f32.mrf.mxu1  ;;  %v1161_v62 = vadd.f32 %v1155_v50, %v1103_v59 }
 0x112   : > { %v2016_v53 = vpop.f32.mrf.mxu0 }
 0x113   : > { %v2022_v1 = vpop.f32.mrf.mxu1  ;;  %v1219_v4 = vadd.f32 %v1213_v51, %v1161_v62 }
 0x114   : > { %v1158_v55 = vpop.f32.mrf.mxu0 }
 0x115   : > { %v1216_v56 = vpop.f32.mrf.mxu1 }
 0x116   : > { %v2017_v57 = vpop.f32.mrf.mxu0 }
 0x117   : > { %v2023_v58 = vpop.f32.mrf.mxu1 }
 0x118   : > { %v1278_v60 = vpop.f32.mrf.mxu0 }
 0x119   : > { %v1343_v61 = vpop.f32.mrf.mxu1  ;;  %v1284_v7 = vadd.f32 %v1278_v60, %v1219_v4 }
 0x11a   : > { %v2028_v63 = vpop.f32.mrf.mxu0 }
 0x11b   : > { %v2034_v0 = vpop.f32.mrf.mxu1  ;;  %v1349_v12 = vadd.f32 %v1343_v61, %v1284_v7 }
 0x11c   : > { %v1281_v2 = vpop.f32.mrf.mxu0 }
 0x11d   : > { %v1346_v3 = vpop.f32.mrf.mxu1 }
 0x11e   : > { %v2029_v5 = vpop.f32.mrf.mxu0 }
 0x11f   : > { %v2035_v6 = vpop.f32.mrf.mxu1 }
 0x120   : > { %v1401_v8 = vpop.f32.mrf.mxu0 }
 0x121   : > { %v1459_v9 = vpop.f32.mrf.mxu1  ;;  %v1407_v15 = vadd.f32 %v1401_v8, %v1349_v12 }
 0x122   : > { %v2040_v10 = vpop.f32.mrf.mxu0 }
 0x123   : > { %v2046_v11 = vpop.f32.mrf.mxu1  ;;  %v1465_v20 = vadd.f32 %v1459_v9, %v1407_v15 }
 0x124   : > { %v1404_v13 = vpop.f32.mrf.mxu0 }
 0x125   : > { %v1462_v14 = vpop.f32.mrf.mxu1 }
 0x126   : > { %v2041_v16 = vpop.f32.mrf.mxu0 }
 0x127   : > { %v2047_v17 = vpop.f32.mrf.mxu1 }
 0x128   : > { %v1517_v18 = vpop.f32.mrf.mxu0 }
 0x129   : > { %v1582_v19 = vpop.f32.mrf.mxu1  ;;  %v1523_v23 = vadd.f32 %v1517_v18, %v1465_v20 }
 0x12a   : > { %v2052_v21 = vpop.f32.mrf.mxu0 }
 0x12b   : > { %v2058_v22 = vpop.f32.mrf.mxu1  ;;  %v1588_v28 = vadd.f32 %v1582_v19, %v1523_v23 }
 0x12c   : > { %v1520_v24 = vpop.f32.mrf.mxu0 }
 0x12d   : > { %v1585_v25 = vpop.f32.mrf.mxu1 }
 0x12e   : > { %v2053_v26 = vpop.f32.mrf.mxu0 }
 0x12f   : > { %v2059_v27 = vpop.f32.mrf.mxu1 }
 0x130   : > { %v1647_v29 = vpop.f32.mrf.mxu0 }
 0x131   : > { %v1653_v31 = vadd.f32 %v1647_v29, %v1588_v28 }
 0x132   : > { %v2064_v32 = vpop.f32.mrf.mxu0 }
 0x133   : > { %v1661_v33 = vadd.f32 %v1863_v30, %v1653_v31 }
 0x134   : > { %v1650_v34 = vpop.f32.mrf.mxu0 }
 0x135   : > { %vm1662_vm2 = vcmp.gt.f32.partialorder %v1661_v33, 0.0  ;;  %v1663_v35 = vmul.f32 0.1, %v1661_v33 }
 0x136   : > { %v2065_v36 = vpop.f32.mrf.mxu0 }
 0x137   : > { %v1664_v37 = vsel %vm1662_vm2, %v1661_v33, %v1663_v35 }
 0x138   : > { %v1665_v38 = vpack.c.bf16 %v1664_v37, %v1664_v37 }
 0x13a   : > { %1667 = vst.msk [vmem:[%s168_s23] sm:$0x3] %vm1666_vm3, %v1665_v38 }
 0x13b PF: > { %s13_s12 = sadd.s32 1, %s2124_s12  }
 0x13c   : > { %p10_p4 = scmp.ge.s32.totalorder %s13_s12, 4  }
 0x13e   :  { %12 = sbr.rel (!%p10_p4) target bundleno = 1 (0x1), region = 94 }

// kernel: stft_discriminator_forward.13
= control target key start
LH: loop header
LB: loop body
LE: loop exit
PB: predicated region body
PF: predicated region fallthrough
CT: control target
= control target key end

     0   :  { %vm23_vm0 = vcmask 253952   ;;  %vm67_vm1 = vcmask 0   ;;  %s140_s0 = inlined_call_operand.vmem [shape: bf16[2,3,1,32], index: 0, kind: input, shape index: {}]   ;;  %s141_s1 = inlined_call_operand.vmem [shape: f32[3,32], index: 1, kind: input, shape index: {}]   ;;  %s142_s2 = inlined_call_operand.<no memory space> [shape: f32[1,1], index: 2, kind: input, shape index: {}]   ;;  %s143_s3 = inlined_call_operand.vmem [shape: f32[2,1,1], index: 3, kind: output, shape index: {}]  }
   0x1   :  { %v74_v0 = vld [vmem:[%s140_s0 + $0x1] sm:$0x1]  ;;  %v16_v2 = vld [vmem:[%s140_s0] sm:$0x1]  ;;  %v75_v6 = vld [vmem:[%s140_s0 + $0x4] sm:$0x1]  ;;  %v8_v27 = vstv %s142_s2 }
   0x2   :  { %v37_v1 = vld [vmem:[%s141_s1 + $0x1] sm:$0x1]  ;;  %v35_v3 = vunpack.c.l.bf16 %v74_v0  ;;  %v18_v4 = vunpack.c.l.bf16 %v16_v2  ;;  %v20_v5 = vld [vmem:[%s141_s1] sm:$0x1]  ;;  %v17_v7 = vld [vmem:[%s140_s0 + $0x3] sm:$0x1]  ;;  %v36_v8 = vunpack.c.l.bf16 %v75_v6 }
   0x3   :  { %v19_v9 = vunpack.c.l.bf16 %v17_v7  ;;  %v77_v10 = vld [vmem:[%s140_s0 + $0x5] sm:$0x1]  ;;  %v76_v11 = vld [vmem:[%s140_s0 + $0x2] sm:$0x1]  ;;  %9 = vst [vmem:[#allocation2] sm:$0x1] %v8_v27 }
   0x4   :  { %v38_v12 = vmul.f32 %v37_v1, %v35_v3  ;;  %v21_v13 = vmul.f32 %v20_v5, %v18_v4  ;;  %v52_v14 = vunpack.c.l.bf16 %v77_v10  ;;  %v51_v15 = vunpack.c.l.bf16 %v76_v11  ;;  %v53_v18 = vld [vmem:[%s141_s1 + $0x2] sm:$0x1] }
   0x5   :  { %v39_v16 = vmul.f32 %v37_v1, %v36_v8  ;;  %v22_v17 = vmul.f32 %v20_v5, %v19_v9 }
   0x6   :  { %v40_v19 = vsel %vm23_vm0, %v38_v12, 0.0  ;;  %v24_v20 = vsel %vm23_vm0, %v21_v13, 0.0  ;;  %v55_v23 = vmul.f32 %v53_v18, %v52_v14  ;;  %v54_v24 = vmul.f32 %v53_v18, %v51_v15 }
   0x7   :  { %41 = vadd.xlane.f32.xlu1 %v40_v19  ;;  %25 = vadd.xlane.f32.xlu0 %v24_v20  ;;  %v43_v21 = vsel %vm23_vm0, %v39_v16, 0.0  ;;  %v27_v22 = vsel %vm23_vm0, %v22_v17, 0.0 }
   0x8   :  { %v59_v25 = vsel %vm23_vm0, %v55_v23, 0.0  ;;  %v56_v26 = vsel %vm23_vm0, %v54_v24, 0.0 }
   0xa   :  { %v64_v34 = vld [vmem:[#allocation2] sm:$0x1] }
   0xb   :  { %44 = vadd.xlane.f32.xlu1 %v43_v21  ;;  %28 = vadd.xlane.f32.xlu0 %v27_v22 }
   0xf   :  { %60 = vadd.xlane.f32.xlu1 %v59_v25  ;;  %57 = vadd.xlane.f32.xlu0 %v56_v26 }
  0x90   :  { %v42_v28 = vpop.xlane.xlu1 %41  ;;  %v26_v29 = vpop.xlane.xlu0 %25 }
  0x91   :  { %v46_v32 = vadd.f32 %v42_v28, %v26_v29 }
  0x94   :  { %v45_v30 = vpop.xlane.xlu1 %44  ;;  %v29_v31 = vpop.xlane.xlu0 %28 }
  0x95   :  { %v47_v33 = vadd.f32 %v45_v30, %v29_v31 }
  0x98   :  { %v61_v35 = vpop.xlane.xlu1 %60  ;;  %v58_v36 = vpop.xlane.xlu0 %57 }
  0x99   :  { %v63_v37 = vadd.f32 %v61_v35, %v47_v33  ;;  %v62_v38 = vadd.f32 %v58_v36, %v46_v32 }
  0x9b   :  { %v66_v39 = vadd.f32 %v64_v34, %v63_v37  ;;  %v65_v40 = vadd.f32 %v64_v34, %v62_v38 }
  0x9d   :  { %69 = vst.msk [vmem:[%s143_s3 + $0x1] sm:$0x1] %vm67_vm1, %v66_v39  ;;  %68 = vst.msk [vmem:[%s143_s3] sm:$0x1] %vm67_vm1, %v65_v40 }

// kernel: stft_discriminator_forward.11
= control target key start
LH: loop header
LB: loop body
LE: loop exit
PB: predicated region body
PF: predicated region fallthrough
CT: control target
= control target key end

     0   :  { %s2512_s12 = smov 0   ;;  %s2838_s0 = inlined_call_operand.vmem [shape: bf16[2,3,3,6,32], index: 0, kind: input, shape index: {}]   ;;  %s2839_s1 = inlined_call_operand.vmem [shape: bf16[25,32,32], index: 1, kind: input, shape index: {}]   ;;  %s2840_s2 = inlined_call_operand.vmem [shape: f32[1,32], index: 2, kind: input, shape index: {}]   ;;  %s2841_s3 = inlined_call_operand.vmem [shape: bf16[2,2,32], index: 3, kind: output, shape index: {}]  }
   0x1 LB: > { %s1913_s13 = sadd.s32 4294967295, %s2488_s12   ;;  %p1917_p0 = scmp.ge.s32.totalorder %s2488_s12, 1  ;;  %s2488_s12 = sphi %s2512_s12, %s13_s12  }
   0x2   : > { %p137_p1 = scmp.lt.s32.totalorder %s2488_s12, 3 }
   0x4   : > { %p138_p2 = pnand %p1917_p0, %p137_p1 }
   0x5   : > { %p159_p3 = scmp.lt.s32.totalorder (!%p138_p2), %s1913_s13, 1 }
   0x6   : > { %141 = sbr.rel (%p138_p2) target bundleno = 319 (0x13f), region = 32 }
   0xb   : > { %v2416_v0 = vld [vmem:[%s2839_s1 + $0x18] sm:$0xff]   ;;  %v2490_v1 = vmov 0.0   ;;  %v2417_v2 = vld [vmem:[%s2839_s1 + $0x8] sm:$0xff]   ;;  %v2418_v3 = vld [vmem:[%s2839_s1 + $0x10] sm:$0xff]   ;;  %vm2491_vm0 = vmmov 0   ;;  %s2843_s13 = smov (!%p159_p3, %s1913_s13), 1 }
   0xc   : > { %2205 = vmatprep.subr.bf16.mxu0 %v2490_v1  ;;  %2213 = vmatprep.subr.bf16.mxu1 %v2490_v1  ;;  %v2419_v4 = vld [vmem:[%s2839_s1] sm:$0xff]   ;;  %s2405_s22 = smul.u32 36, %s2843_s13  ;;  %v2420_v5 = vld [vmem:[%s2839_s1 + $0x28] sm:$0xff]   ;;  %vm192_vm1 = vcmask 261120   ;;  %v2421_v6 = vld [vmem:[%s2839_s1 + $0x38] sm:$0xff]   ;;  %s166_s24 = scalar_lea.vmem %s2841_s3, %s2843_s13  ;;  %vm1864_vm3 = vcmask 253952  }
   0xd   : > { %2206 = vmatpush3.bf16.msra.mxu0 %v2416_v0  ;;  %2209 = vmatprep.mubr.msk.bf16.mxu0 %vm2491_vm0, %v2490_v1  ;;  %v2422_v9 = vld [vmem:[%s2839_s1 + $0x20] sm:$0xff]   ;;  %v2423_v10 = vld [vmem:[%s2839_s1 + $0x30] sm:$0xff]   ;;  %v2425_v14 = vld [vmem:[%s2839_s1 + $0x48] sm:$0xff]  }
   0xe   : > { %2214 = vmatpush3.bf16.msra.mxu1 %v2417_v2  ;;  %2207 = vmatprep.subr.bf16.mxu0 %v2490_v1  ;;  %s2553_s29 = scalar_lea.vmem %s2838_s0, %s2405_s22  ;;  %v2426_v18 = vld [vmem:[%s2839_s1 + $0x58] sm:$0xff]   ;;  %v2427_v23 = vld [vmem:[%s2839_s1 + $0x40] sm:$0xff]   ;;  %v2428_v24 = vld [vmem:[%s2839_s1 + $0x50] sm:$0xff]  }
   0xf   : > { %2215 = vmatprep.subr.bf16.mxu1 %v2490_v1  ;;  %2217 = vmatprep.mubr.msk.bf16.mxu1 %vm2491_vm0, %v2490_v1  ;;  %v1919_v7 = vld [vmem:[%s2553_s29 + $0x4] sm:$0x1]  ;;  %v168_v8 = vld [vmem:[%s2553_s29] sm:$0x1]  ;;  %v1930_v15 = vld [vmem:[%s2553_s29 + $0x8] sm:$0x1] }
  0x10   : > { %v2424_v11 = vld [vmem:[%s2553_s29] ss:$0 sps:$4 sm:$0x33]   ;;  %v2429_v17 = vld [vmem:[%s2553_s29 + $0x4] ss:$0 sps:$4 sm:$0x33]  }
  0x11   : > { %2208 = vmatpush3.bf16.msra.mxu0 %v2418_v3  ;;  %v364_v12 = vshrl.u32 %v2424_v11, 16  ;;  %v366_v13 = vshll.u32 %v2424_v11, 16  ;;  %v438_v20 = vshll.u32 %v2429_v17, 16  ;;  %v436_v21 = vshrl.u32 %v2429_v17, 16  ;;  %v1955_v25 = vld [vmem:[%s2553_s29 + $0xc] sm:$0x1] }
  0x12   : > { %2216 = vmatpush3.bf16.msra.mxu1 %v2419_v4  ;;  %2221 = vmatprep.subr.bf16.mxu0 %v2490_v1  ;;  %v2430_v27 = vld [vmem:[%s2839_s1 + $0x68] sm:$0xff]   ;;  %v2431_v28 = vld [vmem:[%s2839_s1 + $0x78] sm:$0xff]   ;;  %v2439_v30 = vld [vmem:[%s2553_s29 + $0x10] ss:$0 sps:$4 sm:$0x33]  }
  0x13   : > { %2229 = vmatprep.subr.bf16.mxu1 %v2490_v1  ;;  %v368_v16 = vrot.slane %v366_v13, 1  ;;  %v440_v22 = vrot.slane %v438_v20, 1  ;;  %v2438_v29 = vld [vmem:[%s2553_s29 + $0xc] ss:$0 sps:$4 sm:$0x33]   ;;  %v2432_v31 = vld [vmem:[%s2839_s1 + $0x60] sm:$0xff]  }
  0x14   : > { %2210 = vmatmul.mubr.msk.bf16.vlgmr.msra.gmra.mxu0 %vm192_vm1, %v1919_v7  ;;  %v2433_v32 = vld [vmem:[%s2839_s1 + $0x70] sm:$0xff]   ;;  %v2434_v35 = vld [vmem:[%s2839_s1 + $0x88] sm:$0xff]   ;;  %v699_v36 = vshll.u32 %v2438_v29, 16  ;;  %v771_v37 = vshll.u32 %v2439_v30, 16  ;;  %v2435_v38 = vld [vmem:[%s2839_s1 + $0x98] sm:$0xff]   ;;  %v697_v39 = vshrl.u32 %v2438_v29, 16 }
  0x15   : > { %2218 = vmatmul.mubr.msk.bf16.vlgmr.msra.gmra.mxu1 %vm192_vm1, %v168_v8  ;;  %2222 = vmatpush3.bf16.msra.mxu0 %v2420_v5  ;;  %v369_v19 = vor.u32 %v368_v16, %v364_v12  ;;  %v441_v26 = vor.u32 %v440_v22, %v436_v21  ;;  %v1963_v33 = vld [vmem:[%s2553_s29 + $0x10] sm:$0x1]  ;;  %v1971_v34 = vld [vmem:[%s2553_s29 + $0x14] sm:$0x1]  ;;  %v769_v41 = vshrl.u32 %v2439_v30, 16  ;;  %v2436_v43 = vld [vmem:[%s2839_s1 + $0x80] sm:$0xff]  }
  0x16   : > { %2230 = vmatpush3.bf16.msra.mxu1 %v2421_v6  ;;  %2223 = vmatprep.subr.bf16.mxu0 %v2490_v1  ;;  %v701_v40 = vrot.slane %v699_v36, 1  ;;  %v773_v42 = vrot.slane %v771_v37, 1  ;;  %v2437_v44 = vld [vmem:[%s2839_s1 + $0x90] sm:$0xff]   ;;  %v2440_v45 = vld [vmem:[%s2839_s1 + $0xa8] sm:$0xff]   ;;  %v2441_v48 = vld [vmem:[%s2839_s1 + $0xb8] sm:$0xff]  }
  0x17   : > { %2231 = vmatprep.subr.bf16.mxu1 %v2490_v1  ;;  %2225 = vmatprep.mubr.msk.bf16.mxu0 %vm2491_vm0, %v2490_v1  ;;  %v2448_v49 = vld [vmem:[%s2553_s29 + $0x18] ss:$0 sps:$4 sm:$0x33]   ;;  %v2442_v50 = vld [vmem:[%s2839_s1 + $0xa0] sm:$0xff]   ;;  %v2443_v51 = vld [vmem:[%s2839_s1 + $0xb0] sm:$0xff]  }
  0x18   : > { %2233 = vmatprep.mubr.msk.bf16.mxu1 %vm2491_vm0, %v2490_v1  ;;  %v702_v46 = vor.u32 %v701_v40, %v697_v39  ;;  %v774_v47 = vor.u32 %v773_v42, %v769_v41  ;;  %v1997_v52 = vld [vmem:[%s2553_s29 + $0x18] sm:$0x1]  ;;  %v2005_v53 = vld [vmem:[%s2553_s29 + $0x1c] sm:$0x1]  ;;  %v2444_v54 = vld [vmem:[%s2839_s1 + $0xc8] sm:$0xff]   ;;  %v1032_v55 = vshll.u32 %v2448_v49, 16 }
  0x19   : > { %2224 = vmatpush3.bf16.msra.mxu0 %v2422_v9  ;;  %v2445_v56 = vld [vmem:[%s2839_s1 + $0xd8] sm:$0xff]   ;;  %v1030_v58 = vshrl.u32 %v2448_v49, 16  ;;  %v2446_v60 = vld [vmem:[%s2839_s1 + $0xc0] sm:$0xff]   ;;  %v2447_v61 = vld [vmem:[%s2839_s1 + $0xd0] sm:$0xff]  }
  0x1a   : > { %2232 = vmatpush3.bf16.msra.mxu1 %v2423_v10  ;;  %2237 = vmatprep.subr.bf16.mxu0 %v2490_v1  ;;  %v2453_v57 = vld [vmem:[%s2553_s29 + $0x1c] ss:$0 sps:$4 sm:$0x33]   ;;  %v1034_v59 = vrot.slane %v1032_v55, 1  ;;  %v2013_v62 = vld [vmem:[%s2553_s29 + $0x20] sm:$0x1] }
  0x1b   : > { %2245 = vmatprep.subr.bf16.mxu1 %v2490_v1  ;;  %v2449_v0 = vld [vmem:[%s2839_s1 + $0xe8] sm:$0xff]   ;;  %v1104_v2 = vshll.u32 %v2453_v57, 16  ;;  %v2450_v3 = vld [vmem:[%s2839_s1 + $0xf8] sm:$0xff]   ;;  %v2454_v4 = vld [vmem:[%s2553_s29] ss:$0 sps:$4 sm:$0x22]  }
  0x1c   : > { %2226 = vmatmul.mubr.msk.bf16.vlgmr.msra.gmra.mxu0 %vm192_vm1, %v1930_v15  ;;  %v1035_v63 = vor.u32 %v1034_v59, %v1030_v58  ;;  %v1102_v5 = vshrl.u32 %v2453_v57, 16  ;;  %v2451_v7 = vld [vmem:[%s2839_s1 + $0xe0] sm:$0xff]   ;;  %v2452_v8 = vld [vmem:[%s2839_s1 + $0xf0] sm:$0xff]   ;;  %v1173_v9 = vrot.slane %v2454_v4, 1  ;;  %v2455_v10 = vld [vmem:[%s2839_s1 + $0x108] sm:$0xff]  }
  0x1d   : > { %2234 = vmatmul.mubr.msk.bf16.vlgmr.msra.gmra.mxu1 %vm192_vm1, %v369_v19  ;;  %2238 = vmatpush3.bf16.msra.mxu0 %v2425_v14  ;;  %v1106_v6 = vrot.slane %v1104_v2, 1  ;;  %v2456_v12 = vld [vmem:[%s2839_s1 + $0x118] sm:$0xff]   ;;  %v2459_v13 = vld [vmem:[%s2553_s29 + $0x4] ss:$0 sps:$4 sm:$0x22]   ;;  %v2470_v41 = vld [vmem:[%s2839_s1 + $0x150] sm:$0xff]  }
  0x1e   : > { %2246 = vmatpush3.bf16.msra.mxu1 %v2426_v18  ;;  %2239 = vmatprep.subr.bf16.mxu0 %v2490_v1  ;;  %v2460_v14 = vld [vmem:[%s2553_s29 + $0x8] ss:$0 sps:$4 sm:$0x22]   ;;  %v2465_v15 = vld [vmem:[%s2553_s29] ss:$0 sps:$4 sm:$0x66]  }
  0x1f   : > { %2247 = vmatprep.subr.bf16.mxu1 %v2490_v1  ;;  %2241 = vmatprep.mubr.msk.bf16.mxu0 %vm2491_vm0, %v2490_v1  ;;  %v1107_v11 = vor.u32 %v1106_v6, %v1102_v5  ;;  %v2466_v16 = vld [vmem:[%s2553_s29 + $0x4] ss:$0 sps:$4 sm:$0x66]   ;;  %v2458_v18 = vld [vmem:[%s2839_s1 + $0x110] sm:$0xff]   ;;  %v1239_v19 = vrot.slane %v2459_v13, 1  ;;  %v1305_v20 = vrot.slane %v2460_v14, 1 }
  0x20   : > { %2249 = vmatprep.mubr.msk.bf16.mxu1 %vm2491_vm0, %v2490_v1  ;;  %v2457_v17 = vld [vmem:[%s2839_s1 + $0x100] sm:$0xff]   ;;  %v1372_v21 = vshrl.u32 %v2465_v15, 16  ;;  %v1375_v22 = vshll.u32 %v2465_v15, 16  ;;  %v2468_v36 = vld [vmem:[%s2839_s1 + $0x158] sm:$0xff]   ;;  %v2479_v58 = vld [vmem:[%s2839_s1 + $0x188] sm:$0xff]  }
  0x21   : > { %2240 = vmatpush3.bf16.msra.mxu0 %v2427_v23  ;;  %v1445_v23 = vshrl.u32 %v2466_v16, 16  ;;  %v2471_v37 = vld [vmem:[%s2553_s29 + $0xc] ss:$0 sps:$4 sm:$0x22]   ;;  %v2469_v40 = vld [vmem:[%s2839_s1 + $0x140] sm:$0xff]  }
  0x22   : > { %2248 = vmatpush3.bf16.msra.mxu1 %v2428_v24  ;;  %2253 = vmatprep.subr.bf16.mxu0 %v2490_v1  ;;  %v1448_v24 = vshll.u32 %v2466_v16, 16  ;;  %v2478_v39 = vld [vmem:[%s2553_s29 + $0xc] ss:$0 sps:$4 sm:$0x66]   ;;  %v1517_v42 = vrot.slane %v2471_v37, 1 }
  0x23   : > { %2261 = vmatprep.subr.bf16.mxu1 %v2490_v1  ;;  %v1447_v29 = vrot.slane %v1445_v23, 1 }
  0x24   : > { %2242 = vmatmul.mubr.msk.bf16.vlgmr.msra.gmra.mxu0 %vm192_vm1, %v441_v26  ;;  %v2462_v26 = vld [vmem:[%s2839_s1 + $0x138] sm:$0xff]   ;;  %v1450_v30 = vrot.slane %v1448_v24, 2 }
  0x25   : > { %2250 = vmatmul.mubr.msk.bf16.vlgmr.msra.gmra.mxu1 %vm192_vm1, %v1955_v25  ;;  %2254 = vmatpush3.bf16.msra.mxu0 %v2430_v27  ;;  %v2461_v25 = vld [vmem:[%s2839_s1 + $0x128] sm:$0xff]   ;;  %v1374_v27 = vrot.slane %v1372_v21, 1 }
  0x26   : > { %2262 = vmatpush3.bf16.msra.mxu1 %v2431_v28  ;;  %2255 = vmatprep.subr.bf16.mxu0 %v2490_v1  ;;  %v1377_v28 = vrot.slane %v1375_v22, 2 }
  0x27   : > { %2263 = vmatprep.subr.bf16.mxu1 %v2490_v1  ;;  %2257 = vmatprep.mubr.msk.bf16.mxu0 %vm2491_vm0, %v2490_v1 }
  0x28   : > { %2265 = vmatprep.mubr.msk.bf16.mxu1 %vm2491_vm0, %v2490_v1 }
  0x29   : > { %2256 = vmatpush3.bf16.msra.mxu0 %v2432_v31  ;;  %v2463_v31 = vld [vmem:[%s2839_s1 + $0x120] sm:$0xff]  }
  0x2a   : > { %2264 = vmatpush3.bf16.msra.mxu1 %v2433_v32  ;;  %2269 = vmatprep.subr.bf16.mxu0 %v2490_v1  ;;  %v2464_v32 = vld [vmem:[%s2839_s1 + $0x130] sm:$0xff]  }
  0x2b   : > { %2277 = vmatprep.subr.bf16.mxu1 %v2490_v1 }
  0x2c   : > { %2258 = vmatmul.mubr.msk.bf16.vlgmr.msra.gmra.mxu0 %vm192_vm1, %v1963_v33  ;;  %v1378_v33 = vor.u32 %v1377_v28, %v1374_v27 }
  0x2d   : > { %2266 = vmatmul.mubr.msk.bf16.vlgmr.msra.gmra.mxu1 %vm192_vm1, %v1971_v34  ;;  %2270 = vmatpush3.bf16.msra.mxu0 %v2434_v35  ;;  %v1451_v34 = vor.u32 %v1450_v30, %v1447_v29  ;;  %v2467_v35 = vld [vmem:[%s2839_s1 + $0x148] sm:$0xff]  }
  0x2e   : > { %2278 = vmatpush3.bf16.msra.mxu1 %v2435_v38  ;;  %2271 = vmatprep.subr.bf16.mxu0 %v2490_v1  ;;  %v2472_v38 = vld [vmem:[%s2553_s29 + $0x10] ss:$0 sps:$4 sm:$0x22]  }
  0x2f   : > { %2279 = vmatprep.subr.bf16.mxu1 %v2490_v1  ;;  %2273 = vmatprep.mubr.msk.bf16.mxu0 %vm2491_vm0, %v2490_v1 }
  0x30   : > { %2281 = vmatprep.mubr.msk.bf16.mxu1 %vm2491_vm0, %v2490_v1 }
  0x31   : > { %2272 = vmatpush3.bf16.msra.mxu0 %v2436_v43  ;;  %v1583_v43 = vrot.slane %v2472_v38, 1 }
  0x32   : > { %2280 = vmatpush3.bf16.msra.mxu1 %v2437_v44  ;;  %2285 = vmatprep.subr.bf16.mxu0 %v2490_v1  ;;  %v1716_v44 = vshrl.u32 %v2478_v39, 16 }
  0x33   : > { %2293 = vmatprep.subr.bf16.mxu1 %v2490_v1 }
  0x34   : > { %2274 = vmatmul.mubr.msk.bf16.vlgmr.msra.gmra.mxu0 %vm192_vm1, %v702_v46  ;;  %v2473_v46 = vld [vmem:[%s2839_s1 + $0x168] sm:$0xff]   ;;  %v1718_v49 = vrot.slane %v1716_v44, 1 }
  0x35   : > { %2282 = vmatmul.mubr.msk.bf16.vlgmr.msra.gmra.mxu1 %vm192_vm1, %v774_v47  ;;  %2286 = vmatpush3.bf16.msra.mxu0 %v2440_v45  ;;  %v1719_v45 = vshll.u32 %v2478_v39, 16  ;;  %v2474_v47 = vld [vmem:[%s2839_s1 + $0x178] sm:$0xff]  }
  0x36   : > { %2294 = vmatpush3.bf16.msra.mxu1 %v2441_v48  ;;  %2287 = vmatprep.subr.bf16.mxu0 %v2490_v1  ;;  %v2477_v48 = vld [vmem:[%s2553_s29 + $0x14] ss:$0 sps:$4 sm:$0x22]  }
  0x37   : > { %2295 = vmatprep.subr.bf16.mxu1 %v2490_v1  ;;  %2289 = vmatprep.mubr.msk.bf16.mxu0 %vm2491_vm0, %v2490_v1 }
  0x38   : > { %2297 = vmatprep.mubr.msk.bf16.mxu1 %vm2491_vm0, %v2490_v1 }
  0x39   : > { %2288 = vmatpush3.bf16.msra.mxu0 %v2442_v50  ;;  %v1721_v50 = vrot.slane %v1719_v45, 2 }
  0x3a   : > { %2296 = vmatpush3.bf16.msra.mxu1 %v2443_v51  ;;  %2301 = vmatprep.subr.bf16.mxu0 %v2490_v1  ;;  %v2481_v51 = vld [vmem:[%s2553_s29 + $0x10] ss:$0 sps:$4 sm:$0x66]  }
  0x3b   : > { %2309 = vmatprep.subr.bf16.mxu1 %v2490_v1  ;;  %v1722_v55 = vor.u32 %v1721_v50, %v1718_v49  ;;  %v1792_v57 = vshll.u32 %v2481_v51, 16 }
  0x3c   : > { %2290 = vmatmul.mubr.msk.bf16.vlgmr.msra.gmra.mxu0 %vm192_vm1, %v1997_v52  ;;  %v2475_v52 = vld [vmem:[%s2839_s1 + $0x160] sm:$0xff]  }
  0x3d   : > { %2298 = vmatmul.mubr.msk.bf16.vlgmr.msra.gmra.mxu1 %vm192_vm1, %v2005_v53  ;;  %2302 = vmatpush3.bf16.msra.mxu0 %v2444_v54  ;;  %v2476_v53 = vld [vmem:[%s2839_s1 + $0x170] sm:$0xff]   ;;  %v1649_v54 = vrot.slane %v2477_v48, 1 }
  0x3e   : > { %2310 = vmatpush3.bf16.msra.mxu1 %v2445_v56  ;;  %2303 = vmatprep.subr.bf16.mxu0 %v2490_v1  ;;  %v1789_v56 = vshrl.u32 %v2481_v51, 16 }
  0x3f   : > { %2311 = vmatprep.subr.bf16.mxu1 %v2490_v1  ;;  %2305 = vmatprep.mubr.msk.bf16.mxu0 %vm2491_vm0, %v2490_v1 }
  0x40   : > { %2313 = vmatprep.mubr.msk.bf16.mxu1 %vm2491_vm0, %v2490_v1  ;;  %v1791_v59 = vrot.slane %v1789_v56, 1 }
  0x41   : > { %2304 = vmatpush3.bf16.msra.mxu0 %v2446_v60  ;;  %v1794_v60 = vrot.slane %v1792_v57, 2 }
  0x42   : > { %2312 = vmatpush3.bf16.msra.mxu1 %v2447_v61  ;;  %2317 = vmatprep.subr.bf16.mxu0 %v2490_v1  ;;  %v2480_v61 = vld [vmem:[%s2839_s1 + $0x180] sm:$0xff]  }
  0x43   : > { %2325 = vmatprep.subr.bf16.mxu1 %v2490_v1 }
  0x44   : > { %2306 = vmatmul.mubr.msk.bf16.vlgmr.msra.gmra.mxu0 %vm192_vm1, %v2013_v62  ;;  %v1795_v62 = vor.u32 %v1794_v60, %v1791_v59 }
  0x45   : > { %2314 = vmatmul.mubr.msk.bf16.vlgmr.msra.gmra.mxu1 %vm192_vm1, %v1035_v63  ;;  %2318 = vmatpush3.bf16.msra.mxu0 %v2449_v0 }
  0x46   : > { %2326 = vmatpush3.bf16.msra.mxu1 %v2450_v3  ;;  %2319 = vmatprep.subr.bf16.mxu0 %v2490_v1 }
  0x47   : > { %2327 = vmatprep.subr.bf16.mxu1 %v2490_v1  ;;  %2321 = vmatprep.mubr.msk.bf16.mxu0 %vm2491_vm0, %v2490_v1 }
  0x48   : > { %2329 = vmatprep.mubr.msk.bf16.mxu1 %vm2491_vm0, %v2490_v1 }
  0x49   : > { %2320 = vmatpush3.bf16.msra.mxu0 %v2451_v7 }
  0x4a   : > { %2328 = vmatpush3.bf16.msra.mxu1 %v2452_v8  ;;  %2333 = vmatprep.subr.bf16.mxu0 %v2490_v1 }
  0x4b   : > { %2341 = vmatprep.subr.bf16.mxu1 %v2490_v1 }
  0x4c   : > { %2322 = vmatmul.mubr.msk.bf16.vlgmr.msra.gmra.mxu0 %vm192_vm1, %v1107_v11 }
  0x4d   : > { %2330 = vmatmul.mubr.msk.bf16.vlgmr.msra.gmra.mxu1 %vm192_vm1, %v1173_v9  ;;  %2334 = vmatpush3.bf16.msra.mxu0 %v2455_v10 }
  0x4e   : > { %2342 = vmatpush3.bf16.msra.mxu1 %v2456_v12  ;;  %2335 = vmatprep.subr.bf16.mxu0 %v2490_v1 }
  0x4f   : > { %2343 = vmatprep.subr.bf16.mxu1 %v2490_v1  ;;  %2337 = vmatprep.mubr.msk.bf16.mxu0 %vm2491_vm0, %v2490_v1 }
  0x50   : > { %2345 = vmatprep.mubr.msk.bf16.mxu1 %vm2491_vm0, %v2490_v1 }
  0x51   : > { %2336 = vmatpush3.bf16.msra.mxu0 %v2457_v17 }
  0x52   : > { %2344 = vmatpush3.bf16.msra.mxu1 %v2458_v18  ;;  %2349 = vmatprep.subr.bf16.mxu0 %v2490_v1 }
  0x53   : > { %2357 = vmatprep.subr.bf16.mxu1 %v2490_v1 }
  0x54   : > { %2338 = vmatmul.mubr.msk.bf16.vlgmr.msra.gmra.mxu0 %vm192_vm1, %v1239_v19 }
  0x55   : > { %2346 = vmatmul.mubr.msk.bf16.vlgmr.msra.gmra.mxu1 %vm192_vm1, %v1305_v20  ;;  %2350 = vmatpush3.bf16.msra.mxu0 %v2461_v25 }
  0x56   : > { %2358 = vmatpush3.bf16.msra.mxu1 %v2462_v26  ;;  %2351 = vmatprep.subr.bf16.mxu0 %v2490_v1 }
  0x57   : > { %2359 = vmatprep.subr.bf16.mxu1 %v2490_v1  ;;  %2353 = vmatprep.mubr.msk.bf16.mxu0 %vm2491_vm0, %v2490_v1 }
  0x58   : > { %2361 = vmatprep.mubr.msk.bf16.mxu1 %vm2491_vm0, %v2490_v1 }
  0x59   : > { %2352 = vmatpush3.bf16.msra.mxu0 %v2463_v31 }
  0x5a   : > { %2360 = vmatpush3.bf16.msra.mxu1 %v2464_v32  ;;  %2365 = vmatprep.subr.bf16.mxu0 %v2490_v1 }
  0x5b   : > { %2373 = vmatprep.subr.bf16.mxu1 %v2490_v1 }
  0x5c   : > { %2354 = vmatmul.mubr.msk.bf16.vlgmr.msra.gmra.mxu0 %vm192_vm1, %v1378_v33 }
  0x5d   : > { %2362 = vmatmul.mubr.msk.bf16.vlgmr.msra.gmra.mxu1 %vm192_vm1, %v1451_v34  ;;  %2366 = vmatpush3.bf16.msra.mxu0 %v2467_v35 }
  0x5e   : > { %2374 = vmatpush3.bf16.msra.mxu1 %v2468_v36  ;;  %2367 = vmatprep.subr.bf16.mxu0 %v2490_v1 }
  0x5f   : > { %2375 = vmatprep.subr.bf16.mxu1 %v2490_v1  ;;  %2369 = vmatprep.mubr.msk.bf16.mxu0 %vm2491_vm0, %v2490_v1 }
  0x60   : > { %2377 = vmatprep.mubr.msk.bf16.mxu1 %vm2491_vm0, %v2490_v1 }
  0x61   : > { %2368 = vmatpush3.bf16.msra.mxu0 %v2469_v40 }
  0x62   : > { %2376 = vmatpush3.bf16.msra.mxu1 %v2470_v41  ;;  %2381 = vmatprep.subr.bf16.mxu0 %v2490_v1 }
  0x63   : > { %2389 = vmatprep.subr.bf16.mxu1 %v2490_v1 }
  0x64   : > { %2370 = vmatmul.mubr.msk.bf16.vlgmr.msra.gmra.mxu0 %vm192_vm1, %v1517_v42 }
  0x65   : > { %2378 = vmatmul.mubr.msk.bf16.vlgmr.msra.gmra.mxu1 %vm192_vm1, %v1583_v43  ;;  %2382 = vmatpush3.bf16.msra.mxu0 %v2473_v46 }
  0x66   : > { %2390 = vmatpush3.bf16.msra.mxu1 %v2474_v47  ;;  %2383 = vmatprep.subr.bf16.mxu0 %v2490_v1 }
  0x67   : > { %2391 = vmatprep.subr.bf16.mxu1 %v2490_v1  ;;  %2385 = vmatprep.mubr.msk.bf16.mxu0 %vm2491_vm0, %v2490_v1 }
  0x68   : > { %2393 = vmatprep.mubr.msk.bf16.mxu1 %vm2491_vm0, %v2490_v1 }
  0x69   : > { %2384 = vmatpush3.bf16.msra.mxu0 %v2475_v52 }
  0x6a   : > { %2392 = vmatpush3.bf16.msra.mxu1 %v2476_v53  ;;  %2397 = vmatprep.subr.bf16.mxu0 %v2490_v1 }
  0x6c   : > { %2386 = vmatmul.mubr.msk.bf16.vlgmr.msra.gmra.mxu0 %vm192_vm1, %v1649_v54 }
  0x6d   : > { %2394 = vmatmul.mubr.msk.bf16.vlgmr.msra.gmra.mxu1 %vm192_vm1, %v1722_v55  ;;  %2398 = vmatpush3.bf16.msra.mxu0 %v2479_v58 }
  0x6e   : > { %2401 = vmatprep.mubr.msk.bf16.mxu0 %vm2491_vm0, %v2490_v1  ;;  %2399 = vmatprep.subr.bf16.mxu0 %v2490_v1 }
  0x71   : > { %2400 = vmatpush3.bf16.msra.mxu0 %v2480_v61 }
  0x74   : > { %2402 = vmatmul.mubr.msk.bf16.vlgmr.msra.gmra.mxu0 %vm192_vm1, %v1795_v62 }
  0xd4   : > { %v230_v63 = vpop.f32.mrf.mxu0 }
  0xd5   : > { %v285_v0 = vpop.f32.mrf.mxu1 }
  0xd6   : > { %v2211_v2 = vpop.f32.mrf.mxu0  ;;  %v286_v29 = vadd.f32 %v285_v0, %v230_v63 }
  0xd7   : > { %v2219_v3 = vpop.f32.mrf.mxu1 }
  0xd8   : > { %v233_v4 = vpop.f32.mrf.mxu0 }
  0xd9   : > { %v288_v5 = vpop.f32.mrf.mxu1 }
  0xda   : > { %v2212_v6 = vpop.f32.mrf.mxu0 }
  0xdb   : > { %v2220_v7 = vpop.f32.mrf.mxu1 }
  0xdc   : > { %v347_v8 = vpop.f32.mrf.mxu0 }
  0xdd   : > { %v419_v9 = vpop.f32.mrf.mxu1  ;;  %v353_v32 = vadd.f32 %v347_v8, %v286_v29 }
  0xde   : > { %v2227_v10 = vpop.f32.mrf.mxu0 }
  0xdf   : > { %v2235_v11 = vpop.f32.mrf.mxu1  ;;  %v425_v37 = vadd.f32 %v419_v9, %v353_v32 }
  0xe0   : > { %v350_v12 = vpop.f32.mrf.mxu0 }
  0xe1   : > { %v422_v13 = vpop.f32.mrf.mxu1 }
  0xe2   : > { %v2228_v14 = vpop.f32.mrf.mxu0 }
  0xe3   : > { %v2236_v1 = vpop.f32.mrf.mxu1 }
  0xe4   : > { %v491_v15 = vpop.f32.mrf.mxu0 }
  0xe5   : > { %v554_v16 = vpop.f32.mrf.mxu1  ;;  %v497_v40 = vadd.f32 %v491_v15, %v425_v37 }
  0xe6   : > { %v2243_v17 = vpop.f32.mrf.mxu0 }
  0xe7   : > { %v2251_v18 = vpop.f32.mrf.mxu1  ;;  %v560_v45 = vadd.f32 %v554_v16, %v497_v40 }
  0xe8   : > { %v494_v19 = vpop.f32.mrf.mxu0 }
  0xe9   : > { %v557_v20 = vpop.f32.mrf.mxu1 }
  0xea   : > { %v2244_v21 = vpop.f32.mrf.mxu0 }
  0xeb   : > { %v2252_v22 = vpop.f32.mrf.mxu1 }
  0xec   : > { %v617_v23 = vpop.f32.mrf.mxu0 }
  0xed   : > { %v680_v24 = vpop.f32.mrf.mxu1  ;;  %v623_v48 = vadd.f32 %v617_v23, %v560_v45 }
  0xee   : > { %v2259_v25 = vpop.f32.mrf.mxu0 }
  0xef   : > { %v2267_v26 = vpop.f32.mrf.mxu1  ;;  %v686_v53 = vadd.f32 %v680_v24, %v623_v48 }
  0xf0   : > { %v620_v27 = vpop.f32.mrf.mxu0 }
  0xf1   : > { %v683_v28 = vpop.f32.mrf.mxu1 }
  0xf2   : > { %v2260_v30 = vpop.f32.mrf.mxu0 }
  0xf3   : > { %v2268_v31 = vpop.f32.mrf.mxu1 }
  0xf4   : > { %v752_v33 = vpop.f32.mrf.mxu0 }
  0xf5   : > { %v824_v34 = vpop.f32.mrf.mxu1  ;;  %v758_v56 = vadd.f32 %v752_v33, %v686_v53 }
  0xf6   : > { %v2275_v35 = vpop.f32.mrf.mxu0 }
  0xf7   : > { %v2283_v36 = vpop.f32.mrf.mxu1  ;;  %v830_v61 = vadd.f32 %v824_v34, %v758_v56 }
  0xf8   : > { %v755_v38 = vpop.f32.mrf.mxu0 }
  0xf9   : > { %v827_v39 = vpop.f32.mrf.mxu1 }
  0xfa   : > { %v2276_v41 = vpop.f32.mrf.mxu0 }
  0xfb   : > { %v2284_v42 = vpop.f32.mrf.mxu1 }
  0xfc   : > { %v887_v43 = vpop.f32.mrf.mxu0 }
  0xfd   : > { %v950_v44 = vpop.f32.mrf.mxu1  ;;  %v893_v0 = vadd.f32 %v887_v43, %v830_v61 }
  0xfe   : > { %v2291_v46 = vpop.f32.mrf.mxu0 }
  0xff   : > { %v2299_v47 = vpop.f32.mrf.mxu1  ;;  %v956_v6 = vadd.f32 %v950_v44, %v893_v0 }
 0x100   : > { %v890_v49 = vpop.f32.mrf.mxu0 }
 0x101   : > { %v953_v50 = vpop.f32.mrf.mxu1 }
 0x102   : > { %v2292_v51 = vpop.f32.mrf.mxu0 }
 0x103   : > { %v2300_v52 = vpop.f32.mrf.mxu1 }
 0x104   : > { %v1013_v54 = vpop.f32.mrf.mxu0 }
 0x105   : > { %v1085_v55 = vpop.f32.mrf.mxu1  ;;  %v1019_v9 = vadd.f32 %v1013_v54, %v956_v6 }
 0x106   : > { %v2307_v57 = vpop.f32.mrf.mxu0 }
 0x107   : > { %v2315_v58 = vpop.f32.mrf.mxu1  ;;  %v1091_v14 = vadd.f32 %v1085_v55, %v1019_v9  ;;  %v2127_v55 = vld [vmem:[%s2840_s2] ss:$0 sm:$0xff] }
 0x108   : > { %v1016_v59 = vpop.f32.mrf.mxu0 }
 0x109   : > { %v1088_v60 = vpop.f32.mrf.mxu1 }
 0x10a   : > { %v2308_v62 = vpop.f32.mrf.mxu0 }
 0x10b   : > { %v2316_v63 = vpop.f32.mrf.mxu1 }
 0x10c   : > { %v1157_v2 = vpop.f32.mrf.mxu0 }
 0x10d   : > { %v1223_v3 = vpop.f32.mrf.mxu1  ;;  %v1163_v16 = vadd.f32 %v1157_v2, %v1091_v14 }
 0x10e   : > { %v2323_v4 = vpop.f32.mrf.mxu0 }
 0x10f   : > { %v2331_v5 = vpop.f32.mrf.mxu1  ;;  %v1229_v21 = vadd.f32 %v1223_v3, %v1163_v16 }
 0x110   : > { %v1160_v7 = vpop.f32.mrf.mxu0 }
 0x111   : > { %v1226_v8 = vpop.f32.mrf.mxu1 }
 0x112   : > { %v2324_v10 = vpop.f32.mrf.mxu0 }
 0x113   : > { %v2332_v11 = vpop.f32.mrf.mxu1 }
 0x114   : > { %v1289_v12 = vpop.f32.mrf.mxu0 }
 0x115   : > { %v1355_v13 = vpop.f32.mrf.mxu1  ;;  %v1295_v24 = vadd.f32 %v1289_v12, %v1229_v21 }
 0x116   : > { %v2339_v1 = vpop.f32.mrf.mxu0 }
 0x117   : > { %v2347_v15 = vpop.f32.mrf.mxu1  ;;  %v1361_v29 = vadd.f32 %v1355_v13, %v1295_v24 }
 0x118   : > { %v1292_v17 = vpop.f32.mrf.mxu0 }
 0x119   : > { %v1358_v18 = vpop.f32.mrf.mxu1 }
 0x11a   : > { %v2340_v19 = vpop.f32.mrf.mxu0 }
 0x11b   : > { %v2348_v20 = vpop.f32.mrf.mxu1 }
 0x11c   : > { %v1428_v22 = vpop.f32.mrf.mxu0 }
 0x11d   : > { %v1501_v23 = vpop.f32.mrf.mxu1  ;;  %v1434_v32 = vadd.f32 %v1428_v22, %v1361_v29 }
 0x11e   : > { %v2355_v25 = vpop.f32.mrf.mxu0 }
 0x11f   : > { %v2363_v26 = vpop.f32.mrf.mxu1  ;;  %v1507_v37 = vadd.f32 %v1501_v23, %v1434_v32 }
 0x120   : > { %v1431_v27 = vpop.f32.mrf.mxu0 }
 0x121   : > { %v1504_v28 = vpop.f32.mrf.mxu1 }
 0x122   : > { %v2356_v30 = vpop.f32.mrf.mxu0 }
 0x123   : > { %v2364_v31 = vpop.f32.mrf.mxu1 }
 0x124   : > { %v1567_v33 = vpop.f32.mrf.mxu0 }
 0x125   : > { %v1633_v34 = vpop.f32.mrf.mxu1  ;;  %v1573_v40 = vadd.f32 %v1567_v33, %v1507_v37 }
 0x126   : > { %v2371_v35 = vpop.f32.mrf.mxu0 }
 0x127   : > { %v2379_v36 = vpop.f32.mrf.mxu1  ;;  %v1639_v45 = vadd.f32 %v1633_v34, %v1573_v40 }
 0x128   : > { %v1570_v38 = vpop.f32.mrf.mxu0 }
 0x129   : > { %v1636_v39 = vpop.f32.mrf.mxu1 }
 0x12a   : > { %v2372_v41 = vpop.f32.mrf.mxu0 }
 0x12b   : > { %v2380_v42 = vpop.f32.mrf.mxu1 }
 0x12c   : > { %v1699_v43 = vpop.f32.mrf.mxu0 }
 0x12d   : > { %v1772_v44 = vpop.f32.mrf.mxu1  ;;  %v1705_v48 = vadd.f32 %v1699_v43, %v1639_v45 }
 0x12e   : > { %v2387_v46 = vpop.f32.mrf.mxu0 }
 0x12f   : > { %v2395_v47 = vpop.f32.mrf.mxu1  ;;  %v1778_v53 = vadd.f32 %v1772_v44, %v1705_v48 }
 0x130   : > { %v1702_v49 = vpop.f32.mrf.mxu0 }
 0x131   : > { %v1775_v50 = vpop.f32.mrf.mxu1 }
 0x132   : > { %v2388_v51 = vpop.f32.mrf.mxu0 }
 0x133   : > { %v2396_v52 = vpop.f32.mrf.mxu1 }
 0x134   : > { %v1845_v54 = vpop.f32.mrf.mxu0 }
 0x135   : > { %v1851_v56 = vadd.f32 %v1845_v54, %v1778_v53 }
 0x136   : > { %v2403_v57 = vpop.f32.mrf.mxu0 }
 0x137   : > { %v1859_v58 = vadd.f32 %v2127_v55, %v1851_v56 }
 0x138   : > { %v1848_v59 = vpop.f32.mrf.mxu0 }
 0x139   : > { %vm1860_vm2 = vcmp.gt.f32.partialorder %v1859_v58, 0.0  ;;  %v1861_v60 = vmul.f32 0.1, %v1859_v58 }
 0x13a   : > { %v2404_v61 = vpop.f32.mrf.mxu0 }
 0x13b   : > { %v1862_v62 = vsel %vm1860_vm2, %v1859_v58, %v1861_v60 }
 0x13c   : > { %v1863_v63 = vpack.c.bf16 %v1862_v62, %v1862_v62 }
 0x13e   : > { %1865 = vst.msk [vmem:[%s166_s24] sm:$0x1] %vm1864_vm3, %v1863_v63 }
 0x13f PF: > { %s13_s12 = sadd.s32 1, %s2488_s12  }
 0x140   : > { %p10_p4 = scmp.ge.s32.totalorder %s13_s12, 4  }
 0x142   :  { %12 = sbr.rel (!%p10_p4) target bundleno = 1 (0x1), region = 94 }

</bundles_post_ra>
